<compile_context>
chip_gen: v7x
topology: tpu7x:2x2x1
jax: 0.10.0
libtpu: 0.0.40
codegen_flags: <defaults>
</compile_context>

<pallas_src>
import math

import numpy as np
import jax
import jax.numpy as jnp
from jax.experimental import pallas as pl
from jax.experimental.pallas import tpu as pltpu


# ----------------------------------------------------------------------------
# Pallas kernel: per-step (images_per_step images, all windows) window MHA
# ----------------------------------------------------------------------------
def _make_window_attn_kernel(WB, N, C, num_heads):
    D = C // num_heads
    H = num_heads

    def kernel(x_ref, qkvw_ref, qkvb_ref, projw_ref, projb_ref,
               relb_ref, mask_ref, o_ref):
        # ---- fused QKV projection: one (WB*N, C) @ (C, 3C) GEMM (bf16 in, f32 acc)
        # q columns/bias are pre-scaled host-side by head_dim ** -0.5.
        x = x_ref[...].reshape(WB * N, C).astype(jnp.bfloat16)
        qkv = jnp.dot(x, qkvw_ref[...], preferred_element_type=jnp.float32)
        qkv = (qkv + qkvb_ref[...]).astype(jnp.bfloat16)       # single bf16 cast
        qkv = qkv.reshape(WB, N, 3 * C)                         # major-dim split

        # ---- head-batched q/k/v: (H*WB, N, D) via static lane slices + stack
        # (stack = concat along a new MAJOR axis; all reshapes keep the minor dim).
        q = jnp.stack([qkv[:, :, h * D:(h + 1) * D] for h in range(H)], axis=0)
        k = jnp.stack([qkv[:, :, C + h * D:C + (h + 1) * D] for h in range(H)], axis=0)
        v = jnp.stack([qkv[:, :, 2 * C + h * D:2 * C + (h + 1) * D] for h in range(H)], axis=0)
        q = q.reshape(H * WB, N, D)
        k = k.reshape(H * WB, N, D)
        v = v.reshape(H * WB, N, D)

        # ---- one batched score matmul over all heads x windows
        s = jnp.einsum('bnd,bmd->bnm', q, k,
                       preferred_element_type=jnp.float32)      # (H*WB, N, N)
        s = s.reshape(H, WB, N, N)
        # rel-pos bias broadcast over windows, shift mask broadcast over heads.
        s = s + relb_ref[...][:, None, :, :] + mask_ref[...][None, :, :, :]

        # ---- one softmax over keys (f32)
        s = s - jnp.max(s, axis=-1, keepdims=True)
        p = jnp.exp(s)
        p = p * pl.reciprocal(jnp.sum(p, axis=-1, keepdims=True), approx=True)

        # ---- one batched attention x V matmul
        p = p.astype(jnp.bfloat16).reshape(H * WB, N, N)
        o = jnp.einsum('bnm,bmd->bnd', p, v,
                       preferred_element_type=jnp.float32)      # (H*WB, N, D)

        # ---- head merge + output projection
        # TODO(synk): a single (WB*N, C) @ (C, C) GEMM (K=C) would need an
        # in-kernel minor-dim head concat / relayout; use a head-batched GEMM
        # plus one major-axis sum instead, which lowers robustly.
        o = o.reshape(H, WB * N, D).astype(jnp.bfloat16)
        y_h = jnp.einsum('hmd,hdc->hmc', o, projw_ref[...],
                         preferred_element_type=jnp.float32)    # (H, WB*N, C)
        y = jnp.sum(y_h, axis=0) + projb_ref[...]               # (WB*N, C)

        # TODO(synk): lane-dense (WB, N*C) store skipped: it needs a minor-dim
        # reshape/relayout inside the kernel; the (WB, N, C) store is lane-masked
        # (C=32 < 128 lanes) but small at this configuration.
        o_ref[...] = y.reshape(WB, N, C).astype(o_ref.dtype)

    return kernel


def _window_attention_pallas(x_windows, qkv_w, qkv_b, proj_w, proj_b,
                             rel_bias, mask, num_heads, windows_per_step):
    """x_windows: (B*num_windows, N, C) f32 -> (B*num_windows, N, C) f32."""
    BW, N, C = x_windows.shape
    WB = windows_per_step
    num_steps = BW // WB
    D = C // num_heads
    kernel = _make_window_attn_kernel(WB, N, C, num_heads)

    tokens = BW * N
    cost = pl.CostEstimate(
        flops=(2 * tokens * C * (3 * C)          # QKV projection
               + 2 * tokens * N * C              # scores (all heads)
               + 2 * tokens * N * C              # attn @ V
               + 2 * tokens * C * C),            # output projection
        transcendentals=num_heads * BW * N * N,  # softmax exps
        bytes_accessed=(4 * tokens * C * 2              # x in + y out (f32)
                        + 2 * C * 3 * C + 4 * 3 * C     # qkv weight (bf16) + bias
                        + 2 * C * C + 4 * C             # proj weight (bf16) + bias
                        + 4 * num_heads * N * N         # rel-pos bias
                        + 4 * WB * N * N))              # shift mask

    grid_spec = pltpu.PrefetchScalarGridSpec(
        num_scalar_prefetch=0,
        grid=(num_steps,),
        in_specs=[
            pl.BlockSpec((WB, N, C), lambda s: (s, 0, 0)),            # x windows
            # TODO(synk): the remaining inputs have constant index maps (resident
            # across steps); explicit single-buffering (pl.Buffered(1)) skipped
            # for lowering robustness, footprint is tiny at this config.
            pl.BlockSpec((C, 3 * C), lambda s: (0, 0)),               # qkv weight (bf16)
            pl.BlockSpec((1, 3 * C), lambda s: (0, 0)),               # qkv bias  (f32)
            pl.BlockSpec((num_heads, D, C), lambda s: (0, 0, 0)),     # proj weight (bf16)
            pl.BlockSpec((1, C), lambda s: (0, 0)),                   # proj bias (f32)
            pl.BlockSpec((num_heads, N, N), lambda s: (0, 0, 0)),     # rel-pos bias
            pl.BlockSpec((WB, N, N), lambda s: (0, 0, 0)),            # shift mask
        ],
        out_specs=pl.BlockSpec((WB, N, C), lambda s: (s, 0, 0)),
    )

    return pl.pallas_call(
        kernel,
        out_shape=jax.ShapeDtypeStruct((BW, N, C), jnp.float32),
        grid_spec=grid_spec,
        compiler_params=pltpu.CompilerParams(
            dimension_semantics=("parallel",),
            vmem_limit_bytes=32 * 1024 * 1024),
        cost_estimate=cost,
    )(x_windows, qkv_w, qkv_b, proj_w, proj_b, rel_bias, mask)


# ----------------------------------------------------------------------------
# Host-side glue (padding, roll, window partition) + parameter construction
# ----------------------------------------------------------------------------
def _relative_position_index(window_size):
    ws0, ws1 = window_size
    coords = np.stack(np.meshgrid(np.arange(ws0), np.arange(ws1), indexing="ij"))
    coords_flat = coords.reshape(2, -1)                                  # (2, N)
    rel = coords_flat[:, :, None] - coords_flat[:, None, :]              # (2, N, N)
    rel = rel.transpose(1, 2, 0).astype(np.int64)                        # (N, N, 2)
    rel[:, :, 0] += ws0 - 1
    rel[:, :, 1] += ws1 - 1
    rel[:, :, 0] *= 2 * ws1 - 1
    return rel.sum(-1).reshape(-1)                                       # (N*N,)


def _build_attn_mask(pad_H, pad_W, window_size, shift_size):
    ws0, ws1 = window_size
    ss0, ss1 = shift_size
    N = ws0 * ws1
    num_windows = (pad_H // ws0) * (pad_W // ws1)
    if ss0 == 0 and ss1 == 0:
        return np.zeros((num_windows, N, N), np.float32)
    img = np.zeros((pad_H, pad_W), np.float32)
    h_slices = ((0, -ws0), (-ws0, -ss0), (-ss0, None))
    w_slices = ((0, -ws1), (-ws1, -ss1), (-ss1, None))
    cnt = 0
    for hs in h_slices:
        for ws_ in w_slices:
            img[hs[0]:hs[1], ws_[0]:ws_[1]] = cnt
            cnt += 1
    m = img.reshape(pad_H // ws0, ws0, pad_W // ws1, ws1)
    m = m.transpose(0, 2, 1, 3).reshape(num_windows, N)
    diff = m[:, None, :] - m[:, :, None]                                  # (nW, N, N)
    return np.where(diff != 0, np.float32(-100.0), np.float32(0.0))


def _choose_images_per_step(B):
    # Keep >= 2 grid steps so v7x's two TensorCores both get a "parallel" step,
    # while packing as many images per step as possible so the GEMMs stay tall
    # and per-step overhead is amortized on single-core v5e/v6e.
    for ips in (4, 2, 1):
        if B % ips == 0 and B // ips >= 2:
            return ips
    return 1


def shifted_window_attention_forward(x, params, window_size, shift_size, num_heads):
    """x: (B, H, W, C) float32. Returns (B, H, W, C) float32."""
    B, H, W, C = x.shape
    ws0, ws1 = window_size
    pad_r = (ws1 - W % ws1) % ws1
    pad_b = (ws0 - H % ws0) % ws0
    x = jnp.pad(x, ((0, 0), (0, pad_b), (0, pad_r), (0, 0)))
    pad_H, pad_W = H + pad_b, W + pad_r

    ss = list(shift_size)
    if ws0 >= pad_H:
        ss[0] = 0
    if ws1 >= pad_W:
        ss[1] = 0
    if sum(ss) > 0:
        x = jnp.roll(x, shift=(-ss[0], -ss[1]), axis=(1, 2))

    nH, nW_ = pad_H // ws0, pad_W // ws1
    num_windows = nH * nW_
    N = ws0 * ws1
    head_dim = C // num_heads
    scale = head_dim ** (-0.5)

    # window partition: (B*num_windows, N, C)
    xw = x.reshape(B, nH, ws0, nW_, ws1, C)
    xw = xw.transpose(0, 1, 3, 2, 4, 5).reshape(B * num_windows, N, C)

    # relative position bias (num_heads, N, N) and the shift mask (WB, N, N),
    # passed SEPARATELY (two broadcast adds in-kernel, smaller resident VMEM).
    rel_idx = _relative_position_index(window_size)
    rel_bias = params["rel_bias_table"][rel_idx].reshape(N, N, num_heads)
    rel_bias = jnp.transpose(rel_bias, (2, 0, 1)).astype(jnp.float32)     # (H, N, N)
    mask_np = _build_attn_mask(pad_H, pad_W, window_size, ss)             # (nW, N, N)

    images_per_step = _choose_images_per_step(B)
    windows_per_step = images_per_step * num_windows
    if images_per_step > 1:
        mask_np = np.tile(mask_np, (images_per_step, 1, 1))               # (WB, N, N)
    mask = jnp.asarray(mask_np)

    # QKV weight/bias with the q-scale folded into the q columns; bf16 for MXU.
    qkv_w_t = params["qkv_w"].T                                           # (C, 3C)
    col_scale = jnp.concatenate([jnp.full((C,), scale, jnp.float32),
                                 jnp.ones((2 * C,), jnp.float32)])
    qkv_w_t = (qkv_w_t * col_scale[None, :]).astype(jnp.bfloat16)
    qkv_b = (params["qkv_b"] * col_scale)[None, :].astype(jnp.float32)    # (1, 3C)

    # Output projection pre-split per head: (num_heads, head_dim, C), bf16.
    proj_w = params["proj_w"].T.reshape(num_heads, head_dim, C).astype(jnp.bfloat16)
    proj_b = params["proj_b"][None, :].astype(jnp.float32)                # (1, C)

    yw = _window_attention_pallas(xw, qkv_w_t, qkv_b, proj_w, proj_b,
                                  rel_bias, mask, num_heads, windows_per_step)

    # reverse window partition
    y = yw.reshape(B, nH, nW_, ws0, ws1, C)
    y = y.transpose(0, 1, 3, 2, 4, 5).reshape(B, pad_H, pad_W, C)

    if sum(ss) > 0:
        y = jnp.roll(y, shift=(ss[0], ss[1]), axis=(1, 2))

    return y[:, :H, :W, :]


# ----------------------------------------------------------------------------
# Pure-JAX f32 reference (mirrors the PyTorch code) for correctness checking
# ----------------------------------------------------------------------------
def reference_forward(x, params, window_size, shift_size, num_heads):
    B, H, W, C = x.shape
    ws0, ws1 = window_size
    pad_r = (ws1 - W % ws1) % ws1
    pad_b = (ws0 - H % ws0) % ws0
    x = jnp.pad(x, ((0, 0), (0, pad_b), (0, pad_r), (0, 0)))
    pad_H, pad_W = H + pad_b, W + pad_r
    ss = list(shift_size)
    if ws0 >= pad_H:
        ss[0] = 0
    if ws1 >= pad_W:
        ss[1] = 0
    if sum(ss) > 0:
        x = jnp.roll(x, shift=(-ss[0], -ss[1]), axis=(1, 2))
    nH, nW_ = pad_H // ws0, pad_W // ws1
    num_windows = nH * nW_
    N = ws0 * ws1
    xw = x.reshape(B, nH, ws0, nW_, ws1, C).transpose(0, 1, 3, 2, 4, 5)
    xw = xw.reshape(B * num_windows, N, C)

    qkv = xw @ params["qkv_w"].T + params["qkv_b"]
    head_dim = C // num_heads
    qkv = qkv.reshape(B * num_windows, N, 3, num_heads, head_dim)
    qkv = qkv.transpose(2, 0, 3, 1, 4)
    q, k, v = qkv[0], qkv[1], qkv[2]
    q = q * head_dim ** (-0.5)
    attn = q @ jnp.swapaxes(k, -2, -1)

    rel_idx = _relative_position_index(window_size)
    rel_bias = params["rel_bias_table"][rel_idx].reshape(N, N, num_heads)
    rel_bias = jnp.transpose(rel_bias, (2, 0, 1))
    attn = attn + rel_bias[None]

    mask = jnp.asarray(_build_attn_mask(pad_H, pad_W, window_size, ss))
    attn = attn.reshape(B, num_windows, num_heads, N, N) + mask[None, :, None]
    attn = attn.reshape(B * num_windows, num_heads, N, N)
    attn = jax.nn.softmax(attn, axis=-1)

    yw = (attn @ v).transpose(0, 2, 1, 3).reshape(B * num_windows, N, C)
    yw = yw @ params["proj_w"].T + params["proj_b"]

    y = yw.reshape(B, nH, nW_, ws0, ws1, C).transpose(0, 1, 3, 2, 4, 5)
    y = y.reshape(B, pad_H, pad_W, C)
    if sum(ss) > 0:
        y = jnp.roll(y, shift=(ss[0], ss[1]), axis=(1, 2))
    return y[:, :H, :W, :]


# ----------------------------------------------------------------------------
# main
# ----------------------------------------------------------------------------
if __name__ == "__main__":
    # module config (small, consistent with the PyTorch module)
    dim = 32
    window_size = [8, 8]
    shift_size = [4, 4]
    num_heads = 4
    B, H, W = 2, 16, 16

    key = jax.random.PRNGKey(0)
    k_x, k_qw, k_qb, k_pw, k_pb, k_tab = jax.random.split(key, 6)

    params = {
        # nn.Linear(dim, 3*dim): weight (3*dim, dim), bias (3*dim,)
        "qkv_w": (jax.random.normal(k_qw, (3 * dim, dim), jnp.float32)
                  * (1.0 / math.sqrt(dim))),
        "qkv_b": jax.random.normal(k_qb, (3 * dim,), jnp.float32) * 0.02,
        # nn.Linear(dim, dim): weight (dim, dim), bias (dim,)
        "proj_w": (jax.random.normal(k_pw, (dim, dim), jnp.float32)
                   * (1.0 / math.sqrt(dim))),
        "proj_b": jax.random.normal(k_pb, (dim,), jnp.float32) * 0.02,
        # relative_position_bias_table: ((2*ws0-1)*(2*ws1-1), num_heads)
        # TODO(synk): trunc_normal_ init approximated with plain normal * 0.02
        "rel_bias_table": jax.random.normal(
            k_tab,
            ((2 * window_size[0] - 1) * (2 * window_size[1] - 1), num_heads),
            jnp.float32) * 0.02,
    }

    x = jax.random.normal(k_x, (B, H, W, dim), jnp.float32)

    out = shifted_window_attention_forward(x, params, window_size, shift_size,
                                           num_heads)
    out = jax.block_until_ready(out)

    ref = jax.block_until_ready(
        reference_forward(x, params, window_size, shift_size, num_heads))

    assert out.shape == (B, H, W, dim), out.shape
    # Kernel is bf16-compute / f32-accumulate (MXU operands bf16, f32 softmax,
    # approx reciprocal), so compare against the exact f32 reference with a
    # bf16-appropriate tolerance.
    np.testing.assert_allclose(np.asarray(out), np.asarray(ref),
                               rtol=5e-2, atol=5e-2)
    print("KERNEL_OK")
</pallas_src>

<mosaic_0001>
module attributes {stable_mosaic.version = 11 : i64} {
  func.func @kernel(%arg0: i32, %arg1: memref<4x64x32xf32, #tpu.memory_space<vmem>>, %arg2: memref<32x96xbf16, #tpu.memory_space<vmem>>, %arg3: memref<1x96xf32, #tpu.memory_space<vmem>>, %arg4: memref<4x8x32xbf16, #tpu.memory_space<vmem>>, %arg5: memref<1x32xf32, #tpu.memory_space<vmem>>, %arg6: memref<4x64x64xf32, #tpu.memory_space<vmem>>, %arg7: memref<4x64x64xf32, #tpu.memory_space<vmem>>, %arg8: memref<4x64x32xf32, #tpu.memory_space<vmem>>) attributes {dimension_semantics = [#tpu.dimension_semantics<parallel>], iteration_bounds = array<i64: 2>, scalar_prefetch = 0 : i64, scratch_operands = 0 : i64, tpu.core_type = #tpu.core_type<tc>, window_params = [{transform_indices = @transform_0, window_bounds = array<i64: 4, 64, 32>}, {pipeline_mode = #tpu.pipeline_mode<synchronous>, transform_indices = @transform_1, window_bounds = array<i64: 32, 96>}, {pipeline_mode = #tpu.pipeline_mode<synchronous>, transform_indices = @transform_2, window_bounds = array<i64: 1, 96>}, {pipeline_mode = #tpu.pipeline_mode<synchronous>, transform_indices = @transform_3, window_bounds = array<i64: 4, 8, 32>}, {pipeline_mode = #tpu.pipeline_mode<synchronous>, transform_indices = @transform_4, window_bounds = array<i64: 1, 32>}, {pipeline_mode = #tpu.pipeline_mode<synchronous>, transform_indices = @transform_5, window_bounds = array<i64: 4, 64, 64>}, {pipeline_mode = #tpu.pipeline_mode<synchronous>, transform_indices = @transform_6, window_bounds = array<i64: 4, 64, 64>}, {transform_indices = @transform_7, window_bounds = array<i64: 4, 64, 32>}]} {
    %c0 = arith.constant 0 : index
    %c0_0 = arith.constant 0 : index
    %c0_1 = arith.constant 0 : index
    %0 = vector.load %arg1[%c0, %c0_0, %c0_1] : memref<4x64x32xf32, #tpu.memory_space<vmem>>, vector<4x64x32xf32>
    %1 = vector.shape_cast %0 : vector<4x64x32xf32> to vector<256x32xf32>
    %2 = arith.truncf %1 : vector<256x32xf32> to vector<256x32xbf16>
    %c0_2 = arith.constant 0 : index
    %c0_3 = arith.constant 0 : index
    %3 = vector.load %arg2[%c0_2, %c0_3] : memref<32x96xbf16, #tpu.memory_space<vmem>>, vector<32x96xbf16>
    %cst = arith.constant dense<0.000000e+00> : vector<256x96xf32>
    %4 = tpu.matmul %2, %3, %cst {dimension_numbers = #tpu.dot_dimension_numbers<[1], [0], [0], [1], [0, 0, 1, 1], [], []>} : vector<256x32xbf16>, vector<32x96xbf16>, vector<256x96xf32> -> vector<256x96xf32>
    %c0_4 = arith.constant 0 : index
    %c0_5 = arith.constant 0 : index
    %5 = vector.load %arg3[%c0_4, %c0_5] : memref<1x96xf32, #tpu.memory_space<vmem>>, vector<1x96xf32>
    %6 = vector.broadcast %5 : vector<1x96xf32> to vector<256x96xf32>
    %7 = arith.addf %4, %6 : vector<256x96xf32>
    %8 = arith.truncf %7 : vector<256x96xf32> to vector<256x96xbf16>
    %9 = vector.shape_cast %8 : vector<256x96xbf16> to vector<4x64x96xbf16>
    %10 = vector.extract_strided_slice %9 {offsets = [0, 0, 0], sizes = [4, 64, 8], strides = [1, 1, 1]} : vector<4x64x96xbf16> to vector<4x64x8xbf16>
    %11 = vector.extract_strided_slice %9 {offsets = [0, 0, 8], sizes = [4, 64, 8], strides = [1, 1, 1]} : vector<4x64x96xbf16> to vector<4x64x8xbf16>
    %12 = vector.extract_strided_slice %9 {offsets = [0, 0, 16], sizes = [4, 64, 8], strides = [1, 1, 1]} : vector<4x64x96xbf16> to vector<4x64x8xbf16>
    %13 = vector.extract_strided_slice %9 {offsets = [0, 0, 24], sizes = [4, 64, 8], strides = [1, 1, 1]} : vector<4x64x96xbf16> to vector<4x64x8xbf16>
    %14 = vector.shape_cast %10 : vector<4x64x8xbf16> to vector<1x4x64x8xbf16>
    %15 = vector.shape_cast %11 : vector<4x64x8xbf16> to vector<1x4x64x8xbf16>
    %16 = vector.shape_cast %12 : vector<4x64x8xbf16> to vector<1x4x64x8xbf16>
    %17 = vector.shape_cast %13 : vector<4x64x8xbf16> to vector<1x4x64x8xbf16>
    %18 = tpu.concatenate %14, %15, %16, %17 in 0 : vector<1x4x64x8xbf16>, vector<1x4x64x8xbf16>, vector<1x4x64x8xbf16>, vector<1x4x64x8xbf16> -> vector<4x4x64x8xbf16>
    %19 = vector.extract_strided_slice %9 {offsets = [0, 0, 32], sizes = [4, 64, 8], strides = [1, 1, 1]} : vector<4x64x96xbf16> to vector<4x64x8xbf16>
    %20 = vector.extract_strided_slice %9 {offsets = [0, 0, 40], sizes = [4, 64, 8], strides = [1, 1, 1]} : vector<4x64x96xbf16> to vector<4x64x8xbf16>
    %21 = vector.extract_strided_slice %9 {offsets = [0, 0, 48], sizes = [4, 64, 8], strides = [1, 1, 1]} : vector<4x64x96xbf16> to vector<4x64x8xbf16>
    %22 = vector.extract_strided_slice %9 {offsets = [0, 0, 56], sizes = [4, 64, 8], strides = [1, 1, 1]} : vector<4x64x96xbf16> to vector<4x64x8xbf16>
    %23 = vector.shape_cast %19 : vector<4x64x8xbf16> to vector<1x4x64x8xbf16>
    %24 = vector.shape_cast %20 : vector<4x64x8xbf16> to vector<1x4x64x8xbf16>
    %25 = vector.shape_cast %21 : vector<4x64x8xbf16> to vector<1x4x64x8xbf16>
    %26 = vector.shape_cast %22 : vector<4x64x8xbf16> to vector<1x4x64x8xbf16>
    %27 = tpu.concatenate %23, %24, %25, %26 in 0 : vector<1x4x64x8xbf16>, vector<1x4x64x8xbf16>, vector<1x4x64x8xbf16>, vector<1x4x64x8xbf16> -> vector<4x4x64x8xbf16>
    %28 = vector.extract_strided_slice %9 {offsets = [0, 0, 64], sizes = [4, 64, 8], strides = [1, 1, 1]} : vector<4x64x96xbf16> to vector<4x64x8xbf16>
    %29 = vector.extract_strided_slice %9 {offsets = [0, 0, 72], sizes = [4, 64, 8], strides = [1, 1, 1]} : vector<4x64x96xbf16> to vector<4x64x8xbf16>
    %30 = vector.extract_strided_slice %9 {offsets = [0, 0, 80], sizes = [4, 64, 8], strides = [1, 1, 1]} : vector<4x64x96xbf16> to vector<4x64x8xbf16>
    %31 = vector.extract_strided_slice %9 {offsets = [0, 0, 88], sizes = [4, 64, 8], strides = [1, 1, 1]} : vector<4x64x96xbf16> to vector<4x64x8xbf16>
    %32 = vector.shape_cast %28 : vector<4x64x8xbf16> to vector<1x4x64x8xbf16>
    %33 = vector.shape_cast %29 : vector<4x64x8xbf16> to vector<1x4x64x8xbf16>
    %34 = vector.shape_cast %30 : vector<4x64x8xbf16> to vector<1x4x64x8xbf16>
    %35 = vector.shape_cast %31 : vector<4x64x8xbf16> to vector<1x4x64x8xbf16>
    %36 = tpu.concatenate %32, %33, %34, %35 in 0 : vector<1x4x64x8xbf16>, vector<1x4x64x8xbf16>, vector<1x4x64x8xbf16>, vector<1x4x64x8xbf16> -> vector<4x4x64x8xbf16>
    %37 = vector.shape_cast %18 : vector<4x4x64x8xbf16> to vector<16x64x8xbf16>
    %38 = vector.shape_cast %27 : vector<4x4x64x8xbf16> to vector<16x64x8xbf16>
    %39 = vector.shape_cast %36 : vector<4x4x64x8xbf16> to vector<16x64x8xbf16>
    "tpu.trace_start"() <{level = 10 : i32, message = "bnd,bmd->bnm"}> : () -> ()
    %cst_6 = arith.constant dense<0.000000e+00> : vector<16x64x64xf32>
    %40 = tpu.matmul %37, %38, %cst_6 {dimension_numbers = #tpu.dot_dimension_numbers<[2], [2], [1], [1], [0, 0, 0, 1, 1, 1], [0], [0]>} : vector<16x64x8xbf16>, vector<16x64x8xbf16>, vector<16x64x64xf32> -> vector<16x64x64xf32>
    "tpu.trace_stop"() : () -> ()
    %41 = vector.shape_cast %40 : vector<16x64x64xf32> to vector<4x4x64x64xf32>
    %c0_7 = arith.constant 0 : index
    %c0_8 = arith.constant 0 : index
    %c0_9 = arith.constant 0 : index
    %42 = vector.load %arg6[%c0_7, %c0_8, %c0_9] : memref<4x64x64xf32, #tpu.memory_space<vmem>>, vector<4x64x64xf32>
    %43 = vector.shape_cast %42 : vector<4x64x64xf32> to vector<4x1x64x64xf32>
    %44 = vector.broadcast %43 : vector<4x1x64x64xf32> to vector<4x4x64x64xf32>
    %45 = arith.addf %41, %44 : vector<4x4x64x64xf32>
    %c0_10 = arith.constant 0 : index
    %c0_11 = arith.constant 0 : index
    %c0_12 = arith.constant 0 : index
    %46 = vector.load %arg7[%c0_10, %c0_11, %c0_12] : memref<4x64x64xf32, #tpu.memory_space<vmem>>, vector<4x64x64xf32>
    %47 = vector.shape_cast %46 : vector<4x64x64xf32> to vector<1x4x64x64xf32>
    %48 = vector.broadcast %47 : vector<1x4x64x64xf32> to vector<4x4x64x64xf32>
    %49 = arith.addf %45, %48 : vector<4x4x64x64xf32>
    %cst_13 = arith.constant dense<0xFF800000> : vector<4x4x64xf32>
    %50 = vector.multi_reduction <maximumf>, %49, %cst_13 [3] : vector<4x4x64x64xf32> to vector<4x4x64xf32>
    %51 = vector.shape_cast %50 : vector<4x4x64xf32> to vector<4x4x64x1xf32>
    %52 = vector.broadcast %51 : vector<4x4x64x1xf32> to vector<4x4x64x64xf32>
    %53 = arith.subf %49, %52 : vector<4x4x64x64xf32>
    %54 = math.exp %53 : vector<4x4x64x64xf32>
    %cst_14 = arith.constant dense<0.000000e+00> : vector<4x4x64xf32>
    %55 = vector.multi_reduction <add>, %54, %cst_14 [3] : vector<4x4x64x64xf32> to vector<4x4x64xf32>
    %56 = vector.shape_cast %55 : vector<4x4x64xf32> to vector<4x4x64x1xf32>
    %57 = tpu.reciprocal %56 {approx = true} : vector<4x4x64x1xf32> -> vector<4x4x64x1xf32>
    %58 = vector.broadcast %57 : vector<4x4x64x1xf32> to vector<4x4x64x64xf32>
    %59 = arith.mulf %54, %58 : vector<4x4x64x64xf32>
    %60 = arith.truncf %59 : vector<4x4x64x64xf32> to vector<4x4x64x64xbf16>
    %61 = vector.shape_cast %60 : vector<4x4x64x64xbf16> to vector<16x64x64xbf16>
    "tpu.trace_start"() <{level = 10 : i32, message = "bnm,bmd->bnd"}> : () -> ()
    %cst_15 = arith.constant dense<0.000000e+00> : vector<16x64x8xf32>
    %62 = tpu.matmul %61, %39, %cst_15 {dimension_numbers = #tpu.dot_dimension_numbers<[2], [1], [1], [2], [0, 0, 0, 1, 1, 2], [0], [0]>} : vector<16x64x64xbf16>, vector<16x64x8xbf16>, vector<16x64x8xf32> -> vector<16x64x8xf32>
    "tpu.trace_stop"() : () -> ()
    %63 = vector.shape_cast %62 : vector<16x64x8xf32> to vector<4x256x8xf32>
    %64 = arith.truncf %63 : vector<4x256x8xf32> to vector<4x256x8xbf16>
    %c0_16 = arith.constant 0 : index
    %c0_17 = arith.constant 0 : index
    %c0_18 = arith.constant 0 : index
    %65 = vector.load %arg4[%c0_16, %c0_17, %c0_18] : memref<4x8x32xbf16, #tpu.memory_space<vmem>>, vector<4x8x32xbf16>
    "tpu.trace_start"() <{level = 10 : i32, message = "hmd,hdc->hmc"}> : () -> ()
    %cst_19 = arith.constant dense<0.000000e+00> : vector<4x256x32xf32>
    %66 = tpu.matmul %64, %65, %cst_19 {dimension_numbers = #tpu.dot_dimension_numbers<[2], [1], [1], [2], [0, 0, 0, 1, 1, 2], [0], [0]>} : vector<4x256x8xbf16>, vector<4x8x32xbf16>, vector<4x256x32xf32> -> vector<4x256x32xf32>
    "tpu.trace_stop"() : () -> ()
    %cst_20 = arith.constant dense<0.000000e+00> : vector<256x32xf32>
    %67 = vector.multi_reduction <add>, %66, %cst_20 [0] : vector<4x256x32xf32> to vector<256x32xf32>
    %c0_21 = arith.constant 0 : index
    %c0_22 = arith.constant 0 : index
    %68 = vector.load %arg5[%c0_21, %c0_22] : memref<1x32xf32, #tpu.memory_space<vmem>>, vector<1x32xf32>
    %69 = vector.broadcast %68 : vector<1x32xf32> to vector<256x32xf32>
    %70 = arith.addf %67, %69 : vector<256x32xf32>
    %71 = vector.shape_cast %70 : vector<256x32xf32> to vector<4x64x32xf32>
    %c0_23 = arith.constant 0 : index
    %c0_24 = arith.constant 0 : index
    %c0_25 = arith.constant 0 : index
    %72 = vector.load %arg8[%c0_23, %c0_24, %c0_25] : memref<4x64x32xf32, #tpu.memory_space<vmem>>, vector<4x64x32xf32>
    tpu.vector_store %arg8[%c0_23, %c0_24, %c0_25], %71 {strides = array<i32>} : memref<4x64x32xf32, #tpu.memory_space<vmem>>, vector<4x64x32xf32>,
    return
  }
  func.func @transform_0(%arg0: i32) -> (i32, i32, i32) {
    %c0_i32 = arith.constant 0 : i32
    %c0_i32_0 = arith.constant 0 : i32
    %c0_i32_1 = arith.constant 0 : i32
    return %arg0, %c0_i32, %c0_i32_0 : i32, i32, i32
  }
  func.func @transform_1(%arg0: i32) -> (i32, i32) {
    %c0_i32 = arith.constant 0 : i32
    %c0_i32_0 = arith.constant 0 : i32
    %c0_i32_1 = arith.constant 0 : i32
    return %c0_i32, %c0_i32_0 : i32, i32
  }
  func.func @transform_2(%arg0: i32) -> (i32, i32) {
    %c0_i32 = arith.constant 0 : i32
    %c0_i32_0 = arith.constant 0 : i32
    %c0_i32_1 = arith.constant 0 : i32
    return %c0_i32, %c0_i32_0 : i32, i32
  }
  func.func @transform_3(%arg0: i32) -> (i32, i32, i32) {
    %c0_i32 = arith.constant 0 : i32
    %c0_i32_0 = arith.constant 0 : i32
    %c0_i32_1 = arith.constant 0 : i32
    %c0_i32_2 = arith.constant 0 : i32
    return %c0_i32, %c0_i32_0, %c0_i32_1 : i32, i32, i32
  }
  func.func @transform_4(%arg0: i32) -> (i32, i32) {
    %c0_i32 = arith.constant 0 : i32
    %c0_i32_0 = arith.constant 0 : i32
    %c0_i32_1 = arith.constant 0 : i32
    return %c0_i32, %c0_i32_0 : i32, i32
  }
  func.func @transform_5(%arg0: i32) -> (i32, i32, i32) {
    %c0_i32 = arith.constant 0 : i32
    %c0_i32_0 = arith.constant 0 : i32
    %c0_i32_1 = arith.constant 0 : i32
    %c0_i32_2 = arith.constant 0 : i32
    return %c0_i32, %c0_i32_0, %c0_i32_1 : i32, i32, i32
  }
  func.func @transform_6(%arg0: i32) -> (i32, i32, i32) {
    %c0_i32 = arith.constant 0 : i32
    %c0_i32_0 = arith.constant 0 : i32
    %c0_i32_1 = arith.constant 0 : i32
    %c0_i32_2 = arith.constant 0 : i32
    return %c0_i32, %c0_i32_0, %c0_i32_1 : i32, i32, i32
  }
  func.func @transform_7(%arg0: i32) -> (i32, i32, i32) {
    %c0_i32 = arith.constant 0 : i32
    %c0_i32_0 = arith.constant 0 : i32
    %c0_i32_1 = arith.constant 0 : i32
    return %arg0, %c0_i32, %c0_i32_0 : i32, i32, i32
  }
}

</mosaic_0001>

<bundles_post_ra>
// kernel: tpu_custom_call.1
= control target key start
LH: loop header
LB: loop body
LE: loop exit
PB: predicated region body
PF: predicated region fallthrough
CT: control target
= control target key end

     0   :  { %s8671_s24 = smov 0   ;;  %s13647_s0 = inlined_call_operand.vmem [shape: f32[8,64,32], index: 0, kind: input, shape index: {}]   ;;  %s13648_s1 = inlined_call_operand.vmem [shape: bf16[32,96], index: 1, kind: input, shape index: {}]   ;;  %s13649_s2 = inlined_call_operand.vmem [shape: f32[1,96], index: 2, kind: input, shape index: {}]   ;;  %s13650_s3 = inlined_call_operand.vmem [shape: bf16[4,8,32], index: 3, kind: input, shape index: {}]   ;;  %s13651_s4 = inlined_call_operand.vmem [shape: f32[1,32], index: 4, kind: input, shape index: {}]   ;;  %s13652_s5 = inlined_call_operand.vmem [shape: f32[4,64,64], index: 5, kind: input, shape index: {}]   ;;  %s13653_s6 = inlined_call_operand.vmem [shape: f32[4,64,64], index: 6, kind: input, shape index: {}]   ;;  %s13654_s7 = inlined_call_operand.vmem [shape: f32[8,64,32], index: 7, kind: output, shape index: {}]  }
   0x1 LB: > { %s6737_s25 = sadd.s32 4294967295, %s8624_s24   ;;  %p6741_p0 = scmp.ge.s32.totalorder %s8624_s24, 1  ;;  %s8624_s24 = sphi %s8671_s24, %s17_s24  }
   0x2   : > { %p239_p1 = scmp.lt.s32.totalorder %s8624_s24, 3 }
   0x4   : > { %p240_p2 = pnand %p6741_p0, %p239_p1 }
   0x6   : > { %243 = sbr.rel (%p240_p2) target bundleno = 2504 (0x9c8), region = 48 }
   0xd   : > { %v8071_v0 = vld [vmem:[%s13648_s1] sm:$0xff]   ;;  %s6742_s28 = sshll.u32 %s6737_s25, 2  ;;  %v8072_v1 = vld [vmem:[%s13648_s1 + $0x8] sm:$0xff]   ;;  %vm359_vm0 = vcmask 261120   ;;  %vm705_vm1 = vcmask 64512   ;;  %s8626_s14 = smov 120  }
   0xe   : > { %p274_p3 = scmp.lt.s32.totalorder %s6742_s28, 7  ;;  %7306 = vmatprep.subr.bf16.mxu0 %v8071_v0  ;;  %v8746_v51 = vld [vmem:[%s13649_s2] ss:$0 sm:$0xff]  ;;  %s8627_s15 = smov 96   ;;  %vm2570_vm2 = vcmask 523264   ;;  %vm5583_vm3 = vcmask 1043456  }
   0xf   : > { %7307 = vmatpush3.bf16.msra.mxu0 %v8071_v0  ;;  %s8628_s16 = smov 112   ;;  %s8629_s17 = smov 104  }
  0x10   : > { %s14794_s28 = smov (!%p274_p3, %s6742_s28), 7  ;;  %7308 = vmatprep.subr.bf16.mxu0 %v8072_v1  ;;  %s8630_s18 = smov 64  }
  0x11   : > { %s6962_s8 = sshll.u32 %s14794_s28, 6 }
  0x12   : > { %s8693_s11 = scalar_lea.vmem %s13647_s0, %s6962_s8 }
  0x13   : > { %7309 = vmatpush3.bf16.msra.mxu0 %v8072_v1  ;;  %v288_v2 = vld [vmem:[%s8693_s11] sm:$0xff]  ;;  %v289_v3 = vld [vmem:[%s8693_s11 + $0x8] sm:$0xff]  ;;  %v290_v4 = vld [vmem:[%s8693_s11 + $0x10] sm:$0xff] }
  0x14   : > { %v320_v5 = vpack.c.bf16 %v289_v3, %v288_v2  ;;  %v291_v6 = vld [vmem:[%s8693_s11 + $0x18] sm:$0xff]  ;;  %v292_v7 = vld [vmem:[%s8693_s11 + $0x20] sm:$0xff]  ;;  %v293_v8 = vld [vmem:[%s8693_s11 + $0x28] sm:$0xff] }
  0x15   : > { %v321_v9 = vpack.c.bf16 %v291_v6, %v290_v4  ;;  %v322_v10 = vpack.c.bf16 %v293_v8, %v292_v7  ;;  %v294_v11 = vld [vmem:[%s8693_s11 + $0x30] sm:$0xff]  ;;  %v295_v12 = vld [vmem:[%s8693_s11 + $0x38] sm:$0xff]  ;;  %v296_v13 = vld [vmem:[%s8693_s11 + $0x40] sm:$0xff] }
  0x16   : > { %7310 = vmatprep.mubr.msk.bf16.mxu0 %vm359_vm0, %v320_v5  ;;  %v297_v14 = vld [vmem:[%s8693_s11 + $0x48] sm:$0xff]  ;;  %v323_v15 = vpack.c.bf16 %v295_v12, %v294_v11  ;;  %v298_v17 = vld [vmem:[%s8693_s11 + $0x50] sm:$0xff]  ;;  %v299_v18 = vld [vmem:[%s8693_s11 + $0x58] sm:$0xff] }
  0x17   : > { %7311 = vmatmul.mubr.msk.bf16.vlgmr.msra.gmra.mrb[0].mxu0 %vm359_vm0, %v321_v9  ;;  %v324_v16 = vpack.c.bf16 %v297_v14, %v296_v13  ;;  %v300_v19 = vld [vmem:[%s8693_s11 + $0x60] sm:$0xff]  ;;  %v301_v20 = vld [vmem:[%s8693_s11 + $0x68] sm:$0xff]  ;;  %v325_v21 = vpack.c.bf16 %v299_v18, %v298_v17  ;;  %v302_v23 = vld [vmem:[%s8693_s11 + $0x70] sm:$0xff] }
  0x18   : > { %7314 = vmatprep.mubr.msk.bf16.mxu0 %vm359_vm0, %v322_v10  ;;  %v326_v22 = vpack.c.bf16 %v301_v20, %v300_v19  ;;  %v303_v24 = vld [vmem:[%s8693_s11 + $0x78] sm:$0xff]  ;;  %v304_v25 = vld [vmem:[%s8693_s11 + $0x80] sm:$0xff]  ;;  %v305_v26 = vld [vmem:[%s8693_s11 + $0x88] sm:$0xff] }
  0x19   : > { %v327_v27 = vpack.c.bf16 %v303_v24, %v302_v23  ;;  %v328_v28 = vpack.c.bf16 %v305_v26, %v304_v25  ;;  %v306_v29 = vld [vmem:[%s8693_s11 + $0x90] sm:$0xff]  ;;  %v307_v30 = vld [vmem:[%s8693_s11 + $0x98] sm:$0xff]  ;;  %v308_v31 = vld [vmem:[%s8693_s11 + $0xa0] sm:$0xff] }
  0x1a   : > { %v309_v32 = vld [vmem:[%s8693_s11 + $0xa8] sm:$0xff]  ;;  %v329_v33 = vpack.c.bf16 %v307_v30, %v306_v29  ;;  %v310_v35 = vld [vmem:[%s8693_s11 + $0xb0] sm:$0xff]  ;;  %v311_v36 = vld [vmem:[%s8693_s11 + $0xb8] sm:$0xff] }
  0x1b   : > { %v330_v34 = vpack.c.bf16 %v309_v32, %v308_v31  ;;  %v312_v37 = vld [vmem:[%s8693_s11 + $0xc0] sm:$0xff]  ;;  %v313_v38 = vld [vmem:[%s8693_s11 + $0xc8] sm:$0xff]  ;;  %v331_v39 = vpack.c.bf16 %v311_v36, %v310_v35  ;;  %v314_v41 = vld [vmem:[%s8693_s11 + $0xd0] sm:$0xff] }
  0x1c   : > { %v332_v40 = vpack.c.bf16 %v313_v38, %v312_v37  ;;  %v315_v42 = vld [vmem:[%s8693_s11 + $0xd8] sm:$0xff]  ;;  %v316_v43 = vld [vmem:[%s8693_s11 + $0xe0] sm:$0xff]  ;;  %v317_v44 = vld [vmem:[%s8693_s11 + $0xe8] sm:$0xff] }
  0x1d   : > { %v333_v45 = vpack.c.bf16 %v315_v42, %v314_v41  ;;  %v334_v46 = vpack.c.bf16 %v317_v44, %v316_v43  ;;  %v318_v47 = vld [vmem:[%s8693_s11 + $0xf0] sm:$0xff]  ;;  %v319_v48 = vld [vmem:[%s8693_s11 + $0xf8] sm:$0xff] }
  0x1e   : > { %v335_v49 = vpack.c.bf16 %v319_v48, %v318_v47 }
  0x1f   : > { %7315 = vmatmul.mubr.msk.bf16.gmra.mrb[4].mxu0 %vm359_vm0, %v323_v15 }
  0x20   : > { %7318 = vmatprep.mubr.msk.bf16.mxu0 %vm359_vm0, %v324_v16 }
  0x27   : > { %7319 = vmatmul.mubr.msk.bf16.gmra.mrb[8].mxu0 %vm359_vm0, %v325_v21 }
  0x28   : > { %7322 = vmatprep.mubr.msk.bf16.mxu0 %vm359_vm0, %v326_v22 }
  0x2f   : > { %7323 = vmatmul.mubr.msk.bf16.gmra.mrb[12].mxu0 %vm359_vm0, %v327_v27 }
  0x30   : > { %7326 = vmatprep.mubr.msk.bf16.mxu0 %vm359_vm0, %v328_v28 }
  0x37   : > { %7327 = vmatmul.mubr.msk.bf16.gmra.mrb[16].mxu0 %vm359_vm0, %v329_v33 }
  0x38   : > { %7330 = vmatprep.mubr.msk.bf16.mxu0 %vm359_vm0, %v330_v34 }
  0x3f   : > { %7331 = vmatmul.mubr.msk.bf16.gmra.mrb[20].mxu0 %vm359_vm0, %v331_v39 }
  0x40   : > { %7334 = vmatprep.mubr.msk.bf16.mxu0 %vm359_vm0, %v332_v40 }
  0x47   : > { %7335 = vmatmul.mubr.msk.bf16.gmra.mrb[24].mxu0 %vm359_vm0, %v333_v45 }
  0x48   : > { %7338 = vmatprep.mubr.msk.bf16.mxu0 %vm359_vm0, %v334_v46 }
  0x4f   : > { %7339 = vmatmul.mubr.msk.bf16.gmra.mrb[28].mxu0 %vm359_vm0, %v335_v49 }
  0xea   : > { %v7312_v50 = vpop.f32.mrb[0].mxu0 }
  0xeb   : > { %v442_v52 = vpop.f32.mrb[1].mxu0  ;;  %v451_v54 = vadd.f32 %v7312_v50, %v8746_v51 }
  0xec   : > { %v7313_v53 = vpop.f32.mrb[2].mxu0  ;;  %v443_v57 = vadd.f32 %v8746_v51, %v442_v52 }
  0xed   : > { %v454_v55 = vadd.f32 %v7313_v53, %v8746_v51  ;;  %v445_v56 = vpop.f32.mrb[3].mxu0 }
  0xee   : > { %v446_v58 = vadd.f32 %v8746_v51, %v445_v56 }
  0xef   : > { %v8752_v59 = vpack.c.bf16 %v454_v55, %v451_v54 }
  0xf0   : > { %v569_v60 = vpack.c.bf16 %v446_v58, %v443_v57 }
  0xf1   : > { %603 = vrot.lane.b32.xlu1 %v8752_v59, %s8626_s14  ;;  %699 = vrot.lane.b32.xlu0 %v8752_v59, %s8627_s15 }
  0xf2   : > { %v7316_v61 = vpop.f32.mrb[4].mxu0  ;;  %7350 = vmatprep.mubr.msk.bf16.mxu1 %vm705_vm1, %v569_v60 }
  0xf3   : > { %v467_v62 = vadd.f32 %v7316_v61, %v8746_v51  ;;  %v458_v63 = vpop.f32.mrb[5].mxu0 }
  0xf4   : > { %v459_v0 = vadd.f32 %v8746_v51, %v458_v63  ;;  %v7317_v1 = vpop.f32.mrb[6].mxu0 }
  0xf5   : > { %v470_v2 = vadd.f32 %v7317_v1, %v8746_v51  ;;  %635 = vrot.lane.b32.xlu1 %v8752_v59, %s8628_s16  ;;  %697 = vrot.lane.b32.xlu0 %v569_v60, %s8627_s15  ;;  %v461_v3 = vpop.f32.mrb[7].mxu0 }
  0xf6   : > { %v462_v4 = vadd.f32 %v8746_v51, %v461_v3 }
  0xf7   : > { %v8766_v5 = vpack.c.bf16 %v470_v2, %v467_v62 }
  0xf8   : > { %v8768_v6 = vpack.c.bf16 %v462_v4, %v459_v0 }
  0xf9   : > { %667 = vrot.lane.b32.xlu1 %v8752_v59, %s8629_s17  ;;  %703 = vrot.lane.b32.xlu0 %v8766_v5, %s8627_s15 }
  0xfa   : > { %v7320_v7 = vpop.f32.mrb[8].mxu0 }
  0xfb   : > { %v483_v8 = vadd.f32 %v7320_v7, %v8746_v51  ;;  %v474_v9 = vpop.f32.mrb[9].mxu0 }
  0xfc   : > { %v475_v10 = vadd.f32 %v8746_v51, %v474_v9  ;;  %v7321_v11 = vpop.f32.mrb[10].mxu0 }
  0xfd   : > { %4045 = vrot.lane.b32.xlu1 %v8752_v59, %s8630_s18  ;;  %607 = vrot.lane.b32.xlu0 %v8766_v5, %s8626_s14  ;;  %v486_v12 = vadd.f32 %v7321_v11, %v8746_v51  ;;  %v477_v13 = vpop.f32.mrb[11].mxu0 }
  0xfe   : > { %v478_v14 = vadd.f32 %v8746_v51, %v477_v13 }
  0xff   : > { %v8782_v15 = vpack.c.bf16 %v486_v12, %v483_v8 }
 0x100   : > { %v8784_v16 = vpack.c.bf16 %v478_v14, %v475_v10 }
 0x101   : > { %601 = vrot.lane.b32.xlu1 %v569_v60, %s8626_s14  ;;  %639 = vrot.lane.b32.xlu0 %v8766_v5, %s8628_s16 }
 0x102   : > { %v7324_v17 = vpop.f32.mrb[12].mxu0 }
 0x103   : > { %v499_v18 = vadd.f32 %v7324_v17, %v8746_v51  ;;  %v490_v19 = vpop.f32.mrb[13].mxu0 }
 0x104   : > { %v491_v20 = vadd.f32 %v8746_v51, %v490_v19  ;;  %v7325_v21 = vpop.f32.mrb[14].mxu0 }
 0x105   : > { %633 = vrot.lane.b32.xlu1 %v569_v60, %s8628_s16  ;;  %671 = vrot.lane.b32.xlu0 %v8766_v5, %s8629_s17  ;;  %v502_v22 = vadd.f32 %v7325_v21, %v8746_v51  ;;  %v493_v23 = vpop.f32.mrb[15].mxu0 }
 0x106   : > { %v494_v24 = vadd.f32 %v8746_v51, %v493_v23 }
 0x107   : > { %v8796_v25 = vpack.c.bf16 %v502_v22, %v499_v18 }
 0x108   : > { %v8798_v26 = vpack.c.bf16 %v494_v24, %v491_v20 }
 0x109   : > { %665 = vrot.lane.b32.xlu1 %v569_v60, %s8629_s17  ;;  %637 = vrot.lane.b32.xlu0 %v8768_v6, %s8628_s16 }
 0x10a   : > { %v7328_v27 = vpop.f32.mrb[16].mxu0 }
 0x10b   : > { %v515_v28 = vadd.f32 %v7328_v27, %v8746_v51  ;;  %v506_v29 = vpop.f32.mrb[17].mxu0 }
 0x10c   : > { %v507_v30 = vadd.f32 %v8746_v51, %v506_v29  ;;  %v7329_v31 = vpop.f32.mrb[18].mxu0 }
 0x10d   : > { %4043 = vrot.lane.b32.xlu1 %v569_v60, %s8630_s18  ;;  %669 = vrot.lane.b32.xlu0 %v8768_v6, %s8629_s17  ;;  %v518_v32 = vadd.f32 %v7329_v31, %v8746_v51  ;;  %v509_v33 = vpop.f32.mrb[19].mxu0 }
 0x10e   : > { %v510_v34 = vadd.f32 %v8746_v51, %v509_v33 }
 0x10f   : > { %v8810_v35 = vpack.c.bf16 %v518_v32, %v515_v28 }
 0x110   : > { %v8812_v36 = vpack.c.bf16 %v510_v34, %v507_v30 }
 0x111   : > { %4049 = vrot.lane.b32.xlu1 %v8766_v5, %s8630_s18  ;;  %4047 = vrot.lane.b32.xlu0 %v8768_v6, %s8630_s18 }
 0x112   : > { %7382 = vmatprep.mubr.msk.bf16.mxu0 %vm705_vm1, %v8812_v36  ;;  %v7332_v37 = vpop.f32.mrb[20].mxu0 }
 0x113   : > { %v531_v38 = vadd.f32 %v7332_v37, %v8746_v51  ;;  %v522_v39 = vpop.f32.mrb[21].mxu0 }
 0x114   : > { %v523_v40 = vadd.f32 %v8746_v51, %v522_v39  ;;  %v7333_v41 = vpop.f32.mrb[22].mxu0 }
 0x115   : > { %701 = vrot.lane.b32.xlu1 %v8768_v6, %s8627_s15  ;;  %4134 = vrot.lane.b32.xlu0 %v8782_v15, %s8630_s18  ;;  %v534_v42 = vadd.f32 %v7333_v41, %v8746_v51  ;;  %v525_v43 = vpop.f32.mrb[23].mxu0 }
 0x116   : > { %v526_v44 = vadd.f32 %v8746_v51, %v525_v43 }
 0x117   : > { %v8828_v45 = vpack.c.bf16 %v534_v42, %v531_v38 }
 0x118   : > { %v8830_v46 = vpack.c.bf16 %v526_v44, %v523_v40 }
 0x119   : > { %605 = vrot.lane.b32.xlu1 %v8768_v6, %s8626_s14  ;;  %795 = vrot.lane.b32.xlu0 %v8784_v16, %s8627_s15 }
 0x11a   : > { %v7336_v47 = vpop.f32.mrb[24].mxu0 }
 0x11b   : > { %v547_v48 = vadd.f32 %v7336_v47, %v8746_v51  ;;  %v538_v49 = vpop.f32.mrb[25].mxu0 }
 0x11c   : > { %v539_v50 = vadd.f32 %v8746_v51, %v538_v49  ;;  %v7337_v52 = vpop.f32.mrb[26].mxu0 }
 0x11d   : > { %797 = vrot.lane.b32.xlu1 %v8782_v15, %s8627_s15  ;;  %609 = vrot.lane.b32.xlu0 %v8784_v16, %s8626_s14  ;;  %v550_v53 = vadd.f32 %v7337_v52, %v8746_v51  ;;  %v541_v54 = vpop.f32.mrb[27].mxu0 }
 0x11e   : > { %v542_v55 = vadd.f32 %v8746_v51, %v541_v54 }
 0x11f   : > { %v8844_v56 = vpack.c.bf16 %v550_v53, %v547_v48 }
 0x120   : > { %v8846_v57 = vpack.c.bf16 %v542_v55, %v539_v50 }
 0x121   : > { %611 = vrot.lane.b32.xlu1 %v8782_v15, %s8626_s14  ;;  %4132 = vrot.lane.b32.xlu0 %v8784_v16, %s8630_s18 }
 0x122   : > { %v7340_v58 = vpop.f32.mrb[28].mxu0 }
 0x123   : > { %v563_v60 = vadd.f32 %v7340_v58, %v8746_v51  ;;  %v554_v61 = vpop.f32.mrb[29].mxu0 }
 0x124   : > { %v555_v62 = vadd.f32 %v8746_v51, %v554_v61  ;;  %v7341_v63 = vpop.f32.mrb[30].mxu0 }
 0x125   : > { %643 = vrot.lane.b32.xlu1 %v8782_v15, %s8628_s16  ;;  %801 = vrot.lane.b32.xlu0 %v8796_v25, %s8627_s15  ;;  %v566_v0 = vadd.f32 %v7341_v63, %v8746_v51  ;;  %v557_v1 = vpop.f32.mrb[31].mxu0 }
 0x126   : > { %v558_v2 = vadd.f32 %v8746_v51, %v557_v1 }
 0x127   : > { %v8860_v3 = vpack.c.bf16 %v566_v0, %v563_v60 }
 0x128   : > { %v8862_v4 = vpack.c.bf16 %v558_v2, %v555_v62 }
 0x129   : > { %13973 = vst [vmem:[#allocation2_spill] sm:$0xff] %v8860_v3  ;;  %675 = vrot.lane.b32.xlu1 %v8782_v15, %s8629_s17  ;;  %615 = vrot.lane.b32.xlu0 %v8796_v25, %s8626_s14 }
 0x12d   : > { %641 = vrot.lane.b32.xlu1 %v8784_v16, %s8628_s16  ;;  %647 = vrot.lane.b32.xlu0 %v8796_v25, %s8628_s16 }
 0x131   : > { %673 = vrot.lane.b32.xlu1 %v8784_v16, %s8629_s17  ;;  %679 = vrot.lane.b32.xlu0 %v8796_v25, %s8629_s17 }
 0x135   : > { %4136 = vrot.lane.b32.xlu1 %v8798_v26, %s8630_s18  ;;  %4138 = vrot.lane.b32.xlu0 %v8796_v25, %s8630_s18 }
 0x139   : > { %894 = vrot.lane.b32.xlu1 %v8810_v35, %s8627_s15  ;;  %799 = vrot.lane.b32.xlu0 %v8798_v26, %s8627_s15 }
 0x13d   : > { %619 = vrot.lane.b32.xlu1 %v8810_v35, %s8626_s14  ;;  %613 = vrot.lane.b32.xlu0 %v8798_v26, %s8626_s14 }
 0x141   : > { %651 = vrot.lane.b32.xlu1 %v8810_v35, %s8628_s16  ;;  %645 = vrot.lane.b32.xlu0 %v8798_v26, %s8628_s16 }
 0x145   : > { %683 = vrot.lane.b32.xlu1 %v8810_v35, %s8629_s17  ;;  %677 = vrot.lane.b32.xlu0 %v8798_v26, %s8629_s17 }
 0x149   : > { %4223 = vrot.lane.b32.xlu1 %v8810_v35, %s8630_s18  ;;  %898 = vrot.lane.b32.xlu0 %v8828_v45, %s8627_s15 }
 0x14d   : > { %892 = vrot.lane.b32.xlu1 %v8812_v36, %s8627_s15  ;;  %623 = vrot.lane.b32.xlu0 %v8828_v45, %s8626_s14 }
 0x151   : > { %617 = vrot.lane.b32.xlu1 %v8812_v36, %s8626_s14  ;;  %655 = vrot.lane.b32.xlu0 %v8828_v45, %s8628_s16 }
 0x155   : > { %649 = vrot.lane.b32.xlu1 %v8812_v36, %s8628_s16  ;;  %687 = vrot.lane.b32.xlu0 %v8828_v45, %s8629_s17 }
 0x159   : > { %681 = vrot.lane.b32.xlu1 %v8812_v36, %s8629_s17  ;;  %896 = vrot.lane.b32.xlu0 %v8830_v46, %s8627_s15 }
 0x15d   : > { %4221 = vrot.lane.b32.xlu1 %v8812_v36, %s8630_s18  ;;  %621 = vrot.lane.b32.xlu0 %v8830_v46, %s8626_s14 }
 0x161   : > { %4227 = vrot.lane.b32.xlu1 %v8828_v45, %s8630_s18  ;;  %653 = vrot.lane.b32.xlu0 %v8830_v46, %s8628_s16 }
 0x163   : > { %v8924_v51 = vpop.permute.xlu1 %603  ;;  %v700_v7 = vpop.permute.xlu0 %699 }
 0x164   : > { %v722_v17 = vsel %vm705_vm1, %v700_v7, 0 }
 0x165   : > { %991 = vrot.lane.b32.xlu1 %v8844_v56, %s8627_s15  ;;  %685 = vrot.lane.b32.xlu0 %v8830_v46, %s8629_s17 }
 0x167   : > { %v8930_v8 = vpop.permute.xlu1 %635  ;;  %v698_v9 = vpop.permute.xlu0 %697 }
 0x168   : > { %13974 = vst [vmem:[#allocation3_spill] sm:$0xff] %v8930_v8  ;;  %7990 = vmatprep.subr.msk.bf16.mxu1 %vm705_vm1, %v698_v9  ;;  %v719_v10 = vsel %vm705_vm1, %v698_v9, 0 }
 0x169   : > { %627 = vrot.lane.b32.xlu1 %v8844_v56, %s8626_s14  ;;  %4225 = vrot.lane.b32.xlu0 %v8830_v46, %s8630_s18 }
 0x16a   : > { %7343 = vmatpush3.bf16.xpose.msra.mxu1 %v719_v10 }
 0x16b   : > { %7991 = vmatprep.subr.msk.bf16.mxu1 %vm705_vm1, %v700_v7  ;;  %v8939_v11 = vpop.permute.xlu1 %667  ;;  %v704_v12 = vpop.permute.xlu0 %703 }
 0x16c   : > { %13975 = vst [vmem:[#allocation4_spill] sm:$0xff] %v8939_v11  ;;  %v728_v38 = vsel %vm705_vm1, %v704_v12, 0 }
 0x16d   : > { %659 = vrot.lane.b32.xlu1 %v8844_v56, %s8628_s16  ;;  %4312 = vrot.lane.b32.xlu0 %v8844_v56, %s8630_s18 }
 0x16f   : > { %v8945_v13 = vpop.permute.xlu1 %4045  ;;  %v8947_v14 = vpop.permute.xlu0 %607 }
 0x170   : > { %13976 = vst [vmem:[#allocation5_spill] sm:$0xff] %v8945_v13  ;;  %13977 = vst [vmem:[#allocation6_spill] sm:$0xff] %v8947_v14 }
 0x171   : > { %691 = vrot.lane.b32.xlu1 %v8844_v56, %s8629_s17  ;;  %995 = vrot.lane.b32.xlu0 %v8860_v3, %s8627_s15 }
 0x172   : > { %7345 = vmatpush3.bf16.xpose.msra.mxu1 %v722_v17 }
 0x173   : > { %v8954_v18 = vpop.permute.xlu1 %601  ;;  %v8956_v19 = vpop.permute.xlu0 %639 }
 0x174   : > { %13978 = vst [vmem:[#allocation7_spill] sm:$0xff] %v8956_v19 }
 0x175   : > { %989 = vrot.lane.b32.xlu1 %v8846_v57, %s8627_s15  ;;  %631 = vrot.lane.b32.xlu0 %v8860_v3, %s8626_s14 }
 0x177   : > { %v8962_v20 = vpop.permute.xlu1 %633  ;;  %v8964_v21 = vpop.permute.xlu0 %671 }
 0x178   : > { %13979 = vst [vmem:[#allocation8_spill] sm:$0xff] %v8962_v20  ;;  %13980 = vst [vmem:[#allocation9_spill] sm:$0xff] %v8964_v21 }
 0x179   : > { %625 = vrot.lane.b32.xlu1 %v8846_v57, %s8626_s14  ;;  %663 = vrot.lane.b32.xlu0 %v8860_v3, %s8628_s16 }
 0x17b   : > { %v8970_v22 = vpop.permute.xlu1 %665  ;;  %v8972_v23 = vpop.permute.xlu0 %637 }
 0x17c   : > { %13981 = vst [vmem:[#allocation10_spill] sm:$0xff] %v8970_v22  ;;  %13982 = vst [vmem:[#allocation11_spill] sm:$0xff] %v8972_v23 }
 0x17d   : > { %657 = vrot.lane.b32.xlu1 %v8846_v57, %s8628_s16  ;;  %993 = vrot.lane.b32.xlu0 %v8862_v4, %s8627_s15 }
 0x17f   : > { %v8978_v24 = vpop.permute.xlu1 %4043  ;;  %v8980_v27 = vpop.permute.xlu0 %669 }
 0x180   : > { %13983 = vst [vmem:[#allocation12_spill] sm:$0xff] %v8978_v24  ;;  %13984 = vst [vmem:[#allocation13_spill] sm:$0xff] %v8980_v27 }
 0x181   : > { %689 = vrot.lane.b32.xlu1 %v8846_v57, %s8629_s17  ;;  %629 = vrot.lane.b32.xlu0 %v8862_v4, %s8626_s14  ;;  %s13485_s14 = scalar_lea.vmem %s13654_s7, %s6962_s8 }
 0x183   : > { %v8986_v28 = vpop.permute.xlu1 %4049  ;;  %v8988_v29 = vpop.permute.xlu0 %4047 }
 0x184   : > { %13985 = vst [vmem:[#allocation14_spill] sm:$0xff] %v8986_v28  ;;  %13986 = vst [vmem:[#allocation15_spill] sm:$0xff] %v8988_v29 }
 0x185   : > { %4310 = vrot.lane.b32.xlu1 %v8846_v57, %s8630_s18  ;;  %661 = vrot.lane.b32.xlu0 %v8862_v4, %s8628_s16 }
 0x187   : > { %v702_v30 = vpop.permute.xlu1 %701  ;;  %v8994_v31 = vpop.permute.xlu0 %4134 }
 0x188   : > { %13987 = vst [vmem:[#allocation16_spill] sm:$0xff] %v8994_v31  ;;  %7992 = vmatprep.subr.msk.bf16.mxu1 %vm705_vm1, %v702_v30  ;;  %v725_v32 = vsel %vm705_vm1, %v702_v30, 0 }
 0x189   : > { %695 = vrot.lane.b32.xlu1 %v8860_v3, %s8629_s17  ;;  %693 = vrot.lane.b32.xlu0 %v8862_v4, %s8629_s17 }
 0x18a   : > { %7347 = vmatpush3.bf16.xpose.msra.mxu1 %v725_v32 }
 0x18b   : > { %7993 = vmatprep.subr.msk.bf16.mxu1 %vm705_vm1, %v704_v12  ;;  %v9003_v33 = vpop.permute.xlu1 %605  ;;  %v796_v34 = vpop.permute.xlu0 %795 }
 0x18c   : > { %v816_v43 = vsel %vm705_vm1, %v796_v34, 0 }
 0x18d   : > { %4314 = vrot.lane.b32.xlu1 %v8862_v4, %s8630_s18  ;;  %1864 = vrot.lane.b32.xlu0 %v8939_v11, %s8627_s15 }
 0x18f   : > { %v798_v36 = vpop.permute.xlu1 %797  ;;  %v9009_v37 = vpop.permute.xlu0 %609 }
 0x190   : > { %13988 = vst [vmem:[#allocation17_spill] sm:$0xff] %v9009_v37 }
 0x191   : > { %1088 = vrot.lane.b32.xlu1 %v8924_v51, %s8627_s15  ;;  %4399 = vrot.lane.b32.xlu0 %v8954_v18, %s8630_s18 }
 0x192   : > { %7349 = vmatpush3.bf16.xpose.msra.mxu1 %v728_v38 }
 0x193   : > { %7994 = vmatprep.subr.msk.bf16.mxu1 %vm705_vm1, %v796_v34  ;;  %v9017_v39 = vpop.permute.xlu1 %611  ;;  %v9019_v40 = vpop.permute.xlu0 %4132 }
 0x194   : > { %13989 = vst [vmem:[#allocation18_spill] sm:$0xff] %v9017_v39  ;;  %13990 = vst [vmem:[#allocation19_spill] sm:$0xff] %v9019_v40 }
 0x195   : > { %1476 = vrot.lane.b32.xlu1 %v8930_v8, %s8627_s15  ;;  %1092 = vrot.lane.b32.xlu0 %v8947_v14, %s8627_s15 }
 0x197   : > { %v9025_v41 = vpop.permute.xlu1 %643  ;;  %v802_v42 = vpop.permute.xlu0 %801 }
 0x198   : > { %13991 = vst [vmem:[#allocation20_spill] sm:$0xff] %v9025_v41  ;;  %v825_v62 = vsel %vm705_vm1, %v802_v42, 0 }
 0x199   : > { %7351 = vmatmul.mubr.msk.bf16.vlgmr.msra.gmra.mrb[0].mxu1 %vm705_vm1, %v8752_v59  ;;  %4401 = vrot.lane.b32.xlu1 %v8924_v51, %s8630_s18 }
 0x19a   : > { %1480 = vrot.lane.b32.xlu0 %v8956_v19, %s8627_s15  ;;  %7354 = vmatprep.mubr.msk.bf16.mxu1 %vm705_vm1, %v8768_v6  ;;  %v819_v6 = vsel %vm705_vm1, %v798_v36, 0 }
 0x19b   : > { %7359 = vmatpush3.bf16.xpose.msra.mxu1 %v816_v43  ;;  %v9036_v44 = vpop.permute.xlu1 %675  ;;  %v9038_v47 = vpop.permute.xlu0 %615 }
 0x19c   : > { %13992 = vst [vmem:[#allocation21_spill] sm:$0xff] %v9036_v44  ;;  %13993 = vst [vmem:[#allocation22_spill] sm:$0xff] %v9038_v47  ;;  %7995 = vmatprep.subr.msk.bf16.mxu1 %vm705_vm1, %v798_v36 }
 0x19d   : > { %1086 = vrot.lane.b32.xlu1 %v8954_v18, %s8627_s15 }
 0x19e   : > { %1868 = vrot.lane.b32.xlu0 %v8964_v21, %s8627_s15 }
 0x19f   : > { %v9045_v59 = vpop.permute.xlu1 %641  ;;  %v9047_v48 = vpop.permute.xlu0 %647 }
 0x1a0   : > { %13994 = vst [vmem:[#allocation23_spill] sm:$0xff] %v9045_v59  ;;  %13995 = vst [vmem:[#allocation24_spill] sm:$0xff] %v9047_v48 }
 0x1a1   : > { %7355 = vmatmul.mubr.msk.bf16.gmra.mrb[4].mxu1 %vm705_vm1, %v8766_v5  ;;  %1474 = vrot.lane.b32.xlu1 %v8962_v20, %s8627_s15 }
 0x1a2   : > { %1090 = vrot.lane.b32.xlu0 %v9003_v33, %s8627_s15  ;;  %7366 = vmatprep.mubr.msk.bf16.mxu1 %vm705_vm1, %v8784_v16 }
 0x1a3   : > { %7361 = vmatpush3.bf16.xpose.msra.mxu1 %v819_v6  ;;  %v9058_v49 = vpop.permute.xlu1 %673  ;;  %v9060_v50 = vpop.permute.xlu0 %679 }
 0x1a4   : > { %13996 = vst [vmem:[#allocation25_spill] sm:$0xff] %v9058_v49  ;;  %13997 = vst [vmem:[#allocation26_spill] sm:$0xff] %v9060_v50 }
 0x1a5   : > { %1862 = vrot.lane.b32.xlu1 %v8970_v22, %s8627_s15 }
 0x1a6   : > { %1478 = vrot.lane.b32.xlu0 %v8972_v23, %s8627_s15 }
 0x1a7   : > { %v9066_v5 = vpop.permute.xlu1 %4136  ;;  %v9068_v52 = vpop.permute.xlu0 %4138 }
 0x1a8   : > { %13998 = vst [vmem:[#allocation27_spill] sm:$0xff] %v9066_v5  ;;  %13999 = vst [vmem:[#allocation28_spill] sm:$0xff] %v9068_v52 }
 0x1a9   : > { %1185 = vrot.lane.b32.xlu1 %v9017_v39, %s8627_s15 }
 0x1aa   : > { %1866 = vrot.lane.b32.xlu0 %v8980_v27, %s8627_s15 }
 0x1ab   : > { %v895_v16 = vpop.permute.xlu1 %894  ;;  %v800_v53 = vpop.permute.xlu0 %799 }
 0x1ac   : > { %7996 = vmatprep.subr.msk.bf16.mxu1 %vm705_vm1, %v800_v53  ;;  %v822_v54 = vsel %vm705_vm1, %v800_v53, 0  ;;  %v916_v30 = vsel %vm705_vm1, %v895_v16, 0 }
 0x1ad   : > { %1573 = vrot.lane.b32.xlu1 %v9025_v41, %s8627_s15  ;;  %7363 = vmatpush3.bf16.xpose.msra.mxu1 %v822_v54 }
 0x1ae   : > { %4403 = vrot.lane.b32.xlu0 %v9003_v33, %s8630_s18  ;;  %7997 = vmatprep.subr.msk.bf16.mxu1 %vm705_vm1, %v802_v42 }
 0x1af   : > { %v9081_v55 = vpop.permute.xlu1 %619  ;;  %v9083_v58 = vpop.permute.xlu0 %613 }
 0x1b0   : > { %14000 = vst [vmem:[#allocation29_spill] sm:$0xff] %v9081_v55  ;;  %14001 = vst [vmem:[#allocation30_spill] sm:$0xff] %v9083_v58 }
 0x1b1   : > { %1961 = vrot.lane.b32.xlu1 %v9036_v44, %s8627_s15 }
 0x1b2   : > { %1189 = vrot.lane.b32.xlu0 %v9038_v47, %s8627_s15 }
 0x1b3   : > { %v9089_v60 = vpop.permute.xlu1 %651  ;;  %v9091_v61 = vpop.permute.xlu0 %645 }
 0x1b4   : > { %14002 = vst [vmem:[#allocation31_spill] sm:$0xff] %v9089_v60  ;;  %14003 = vst [vmem:[#allocation32_spill] sm:$0xff] %v9091_v61 }
 0x1b5   : > { %1183 = vrot.lane.b32.xlu1 %v9009_v37, %s8627_s15  ;;  %7365 = vmatpush3.bf16.xpose.msra.mxu1 %v825_v62 }
 0x1b6   : > { %1577 = vrot.lane.b32.xlu0 %v9047_v48, %s8627_s15 }
 0x1b7   : > { %v9098_v63 = vpop.permute.xlu1 %683  ;;  %v9100_v0 = vpop.permute.xlu0 %677 }
 0x1b8   : > { %14004 = vst [vmem:[#allocation33_spill] sm:$0xff] %v9098_v63  ;;  %14005 = vst [vmem:[#allocation34_spill] sm:$0xff] %v9100_v0 }
 0x1b9   : > { %1571 = vrot.lane.b32.xlu1 %v9045_v59, %s8627_s15 }
 0x1ba   : > { %1965 = vrot.lane.b32.xlu0 %v9060_v50, %s8627_s15 }
 0x1bb   : > { %v9106_v1 = vpop.permute.xlu1 %4223  ;;  %v899_v2 = vpop.permute.xlu0 %898 }
 0x1bc   : > { %14006 = vst [vmem:[#allocation35_spill] sm:$0xff] %v9106_v1  ;;  %7367 = vmatmul.mubr.msk.bf16.vlgmr.msra.gmra.mrb[8].mxu1 %vm705_vm1, %v8782_v15 }
 0x1bd   : > { %1959 = vrot.lane.b32.xlu1 %v9058_v49, %s8627_s15  ;;  %7370 = vmatprep.mubr.msk.bf16.mxu1 %vm705_vm1, %v8798_v26 }
 0x1be   : > { %1187 = vrot.lane.b32.xlu0 %v9083_v58, %s8627_s15 }
 0x1bf   : > { %v893_v7 = vpop.permute.xlu1 %892  ;;  %v9116_v9 = vpop.permute.xlu0 %623 }
 0x1c0   : > { %14007 = vst [vmem:[#allocation36_spill] sm:$0xff] %v9116_v9  ;;  %7998 = vmatprep.subr.msk.bf16.mxu0 %vm705_vm1, %v893_v7  ;;  %v913_v10 = vsel %vm705_vm1, %v893_v7, 0 }
 0x1c1   : > { %7375 = vmatpush3.bf16.xpose.msra.mxu0 %v913_v10  ;;  %1282 = vrot.lane.b32.xlu1 %v9081_v55, %s8627_s15 }
 0x1c2   : > { %1575 = vrot.lane.b32.xlu0 %v9091_v61, %s8627_s15  ;;  %7999 = vmatprep.subr.msk.bf16.mxu0 %vm705_vm1, %v895_v16  ;;  %v922_v16 = vsel %vm705_vm1, %v899_v2, 0 }
 0x1c3   : > { %v9125_v15 = vpop.permute.xlu1 %617  ;;  %v9127_v26 = vpop.permute.xlu0 %655 }
 0x1c4   : > { %14008 = vst [vmem:[#allocation37_spill] sm:$0xff] %v9125_v15  ;;  %14009 = vst [vmem:[#allocation38_spill] sm:$0xff] %v9127_v26  ;;  %7371 = vmatmul.mubr.msk.bf16.gmra.mrb[12].mxu1 %vm705_vm1, %v8796_v25 }
 0x1c5   : > { %1670 = vrot.lane.b32.xlu1 %v9089_v60, %s8627_s15  ;;  %7398 = vmatprep.mubr.msk.bf16.mxu1 %vm705_vm1, %v8846_v57 }
 0x1c6   : > { %1963 = vrot.lane.b32.xlu0 %v9100_v0, %s8627_s15 }
 0x1c7   : > { %v9137_v12 = vpop.permute.xlu1 %649  ;;  %v9139_v17 = vpop.permute.xlu0 %687 }
 0x1c8   : > { %14010 = vst [vmem:[#allocation39_spill] sm:$0xff] %v9137_v12  ;;  %14011 = vst [vmem:[#allocation40_spill] sm:$0xff] %v9139_v17 }
 0x1c9   : > { %7377 = vmatpush3.bf16.xpose.msra.mxu0 %v916_v30  ;;  %2058 = vrot.lane.b32.xlu1 %v9098_v63, %s8627_s15 }
 0x1ca   : > { %1286 = vrot.lane.b32.xlu0 %v9116_v9, %s8627_s15 }
 0x1cb   : > { %v9146_v25 = vpop.permute.xlu1 %681  ;;  %v897_v32 = vpop.permute.xlu0 %896 }
 0x1cc   : > { %14012 = vst [vmem:[#allocation41_spill] sm:$0xff] %v9146_v25  ;;  %8000 = vmatprep.subr.msk.bf16.mxu0 %vm705_vm1, %v897_v32  ;;  %v919_v36 = vsel %vm705_vm1, %v897_v32, 0 }
 0x1cd   : > { %1280 = vrot.lane.b32.xlu1 %v9125_v15, %s8627_s15 }
 0x1ce   : > { %1674 = vrot.lane.b32.xlu0 %v9127_v26, %s8627_s15 }
 0x1cf   : > { %v9153_v57 = vpop.permute.xlu1 %4221  ;;  %v9155_v34 = vpop.permute.xlu0 %621 }
 0x1d0   : > { %14013 = vst [vmem:[#allocation42_spill] sm:$0xff] %v9153_v57  ;;  %14014 = vst [vmem:[#allocation43_spill] sm:$0xff] %v9155_v34 }
 0x1d1   : > { %1668 = vrot.lane.b32.xlu1 %v9137_v12, %s8627_s15  ;;  %7379 = vmatpush3.bf16.xpose.msra.mxu0 %v919_v36 }
 0x1d2   : > { %2062 = vrot.lane.b32.xlu0 %v9139_v17, %s8627_s15  ;;  %8001 = vmatprep.subr.msk.bf16.mxu0 %vm705_vm1, %v899_v2 }
 0x1d3   : > { %v9163_v38 = vpop.permute.xlu1 %4227  ;;  %v9165_v42 = vpop.permute.xlu0 %653 }
 0x1d4   : > { %14015 = vst [vmem:[#allocation44_spill] sm:$0xff] %v9163_v38  ;;  %14016 = vst [vmem:[#allocation45_spill] sm:$0xff] %v9165_v42 }
 0x1d5   : > { %2056 = vrot.lane.b32.xlu1 %v9146_v25, %s8627_s15 }
 0x1d6   : > { %1284 = vrot.lane.b32.xlu0 %v9155_v34, %s8627_s15 }
 0x1d7   : > { %v992_v43 = vpop.permute.xlu1 %991  ;;  %v9171_v6 = vpop.permute.xlu0 %685 }
 0x1d8   : > { %14017 = vst [vmem:[#allocation46_spill] sm:$0xff] %v9171_v6 }
 0x1d9   : > { %7381 = vmatpush3.bf16.xpose.msra.mxu0 %v922_v16 }
 0x1da   : > { %1672 = vrot.lane.b32.xlu0 %v9165_v42, %s8627_s15 }
 0x1db   : > { %v9176_v53 = vpop.permute.xlu1 %627  ;;  %v9178_v54 = vpop.permute.xlu0 %4225 }
 0x1dc   : > { %14018 = vst [vmem:[#allocation47_spill] sm:$0xff] %v9176_v53  ;;  %14019 = vst [vmem:[#allocation48_spill] sm:$0xff] %v9178_v54  ;;  %1379 = vrot.lane.b32.xlu1 %v9176_v53, %s8627_s15 }
 0x1de   : > { %2060 = vrot.lane.b32.xlu0 %v9171_v6, %s8627_s15 }
 0x1df   : > { %v9184_v62 = vpop.permute.xlu1 %659  ;;  %v9186_v7 = vpop.permute.xlu0 %4312 }
 0x1e0   : > { %14020 = vst [vmem:[#allocation49_spill] sm:$0xff] %v9184_v62  ;;  %14021 = vst [vmem:[#allocation50_spill] sm:$0xff] %v9186_v7  ;;  %1767 = vrot.lane.b32.xlu1 %v9184_v62, %s8627_s15  ;;  %7383 = vmatmul.mubr.msk.bf16.vlgmr.msra.gmra.mrb[32].mxu0 %vm705_vm1, %v8810_v35 }
 0x1e1   : > { %7386 = vmatprep.mubr.msk.bf16.mxu0 %vm705_vm1, %v8830_v46 }
 0x1e3   : > { %v9194_v2 = vpop.permute.xlu1 %691  ;;  %v996_v10 = vpop.permute.xlu0 %995 }
 0x1e4   : > { %14022 = vst [vmem:[#allocation51_spill] sm:$0xff] %v9194_v2  ;;  %2155 = vrot.lane.b32.xlu1 %v9194_v2, %s8627_s15  ;;  %v1019_v38 = vsel %vm705_vm1, %v996_v10, 0 }
 0x1e7   : > { %v990_v30 = vpop.permute.xlu1 %989  ;;  %v9198_v32 = vpop.permute.xlu0 %631 }
 0x1e8   : > { %14023 = vst [vmem:[#allocation52_spill] sm:$0xff] %v9198_v32  ;;  %7387 = vmatmul.mubr.msk.bf16.gmra.mrb[36].mxu0 %vm705_vm1, %v8828_v45  ;;  %8002 = vmatprep.subr.msk.bf16.mxu1 %vm705_vm1, %v990_v30  ;;  %v1010_v36 = vsel %vm705_vm1, %v990_v30, 0 }
 0x1e9   : > { %7391 = vmatpush3.bf16.xpose.msra.mxu1 %v1010_v36  ;;  %7414 = vmatprep.mubr.msk.bf16.mxu0 %vm705_vm1, %v8954_v18  ;;  %v1013_v18 = vsel %vm705_vm1, %v992_v43, 0 }
 0x1ea   : > { %1383 = vrot.lane.b32.xlu0 %v9198_v32, %s8627_s15  ;;  %8003 = vmatprep.subr.msk.bf16.mxu1 %vm705_vm1, %v992_v43 }
 0x1eb   : > { %v9209_v35 = vpop.permute.xlu1 %625  ;;  %v9211_v46 = vpop.permute.xlu0 %663 }
 0x1ec   : > { %14024 = vst [vmem:[#allocation53_spill] sm:$0xff] %v9209_v35  ;;  %14025 = vst [vmem:[#allocation54_spill] sm:$0xff] %v9211_v46  ;;  %1377 = vrot.lane.b32.xlu1 %v9209_v35, %s8627_s15 }
 0x1ef   : > { %v9215_v45 = vpop.permute.xlu1 %657  ;;  %v994_v16 = vpop.permute.xlu0 %993 }
 0x1f0   : > { %14026 = vst [vmem:[#allocation55_spill] sm:$0xff] %v9215_v45  ;;  %1765 = vrot.lane.b32.xlu1 %v9215_v45, %s8627_s15  ;;  %v1016_v43 = vsel %vm705_vm1, %v994_v16, 0 }
 0x1f1   : > { %7393 = vmatpush3.bf16.xpose.msra.mxu1 %v1013_v18 }
 0x1f2   : > { %8004 = vmatprep.subr.msk.bf16.mxu1 %vm705_vm1, %v994_v16 }
 0x1f3   : > { %v9221_v30 = vpop.permute.xlu1 %689  ;;  %v9223_v36 = vpop.permute.xlu0 %629 }
 0x1f4   : > { %14027 = vst [vmem:[#allocation56_spill] sm:$0xff] %v9221_v30  ;;  %14028 = vst [vmem:[#allocation57_spill] sm:$0xff] %v9223_v36  ;;  %2153 = vrot.lane.b32.xlu1 %v9221_v30, %s8627_s15  ;;  %1381 = vrot.lane.b32.xlu0 %v9223_v36, %s8627_s15 }
 0x1f7   : > { %v9229_v7 = vpop.permute.xlu1 %4310  ;;  %v9231_v52 = vpop.permute.xlu0 %661 }
 0x1f8   : > { %14029 = vst [vmem:[#allocation58_spill] sm:$0xff] %v9229_v7  ;;  %14030 = vst [vmem:[#allocation59_spill] sm:$0xff] %v9231_v52  ;;  %1771 = vrot.lane.b32.xlu1 %v9211_v46, %s8627_s15  ;;  %1769 = vrot.lane.b32.xlu0 %v9231_v52, %s8627_s15 }
 0x1f9   : > { %7395 = vmatpush3.bf16.xpose.msra.mxu1 %v1016_v43 }
 0x1fa   : > { %8005 = vmatprep.subr.msk.bf16.mxu1 %vm705_vm1, %v996_v10 }
 0x1fb   : > { %v9239_v18 = vpop.permute.xlu1 %695  ;;  %v9241_v5 = vpop.permute.xlu0 %693 }
 0x1fc   : > { %14031 = vst [vmem:[#allocation60_spill] sm:$0xff] %v9239_v18  ;;  %14032 = vst [vmem:[#allocation61_spill] sm:$0xff] %v9241_v5  ;;  %2159 = vrot.lane.b32.xlu1 %v9239_v18, %s8627_s15  ;;  %2157 = vrot.lane.b32.xlu0 %v9241_v5, %s8627_s15 }
 0x1ff   : > { %v9247_v7 = vpop.permute.xlu1 %4314  ;;  %v9249_v31 = vpop.permute.xlu0 %1864 }
 0x200   : > { %14033 = vst [vmem:[#allocation62_spill] sm:$0xff] %v9247_v7 }
 0x201   : > { %7397 = vmatpush3.bf16.xpose.msra.mxu1 %v1019_v38 }
 0x203   : > { %v1089_v16 = vpop.permute.xlu1 %1088  ;;  %v9252_v43 = vpop.permute.xlu0 %4399 }
 0x204   : > { %14034 = vst [vmem:[#allocation63_spill] sm:$0xff] %v9252_v43  ;;  %v1110_v43 = vsel %vm705_vm1, %v1089_v16, 0 }
 0x207   : > { %v9254_v54 = vpop.permute.xlu1 %1476  ;;  %v1093_v1 = vpop.permute.xlu0 %1092 }
 0x208   : > { %7399 = vmatmul.mubr.msk.bf16.vlgmr.msra.gmra.mrb[16].mxu1 %vm705_vm1, %v8844_v56 }
 0x209   : > { %7402 = vmatprep.mubr.msk.bf16.mxu1 %vm705_vm1, %v8862_v4 }
 0x20b   : > { %v9260_v18 = vpop.permute.xlu1 %4401 }
 0x20c   : > { %14035 = vst [vmem:[#allocation64_spill] sm:$0xff] %v9260_v18  ;;  %v9262_v7 = vpop.permute.xlu0 %1480 }
 0x20f   : > { %v1087_v5 = vpop.permute.xlu1 %1086 }
 0x210   : > { %v9264_v2 = vpop.permute.xlu0 %1868  ;;  %7403 = vmatmul.mubr.msk.bf16.gmra.mrb[20].mxu1 %vm705_vm1, %v8860_v3  ;;  %8006 = vmatprep.subr.msk.bf16.mxu0 %vm705_vm1, %v1087_v5  ;;  %v1107_v38 = vsel %vm705_vm1, %v1087_v5, 0 }
 0x211   : > { %7407 = vmatpush3.bf16.xpose.msra.mxu0 %v1107_v38  ;;  %7430 = vmatprep.mubr.msk.bf16.mxu1 %vm705_vm1, %v9009_v37 }
 0x212   : > { %8007 = vmatprep.subr.msk.bf16.mxu0 %vm705_vm1, %v1089_v16 }
 0x213   : > { %v9273_v56 = vpop.permute.xlu1 %1474 }
 0x214   : > { %v1091_v4 = vpop.permute.xlu0 %1090 }
 0x215   : > { %v1113_v57 = vsel %vm705_vm1, %v1091_v4, 0 }
 0x217   : > { %v9275_v10 = vpop.permute.xlu1 %1862 }
 0x218   : > { %v9277_v18 = vpop.permute.xlu0 %1478 }
 0x219   : > { %7409 = vmatpush3.bf16.xpose.msra.mxu0 %v1110_v43  ;;  %v1116_v43 = vsel %vm705_vm1, %v1093_v1, 0 }
 0x21a   : > { %8008 = vmatprep.subr.msk.bf16.mxu0 %vm705_vm1, %v1091_v4 }
 0x21b   : > { %v1186_v3 = vpop.permute.xlu1 %1185 }
 0x21c   : > { %v9281_v5 = vpop.permute.xlu0 %1866  ;;  %v1207_v29 = vsel %vm705_vm1, %v1186_v3, 0 }
 0x21f   : > { %v9283_v38 = vpop.permute.xlu1 %1573 }
 0x220   : > { %v9285_v37 = vpop.permute.xlu0 %4403 }
 0x221   : > { %14036 = vst [vmem:[#allocation65_spill] sm:$0xff] %v9285_v37  ;;  %7411 = vmatpush3.bf16.xpose.msra.mxu0 %v1113_v57 }
 0x222   : > { %8009 = vmatprep.subr.msk.bf16.mxu0 %vm705_vm1, %v1093_v1 }
 0x223   : > { %v9289_v40 = vpop.permute.xlu1 %1961 }
 0x224   : > { %v1190_v28 = vpop.permute.xlu0 %1189 }
 0x225   : > { %v1213_v6 = vsel %vm705_vm1, %v1190_v28, 0 }
 0x227   : > { %v1184_v30 = vpop.permute.xlu1 %1183 }
 0x228   : > { %v9291_v16 = vpop.permute.xlu0 %1577  ;;  %8010 = vmatprep.subr.msk.bf16.mxu1 %vm705_vm1, %v1184_v30  ;;  %v1204_v17 = vsel %vm705_vm1, %v1184_v30, 0 }
 0x229   : > { %7413 = vmatpush3.bf16.xpose.msra.mxu0 %v1116_v43  ;;  %7423 = vmatpush3.bf16.xpose.msra.mxu1 %v1204_v17 }
 0x22a   : > { %8011 = vmatprep.subr.msk.bf16.mxu1 %vm705_vm1, %v1186_v3 }
 0x22b   : > { %v9297_v4 = vpop.permute.xlu1 %1571 }
 0x22c   : > { %v9299_v57 = vpop.permute.xlu0 %1965 }
 0x22d   : > { %14037 = vst [vmem:[#allocation66_spill] sm:$0xff] %v9299_v57 }
 0x22f   : > { %v9301_v37 = vpop.permute.xlu1 %1959 }
 0x230   : > { %v1188_v50 = vpop.permute.xlu0 %1187  ;;  %7415 = vmatmul.mubr.msk.bf16.vlgmr.msra.gmra.mrb[40].mxu0 %vm705_vm1, %v8924_v51 }
 0x231   : > { %7418 = vmatprep.mubr.msk.bf16.mxu0 %vm705_vm1, %v9003_v33  ;;  %7425 = vmatpush3.bf16.xpose.msra.mxu1 %v1207_v29  ;;  %v1210_v51 = vsel %vm705_vm1, %v1188_v50, 0 }
 0x232   : > { %8012 = vmatprep.subr.msk.bf16.mxu1 %vm705_vm1, %v1188_v50 }
 0x233   : > { %v1283_v1 = vpop.permute.xlu1 %1282 }
 0x234   : > { %v9309_v17 = vpop.permute.xlu0 %1575 }
 0x237   : > { %v9311_v30 = vpop.permute.xlu1 %1670 }
 0x238   : > { %v9313_v43 = vpop.permute.xlu0 %1963  ;;  %7419 = vmatmul.mubr.msk.bf16.gmra.mrb[44].mxu0 %vm705_vm1, %v8947_v14 }
 0x239   : > { %7427 = vmatpush3.bf16.xpose.msra.mxu1 %v1210_v51  ;;  %7446 = vmatprep.mubr.msk.bf16.mxu0 %vm705_vm1, %v9125_v15  ;;  %v1304_v15 = vsel %vm705_vm1, %v1283_v1, 0 }
 0x23a   : > { %8013 = vmatprep.subr.msk.bf16.mxu1 %vm705_vm1, %v1190_v28 }
 0x23b   : > { %v9321_v3 = vpop.permute.xlu1 %2058 }
 0x23c   : > { %v1287_v29 = vpop.permute.xlu0 %1286 }
 0x23f   : > { %v1281_v33 = vpop.permute.xlu1 %1280 }
 0x240   : > { %v9323_v13 = vpop.permute.xlu0 %1674  ;;  %8014 = vmatprep.subr.msk.bf16.mxu0 %vm705_vm1, %v1281_v33  ;;  %v1301_v14 = vsel %vm705_vm1, %v1281_v33, 0 }
 0x241   : > { %7429 = vmatpush3.bf16.xpose.msra.mxu1 %v1213_v6  ;;  %7439 = vmatpush3.bf16.xpose.msra.mxu0 %v1301_v14 }
 0x242   : > { %8015 = vmatprep.subr.msk.bf16.mxu0 %vm705_vm1, %v1283_v1 }
 0x243   : > { %v9329_v50 = vpop.permute.xlu1 %1668 }
 0x244   : > { %v9331_v51 = vpop.permute.xlu0 %2062 }
 0x245   : > { %14038 = vst [vmem:[#allocation67_spill] sm:$0xff] %v9331_v51 }
 0x247   : > { %v9338_v28 = vpop.permute.xlu1 %2056 }
 0x248   : > { %7431 = vmatmul.mubr.msk.bf16.vlgmr.msra.gmra.mrb[24].mxu1 %vm705_vm1, %v9017_v39  ;;  %v1285_v63 = vpop.permute.xlu0 %1284 }
 0x249   : > { %7434 = vmatprep.mubr.msk.bf16.mxu1 %vm705_vm1, %v9083_v58  ;;  %7441 = vmatpush3.bf16.xpose.msra.mxu0 %v1304_v15  ;;  %v1307_v6 = vsel %vm705_vm1, %v1285_v63, 0  ;;  %v1310_v15 = vsel %vm705_vm1, %v1287_v29, 0 }
 0x24a   : > { %8016 = vmatprep.subr.msk.bf16.mxu0 %vm705_vm1, %v1285_v63 }
 0x24c   : > { %v9350_v33 = vpop.permute.xlu0 %1672 }
 0x24e   : > { %v1380_v14 = vpop.permute.xlu1 %1379 }
 0x250   : > { %7435 = vmatmul.mubr.msk.bf16.gmra.mrb[28].mxu1 %vm705_vm1, %v9038_v47 }
 0x251   : > { %7443 = vmatpush3.bf16.xpose.msra.mxu0 %v1307_v6  ;;  %7462 = vmatprep.mubr.msk.bf16.mxu1 %vm705_vm1, %v9209_v35  ;;  %v9358_v6 = vpop.permute.xlu0 %2060 }
 0x252   : > { %8017 = vmatprep.subr.msk.bf16.mxu0 %vm705_vm1, %v1287_v29  ;;  %v9347_v1 = vpop.permute.xlu1 %1767  ;;  %14040 = vst [vmem:[#allocation69_spill] sm:$0xff] %v9358_v6  ;;  %v1495_v29 = vsel %vm705_vm1, %v9273_v56, 0 }
 0x256   : > { %v9352_v39 = vpop.permute.xlu1 %2155 }
 0x257   : > { %14039 = vst [vmem:[#allocation68_spill] sm:$0xff] %v9352_v39 }
 0x259   : > { %7445 = vmatpush3.bf16.xpose.msra.mxu0 %v1310_v15 }
 0x25a   : > { %8022 = vmatprep.subr.msk.bf16.mxu0 %vm705_vm1, %v9273_v56  ;;  %v9380_v56 = vld [vmem:[%s13652_s5 + $0x10] sm:$0xff] }
 0x25c   : > { %v1384_v15 = vpop.permute.xlu0 %1383 }
 0x25e   : > { %v1378_v47 = vpop.permute.xlu1 %1377 }
 0x25f   : > { %8018 = vmatprep.subr.msk.bf16.mxu1 %vm705_vm1, %v1378_v47  ;;  %v1398_v63 = vsel %vm705_vm1, %v1378_v47, 0  ;;  %v1401_v47 = vsel %vm705_vm1, %v1380_v14, 0 }
 0x260   : > { %7447 = vmatmul.mubr.msk.bf16.vlgmr.msra.gmra.mrb[48].mxu0 %vm705_vm1, %v9081_v55  ;;  %7455 = vmatpush3.bf16.xpose.msra.mxu1 %v1398_v63  ;;  %v1498_v63 = vsel %vm705_vm1, %v9254_v54, 0  ;;  %v9409_v55 = vld [vmem:[%s13652_s5 + $0x18] sm:$0xff] }
 0x261   : > { %7450 = vmatprep.mubr.msk.bf16.mxu0 %vm705_vm1, %v9155_v34  ;;  %8019 = vmatprep.subr.msk.bf16.mxu1 %vm705_vm1, %v1380_v14  ;;  %v9387_v14 = vld [vmem:[%s13652_s5] sm:$0xff] }
 0x262   : > { %7471 = vmatpush3.bf16.xpose.msra.mxu0 %v1495_v29  ;;  %v9404_v34 = vld [vmem:[%s13653_s6] sm:$0xff] }
 0x263   : > { %8023 = vmatprep.subr.msk.bf16.mxu0 %vm705_vm1, %v9254_v54  ;;  %v9392_v54 = vld [vmem:[%s13653_s6 + $0x10] sm:$0xff]  ;;  %14042 = vst [vmem:[#allocation71_spill] sm:$0xff] %v9404_v34 }
 0x264   : > { %14041 = vst [vmem:[#allocation70_spill] sm:$0xff] %v9392_v54 }
 0x266   : > { %v1382_v35 = vpop.permute.xlu0 %1381 }
 0x267   : > { %v1404_v0 = vsel %vm705_vm1, %v1382_v35, 0 }
 0x268   : > { %7451 = vmatmul.mubr.msk.bf16.gmra.mrb[52].mxu0 %vm705_vm1, %v9116_v9  ;;  %7457 = vmatpush3.bf16.xpose.msra.mxu1 %v1401_v47 }
 0x269   : > { %8020 = vmatprep.subr.msk.bf16.mxu1 %vm705_vm1, %v1382_v35  ;;  %7478 = vmatprep.mubr.msk.bf16.mxu0 %vm705_vm1, %v8962_v20  ;;  %v9398_v20 = vld [vmem:[%s13652_s5 + $0x8] sm:$0xff]  ;;  %v9433_v35 = vld [vmem:[%s13653_s6 + $0x18] sm:$0xff] }
 0x26a   : > { %7473 = vmatpush3.bf16.xpose.msra.mxu0 %v1498_v63  ;;  %14046 = vst [vmem:[#allocation75_spill] sm:$0xff] %v9433_v35 }
 0x26b   : > { %8024 = vmatprep.subr.msk.bf16.mxu0 %vm705_vm1, %v9277_v18 }
 0x26c   : > { %v7352_v29 = vpop.f32.mrb[0].mxu1 }
 0x26d   : > { %v2284_v47 = vadd.f32 %v7352_v29, %v9380_v56  ;;  %v764_v63 = vpop.f32.mrb[1].mxu1 }
 0x26e   : > { %v2282_v9 = vadd.f32 %v9387_v14, %v764_v63  ;;  %v7353_v58 = vpop.f32.mrb[2].mxu1  ;;  %v9417_v63 = vld [vmem:[%s13653_s6 + $0x8] sm:$0xff] }
 0x26f   : > { %v9412_v29 = vadd.f32 %v9392_v54, %v2284_v47  ;;  %v767_v39 = vpop.f32.mrb[3].mxu1  ;;  %14044 = vst [vmem:[#allocation73_spill] sm:$0xff] %v9417_v63  ;;  %v2285_v51 = vadd.f32 %v7353_v58, %v9409_v55  ;;  %v1501_v47 = vsel %vm705_vm1, %v9277_v18, 0  ;;  %v9441_v58 = vld [vmem:[%s13652_s5 + $0x30] sm:$0xff] }
 0x270   : > { %v2283_v44 = vadd.f32 %v9398_v20, %v767_v39  ;;  %7459 = vmatpush3.bf16.xpose.msra.mxu1 %v1404_v0  ;;  %v9422_v24 = vadd.f32 %v9404_v34, %v2282_v9  ;;  %v9448_v0 = vld [vmem:[%s13652_s5 + $0x20] sm:$0xff] }
 0x271   : > { %14043 = vst [vmem:[#allocation72_spill] sm:$0xff] %v9412_v29  ;;  %8021 = vmatprep.subr.msk.bf16.mxu1 %vm705_vm1, %v1384_v15  ;;  %v2577_v54 = vsel %vm2570_vm2, %v9412_v29, -inf }
 0x272   : > { %14045 = vst [vmem:[#allocation74_spill] sm:$0xff] %v9422_v24  ;;  %v9436_v39 = vadd.f32 %v9417_v63, %v2283_v44  ;;  %7475 = vmatpush3.bf16.xpose.msra.mxu0 %v1501_v47  ;;  %2578 = vmax.xlane.f32.xlu0 %v2577_v54  ;;  %v9453_v44 = vld [vmem:[%s13653_s6 + $0x30] sm:$0xff]  ;;  %v9460_v54 = vld [vmem:[%s13652_s5 + $0x38] sm:$0xff]  ;;  %v9463_v47 = vadd.f32 %v9433_v35, %v2285_v51  ;;  %v2571_v34 = vsel %vm2570_vm2, %v9422_v24, -inf  ;;  %v9480_v51 = vld [vmem:[%s13653_s6 + $0x20] sm:$0xff] }
 0x273   : > { %8025 = vmatprep.subr.msk.bf16.mxu0 %vm705_vm1, %v9262_v7  ;;  %14048 = vst [vmem:[#allocation77_spill] sm:$0xff] %v9453_v44 }
 0x274   : > { %14047 = vst [vmem:[#allocation76_spill] sm:$0xff] %v9436_v39  ;;  %v7356_v9 = vpop.f32.mrb[4].mxu1  ;;  %v2574_v18 = vsel %vm2570_vm2, %v9436_v39, -inf  ;;  %v9472_v39 = vld [vmem:[%s13653_s6 + $0x38] sm:$0xff] }
 0x275   : > { %v2288_v29 = vadd.f32 %v7356_v9, %v9441_v58  ;;  %2575 = vmax.xlane.f32.xlu1 %v2574_v18  ;;  %v780_v63 = vpop.f32.mrb[5].mxu1 }
 0x276   : > { %v2286_v57 = vadd.f32 %v9448_v0, %v780_v63  ;;  %2572 = vmax.xlane.f32.xlu0 %v2571_v34  ;;  %v7357_v6 = vpop.f32.mrb[6].mxu1  ;;  %v9486_v34 = vld [vmem:[%s13652_s5 + $0x28] sm:$0xff]  ;;  %v1407_v63 = vsel %vm705_vm1, %v1384_v15, 0 }
 0x277   : > { %v9475_v25 = vadd.f32 %v9453_v44, %v2288_v29  ;;  %v2289_v9 = vadd.f32 %v7357_v6, %v9460_v54  ;;  %v783_v18 = vpop.f32.mrb[7].mxu1  ;;  %v1504_v29 = vsel %vm705_vm1, %v9262_v7, 0  ;;  %v2580_v6 = vsel %vm2570_vm2, %v9463_v47, -inf  ;;  %v9507_v7 = vld [vmem:[%s13653_s6 + $0x28] sm:$0xff] }
 0x278   : > { %7461 = vmatpush3.bf16.xpose.msra.mxu1 %v1407_v63  ;;  %v9501_v35 = vadd.f32 %v9480_v51, %v2286_v57  ;;  %v2287_v15 = vadd.f32 %v9486_v34, %v783_v18  ;;  %v1689_v18 = vsel %vm705_vm1, %v9329_v50, 0 }
 0x279   : > { %v9490_v24 = vadd.f32 %v9472_v39, %v2289_v9  ;;  %8026 = vmatprep.subr.msk.bf16.mxu1 %vm705_vm1, %v9297_v4  ;;  %v2589_v44 = vsel %vm2570_vm2, %v9475_v25, -inf }
 0x27a   : > { %7477 = vmatpush3.bf16.xpose.msra.mxu0 %v1504_v29  ;;  %2581 = vmax.xlane.f32.xlu0 %v2580_v6  ;;  %v9514_v63 = vadd.f32 %v9507_v7, %v2287_v15  ;;  %v2583_v57 = vsel %vm2570_vm2, %v9501_v35, -inf  ;;  %v1595_v29 = vsel %vm705_vm1, %v9283_v38, 0  ;;  %v9555_v6 = vld [vmem:[%s13653_s6 + $0x50] sm:$0xff]  ;;  %v1598_v15 = vsel %vm705_vm1, %v9309_v17, 0 }
 0x27b   : > { %2590 = vmax.xlane.f32.xlu1 %v2589_v44  ;;  %8030 = vmatprep.subr.msk.bf16.mxu0 %vm705_vm1, %v9329_v50  ;;  %v2592_v9 = vsel %vm2570_vm2, %v9490_v24, -inf  ;;  %v1592_v44 = vsel %vm705_vm1, %v9297_v4, 0  ;;  %v1692_v50 = vsel %vm705_vm1, %v9311_v30, 0 }
 0x27c   : > { %v2586_v4 = vsel %vm2570_vm2, %v9514_v63, -inf }
 0x27e   : > { %2593 = vmax.xlane.f32.xlu0 %v2592_v9 }
 0x27f   : > { %2584 = vmax.xlane.f32.xlu1 %v2583_v57  ;;  %7463 = vmatmul.mubr.msk.bf16.vlgmr.msra.gmra.mrb[32].mxu1 %vm705_vm1, %v9176_v53 }
 0x280   : > { %7466 = vmatprep.mubr.msk.bf16.mxu1 %vm705_vm1, %v9223_v36  ;;  %7487 = vmatpush3.bf16.xpose.msra.mxu1 %v1592_v44  ;;  %v9563_v44 = vld [vmem:[%s13653_s6 + $0x58] sm:$0xff] }
 0x281   : > { %7479 = vmatmul.mubr.msk.bf16.vlgmr.msra.gmra.mrb[56].mxu0 %vm705_vm1, %v8930_v8  ;;  %8027 = vmatprep.subr.msk.bf16.mxu1 %vm705_vm1, %v9283_v38  ;;  %v9910_v36 = vld [vmem:[%s13653_s6 + $0xf8] sm:$0xff] }
 0x282   : > { %7482 = vmatprep.mubr.msk.bf16.mxu0 %vm705_vm1, %v8972_v23  ;;  %7503 = vmatpush3.bf16.xpose.msra.mxu0 %v1689_v18  ;;  %v1695_v18 = vsel %vm705_vm1, %v9350_v33, 0  ;;  %v9866_v23 = vld [vmem:[%s13653_s6 + $0xc0] sm:$0xff] }
 0x283   : > { %2587 = vmax.xlane.f32.xlu0 %v2586_v4  ;;  %8031 = vmatprep.subr.msk.bf16.mxu0 %vm705_vm1, %v9311_v30 }
 0x287   : > { %7467 = vmatmul.mubr.msk.bf16.gmra.mrb[36].mxu1 %vm705_vm1, %v9198_v32  ;;  %v9706_v32 = vld [vmem:[%s13653_s6 + $0x70] sm:$0xff] }
 0x288   : > { %7489 = vmatpush3.bf16.xpose.msra.mxu1 %v1595_v29  ;;  %7494 = vmatprep.mubr.msk.bf16.mxu1 %vm705_vm1, %v9045_v59 }
 0x289   : > { %7483 = vmatmul.mubr.msk.bf16.gmra.mrb[60].mxu0 %vm705_vm1, %v8956_v19  ;;  %8028 = vmatprep.subr.msk.bf16.mxu1 %vm705_vm1, %v9309_v17 }
 0x28a   : > { %7505 = vmatpush3.bf16.xpose.msra.mxu0 %v1692_v50  ;;  %7510 = vmatprep.mubr.msk.bf16.mxu0 %vm705_vm1, %v9137_v12 }
 0x28b   : > { %8032 = vmatprep.subr.msk.bf16.mxu0 %vm705_vm1, %v9350_v33 }
 0x28f   : > { %v7368_v38 = vpop.f32.mrb[8].mxu1 }
 0x290   : > { %v2292_v9 = vadd.f32 %v7368_v38, %v9380_v56  ;;  %v861_v57 = vpop.f32.mrb[9].mxu1  ;;  %7491 = vmatpush3.bf16.xpose.msra.mxu1 %v1598_v15 }
 0x291   : > { %v7369_v30 = vpop.f32.mrb[10].mxu1  ;;  %8029 = vmatprep.subr.msk.bf16.mxu1 %vm705_vm1, %v9291_v16 }
 0x292   : > { %v9570_v4 = vadd.f32 %v9555_v6, %v2292_v9  ;;  %v2293_v17 = vadd.f32 %v7369_v30, %v9409_v55  ;;  %7507 = vmatpush3.bf16.xpose.msra.mxu0 %v1695_v18  ;;  %v864_v29 = vpop.f32.mrb[11].mxu1  ;;  %v1601_v9 = vsel %vm705_vm1, %v9291_v16, 0  ;;  %v1766_v30 = vpop.permute.xlu1 %1765 }
 0x293   : > { %8033 = vmatprep.subr.msk.bf16.mxu0 %vm705_vm1, %v9323_v13  ;;  %v1786_v16 = vsel %vm705_vm1, %v1766_v30, 0 }
 0x294   : > { %v9576_v50 = vadd.f32 %v9563_v44, %v2293_v17  ;;  %v2601_v38 = vsel %vm2570_vm2, %v9570_v4, -inf  ;;  %v1698_v17 = vsel %vm705_vm1, %v9323_v13, 0  ;;  %v1883_v13 = vsel %vm705_vm1, %v9275_v10, 0 }
 0x295   : > { %2602 = vmax.xlane.f32.xlu1 %v2601_v38 }
 0x296   : > { %v2604_v33 = vsel %vm2570_vm2, %v9576_v50, -inf }
 0x297   : > { %2605 = vmax.xlane.f32.xlu0 %v2604_v33  ;;  %v9582_v15 = vpop.f32.mrb[12].mxu1  ;;  %v1789_v33 = vsel %vm705_vm1, %v9347_v1, 0 }
 0x298   : > { %v9586_v18 = vpop.f32.mrb[13].mxu1  ;;  %7493 = vmatpush3.bf16.xpose.msra.mxu1 %v1601_v9  ;;  %v1770_v9 = vpop.permute.xlu0 %1769 }
 0x299   : > { %v9588_v12 = vpop.f32.mrb[14].mxu1  ;;  %8034 = vmatprep.subr.msk.bf16.mxu1 %vm705_vm1, %v1766_v30  ;;  %v9623_v30 = vpop.permute.xlu1 %2153 }
 0x29a   : > { %7509 = vmatpush3.bf16.xpose.msra.mxu0 %v1698_v17  ;;  %v9593_v38 = vpop.f32.mrb[15].mxu1  ;;  %v2297_v59 = vadd.f32 %v9588_v12, %v9460_v54  ;;  %v2077_v12 = vsel %vm705_vm1, %v9338_v28, 0  ;;  %v2174_v53 = vsel %vm705_vm1, %v9623_v30, 0 }
 0x29b   : > { %8038 = vmatprep.subr.msk.bf16.mxu0 %vm705_vm1, %v9275_v10  ;;  %v1886_v10 = vsel %vm705_vm1, %v9249_v31, 0 }
 0x29d   : > { %v1772_v17 = vpop.permute.xlu1 %1771 }
 0x29f   : > { %7495 = vmatmul.mubr.msk.bf16.vlgmr.msra.gmra.mrb[40].mxu1 %vm705_vm1, %v9025_v41 }
 0x2a0   : > { %7498 = vmatprep.mubr.msk.bf16.mxu1 %vm705_vm1, %v9091_v61  ;;  %7519 = vmatpush3.bf16.xpose.msra.mxu1 %v1786_v16  ;;  %v1889_v16 = vsel %vm705_vm1, %v9281_v5, 0  ;;  %v2296_v61 = vadd.f32 %v9582_v15, %v9441_v58  ;;  %v1980_v15 = vsel %vm705_vm1, %v9301_v37, 0 }
 0x2a1   : > { %7511 = vmatmul.mubr.msk.bf16.vlgmr.msra.gmra.mrb[64].mxu0 %vm705_vm1, %v9089_v60  ;;  %8035 = vmatprep.subr.msk.bf16.mxu1 %vm705_vm1, %v9347_v1  ;;  %v1792_v1 = vsel %vm705_vm1, %v1770_v9, 0 }
 0x2a2   : > { %7514 = vmatprep.mubr.msk.bf16.mxu0 %vm705_vm1, %v9165_v42  ;;  %7535 = vmatpush3.bf16.xpose.msra.mxu0 %v1883_v13  ;;  %v9638_v13 = vld [vmem:[%s13653_s6 + $0x90] sm:$0xff] }
 0x2a3   : > { %8039 = vmatprep.subr.msk.bf16.mxu0 %vm705_vm1, %v9249_v31 }
 0x2a7   : > { %7499 = vmatmul.mubr.msk.bf16.gmra.mrb[44].mxu1 %vm705_vm1, %v9047_v48 }
 0x2a8   : > { %7521 = vmatpush3.bf16.xpose.msra.mxu1 %v1789_v33  ;;  %7526 = vmatprep.mubr.msk.bf16.mxu1 %vm705_vm1, %v9215_v45  ;;  %v2290_v33 = vadd.f32 %v9387_v14, %v861_v57  ;;  %v9660_v45 = vld [vmem:[%s13653_s6 + $0x48] sm:$0xff] }
 0x2a9   : > { %7515 = vmatmul.mubr.msk.bf16.gmra.mrb[68].mxu0 %vm705_vm1, %v9127_v26  ;;  %8036 = vmatprep.subr.msk.bf16.mxu1 %vm705_vm1, %v1770_v9  ;;  %v1795_v26 = vsel %vm705_vm1, %v1772_v17, 0 }
 0x2aa   : > { %7537 = vmatpush3.bf16.xpose.msra.mxu0 %v1886_v10  ;;  %7542 = vmatprep.mubr.msk.bf16.mxu0 %vm705_vm1, %v8970_v22  ;;  %v2291_v22 = vadd.f32 %v9398_v20, %v864_v29 }
 0x2ab   : > { %8040 = vmatprep.subr.msk.bf16.mxu0 %vm705_vm1, %v9281_v5 }
 0x2b0   : > { %7523 = vmatpush3.bf16.xpose.msra.mxu1 %v1792_v1  ;;  %v9645_v1 = vld [vmem:[%s13653_s6 + $0x40] sm:$0xff] }
 0x2b1   : > { %8037 = vmatprep.subr.msk.bf16.mxu1 %vm705_vm1, %v1772_v17  ;;  %v9664_v42 = vadd.f32 %v9645_v1, %v2290_v33 }
 0x2b2   : > { %7539 = vmatpush3.bf16.xpose.msra.mxu0 %v1889_v16  ;;  %v9650_v16 = vld [vmem:[%s13653_s6 + $0x98] sm:$0xff] }
 0x2b3   : > { %8041 = vmatprep.subr.msk.bf16.mxu0 %vm705_vm1, %v9264_v2  ;;  %v7384_v31 = vpop.f32.mrb[32].mxu0 }
 0x2b4   : > { %v2300_v9 = vadd.f32 %v7384_v31, %v9380_v56  ;;  %v958_v10 = vpop.f32.mrb[33].mxu0 }
 0x2b5   : > { %v7385_v5 = vpop.f32.mrb[34].mxu0  ;;  %v2298_v17 = vadd.f32 %v9387_v14, %v958_v10 }
 0x2b6   : > { %v9654_v48 = vadd.f32 %v9638_v13, %v2300_v9  ;;  %v2301_v57 = vadd.f32 %v7385_v5, %v9409_v55  ;;  %v961_v31 = vpop.f32.mrb[35].mxu0  ;;  %v1892_v9 = vsel %vm705_vm1, %v9264_v2, 0  ;;  %v9676_v5 = vadd.f32 %v9660_v45, %v2291_v22  ;;  %v9692_v22 = vld [vmem:[%s13653_s6 + $0x88] sm:$0xff] }
 0x2b7   : > { %v2299_v2 = vadd.f32 %v9398_v20, %v961_v31 }
 0x2b8   : > { %v9667_v41 = vadd.f32 %v9650_v16, %v2301_v57  ;;  %7525 = vmatpush3.bf16.xpose.msra.mxu1 %v1795_v26  ;;  %v2625_v29 = vsel %vm2570_vm2, %v9654_v48, -inf  ;;  %v9684_v26 = vld [vmem:[%s13653_s6 + $0x80] sm:$0xff] }
 0x2b9   : > { %8042 = vmatprep.subr.msk.bf16.mxu1 %vm705_vm1, %v9301_v37  ;;  %2626 = vmax.xlane.f32.xlu1 %v2625_v29  ;;  %v2595_v29 = vsel %vm2570_vm2, %v9664_v42, -inf  ;;  %v9699_v31 = vadd.f32 %v9684_v26, %v2298_v17  ;;  %v9720_v17 = vld [vmem:[%s13653_s6 + $0x78] sm:$0xff]  ;;  %v9731_v37 = vadd.f32 %v9706_v32, %v2296_v61 }
 0x2ba   : > { %7541 = vmatpush3.bf16.xpose.msra.mxu0 %v1892_v9  ;;  %v2628_v33 = vsel %vm2570_vm2, %v9667_v41, -inf }
 0x2bb   : > { %8046 = vmatprep.subr.msk.bf16.mxu0 %vm705_vm1, %v9338_v28  ;;  %v7388_v57 = vpop.f32.mrb[36].mxu0  ;;  %2629 = vmax.xlane.f32.xlu0 %v2628_v33  ;;  %v2598_v33 = vsel %vm2570_vm2, %v9676_v5, -inf }
 0x2bc   : > { %v974_v10 = vpop.f32.mrb[37].mxu0 }
 0x2bd   : > { %v7389_v9 = vpop.f32.mrb[38].mxu0  ;;  %2596 = vmax.xlane.f32.xlu1 %v2595_v29  ;;  %v9711_v29 = vadd.f32 %v9692_v22, %v2299_v2  ;;  %v2304_v2 = vadd.f32 %v7388_v57, %v9441_v58  ;;  %v9754_v57 = vld [vmem:[%s13653_s6 + $0xb8] sm:$0xff] }
 0x2be   : > { %v977_v60 = vpop.f32.mrb[39].mxu0  ;;  %v2305_v61 = vadd.f32 %v7389_v9, %v9460_v54  ;;  %v2613_v9 = vsel %vm2570_vm2, %v9731_v37, -inf }
 0x2bf   : > { %7527 = vmatmul.mubr.msk.bf16.vlgmr.msra.gmra.mrb[48].mxu1 %vm705_vm1, %v9184_v62  ;;  %2599 = vmax.xlane.f32.xlu0 %v2598_v33  ;;  %v2619_v33 = vsel %vm2570_vm2, %v9699_v31, -inf  ;;  %v9744_v62 = vld [vmem:[%s13653_s6 + $0xb0] sm:$0xff]  ;;  %v2622_v28 = vsel %vm2570_vm2, %v9711_v29, -inf }
 0x2c0   : > { %7530 = vmatprep.mubr.msk.bf16.mxu1 %vm705_vm1, %v9231_v52  ;;  %7551 = vmatpush3.bf16.xpose.msra.mxu1 %v1980_v15  ;;  %v9739_v15 = vadd.f32 %v9720_v17, %v2297_v59  ;;  %v2294_v59 = vadd.f32 %v9448_v0, %v9586_v18  ;;  %v9771_v52 = vadd.f32 %v9754_v57, %v2305_v61 }
 0x2c1   : > { %7543 = vmatmul.mubr.msk.bf16.vlgmr.msra.gmra.mrb[72].mxu0 %vm705_vm1, %v8939_v11  ;;  %8043 = vmatprep.subr.msk.bf16.mxu1 %vm705_vm1, %v9289_v40 }
 0x2c2   : > { %7546 = vmatprep.mubr.msk.bf16.mxu0 %vm705_vm1, %v8980_v27  ;;  %7567 = vmatpush3.bf16.xpose.msra.mxu0 %v2077_v12  ;;  %14049 = vst [vmem:[#allocation78_spill] sm:$0xff] %v9739_v15  ;;  %v9759_v12 = vadd.f32 %v9744_v62, %v2304_v2  ;;  %v2295_v27 = vadd.f32 %v9486_v34, %v9593_v38  ;;  %14050 = vst [vmem:[#allocation79_spill] sm:$0xff] %v9771_v52  ;;  %v2616_v18 = vsel %vm2570_vm2, %v9739_v15, -inf  ;;  %v14096_v15 = vld [vmem:[#allocation63_spill] sm:$0xff] }
 0x2c3   : > { %2620 = vmax.xlane.f32.xlu1 %v2619_v33  ;;  %8047 = vmatprep.subr.msk.bf16.mxu0 %vm705_vm1, %v9321_v3  ;;  %v9766_v33 = vld [vmem:[%s13653_s6 + $0x60] sm:$0xff]  ;;  %v1983_v2 = vsel %vm705_vm1, %v9289_v40, 0  ;;  %v2080_v38 = vsel %vm705_vm1, %v9321_v3, 0  ;;  %v2302_v40 = vadd.f32 %v9448_v0, %v974_v10  ;;  %v2303_v3 = vadd.f32 %v9486_v34, %v977_v60 }
 0x2c4   : > { %2623 = vmax.xlane.f32.xlu0 %v2622_v28  ;;  %v9782_v28 = vld [vmem:[%s13653_s6 + $0x68] sm:$0xff]  ;;  %v9791_v61 = vadd.f32 %v9766_v33, %v2294_v59  ;;  %v14053_v59 = vld [vmem:[#allocation41_spill] sm:$0xff]  ;;  %v2640_v10 = vsel %vm2570_vm2, %v9771_v52, -inf }
 0x2c6   : > { %14051 = vst [vmem:[#allocation80_spill] sm:$0xff] %v9791_v61  ;;  %v2607_v60 = vsel %vm2570_vm2, %v9791_v61, -inf }
 0x2c7   : > { %2614 = vmax.xlane.f32.xlu1 %v2613_v9  ;;  %7531 = vmatmul.mubr.msk.bf16.gmra.mrb[52].mxu1 %vm705_vm1, %v9211_v46  ;;  %v2637_v9 = vsel %vm2570_vm2, %v9759_v12, -inf }
 0x2c8   : > { %2617 = vmax.xlane.f32.xlu0 %v2616_v18  ;;  %7553 = vmatpush3.bf16.xpose.msra.mxu1 %v1983_v2  ;;  %v9799_v18 = vadd.f32 %v9782_v28, %v2295_v27  ;;  %v9804_v2 = vld [vmem:[%s13653_s6 + $0xa0] sm:$0xff]  ;;  %v14054_v27 = vld [vmem:[#allocation69_spill] sm:$0xff] }
 0x2c9   : > { %7547 = vmatmul.mubr.msk.bf16.gmra.mrb[76].mxu0 %vm705_vm1, %v8964_v21  ;;  %7558 = vmatprep.mubr.msk.bf16.mxu1 %vm705_vm1, %v9058_v49  ;;  %v9819_v46 = vadd.f32 %v9804_v2, %v2302_v40  ;;  %v1986_v49 = vsel %vm705_vm1, %v9313_v43, 0  ;;  %v14057_v21 = vld [vmem:[#allocation66_spill] sm:$0xff]  ;;  %v2083_v40 = vsel %vm705_vm1, %v14054_v27, 0 }
 0x2ca   : > { %8044 = vmatprep.subr.msk.bf16.mxu1 %vm705_vm1, %v9313_v43  ;;  %7569 = vmatpush3.bf16.xpose.msra.mxu0 %v2080_v38  ;;  %14052 = vst [vmem:[#allocation81_spill] sm:$0xff] %v9799_v18  ;;  %v9814_v38 = vld [vmem:[%s13653_s6 + $0xa8] sm:$0xff] }
 0x2cb   : > { %7574 = vmatprep.mubr.msk.bf16.mxu0 %vm705_vm1, %v14053_v59  ;;  %2638 = vmax.xlane.f32.xlu1 %v2637_v9  ;;  %14055 = vst [vmem:[#allocation69_spill] sm:$0xff] %v9819_v46  ;;  %v9824_v9 = vadd.f32 %v9814_v38, %v2303_v3  ;;  %v2610_v59 = vsel %vm2570_vm2, %v9799_v18, -inf  ;;  %v2631_v3 = vsel %vm2570_vm2, %v9819_v46, -inf  ;;  %v14089_v18 = vld [vmem:[#allocation75_spill] sm:$0xff] }
 0x2cc   : > { %8048 = vmatprep.subr.msk.bf16.mxu0 %vm705_vm1, %v14054_v27  ;;  %2641 = vmax.xlane.f32.xlu0 %v2640_v10  ;;  %v14058_v10 = vld [vmem:[#allocation67_spill] sm:$0xff] }
 0x2cd   : > { %14056 = vst [vmem:[#allocation82_spill] sm:$0xff] %v9824_v9  ;;  %v2086_v43 = vsel %vm705_vm1, %v14058_v10, 0 }
 0x2cf   : > { %2608 = vmax.xlane.f32.xlu1 %v2607_v60  ;;  %v2634_v60 = vsel %vm2570_vm2, %v9824_v9, -inf }
 0x2d0   : > { %2611 = vmax.xlane.f32.xlu0 %v2610_v59  ;;  %7555 = vmatpush3.bf16.xpose.msra.mxu1 %v1986_v49  ;;  %v1989_v49 = vsel %vm705_vm1, %v14057_v21, 0  ;;  %v14059_v59 = vld [vmem:[#allocation12_spill] sm:$0xff] }
 0x2d1   : > { %8045 = vmatprep.subr.msk.bf16.mxu1 %vm705_vm1, %v14057_v21 }
 0x2d2   : > { %7571 = vmatpush3.bf16.xpose.msra.mxu0 %v2083_v40  ;;  %v9850_v40 = vld [vmem:[%s13653_s6 + $0xd0] sm:$0xff] }
 0x2d3   : > { %2632 = vmax.xlane.f32.xlu1 %v2631_v3  ;;  %8049 = vmatprep.subr.msk.bf16.mxu0 %vm705_vm1, %v14058_v10  ;;  %v9856_v10 = vld [vmem:[%s13653_s6 + $0xd8] sm:$0xff] }
 0x2d4   : > { %2635 = vmax.xlane.f32.xlu0 %v2634_v60 }
 0x2d8   : > { %7557 = vmatpush3.bf16.xpose.msra.mxu1 %v1989_v49 }
 0x2d9   : > { %8050 = vmatprep.subr.msk.bf16.mxu1 %vm705_vm1, %v9623_v30  ;;  %v14067_v30 = vld [vmem:[#allocation46_spill] sm:$0xff] }
 0x2da   : > { %7573 = vmatpush3.bf16.xpose.msra.mxu0 %v2086_v43 }
 0x2db   : > { %7598 = vmatprep.subr.bf16.mxu0 %v14059_v59  ;;  %v7400_v27 = vpop.f32.mrb[16].mxu1 }
 0x2dc   : > { %v2308_v3 = vadd.f32 %v7400_v27, %v9380_v56  ;;  %v1055_v60 = vpop.f32.mrb[17].mxu1  ;;  %v14061_v27 = vld [vmem:[#allocation21_spill] sm:$0xff] }
 0x2dd   : > { %v7401_v21 = vpop.f32.mrb[18].mxu1  ;;  %v2306_v43 = vadd.f32 %v9387_v14, %v1055_v60  ;;  %v14063_v14 = vld [vmem:[#allocation34_spill] sm:$0xff]  ;;  %v14065_v60 = vld [vmem:[#allocation68_spill] sm:$0xff] }
 0x2de   : > { %v9859_v49 = vadd.f32 %v9850_v40, %v2308_v3  ;;  %v2309_v11 = vadd.f32 %v7401_v21, %v9409_v55  ;;  %v1058_v19 = vpop.f32.mrb[19].mxu1  ;;  %v9879_v55 = vld [vmem:[%s13653_s6 + $0xc8] sm:$0xff] }
 0x2df   : > { %v2307_v56 = vadd.f32 %v9398_v20, %v1058_v19  ;;  %7559 = vmatmul.mubr.msk.bf16.vlgmr.msra.gmra.mrb[56].mxu1 %vm705_vm1, %v14061_v27  ;;  %v14064_v20 = vld [vmem:[#allocation33_spill] sm:$0xff] }
 0x2e0   : > { %14060 = vst [vmem:[#allocation66_spill] sm:$0xff] %v9859_v49  ;;  %v9874_v3 = vadd.f32 %v9856_v10, %v2309_v11  ;;  %7562 = vmatprep.mubr.msk.bf16.mxu1 %vm705_vm1, %v14063_v14  ;;  %7583 = vmatpush3.bf16.xpose.msra.mxu1 %v2174_v53  ;;  %v2649_v19 = vsel %vm2570_vm2, %v9859_v49, -inf  ;;  %v9890_v11 = vadd.f32 %v9866_v23, %v2306_v43  ;;  %v14069_v14 = vld [vmem:[#allocation5_spill] sm:$0xff]  ;;  %v9904_v43 = vld [vmem:[%s13653_s6 + $0xf0] sm:$0xff] }
 0x2e1   : > { %7575 = vmatmul.mubr.msk.bf16.vlgmr.msra.gmra.mrb[80].mxu0 %vm705_vm1, %v14064_v20  ;;  %8051 = vmatprep.subr.msk.bf16.mxu1 %vm705_vm1, %v14065_v60  ;;  %v9898_v21 = vadd.f32 %v9879_v55, %v2307_v56 }
 0x2e2   : > { %14062 = vst [vmem:[#allocation67_spill] sm:$0xff] %v9874_v3  ;;  %14066 = vst [vmem:[#allocation12_spill] sm:$0xff] %v9890_v11  ;;  %7578 = vmatprep.mubr.msk.bf16.mxu0 %vm705_vm1, %v14067_v30  ;;  %7599 = vmatpush3.bf16.msra.mxu0 %v14059_v59  ;;  %v2652_v53 = vsel %vm2570_vm2, %v9874_v3, -inf  ;;  %v2643_v8 = vsel %vm2570_vm2, %v9890_v11, -inf  ;;  %v14076_v11 = vld [vmem:[#allocation56_spill] sm:$0xff]  ;;  %v14087_v3 = vld [vmem:[#allocation71_spill] sm:$0xff] }
 0x2e3   : > { %14068 = vst [vmem:[#allocation68_spill] sm:$0xff] %v9898_v21  ;;  %2650 = vmax.xlane.f32.xlu1 %v2649_v19  ;;  %7600 = vmatprep.subr.bf16.mxu0 %v14069_v14  ;;  %v7404_v20 = vpop.f32.mrb[20].mxu1 }
 0x2e4   : > { %2653 = vmax.xlane.f32.xlu0 %v2652_v53  ;;  %v2312_v30 = vadd.f32 %v7404_v20, %v9441_v58  ;;  %v1071_v27 = vpop.f32.mrb[21].mxu1  ;;  %v9923_v20 = vld [vmem:[%s13653_s6 + $0xe0] sm:$0xff] }
 0x2e5   : > { %v7405_v59 = vpop.f32.mrb[22].mxu1  ;;  %v2310_v19 = vadd.f32 %v9448_v0, %v1071_v27  ;;  %v2646_v0 = vsel %vm2570_vm2, %v9898_v21, -inf }
 0x2e6   : > { %v9913_v56 = vadd.f32 %v9904_v43, %v2312_v30  ;;  %7601 = vmatpush3.bf16.msra.mxu0 %v14069_v14  ;;  %v2313_v53 = vadd.f32 %v7405_v59, %v9460_v54  ;;  %v1074_v58 = vpop.f32.mrb[23].mxu1  ;;  %v14071_v30 = vld [vmem:[#allocation15_spill] sm:$0xff]  ;;  %v14073_v14 = vld [vmem:[#allocation26_spill] sm:$0xff]  ;;  %v2158_v59 = vpop.permute.xlu0 %2157 }
 0x2e7   : > { %2644 = vmax.xlane.f32.xlu1 %v2643_v8  ;;  %v2311_v49 = vadd.f32 %v9486_v34, %v1074_v58  ;;  %7602 = vmatprep.subr.bf16.mxu0 %v14071_v30  ;;  %v9935_v54 = vld [vmem:[%s13653_s6 + $0xe8] sm:$0xff]  ;;  %v2177_v8 = vsel %vm705_vm1, %v14065_v60, 0  ;;  %v14074_v58 = vld [vmem:[#allocation40_spill] sm:$0xff] }
 0x2e8   : > { %14070 = vst [vmem:[#allocation5_spill] sm:$0xff] %v9913_v56  ;;  %v9930_v27 = vadd.f32 %v9910_v36, %v2313_v53  ;;  %7563 = vmatmul.mubr.msk.bf16.gmra.mrb[60].mxu1 %vm705_vm1, %v14073_v14  ;;  %2647 = vmax.xlane.f32.xlu0 %v2646_v0  ;;  %v2661_v34 = vsel %vm2570_vm2, %v9913_v56, -inf  ;;  %v9946_v53 = vadd.f32 %v9923_v20, %v2310_v19  ;;  %v14078_v14 = vld [vmem:[#allocation14_spill] sm:$0xff] }
 0x2e9   : > { %7579 = vmatmul.mubr.msk.bf16.gmra.mrb[84].mxu0 %vm705_vm1, %v14074_v58  ;;  %7585 = vmatpush3.bf16.xpose.msra.mxu1 %v2177_v8  ;;  %v9954_v60 = vadd.f32 %v9935_v54, %v2311_v49  ;;  %v2180_v49 = vsel %vm705_vm1, %v2158_v59, 0  ;;  %v2160_v58 = vpop.permute.xlu1 %2159 }
 0x2ea   : > { %14072 = vst [vmem:[#allocation15_spill] sm:$0xff] %v9930_v27  ;;  %14075 = vst [vmem:[#allocation83_spill] sm:$0xff] %v9946_v53  ;;  %7590 = vmatprep.mubr.msk.bf16.mxu1 %vm705_vm1, %v14076_v11  ;;  %8052 = vmatprep.subr.msk.bf16.mxu1 %vm705_vm1, %v2158_v59  ;;  %v2664_v0 = vsel %vm2570_vm2, %v9930_v27, -inf  ;;  %v2655_v19 = vsel %vm2570_vm2, %v9946_v53, -inf  ;;  %v14079_v11 = vld [vmem:[#allocation19_spill] sm:$0xff]  ;;  %v9976_v59 = vld [vmem:[%s13652_s5 + $0x50] sm:$0xff] }
 0x2eb   : > { %14077 = vst [vmem:[#allocation84_spill] sm:$0xff] %v9954_v60  ;;  %7603 = vmatpush3.bf16.msra.mxu0 %v14071_v30  ;;  %2662 = vmax.xlane.f32.xlu1 %v2661_v34  ;;  %v2658_v8 = vsel %vm2570_vm2, %v9954_v60, -inf  ;;  %v2183_v30 = vsel %vm705_vm1, %v2160_v58, 0  ;;  %v14080_v34 = vld [vmem:[#allocation42_spill] sm:$0xff]  ;;  %v14086_v27 = vld [vmem:[#allocation48_spill] sm:$0xff] }
 0x2ec   : > { %7604 = vmatprep.subr.bf16.mxu0 %v14078_v14  ;;  %2665 = vmax.xlane.f32.xlu0 %v2664_v0  ;;  %v14081_v0 = vld [vmem:[#allocation51_spill] sm:$0xff]  ;;  %v14084_v53 = vld [vmem:[#allocation70_spill] sm:$0xff] }
 0x2ef   : > { %7605 = vmatpush3.bf16.msra.mxu0 %v14078_v14  ;;  %2656 = vmax.xlane.f32.xlu1 %v2655_v19  ;;  %v14082_v14 = vld [vmem:[#allocation61_spill] sm:$0xff]  ;;  %v14083_v19 = vld [vmem:[#allocation35_spill] sm:$0xff] }
 0x2f0   : > { %7614 = vmatprep.subr.bf16.mxu0 %v14079_v11  ;;  %2659 = vmax.xlane.f32.xlu0 %v2658_v8 }
 0x2f1   : > { %7587 = vmatpush3.bf16.xpose.msra.mxu1 %v2180_v49  ;;  %v9987_v49 = vld [vmem:[%s13652_s5 + $0x58] sm:$0xff] }
 0x2f2   : > { %8053 = vmatprep.subr.msk.bf16.mxu1 %vm705_vm1, %v2160_v58  ;;  %v9982_v58 = vld [vmem:[%s13652_s5 + $0x40] sm:$0xff] }
 0x2f9   : > { %7589 = vmatpush3.bf16.xpose.msra.mxu1 %v2183_v30 }
 0x2fa   : > { %7630 = vmatprep.subr.bf16.mxu1 %v14080_v34 }
 0x300   : > { %7591 = vmatmul.mubr.msk.bf16.vlgmr.msra.gmra.mrb[64].mxu1 %vm705_vm1, %v14081_v0 }
 0x301   : > { %7594 = vmatprep.mubr.msk.bf16.mxu1 %vm705_vm1, %v14082_v14  ;;  %7631 = vmatpush3.bf16.msra.mxu1 %v14080_v34  ;;  %v9993_v14 = vld [vmem:[%s13652_s5 + $0x48] sm:$0xff] }
 0x302   : > { %7632 = vmatprep.subr.bf16.mxu1 %v14083_v19 }
 0x303   : > { %v7416_v8 = vpop.f32.mrb[40].mxu0 }
 0x304   : > { %v2316_v30 = vadd.f32 %v7416_v8, %v9976_v59  ;;  %v1152_v34 = vpop.f32.mrb[41].mxu0 }
 0x305   : > { %v2314_v0 = vadd.f32 %v9982_v58, %v1152_v34  ;;  %7633 = vmatpush3.bf16.msra.mxu1 %v14083_v19  ;;  %v7417_v11 = vpop.f32.mrb[42].mxu0  ;;  %v14091_v34 = vld [vmem:[#allocation60_spill] sm:$0xff]  ;;  %v10033_v19 = vld [vmem:[%s13652_s5 + $0x78] sm:$0xff] }
 0x306   : > { %v9998_v56 = vadd.f32 %v14084_v53, %v2316_v30  ;;  %v2317_v60 = vadd.f32 %v7417_v11, %v9987_v49  ;;  %7634 = vmatprep.subr.bf16.mxu1 %v14086_v27  ;;  %v1155_v21 = vpop.f32.mrb[43].mxu0  ;;  %v10017_v11 = vld [vmem:[%s13652_s5 + $0x70] sm:$0xff] }
 0x307   : > { %v2315_v8 = vadd.f32 %v9993_v14, %v1155_v21  ;;  %v10004_v9 = vadd.f32 %v14087_v3, %v2314_v0  ;;  %v14092_v21 = vld [vmem:[#allocation73_spill] sm:$0xff]  ;;  %v14093_v0 = vld [vmem:[#allocation44_spill] sm:$0xff] }
 0x308   : > { %14085 = vst [vmem:[#allocation14_spill] sm:$0xff] %v9998_v56  ;;  %v10007_v52 = vadd.f32 %v14089_v18, %v2317_v60  ;;  %7595 = vmatmul.mubr.msk.bf16.gmra.mrb[68].mxu1 %vm705_vm1, %v14091_v34  ;;  %v2673_v53 = vsel %vm2570_vm2, %v9998_v56, -inf  ;;  %v10028_v60 = vld [vmem:[%s13652_s5 + $0x60] sm:$0xff]  ;;  %v14094_v56 = vld [vmem:[#allocation77_spill] sm:$0xff] }
 0x309   : > { %14088 = vst [vmem:[#allocation42_spill] sm:$0xff] %v10004_v9  ;;  %7635 = vmatpush3.bf16.msra.mxu1 %v14086_v27  ;;  %2674 = vmax.xlane.f32.xlu1 %v2673_v53  ;;  %v10020_v3 = vadd.f32 %v14092_v21, %v2315_v8  ;;  %v2667_v53 = vsel %vm2570_vm2, %v10004_v9, -inf  ;;  %v10041_v21 = vld [vmem:[%s13652_s5 + $0x68] sm:$0xff] }
 0x30a   : > { %14090 = vst [vmem:[#allocation35_spill] sm:$0xff] %v10007_v52  ;;  %7636 = vmatprep.subr.bf16.mxu1 %v14093_v0  ;;  %v2676_v18 = vsel %vm2570_vm2, %v10007_v52, -inf }
 0x30b   : > { %v7420_v27 = vpop.f32.mrb[44].mxu0  ;;  %2677 = vmax.xlane.f32.xlu0 %v2676_v18  ;;  %v2670_v9 = vsel %vm2570_vm2, %v10020_v3, -inf }
 0x30c   : > { %v2320_v30 = vadd.f32 %v7420_v27, %v10017_v11  ;;  %v1168_v8 = vpop.f32.mrb[45].mxu0 }
 0x30d   : > { %v2318_v34 = vadd.f32 %v10028_v60, %v1168_v8  ;;  %7637 = vmatpush3.bf16.msra.mxu1 %v14093_v0  ;;  %v7421_v18 = vpop.f32.mrb[46].mxu0  ;;  %2668 = vmax.xlane.f32.xlu1 %v2667_v53 }
 0x30e   : > { %v10046_v52 = vadd.f32 %v14094_v56, %v2320_v30  ;;  %v2321_v27 = vadd.f32 %v7421_v18, %v10033_v19  ;;  %7662 = vmatprep.subr.bf16.mxu1 %v14096_v15  ;;  %v1171_v46 = vpop.f32.mrb[47].mxu0 }
 0x30f   : > { %v2319_v61 = vadd.f32 %v10041_v21, %v1171_v46  ;;  %2671 = vmax.xlane.f32.xlu0 %v2670_v9  ;;  %v10054_v8 = vadd.f32 %v9480_v51, %v2318_v34 }
 0x310   : > { %14095 = vst [vmem:[#allocation70_spill] sm:$0xff] %v10046_v52  ;;  %v10057_v0 = vadd.f32 %v9472_v39, %v2321_v27  ;;  %v2685_v56 = vsel %vm2570_vm2, %v10046_v52, -inf }
 0x311   : > { %14097 = vst [vmem:[#allocation48_spill] sm:$0xff] %v10054_v8  ;;  %2686 = vmax.xlane.f32.xlu1 %v2685_v56  ;;  %v10062_v30 = vadd.f32 %v9507_v7, %v2319_v61  ;;  %v2679_v46 = vsel %vm2570_vm2, %v10054_v8, -inf  ;;  %v14108_v8 = vld [vmem:[#allocation74_spill] sm:$0xff] }
 0x312   : > { %v2688_v53 = vsel %vm2570_vm2, %v10057_v0, -inf }
 0x313   : > { %2689 = vmax.xlane.f32.xlu0 %v2688_v53  ;;  %v2682_v51 = vsel %vm2570_vm2, %v10062_v30, -inf }
 0x315   : > { %2680 = vmax.xlane.f32.xlu1 %v2679_v46 }
 0x317   : > { %2683 = vmax.xlane.f32.xlu0 %v2682_v51 }
 0x31b   : > { %v7432_v39 = vpop.f32.mrb[24].mxu1 }
 0x31c   : > { %v2324_v9 = vadd.f32 %v7432_v39, %v9976_v59  ;;  %v1249_v34 = vpop.f32.mrb[25].mxu1 }
 0x31d   : > { %v2322_v18 = vadd.f32 %v9982_v58, %v1249_v34  ;;  %v7433_v7 = vpop.f32.mrb[26].mxu1 }
 0x31e   : > { %v10073_v61 = vadd.f32 %v9555_v6, %v2324_v9  ;;  %v2325_v27 = vadd.f32 %v7433_v7, %v9987_v49  ;;  %v1252_v56 = vpop.f32.mrb[27].mxu1 }
 0x31f   : > { %v2323_v53 = vadd.f32 %v9993_v14, %v1252_v56  ;;  %v10078_v46 = vadd.f32 %v9645_v1, %v2322_v18 }
 0x320   : > { %14098 = vst [vmem:[#allocation71_spill] sm:$0xff] %v10073_v61  ;;  %v10081_v51 = vadd.f32 %v9563_v44, %v2325_v27  ;;  %v2697_v39 = vsel %vm2570_vm2, %v10073_v61, -inf  ;;  %v2579_v27 = vpop.xlane.xlu0 %2578 }
 0x321   : > { %14099 = vst [vmem:[#allocation75_spill] sm:$0xff] %v10078_v46  ;;  %2698 = vmax.xlane.f32.xlu1 %v2697_v39  ;;  %v10086_v34 = vadd.f32 %v9660_v45, %v2323_v53  ;;  %v2691_v1 = vsel %vm2570_vm2, %v10078_v46, -inf  ;;  %v2576_v46 = vpop.xlane.xlu1 %2575 }
 0x322   : > { %14100 = vst [vmem:[#allocation73_spill] sm:$0xff] %v10081_v51  ;;  %v2700_v6 = vsel %vm2570_vm2, %v10081_v51, -inf }
 0x323   : > { %14101 = vst [vmem:[#allocation44_spill] sm:$0xff] %v10086_v34  ;;  %2701 = vmax.xlane.f32.xlu0 %v2700_v6  ;;  %v7436_v9 = vpop.f32.mrb[28].mxu1  ;;  %v2694_v6 = vsel %vm2570_vm2, %v10086_v34, -inf }
 0x324   : > { %v2328_v7 = vadd.f32 %v7436_v9, %v10017_v11  ;;  %v1265_v56 = vpop.f32.mrb[29].mxu1 }
 0x325   : > { %v2326_v44 = vadd.f32 %v10028_v60, %v1265_v56  ;;  %2692 = vmax.xlane.f32.xlu1 %v2691_v1  ;;  %v7437_v18 = vpop.f32.mrb[30].mxu1 }
 0x326   : > { %v10095_v39 = vadd.f32 %v9706_v32, %v2328_v7  ;;  %v2329_v45 = vadd.f32 %v7437_v18, %v10033_v19  ;;  %v1268_v53 = vpop.f32.mrb[31].mxu1  ;;  %v2573_v18 = vpop.xlane.xlu0 %2572 }
 0x327   : > { %v2327_v9 = vadd.f32 %v10041_v21, %v1268_v53  ;;  %2695 = vmax.xlane.f32.xlu0 %v2694_v6  ;;  %v10102_v15 = vadd.f32 %v9766_v33, %v2326_v44  ;;  %v14106_v44 = vld [vmem:[#allocation72_spill] sm:$0xff]  ;;  %v2955_v52 = vsub.f32 %v14108_v8, %v2573_v18 }
 0x328   : > { %14102 = vst [vmem:[#allocation77_spill] sm:$0xff] %v10095_v39  ;;  %v10105_v56 = vadd.f32 %v9720_v17, %v2329_v45  ;;  %v2709_v1 = vsel %vm2570_vm2, %v10095_v39, -inf  ;;  %v2957_v45 = vsub.f32 %v14106_v44, %v2579_v27 }
 0x329   : > { %14103 = vst [vmem:[#allocation85_spill] sm:$0xff] %v10102_v15  ;;  %2710 = vmax.xlane.f32.xlu1 %v2709_v1  ;;  %v10110_v32 = vadd.f32 %v9782_v28, %v2327_v9  ;;  %v2703_v53 = vsel %vm2570_vm2, %v10102_v15, -inf }
 0x32a   : > { %14104 = vst [vmem:[#allocation86_spill] sm:$0xff] %v10105_v56  ;;  %v2712_v7 = vsel %vm2570_vm2, %v10105_v56, -inf  ;;  %v2582_v33 = vpop.xlane.xlu0 %2581 }
 0x32b   : > { %14105 = vst [vmem:[#allocation87_spill] sm:$0xff] %v10110_v32  ;;  %2713 = vmax.xlane.f32.xlu0 %v2712_v7  ;;  %v2706_v17 = vsel %vm2570_vm2, %v10110_v32, -inf  ;;  %v2958_v1 = vsub.f32 %v9463_v47, %v2582_v33 }
 0x32d   : > { %2704 = vmax.xlane.f32.xlu1 %v2703_v53 }
 0x32f   : > { %2707 = vmax.xlane.f32.xlu0 %v2706_v17  ;;  %v3087_v17 = vmul.f32 1.442695, %v2957_v45 }
 0x331   : > { %8073 = vpow2.f32 %v3087_v17 }
 0x333   : > { %v7448_v6 = vpop.f32.mrb[48].mxu0 }
 0x334   : > { %v2332_v28 = vadd.f32 %v7448_v6, %v9976_v59  ;;  %v1346_v9 = vpop.f32.mrb[49].mxu0  ;;  %v14111_v6 = vld [vmem:[#allocation76_spill] sm:$0xff] }
 0x335   : > { %v2330_v7 = vadd.f32 %v9982_v58, %v1346_v9  ;;  %v7449_v39 = vpop.f32.mrb[50].mxu0 }
 0x336   : > { %v10123_v15 = vadd.f32 %v9638_v13, %v2332_v28  ;;  %v2333_v53 = vadd.f32 %v7449_v39, %v9987_v49  ;;  %v1349_v61 = vpop.f32.mrb[51].mxu0  ;;  %v2956_v13 = vsub.f32 %v14111_v6, %v2576_v46  ;;  %v3089_v28 = vmul.f32 1.442695, %v2958_v1 }
 0x337   : > { %v2331_v27 = vadd.f32 %v9993_v14, %v1349_v61  ;;  %v10129_v44 = vadd.f32 %v9684_v26, %v2330_v7  ;;  %v3083_v61 = vmul.f32 1.442695, %v2955_v52 }
 0x338   : > { %14107 = vst [vmem:[#allocation72_spill] sm:$0xff] %v10123_v15  ;;  %v10132_v47 = vadd.f32 %v9650_v16, %v2333_v53  ;;  %v2721_v33 = vsel %vm2570_vm2, %v10123_v15, -inf  ;;  %v3085_v9 = vmul.f32 1.442695, %v2956_v13  ;;  %8075 = vpow2.f32 %v3089_v28 }
 0x339   : > { %14109 = vst [vmem:[#allocation74_spill] sm:$0xff] %v10129_v44  ;;  %2722 = vmax.xlane.f32.xlu1 %v2721_v33  ;;  %v10138_v39 = vadd.f32 %v9692_v22, %v2331_v27  ;;  %v2715_v45 = vsel %vm2570_vm2, %v10129_v44, -inf  ;;  %8077 = vpow2.f32 %v3083_v61  ;;  %v2591_v61 = vpop.xlane.xlu1 %2590 }
 0x33a   : > { %14110 = vst [vmem:[#allocation88_spill] sm:$0xff] %v10132_v47  ;;  %v2724_v8 = vsel %vm2570_vm2, %v10132_v47, -inf  ;;  %8079 = vpow2.f32 %v3085_v9 }
 0x33b   : > { %14112 = vst [vmem:[#allocation76_spill] sm:$0xff] %v10138_v39  ;;  %v7452_v26 = vpop.f32.mrb[52].mxu0  ;;  %2725 = vmax.xlane.f32.xlu0 %v2724_v8  ;;  %v2718_v53 = vsel %vm2570_vm2, %v10138_v39, -inf }
 0x33c   : > { %v2336_v16 = vadd.f32 %v7452_v26, %v10017_v11  ;;  %v1362_v18 = vpop.f32.mrb[53].mxu0  ;;  %v2594_v26 = vpop.xlane.xlu0 %2593 }
 0x33d   : > { %v2334_v46 = vadd.f32 %v10028_v60, %v1362_v18  ;;  %v7453_v1 = vpop.f32.mrb[54].mxu0  ;;  %2716 = vmax.xlane.f32.xlu1 %v2715_v45 }
 0x33e   : > { %v10147_v22 = vadd.f32 %v9744_v62, %v2336_v16  ;;  %v2337_v7 = vadd.f32 %v7453_v1, %v10033_v19  ;;  %v1365_v52 = vpop.f32.mrb[55].mxu0  ;;  %v2585_v1 = vpop.xlane.xlu1 %2584 }
 0x33f   : > { %v2335_v17 = vadd.f32 %v10041_v21, %v1365_v52  ;;  %2719 = vmax.xlane.f32.xlu0 %v2718_v53  ;;  %v10154_v27 = vadd.f32 %v9804_v2, %v2334_v46  ;;  %v10168_v2 = vpop.eup %8073  ;;  %v2961_v46 = vsub.f32 %v9475_v25, %v2591_v61 }
 0x340   : > { %14113 = vst [vmem:[#allocation89_spill] sm:$0xff] %v10147_v22  ;;  %v10157_v33 = vadd.f32 %v9754_v57, %v2337_v7  ;;  %v2733_v62 = vsel %vm2570_vm2, %v10147_v22, -inf  ;;  %v2962_v7 = vsub.f32 %v9490_v24, %v2594_v26  ;;  %v2588_v52 = vpop.xlane.xlu0 %2587 }
 0x341   : > { %14114 = vst [vmem:[#allocation90_spill] sm:$0xff] %v10154_v27  ;;  %2734 = vmax.xlane.f32.xlu1 %v2733_v62  ;;  %v10162_v6 = vadd.f32 %v9814_v38, %v2335_v17  ;;  %v2727_v28 = vsel %vm2570_vm2, %v10154_v27, -inf  ;;  %v3345_v38 = vsel %vm2570_vm2, %v10168_v2, 0.0  ;;  %v2959_v17 = vsub.f32 %v9501_v35, %v2585_v1 }
 0x342   : > { %14115 = vst [vmem:[#allocation91_spill] sm:$0xff] %v10157_v33  ;;  %v2736_v13 = vsel %vm2570_vm2, %v10157_v33, -inf  ;;  %v10172_v8 = vpop.eup %8075  ;;  %v3095_v62 = vmul.f32 1.442695, %v2961_v46 }
 0x343   : > { %14116 = vst [vmem:[#allocation92_spill] sm:$0xff] %v10162_v6  ;;  %2737 = vmax.xlane.f32.xlu0 %v2736_v13  ;;  %v2730_v57 = vsel %vm2570_vm2, %v10162_v6, -inf  ;;  %v10176_v16 = vpop.eup %8077  ;;  %v3348_v18 = vsel %vm2570_vm2, %v10172_v8, 0.0  ;;  %v2960_v13 = vsub.f32 %v9514_v63, %v2588_v52 }
 0x344   : > { %v10180_v45 = vpop.eup %8079  ;;  %v3339_v9 = vsel %vm2570_vm2, %v10176_v16, 0.0  ;;  %8081 = vpow2.f32 %v3095_v62 }
 0x345   : > { %2728 = vmax.xlane.f32.xlu1 %v2727_v28  ;;  %v3342_v53 = vsel %vm2570_vm2, %v10180_v45, 0.0  ;;  %v10190_v28 = vpop.xlane.xlu1 %2602  ;;  %v3093_v24 = vmul.f32 1.442695, %v2960_v13 }
 0x347   : > { %2731 = vmax.xlane.f32.xlu0 %v2730_v57  ;;  %v3097_v57 = vmul.f32 1.442695, %v2962_v7 }
 0x349   : > { %3346 = vadd.xlane.f32.xlu1 %v3345_v38  ;;  %v10193_v26 = vpop.xlane.xlu1 %2626  ;;  %8083 = vpow2.f32 %v3097_v57 }
 0x34b   : > { %3349 = vadd.xlane.f32.xlu0 %v3348_v18  ;;  %v3091_v18 = vmul.f32 1.442695, %v2959_v17 }
 0x34d   : > { %3340 = vadd.xlane.f32.xlu1 %v3339_v9  ;;  %8085 = vpow2.f32 %v3091_v18 }
 0x34e   : > { %8087 = vpow2.f32 %v3093_v24  ;;  %v10230_v18 = vpop.eup %8081 }
 0x34f   : > { %3343 = vadd.xlane.f32.xlu0 %v3342_v53  ;;  %v10204_v53 = vpop.xlane.xlu0 %2605  ;;  %14121 = vst [vmem:[#allocation97_spill] sm:$0xff] %v10230_v18  ;;  %v3357_v22 = vsel %vm2570_vm2, %v10230_v18, 0.0 }
 0x352   : > { %v7464_v38 = vpop.f32.mrb[32].mxu1 }
 0x353   : > { %v2340_v25 = vadd.f32 %v7464_v38, %v9976_v59  ;;  %v1443_v61 = vpop.f32.mrb[33].mxu1 }
 0x354   : > { %v7480_v9 = vpop.f32.mrb[56].mxu0  ;;  %v7465_v35 = vpop.f32.mrb[34].mxu1  ;;  %v2338_v1 = vadd.f32 %v9982_v58, %v1443_v61 }
 0x355   : > { %v10195_v27 = vpop.f32.mrb[57].mxu0  ;;  %v10198_v63 = vadd.f32 %v9850_v40, %v2340_v25  ;;  %v2341_v7 = vadd.f32 %v7465_v35, %v9987_v49  ;;  %v1446_v59 = vpop.f32.mrb[35].mxu1 }
 0x356   : > { %v7481_v46 = vpop.f32.mrb[58].mxu0  ;;  %v2339_v17 = vadd.f32 %v9993_v14, %v1446_v59  ;;  %v10211_v40 = vadd.f32 %v9866_v23, %v2338_v1  ;;  %v10220_v25 = vpop.xlane.xlu0 %2629 }
 0x357   : > { %14117 = vst [vmem:[#allocation93_spill] sm:$0xff] %v10198_v63  ;;  %v10202_v52 = vpop.f32.mrb[59].mxu0  ;;  %v10208_v62 = vadd.f32 %v9856_v10, %v2341_v7  ;;  %v2745_v49 = vsel %vm2570_vm2, %v10198_v63, -inf  ;;  %v10224_v14 = vpop.xlane.xlu1 %2596  ;;  %v2974_v32 = vsub.f32 %v9667_v41, %v10220_v25 }
 0x358   : > { %14119 = vst [vmem:[#allocation95_spill] sm:$0xff] %v10211_v40  ;;  %v10214_v58 = vadd.f32 %v9879_v55, %v2339_v17  ;;  %2746 = vmax.xlane.f32.xlu1 %v2745_v49  ;;  %v2739_v24 = vsel %vm2570_vm2, %v10211_v40, -inf  ;;  %v10238_v59 = vpop.eup %8083 }
 0x359   : > { %14118 = vst [vmem:[#allocation94_spill] sm:$0xff] %v10208_v62  ;;  %v2748_v57 = vsel %vm2570_vm2, %v10208_v62, -inf  ;;  %14122 = vst [vmem:[#allocation98_spill] sm:$0xff] %v10238_v59  ;;  %v10240_v17 = vpop.eup %8085 }
 0x35a   : > { %v7468_v13 = vpop.f32.mrb[36].mxu1  ;;  %14120 = vst [vmem:[#allocation96_spill] sm:$0xff] %v10214_v58  ;;  %2749 = vmax.xlane.f32.xlu0 %v2748_v57  ;;  %v2742_v7 = vsel %vm2570_vm2, %v10214_v58, -inf  ;;  %14123 = vst [vmem:[#allocation99_spill] sm:$0xff] %v10240_v17  ;;  %v10242_v49 = vpop.xlane.xlu0 %2599  ;;  %v3360_v58 = vsel %vm2570_vm2, %v10238_v59, 0.0 }
 0x35b   : > { %v1459_v38 = vpop.f32.mrb[37].mxu1  ;;  %v10244_v57 = vpop.eup %8087  ;;  %v2344_v40 = vadd.f32 %v7468_v13, %v10017_v11  ;;  %v10261_v11 = vld [vmem:[%s13652_s5 + $0x90] sm:$0xff] }
 0x35c   : > { %v10222_v10 = vpop.f32.mrb[60].mxu0  ;;  %v7469_v61 = vpop.f32.mrb[38].mxu1  ;;  %2740 = vmax.xlane.f32.xlu1 %v2739_v24  ;;  %14124 = vst [vmem:[#allocation100_spill] sm:$0xff] %v10244_v57  ;;  %v3351_v24 = vsel %vm2570_vm2, %v10240_v17, 0.0  ;;  %v2348_v6 = vadd.f32 %v7480_v9, %v10261_v11  ;;  %v2965_v9 = vsub.f32 %v9570_v4, %v10190_v28 }
 0x35d   : > { %v10226_v23 = vpop.f32.mrb[61].mxu0  ;;  %v1462_v35 = vpop.f32.mrb[39].mxu1  ;;  %v2345_v62 = vadd.f32 %v7469_v61, %v10033_v19  ;;  %v10266_v19 = vld [vmem:[%s13652_s5 + $0x98] sm:$0xff]  ;;  %v10269_v13 = vadd.f32 %v9904_v43, %v2344_v40  ;;  %v10285_v43 = vld [vmem:[%s13652_s5 + $0x80] sm:$0xff] }
 0x35e   : > { %v10228_v55 = vpop.f32.mrb[62].mxu0  ;;  %2743 = vmax.xlane.f32.xlu0 %v2742_v7  ;;  %v10246_v63 = vpop.xlane.xlu1 %2620  ;;  %v3354_v7 = vsel %vm2570_vm2, %v10244_v57, 0.0  ;;  %v2343_v61 = vadd.f32 %v10041_v21, %v1462_v35  ;;  %v2349_v33 = vadd.f32 %v7481_v46, %v10266_v19  ;;  %v10302_v46 = vld [vmem:[%s13652_s5 + $0x88] sm:$0xff]  ;;  %v2346_v4 = vadd.f32 %v10285_v43, %v10195_v27 }
 0x35f   : > { %v10234_v1 = vpop.f32.mrb[63].mxu0  ;;  %14125 = vst [vmem:[#allocation101_spill] sm:$0xff] %v10269_v13  ;;  %v10276_v44 = vpop.xlane.xlu0 %2623  ;;  %v2757_v21 = vsel %vm2570_vm2, %v10269_v13, -inf }
 0x360   : > { %3358 = vadd.xlane.f32.xlu1 %v3357_v22  ;;  %v2342_v22 = vadd.f32 %v10028_v60, %v1459_v38  ;;  %v10291_v60 = vadd.f32 %v9935_v54, %v2343_v61  ;;  %v10309_v54 = vld [vmem:[%s13653_s6 + $0x10] sm:$0xff]  ;;  %v10321_v38 = vld [vmem:[%s13653_s6 + $0x18] sm:$0xff]  ;;  %v2971_v61 = vsub.f32 %v9699_v31, %v10246_v63  ;;  %v10371_v63 = vld [vmem:[%s13652_s5 + $0xa0] sm:$0xff] }
 0x361   : > { %v10312_v40 = vadd.f32 %v10309_v54, %v2348_v6  ;;  %v10333_v6 = vld [vmem:[%s13652_s5 + $0xb0] sm:$0xff] }
 0x362   : > { %3361 = vadd.xlane.f32.xlu0 %v3360_v58  ;;  %v10273_v58 = vadd.f32 %v9910_v36, %v2345_v62  ;;  %v10278_v15 = vpop.xlane.xlu1 %2614  ;;  %v10288_v36 = vadd.f32 %v9923_v20, %v2342_v22  ;;  %14128 = vst [vmem:[#allocation104_spill] sm:$0xff] %v10291_v60  ;;  %v2973_v20 = vsub.f32 %v9654_v48, %v10193_v26 }
 0x363   : > { %14129 = vst [vmem:[#allocation105_spill] sm:$0xff] %v10312_v40  ;;  %v10316_v28 = vpop.xlane.xlu0 %2617  ;;  %v10324_v48 = vadd.f32 %v10321_v38, %v2349_v33  ;;  %v2347_v26 = vadd.f32 %v10302_v46, %v10202_v52  ;;  %v10342_v33 = vld [vmem:[%s13652_s5 + $0xb8] sm:$0xff]  ;;  %v2963_v22 = vsub.f32 %v9664_v42, %v10224_v14  ;;  %v10363_v42 = vld [vmem:[%s13653_s6 + $0x8] sm:$0xff] }
 0x364   : > { %14126 = vst [vmem:[#allocation102_spill] sm:$0xff] %v10273_v58  ;;  %3352 = vadd.xlane.f32.xlu1 %v3351_v24  ;;  %14127 = vst [vmem:[#allocation103_spill] sm:$0xff] %v10288_v36  ;;  %v2760_v62 = vsel %vm2570_vm2, %v10273_v58, -inf  ;;  %v2751_v27 = vsel %vm2570_vm2, %v10288_v36, -inf  ;;  %v2754_v24 = vsel %vm2570_vm2, %v10291_v60, -inf  ;;  %v2353_v14 = vadd.f32 %v10228_v55, %v10342_v33 }
 0x365   : > { %14130 = vst [vmem:[#allocation106_spill] sm:$0xff] %v10324_v48  ;;  %v3119_v52 = vmul.f32 1.442695, %v2973_v20  ;;  %14132 = vst [vmem:[#allocation108_spill] sm:$0xff] %v10363_v42  ;;  %v10366_v31 = vadd.f32 %v10363_v42, %v2347_v26  ;;  %v2769_v20 = vsel %vm2570_vm2, %v10312_v40, -inf  ;;  %v2966_v55 = vsub.f32 %v9576_v50, %v10204_v53 }
 0x366   : > { %3355 = vadd.xlane.f32.xlu0 %v3354_v7  ;;  %v10328_v35 = vpop.xlane.xlu1 %2638  ;;  %v3103_v7 = vmul.f32 1.442695, %v2965_v9  ;;  %v2352_v9 = vadd.f32 %v10222_v10, %v10333_v6  ;;  %v10378_v10 = vld [vmem:[%s13652_s5 + $0xa8] sm:$0xff]  ;;  %v3099_v60 = vmul.f32 1.442695, %v2963_v22  ;;  %v10413_v22 = vld [vmem:[%s13653_s6 + $0x38] sm:$0xff] }
 0x367   : > { %14133 = vst [vmem:[#allocation109_spill] sm:$0xff] %v10366_v31  ;;  %v3115_v40 = vmul.f32 1.442695, %v2971_v61  ;;  %v2351_v50 = vadd.f32 %v10378_v10, %v10234_v1  ;;  %14136 = vst [vmem:[#allocation112_spill] sm:$0xff] %v10413_v22  ;;  %v10416_v61 = vadd.f32 %v10413_v22, %v2353_v14  ;;  %v2766_v39 = vsel %vm2570_vm2, %v10366_v31, -inf }
 0x368   : > { %2758 = vmax.xlane.f32.xlu1 %v2757_v21  ;;  %v10351_v21 = vld [vmem:[%s13653_s6] sm:$0xff]  ;;  %8089 = vpow2.f32 %v3103_v7  ;;  %v10399_v7 = vld [vmem:[%s13653_s6 + $0x30] sm:$0xff]  ;;  %v3105_v14 = vmul.f32 1.442695, %v2966_v55  ;;  %v2977_v59 = vsub.f32 %v9759_v12, %v10328_v35 }
 0x369   : > { %8091 = vpow2.f32 %v3119_v52  ;;  %14134 = vst [vmem:[#allocation110_spill] sm:$0xff] %v10399_v7  ;;  %14137 = vst [vmem:[#allocation113_spill] sm:$0xff] %v10416_v61 }
 0x36a   : > { %2761 = vmax.xlane.f32.xlu0 %v2760_v62  ;;  %v10354_v62 = vadd.f32 %v10351_v21, %v2346_v4  ;;  %v2772_v4 = vsel %vm2570_vm2, %v10324_v48, -inf  ;;  %v10392_v58 = vpop.xlane.xlu1 %2608  ;;  %8093 = vpow2.f32 %v3099_v60  ;;  %v2784_v60 = vsel %vm2570_vm2, %v10416_v61, -inf }
 0x36b   : > { %8095 = vpow2.f32 %v3115_v40  ;;  %v2969_v61 = vsub.f32 %v9731_v37, %v10278_v15 }
 0x36c   : > { %2752 = vmax.xlane.f32.xlu1 %v2751_v27  ;;  %14131 = vst [vmem:[#allocation107_spill] sm:$0xff] %v10354_v62  ;;  %8097 = vpow2.f32 %v3105_v14 }
 0x36e   : > { %2755 = vmax.xlane.f32.xlu0 %v2754_v24  ;;  %v10386_v24 = vpop.xlane.xlu0 %2641  ;;  %v10458_v55 = vpop.xlane.xlu1 %2632 }
 0x370   : > { %2770 = vmax.xlane.f32.xlu1 %v2769_v20  ;;  %v10402_v20 = vadd.f32 %v10399_v7, %v2352_v9  ;;  %v2763_v9 = vsel %vm2570_vm2, %v10354_v62, -inf  ;;  %v14163_v7 = vld [vmem:[#allocation82_spill] sm:$0xff] }
 0x372   : > { %v10358_v27 = vpop.f32.mrb[40].mxu1  ;;  %2773 = vmax.xlane.f32.xlu0 %v2772_v4  ;;  %14135 = vst [vmem:[#allocation111_spill] sm:$0xff] %v10402_v20  ;;  %v2350_v4 = vadd.f32 %v10371_v63, %v10226_v23  ;;  %v2781_v25 = vsel %vm2570_vm2, %v10402_v20, -inf  ;;  %v3121_v20 = vmul.f32 1.442695, %v2974_v32  ;;  %v10483_v14 = vpop.xlane.xlu1 %2650 }
 0x373   : > { %v10384_v26 = vpop.f32.mrb[41].mxu1 }
 0x374   : > { %v10388_v13 = vpop.f32.mrb[64].mxu0  ;;  %v10408_v53 = vpop.f32.mrb[42].mxu1  ;;  %2764 = vmax.xlane.f32.xlu1 %v2763_v9  ;;  %8099 = vpow2.f32 %v3121_v20  ;;  %v3127_v20 = vmul.f32 1.442695, %v2977_v59 }
 0x375   : > { %v10394_v36 = vpop.f32.mrb[65].mxu0  ;;  %v10420_v48 = vpop.f32.mrb[43].mxu1 }
 0x376   : > { %v7513_v52 = vpop.f32.mrb[66].mxu0  ;;  %2767 = vmax.xlane.f32.xlu0 %v2766_v39  ;;  %v10442_v9 = vpop.xlane.xlu0 %2611  ;;  %v10447_v39 = vld [vmem:[%s13653_s6 + $0x28] sm:$0xff] }
 0x377   : > { %v10423_v23 = vadd.f32 %v7513_v52, %v10266_v19  ;;  %v1737_v1 = vpop.f32.mrb[67].mxu0  ;;  %v10437_v52 = vld [vmem:[%s13653_s6 + $0x20] sm:$0xff]  ;;  %14140 = vst [vmem:[#allocation116_spill] sm:$0xff] %v10447_v39  ;;  %v10450_v41 = vadd.f32 %v10447_v39, %v2351_v50  ;;  %v10466_v50 = vpop.eup %8089 }
 0x378   : > { %v10428_v47 = vadd.f32 %v10302_v46, %v1737_v1  ;;  %14138 = vst [vmem:[#allocation114_spill] sm:$0xff] %v10437_v52  ;;  %v10440_v31 = vadd.f32 %v10437_v52, %v2350_v4  ;;  %2782 = vmax.xlane.f32.xlu1 %v2781_v25  ;;  %v2964_v1 = vsub.f32 %v9676_v5, %v10242_v49  ;;  %14142 = vst [vmem:[#allocation118_spill] sm:$0xff] %v10466_v50  ;;  %v10472_v57 = vpop.eup %8091 }
 0x379   : > { %14141 = vst [vmem:[#allocation117_spill] sm:$0xff] %v10450_v41  ;;  %14143 = vst [vmem:[#allocation119_spill] sm:$0xff] %v10472_v57  ;;  %v2778_v32 = vsel %vm2570_vm2, %v10450_v41, -inf  ;;  %v10494_v22 = vpop.eup %8093 }
 0x37a   : > { %v10432_v62 = vpop.f32.mrb[44].mxu1  ;;  %14139 = vst [vmem:[#allocation115_spill] sm:$0xff] %v10440_v31  ;;  %2785 = vmax.xlane.f32.xlu0 %v2784_v60  ;;  %v2775_v25 = vsel %vm2570_vm2, %v10440_v31, -inf  ;;  %v3101_v15 = vmul.f32 1.442695, %v2964_v1  ;;  %v2972_v31 = vsub.f32 %v9711_v29, %v10276_v44  ;;  %v10490_v17 = vpop.xlane.xlu0 %2635  ;;  %14144 = vst [vmem:[#allocation120_spill] sm:$0xff] %v10494_v22 }
 0x37b   : > { %v10456_v40 = vpop.f32.mrb[45].mxu1  ;;  %v3369_v1 = vsel %vm2570_vm2, %v10466_v50, 0.0  ;;  %v14146_v44 = vld [vmem:[#allocation80_spill] sm:$0xff] }
 0x37c   : > { %v10460_v4 = vpop.f32.mrb[68].mxu0  ;;  %v10470_v39 = vpop.f32.mrb[46].mxu1  ;;  %2776 = vmax.xlane.f32.xlu1 %v2775_v25  ;;  %v2356_v25 = vadd.f32 %v10358_v27, %v10261_v11  ;;  %8101 = vpow2.f32 %v3101_v15  ;;  %v3117_v29 = vmul.f32 1.442695, %v2972_v31  ;;  %v2967_v12 = vsub.f32 %v14146_v44, %v10392_v58 }
 0x37d   : > { %v10464_v56 = vpop.f32.mrb[69].mxu0  ;;  %v10476_v60 = vpop.f32.mrb[47].mxu1  ;;  %v2354_v31 = vadd.f32 %v10285_v43, %v10384_v26  ;;  %v3363_v58 = vsel %vm2570_vm2, %v10494_v22, 0.0  ;;  %v10531_v26 = vld [vmem:[%s13653_s6 + $0x40] sm:$0xff]  ;;  %v14158_v22 = vld [vmem:[#allocation81_spill] sm:$0xff] }
 0x37e   : > { %v7517_v18 = vpop.f32.mrb[70].mxu0  ;;  %2779 = vmax.xlane.f32.xlu0 %v2778_v32  ;;  %v10502_v32 = vpop.eup %8095 }
 0x37f   : > { %v10479_v5 = vadd.f32 %v7517_v18, %v10342_v33  ;;  %v1753_v49 = vpop.f32.mrb[71].mxu0  ;;  %v3111_v18 = vmul.f32 1.442695, %v2969_v61  ;;  %14145 = vst [vmem:[#allocation121_spill] sm:$0xff] %v10502_v32  ;;  %v10506_v35 = vpop.xlane.xlu0 %2653  ;;  %v10513_v61 = vld [vmem:[%s13653_s6 + $0x50] sm:$0xff]  ;;  %v3387_v15 = vsel %vm2570_vm2, %v10502_v32, 0.0 }
 0x380   : > { %v10486_v37 = vadd.f32 %v10378_v10, %v1753_v49  ;;  %v3393_v49 = vsel %vm2570_vm2, %v10472_v57, 0.0  ;;  %v10508_v27 = vpop.xlane.xlu1 %2644  ;;  %v10516_v41 = vadd.f32 %v10513_v61, %v2356_v25  ;;  %v10524_v59 = vpop.eup %8097  ;;  %v10534_v25 = vadd.f32 %v10531_v26, %v2354_v31 }
 0x381   : > { %3394 = vadd.xlane.f32.xlu1 %v3393_v49  ;;  %8103 = vpow2.f32 %v3111_v18  ;;  %14148 = vst [vmem:[#allocation122_spill] sm:$0xff] %v10524_v59  ;;  %v3107_v18 = vmul.f32 1.442695, %v2967_v12  ;;  %v14149_v49 = vld [vmem:[#allocation69_spill] sm:$0xff]  ;;  %v10542_v12 = vpop.eup %8099 }
 0x382   : > { %3370 = vadd.xlane.f32.xlu0 %v3369_v1  ;;  %14147 = vst [vmem:[#allocation80_spill] sm:$0xff] %v10516_v41  ;;  %8105 = vpow2.f32 %v3117_v29  ;;  %v2975_v1 = vsub.f32 %v14149_v49, %v10458_v55  ;;  %14150 = vst [vmem:[#allocation69_spill] sm:$0xff] %v10534_v25  ;;  %v3372_v29 = vsel %vm2570_vm2, %v10524_v59, 0.0  ;;  %v2787_v57 = vsel %vm2570_vm2, %v10534_v25, -inf }
 0x383   : > { %8107 = vpow2.f32 %v3127_v20  ;;  %v10536_v44 = vpop.xlane.xlu0 %2647  ;;  %14151 = vst [vmem:[#allocation123_spill] sm:$0xff] %v10542_v12  ;;  %v2357_v25 = vadd.f32 %v10408_v53, %v10266_v19 }
 0x384   : > { %v10544_v55 = vpop.xlane.xlu1 %2662  ;;  %8109 = vpow2.f32 %v3107_v18  ;;  %v3123_v20 = vmul.f32 1.442695, %v2975_v1  ;;  %v14155_v1 = vld [vmem:[#allocation79_spill] sm:$0xff] }
 0x385   : > { %3364 = vadd.xlane.f32.xlu1 %v3363_v58  ;;  %v2793_v58 = vsel %vm2570_vm2, %v10516_v41, -inf  ;;  %v3396_v41 = vsel %vm2570_vm2, %v10542_v12, 0.0 }
 0x386   : > { %3388 = vadd.xlane.f32.xlu0 %v3387_v15  ;;  %v14152_v15 = vld [vmem:[#allocation78_spill] sm:$0xff]  ;;  %v10548_v49 = vpop.eup %8101  ;;  %8111 = vpow2.f32 %v3123_v20 }
 0x387   : > { %v2970_v31 = vsub.f32 %v14152_v15, %v10316_v28  ;;  %14153 = vst [vmem:[#allocation78_spill] sm:$0xff] %v10548_v49 }
 0x388   : > { %v10560_v28 = vpop.xlane.xlu1 %2656 }
 0x389   : > { %2794 = vmax.xlane.f32.xlu1 %v2793_v58  ;;  %v10556_v58 = vpop.xlane.xlu0 %2665  ;;  %v3113_v18 = vmul.f32 1.442695, %v2970_v31 }
 0x38a   : > { %3373 = vadd.xlane.f32.xlu0 %v3372_v29  ;;  %v2978_v29 = vsub.f32 %v14155_v1, %v10386_v24 }
 0x38b   : > { %v10554_v32 = vpop.eup %8103  ;;  %8113 = vpow2.f32 %v3113_v18 }
 0x38c   : > { %14154 = vst [vmem:[#allocation124_spill] sm:$0xff] %v10554_v32  ;;  %v10562_v50 = vpop.eup %8105  ;;  %v3381_v12 = vsel %vm2570_vm2, %v10554_v32, 0.0  ;;  %v2968_v32 = vsub.f32 %v14158_v22, %v10442_v9  ;;  %v3129_v52 = vmul.f32 1.442695, %v2978_v29  ;;  %v10599_v22 = vld [vmem:[%s13653_s6 + $0x58] sm:$0xff]  ;;  %v2355_v9 = vadd.f32 %v10302_v46, %v10420_v48 }
 0x38d   : > { %2788 = vmax.xlane.f32.xlu1 %v2787_v57  ;;  %14156 = vst [vmem:[#allocation79_spill] sm:$0xff] %v10562_v50  ;;  %v3366_v57 = vsel %vm2570_vm2, %v10548_v49, 0.0  ;;  %v10573_v31 = vpop.eup %8107  ;;  %14161 = vst [vmem:[#allocation127_spill] sm:$0xff] %v10599_v22  ;;  %v10606_v18 = vpop.xlane.xlu0 %2659 }
 0x38e   : > { %3397 = vadd.xlane.f32.xlu0 %v3396_v41  ;;  %14157 = vst [vmem:[#allocation125_spill] sm:$0xff] %v10573_v31  ;;  %v10594_v34 = vpop.eup %8109  ;;  %v3405_v29 = vsel %vm2570_vm2, %v10573_v31, 0.0  ;;  %8115 = vpow2.f32 %v3129_v52  ;;  %v10623_v31 = vld [vmem:[%s13653_s6 + $0x48] sm:$0xff] }
 0x38f   : > { %14160 = vst [vmem:[#allocation126_spill] sm:$0xff] %v10594_v34  ;;  %14165 = vst [vmem:[#allocation129_spill] sm:$0xff] %v10623_v31 }
 0x391   : > { %3382 = vadd.xlane.f32.xlu1 %v3381_v12 }
 0x392   : > { %v7528_v15 = vpop.f32.mrb[48].mxu1  ;;  %3367 = vadd.xlane.f32.xlu0 %v3366_v57 }
 0x393   : > { %v10571_v41 = vadd.f32 %v7528_v15, %v10261_v11  ;;  %v1831_v20 = vpop.f32.mrb[49].mxu1 }
 0x394   : > { %v10576_v24 = vadd.f32 %v10285_v43, %v1831_v20  ;;  %v10578_v1 = vpop.f32.mrb[72].mxu0  ;;  %v7529_v53 = vpop.f32.mrb[50].mxu1 }
 0x395   : > { %v10582_v59 = vpop.f32.mrb[73].mxu0  ;;  %v10585_v49 = vadd.f32 %v7529_v53, %v10266_v19  ;;  %v1834_v15 = vpop.f32.mrb[51].mxu1  ;;  %v10602_v19 = vadd.f32 %v10599_v22, %v2357_v25  ;;  %3406 = vadd.xlane.f32.xlu1 %v3405_v29  ;;  %v2976_v25 = vsub.f32 %v14163_v7, %v10490_v17 }
 0x396   : > { %v10588_v12 = vadd.f32 %v10302_v46, %v1834_v15  ;;  %v10590_v57 = vpop.f32.mrb[74].mxu0  ;;  %v10592_v20 = vpop.xlane.xlu1 %2674  ;;  %v3390_v15 = vsel %vm2570_vm2, %v10562_v50, 0.0  ;;  %v3375_v46 = vsel %vm2570_vm2, %v10594_v34, 0.0  ;;  %v10626_v50 = vadd.f32 %v10623_v31, %v2355_v9 }
 0x397   : > { %14159 = vst [vmem:[#allocation81_spill] sm:$0xff] %v10592_v20  ;;  %14162 = vst [vmem:[#allocation128_spill] sm:$0xff] %v10602_v19  ;;  %v10610_v53 = vpop.f32.mrb[75].mxu0  ;;  %3391 = vadd.xlane.f32.xlu0 %v3390_v15  ;;  %v3109_v20 = vmul.f32 1.442695, %v2968_v32  ;;  %v10618_v22 = vpop.eup %8111  ;;  %v2360_v32 = vadd.f32 %v10432_v62, %v10333_v6  ;;  %v2796_v17 = vsel %vm2570_vm2, %v10602_v19, -inf }
 0x398   : > { %14164 = vst [vmem:[#allocation82_spill] sm:$0xff] %v10618_v22  ;;  %14166 = vst [vmem:[#allocation130_spill] sm:$0xff] %v10626_v50  ;;  %v10630_v29 = vpop.xlane.xlu0 %2677  ;;  %v3125_v62 = vmul.f32 1.442695, %v2976_v25  ;;  %v3399_v19 = vsel %vm2570_vm2, %v10618_v22, 0.0  ;;  %v2358_v25 = vadd.f32 %v10371_v63, %v10456_v40  ;;  %v10679_v40 = vld [vmem:[%s13653_s6 + $0x60] sm:$0xff] }
 0x399   : > { %3376 = vadd.xlane.f32.xlu1 %v3375_v46  ;;  %8117 = vpow2.f32 %v3109_v20 }
 0x39a   : > { %v7532_v48 = vpop.f32.mrb[52].mxu1  ;;  %v10637_v15 = vpop.xlane.xlu1 %2668  ;;  %8119 = vpow2.f32 %v3125_v62 }
 0x39b   : > { %v10635_v7 = vadd.f32 %v7532_v48, %v10333_v6  ;;  %v1847_v52 = vpop.f32.mrb[53].mxu1  ;;  %14167 = vst [vmem:[#allocation131_spill] sm:$0xff] %v10637_v15  ;;  %2797 = vmax.xlane.f32.xlu0 %v2796_v17  ;;  %v10656_v17 = vld [vmem:[%s13653_s6 + $0x70] sm:$0xff]  ;;  %v10670_v15 = vpop.eup %8113 }
 0x39c   : > { %v10640_v34 = vadd.f32 %v10371_v63, %v1847_v52  ;;  %v10642_v9 = vpop.f32.mrb[76].mxu0  ;;  %v7533_v51 = vpop.f32.mrb[54].mxu1  ;;  %14170 = vst [vmem:[#allocation134_spill] sm:$0xff] %v10656_v17  ;;  %v10659_v20 = vadd.f32 %v10656_v17, %v2360_v32  ;;  %14173 = vst [vmem:[#allocation137_spill] sm:$0xff] %v10670_v15  ;;  %v2364_v32 = vadd.f32 %v10388_v13, %v10261_v11  ;;  %v14177_v11 = vld [vmem:[#allocation67_spill] sm:$0xff] }
 0x39d   : > { %v10644_v31 = vpop.f32.mrb[77].mxu0  ;;  %v10649_v48 = vadd.f32 %v7533_v51, %v10342_v33  ;;  %v1850_v46 = vpop.f32.mrb[55].mxu1  ;;  %v2790_v51 = vsel %vm2570_vm2, %v10626_v50, -inf  ;;  %3400 = vadd.xlane.f32.xlu1 %v3399_v19  ;;  %v3384_v19 = vsel %vm2570_vm2, %v10670_v15, 0.0  ;;  %v2982_v13 = vsub.f32 %v14177_v11, %v10506_v35  ;;  %v14181_v11 = vld [vmem:[#allocation68_spill] sm:$0xff] }
 0x39e   : > { %14168 = vst [vmem:[#allocation132_spill] sm:$0xff] %v10644_v31  ;;  %v10651_v42 = vpop.f32.mrb[78].mxu0  ;;  %14171 = vst [vmem:[#allocation135_spill] sm:$0xff] %v10659_v20  ;;  %v10664_v52 = vadd.f32 %v10378_v10, %v1850_v46  ;;  %v10682_v46 = vadd.f32 %v10679_v40, %v2358_v25  ;;  %v2805_v50 = vsel %vm2570_vm2, %v10659_v20, -inf  ;;  %v10688_v62 = vpop.eup %8115  ;;  %v10699_v25 = vld [vmem:[%s13653_s6 + $0x90] sm:$0xff]  ;;  %v2362_v15 = vadd.f32 %v10285_v43, %v10394_v36  ;;  %v10723_v36 = vld [vmem:[%s13653_s6 + $0x80] sm:$0xff] }
 0x39f   : > { %14169 = vst [vmem:[#allocation133_spill] sm:$0xff] %v10651_v42  ;;  %v10666_v22 = vpop.f32.mrb[79].mxu0  ;;  %2791 = vmax.xlane.f32.xlu0 %v2790_v51  ;;  %v10672_v42 = vpop.xlane.xlu0 %2671  ;;  %14175 = vst [vmem:[#allocation139_spill] sm:$0xff] %v10688_v62  ;;  %v10702_v20 = vadd.f32 %v10699_v25, %v2364_v32  ;;  %v3408_v35 = vsel %vm2570_vm2, %v10688_v62, 0.0  ;;  %v2366_v62 = vadd.f32 %v10371_v63, %v10464_v56 }
 0x3a0   : > { %14172 = vst [vmem:[#allocation136_spill] sm:$0xff] %v10666_v22  ;;  %14174 = vst [vmem:[#allocation138_spill] sm:$0xff] %v10682_v46  ;;  %v10690_v51 = vpop.xlane.xlu1 %2686  ;;  %v2359_v63 = vadd.f32 %v10378_v10, %v10476_v60  ;;  %v10777_v10 = vld [vmem:[%s13653_s6 + $0x68] sm:$0xff] }
 0x3a1   : > { %14176 = vst [vmem:[#allocation140_spill] sm:$0xff] %v10690_v51  ;;  %2806 = vmax.xlane.f32.xlu1 %v2805_v50  ;;  %14179 = vst [vmem:[#allocation141_spill] sm:$0xff] %v10699_v25  ;;  %v2799_v50 = vsel %vm2570_vm2, %v10682_v46, -inf  ;;  %v2980_v51 = vsub.f32 %v14181_v11, %v10536_v44  ;;  %v10726_v46 = vadd.f32 %v10723_v36, %v2362_v15 }
 0x3a2   : > { %14180 = vst [vmem:[#allocation142_spill] sm:$0xff] %v10702_v20  ;;  %v2361_v44 = vadd.f32 %v10470_v39, %v10342_v33  ;;  %v10745_v33 = vld [vmem:[%s13653_s6 + $0xb0] sm:$0xff]  ;;  %14190 = vst [vmem:[#allocation150_spill] sm:$0xff] %v10777_v10  ;;  %v10780_v60 = vadd.f32 %v10777_v10, %v2359_v63  ;;  %v14193_v63 = vld [vmem:[#allocation66_spill] sm:$0xff] }
 0x3a3   : > { %3385 = vadd.xlane.f32.xlu0 %v3384_v19  ;;  %v10694_v17 = vpop.eup %8117  ;;  %v10706_v22 = vpop.xlane.xlu0 %2689  ;;  %v3137_v19 = vmul.f32 1.442695, %v2982_v13  ;;  %14184 = vst [vmem:[#allocation144_spill] sm:$0xff] %v10726_v46  ;;  %v2368_v13 = vadd.f32 %v10460_v4, %v10333_v6  ;;  %v3133_v11 = vmul.f32 1.442695, %v2980_v51  ;;  %14186 = vst [vmem:[#allocation146_spill] sm:$0xff] %v10745_v33 }
 0x3a4   : > { %14178 = vst [vmem:[#allocation67_spill] sm:$0xff] %v10694_v17  ;;  %v10714_v31 = vpop.xlane.xlu1 %2680  ;;  %v3378_v32 = vsel %vm2570_vm2, %v10694_v17, 0.0  ;;  %v10718_v43 = vpop.eup %8119  ;;  %v10753_v4 = vld [vmem:[%s13653_s6 + $0x78] sm:$0xff]  ;;  %v2811_v51 = vsel %vm2570_vm2, %v10726_v46, -inf  ;;  %14191 = vst [vmem:[#allocation151_spill] sm:$0xff] %v10780_v60  ;;  %v2981_v46 = vsub.f32 %v14193_v63, %v10483_v14  ;;  %v14195_v17 = vld [vmem:[#allocation15_spill] sm:$0xff] }
 0x3a5   : > { %2800 = vmax.xlane.f32.xlu1 %v2799_v50  ;;  %14182 = vst [vmem:[#allocation68_spill] sm:$0xff] %v10714_v31  ;;  %14183 = vst [vmem:[#allocation143_spill] sm:$0xff] %v10718_v43  ;;  %v2817_v50 = vsel %vm2570_vm2, %v10702_v20, -inf  ;;  %8121 = vpow2.f32 %v3137_v19  ;;  %v3402_v6 = vsel %vm2570_vm2, %v10718_v43, 0.0  ;;  %v10748_v39 = vadd.f32 %v10745_v33, %v2368_v13  ;;  %v10769_v13 = vld [vmem:[%s13653_s6 + $0xa0] sm:$0xff]  ;;  %v14201_v10 = vld [vmem:[#allocation84_spill] sm:$0xff] }
 0x3a6   : > { %v10756_v56 = vadd.f32 %v10753_v4, %v2361_v44  ;;  %8123 = vpow2.f32 %v3133_v11  ;;  %v10772_v44 = vadd.f32 %v10769_v13, %v2366_v62  ;;  %v10791_v62 = vld [vmem:[%s13652_s5 + $0xd0] sm:$0xff]  ;;  %v2986_v33 = vsub.f32 %v14195_v17, %v10556_v58 }
 0x3a7   : > { %3409 = vadd.xlane.f32.xlu0 %v3408_v35  ;;  %v10734_v35 = vpop.xlane.xlu0 %2683  ;;  %14187 = vst [vmem:[#allocation147_spill] sm:$0xff] %v10748_v39  ;;  %v2802_v58 = vsel %vm2570_vm2, %v10780_v60, -inf  ;;  %v3135_v25 = vmul.f32 1.442695, %v2981_v46 }
 0x3a8   : > { %14188 = vst [vmem:[#allocation148_spill] sm:$0xff] %v10756_v56  ;;  %14189 = vst [vmem:[#allocation149_spill] sm:$0xff] %v10772_v44  ;;  %v2808_v11 = vsel %vm2570_vm2, %v10756_v56, -inf  ;;  %v2823_v63 = vsel %vm2570_vm2, %v10772_v44, -inf  ;;  %v10836_v44 = vld [vmem:[%s13653_s6 + $0x88] sm:$0xff] }
 0x3a9   : > { %2818 = vmax.xlane.f32.xlu1 %v2817_v50  ;;  %v2829_v50 = vsel %vm2570_vm2, %v10748_v39, -inf  ;;  %v10840_v60 = vadd.f32 %v10836_v44, %v10428_v47  ;;  %8125 = vpow2.f32 %v3135_v25 }
 0x3ab   : > { %3379 = vadd.xlane.f32.xlu0 %v3378_v32  ;;  %14203 = vst [vmem:[#allocation84_spill] sm:$0xff] %v10840_v60 }
 0x3ad   : > { %2812 = vmax.xlane.f32.xlu1 %v2811_v51 }
 0x3ae   : > { %v10738_v15 = vpop.xlane.xlu1 %2698 }
 0x3af   : > { %14185 = vst [vmem:[#allocation145_spill] sm:$0xff] %v10738_v15  ;;  %3403 = vadd.xlane.f32.xlu0 %v3402_v6  ;;  %v10827_v17 = vpop.eup %8121 }
 0x3b0   : > { %v10762_v19 = vpop.xlane.xlu0 %2701  ;;  %14199 = vst [vmem:[#allocation155_spill] sm:$0xff] %v10827_v17  ;;  %v3420_v46 = vsel %vm2570_vm2, %v10827_v17, 0.0 }
 0x3b1   : > { %2830 = vmax.xlane.f32.xlu1 %v2829_v50 }
 0x3b2   : > { %v10764_v32 = vpop.f32.mrb[56].mxu1  ;;  %v10793_v51 = vpop.xlane.xlu1 %2692 }
 0x3b3   : > { %v10786_v6 = vpop.f32.mrb[57].mxu1  ;;  %14192 = vst [vmem:[#allocation152_spill] sm:$0xff] %v10793_v51  ;;  %2809 = vmax.xlane.f32.xlu0 %v2808_v11  ;;  %v10813_v11 = vld [vmem:[%s13653_s6 + $0x98] sm:$0xff] }
 0x3b4   : > { %v7576_v20 = vpop.f32.mrb[80].mxu0  ;;  %v10802_v56 = vpop.f32.mrb[58].mxu1  ;;  %v10817_v14 = vadd.f32 %v10813_v11, %v10423_v23  ;;  %v3145_v23 = vmul.f32 1.442695, %v2986_v33 }
 0x3b5   : > { %v10798_v39 = vadd.f32 %v7576_v20, %v10791_v62  ;;  %v10800_v43 = vpop.f32.mrb[81].mxu0  ;;  %v10806_v15 = vpop.f32.mrb[59].mxu1  ;;  %2824 = vmax.xlane.f32.xlu1 %v2823_v63 }
 0x3b6   : > { %14196 = vst [vmem:[#allocation15_spill] sm:$0xff] %v10806_v15  ;;  %v10808_v50 = vpop.f32.mrb[82].mxu0  ;;  %14197 = vst [vmem:[#allocation153_spill] sm:$0xff] %v10817_v14  ;;  %v10819_v20 = vpop.xlane.xlu0 %2695  ;;  %v2984_v15 = vsub.f32 %v14201_v10, %v10606_v18  ;;  %8127 = vpow2.f32 %v3145_v23 }
 0x3b7   : > { %14194 = vst [vmem:[#allocation66_spill] sm:$0xff] %v10798_v39  ;;  %v10823_v51 = vpop.f32.mrb[83].mxu0  ;;  %2803 = vmax.xlane.f32.xlu0 %v2802_v58  ;;  %v14200_v39 = vld [vmem:[#allocation12_spill] sm:$0xff]  ;;  %v10850_v18 = vpop.eup %8123 }
 0x3b8   : > { %14198 = vst [vmem:[#allocation154_spill] sm:$0xff] %v10823_v51  ;;  %v2979_v31 = vsub.f32 %v14200_v39, %v10508_v27  ;;  %14202 = vst [vmem:[#allocation12_spill] sm:$0xff] %v10836_v44  ;;  %v10842_v51 = vpop.xlane.xlu1 %2710  ;;  %v2820_v27 = vsel %vm2570_vm2, %v10817_v14, -inf  ;;  %v3141_v17 = vmul.f32 1.442695, %v2984_v15  ;;  %v3414_v15 = vsel %vm2570_vm2, %v10850_v18, 0.0 }
 0x3b9   : > { %14204 = vst [vmem:[#allocation156_spill] sm:$0xff] %v10842_v51  ;;  %14205 = vst [vmem:[#allocation157_spill] sm:$0xff] %v10850_v18  ;;  %3421 = vadd.xlane.f32.xlu1 %v3420_v46  ;;  %v10867_v46 = vld [vmem:[%s13653_s6 + $0xb8] sm:$0xff] }
 0x3ba   : > { %v3131_v47 = vmul.f32 1.442695, %v2979_v31  ;;  %v10856_v63 = vpop.xlane.xlu0 %2713  ;;  %v10876_v31 = vld [vmem:[%s13653_s6 + $0xd0] sm:$0xff] }
 0x3bb   : > { %v10848_v33 = vpop.f32.mrb[60].mxu1  ;;  %2821 = vmax.xlane.f32.xlu0 %v2820_v27  ;;  %v10871_v27 = vadd.f32 %v10867_v46, %v10479_v5  ;;  %14208 = vst [vmem:[#allocation160_spill] sm:$0xff] %v10876_v31  ;;  %v10880_v25 = vadd.f32 %v10876_v31, %v10571_v41  ;;  %v2814_v5 = vsel %vm2570_vm2, %v10840_v60, -inf  ;;  %v10895_v41 = vld [vmem:[%s13653_s6 + $0xa8] sm:$0xff]  ;;  %v10904_v31 = vld [vmem:[%s13653_s6 + $0xc0] sm:$0xff] }
 0x3bc   : > { %v10852_v39 = vpop.f32.mrb[61].mxu1  ;;  %v10854_v10 = vpop.f32.mrb[84].mxu0  ;;  %8129 = vpow2.f32 %v3131_v47  ;;  %14213 = vst [vmem:[#allocation165_spill] sm:$0xff] %v10895_v41  ;;  %v10899_v18 = vadd.f32 %v10895_v41, %v10486_v37  ;;  %v10908_v47 = vadd.f32 %v10904_v31, %v10576_v24  ;;  %v14216_v37 = vld [vmem:[#allocation5_spill] sm:$0xff] }
 0x3bd   : > { %14206 = vst [vmem:[#allocation158_spill] sm:$0xff] %v10854_v10  ;;  %v10858_v58 = vpop.f32.mrb[85].mxu0  ;;  %v10860_v51 = vpop.f32.mrb[62].mxu1  ;;  %14207 = vst [vmem:[#allocation159_spill] sm:$0xff] %v10871_v27  ;;  %3415 = vadd.xlane.f32.xlu1 %v3414_v15  ;;  %8131 = vpow2.f32 %v3141_v17  ;;  %v2841_v17 = vsel %vm2570_vm2, %v10880_v25, -inf  ;;  %v2832_v15 = vsel %vm2570_vm2, %v10871_v27, -inf  ;;  %v2985_v60 = vsub.f32 %v14216_v37, %v10544_v55 }
 0x3be   : > { %v10862_v14 = vpop.f32.mrb[86].mxu0  ;;  %14209 = vst [vmem:[#allocation161_spill] sm:$0xff] %v10880_v25  ;;  %v10884_v23 = vpop.f32.mrb[63].mxu1  ;;  %14214 = vst [vmem:[#allocation166_spill] sm:$0xff] %v10899_v18  ;;  %v2835_v24 = vsel %vm2570_vm2, %v10908_v47, -inf  ;;  %v2826_v25 = vsel %vm2570_vm2, %v10899_v18, -inf }
 0x3bf   : > { %14210 = vst [vmem:[#allocation162_spill] sm:$0xff] %v10884_v23  ;;  %v10886_v10 = vpop.f32.mrb[87].mxu0  ;;  %2815 = vmax.xlane.f32.xlu0 %v2814_v5  ;;  %v10890_v44 = vpop.xlane.xlu1 %2704  ;;  %14215 = vst [vmem:[#allocation167_spill] sm:$0xff] %v10908_v47  ;;  %v14220_v27 = vld [vmem:[#allocation83_spill] sm:$0xff]  ;;  %v3143_v55 = vmul.f32 1.442695, %v2985_v60  ;;  %v2380_v47 = vadd.f32 %v10578_v1, %v10791_v62 }
 0x3c0   : > { %14211 = vst [vmem:[#allocation163_spill] sm:$0xff] %v10886_v10  ;;  %14212 = vst [vmem:[#allocation164_spill] sm:$0xff] %v10890_v44  ;;  %v10914_v5 = vpop.xlane.xlu0 %2707  ;;  %v10920_v41 = vpop.eup %8125  ;;  %v2983_v23 = vsub.f32 %v14220_v27, %v10560_v28  ;;  %v10941_v18 = vld [vmem:[%s13652_s5 + $0xc0] sm:$0xff] }
 0x3c1   : > { %2842 = vmax.xlane.f32.xlu1 %v2841_v17  ;;  %14218 = vst [vmem:[#allocation168_spill] sm:$0xff] %v10920_v41  ;;  %v10926_v10 = vpop.eup %8127  ;;  %v3417_v27 = vsel %vm2570_vm2, %v10920_v41, 0.0  ;;  %8133 = vpow2.f32 %v3143_v55  ;;  %v2378_v1 = vadd.f32 %v10941_v18, %v10582_v59 }
 0x3c2   : > { %14219 = vst [vmem:[#allocation169_spill] sm:$0xff] %v10926_v10  ;;  %v3432_v28 = vsel %vm2570_vm2, %v10926_v10, 0.0  ;;  %v3139_v60 = vmul.f32 1.442695, %v2983_v23  ;;  %v10961_v10 = vld [vmem:[%s13653_s6 + $0xd8] sm:$0xff] }
 0x3c3   : > { %2833 = vmax.xlane.f32.xlu0 %v2832_v15  ;;  %v10965_v23 = vadd.f32 %v10961_v10, %v10585_v49  ;;  %v10981_v49 = vld [vmem:[%s13653_s6 + $0xc8] sm:$0xff] }
 0x3c4   : > { %8135 = vpow2.f32 %v3139_v60  ;;  %14229 = vst [vmem:[#allocation177_spill] sm:$0xff] %v10981_v49  ;;  %v2388_v60 = vadd.f32 %v10764_v32, %v10791_v62  ;;  %v11005_v32 = vld [vmem:[%s13652_s5 + $0xc8] sm:$0xff] }
 0x3c5   : > { %2836 = vmax.xlane.f32.xlu1 %v2835_v24  ;;  %14226 = vst [vmem:[#allocation174_spill] sm:$0xff] %v10965_v23 }
 0x3c6   : > { %v10918_v44 = vpop.xlane.xlu1 %2722  ;;  %v10934_v37 = vpop.eup %8129 }
 0x3c7   : > { %14217 = vst [vmem:[#allocation5_spill] sm:$0xff] %v10918_v44  ;;  %2827 = vmax.xlane.f32.xlu0 %v2826_v25  ;;  %14222 = vst [vmem:[#allocation170_spill] sm:$0xff] %v10934_v37  ;;  %v10947_v25 = vpop.eup %8131  ;;  %v10956_v44 = vadd.f32 %v10309_v54, %v2380_v47  ;;  %v3411_v59 = vsel %vm2570_vm2, %v10934_v37, 0.0  ;;  %v10974_v47 = vadd.f32 %v10351_v21, %v2378_v1  ;;  %v2844_v21 = vsel %vm2570_vm2, %v10965_v23, -inf }
 0x3c8   : > { %v10930_v17 = vpop.xlane.xlu0 %2725  ;;  %14223 = vst [vmem:[#allocation171_spill] sm:$0xff] %v10947_v25  ;;  %v3426_v55 = vsel %vm2570_vm2, %v10947_v25, 0.0  ;;  %v11014_v37 = vadd.f32 %v10513_v61, %v2388_v60  ;;  %v11028_v61 = vld [vmem:[%s13652_s5 + $0xe0] sm:$0xff] }
 0x3c9   : > { %3433 = vadd.xlane.f32.xlu1 %v3432_v28  ;;  %14225 = vst [vmem:[#allocation173_spill] sm:$0xff] %v10956_v44  ;;  %14227 = vst [vmem:[#allocation175_spill] sm:$0xff] %v10974_v47 }
 0x3ca   : > { %v10932_v15 = vpop.xlane.xlu1 %2716  ;;  %14233 = vst [vmem:[#allocation179_spill] sm:$0xff] %v11014_v37 }
 0x3cb   : > { %14221 = vst [vmem:[#allocation83_spill] sm:$0xff] %v10932_v15  ;;  %3418 = vadd.xlane.f32.xlu0 %v3417_v27  ;;  %v10985_v27 = vadd.f32 %v10981_v49, %v10588_v12 }
 0x3cc   : > { %v10949_v24 = vpop.xlane.xlu0 %2719 }
 0x3cd   : > { %3427 = vadd.xlane.f32.xlu1 %v3426_v55  ;;  %14230 = vst [vmem:[#allocation178_spill] sm:$0xff] %v10985_v27  ;;  %v2865_v55 = vsel %vm2570_vm2, %v10956_v44, -inf  ;;  %v14231_v44 = vld [vmem:[#allocation35_spill] sm:$0xff]  ;;  %v2838_v49 = vsel %vm2570_vm2, %v10985_v27, -inf  ;;  %v2889_v27 = vsel %vm2570_vm2, %v11014_v37, -inf }
 0x3ce   : > { %v10953_v15 = vpop.xlane.xlu1 %2734  ;;  %v2990_v23 = vsub.f32 %v14231_v44, %v10630_v29 }
 0x3cf   : > { %14224 = vst [vmem:[#allocation172_spill] sm:$0xff] %v10953_v15  ;;  %3412 = vadd.xlane.f32.xlu0 %v3411_v59 }
 0x3d0   : > { %v10971_v54 = vpop.xlane.xlu0 %2737 }
 0x3d1   : > { %2866 = vmax.xlane.f32.xlu1 %v2865_v55  ;;  %v2859_v55 = vsel %vm2570_vm2, %v10974_v47, -inf  ;;  %v3153_v47 = vmul.f32 1.442695, %v2990_v23 }
 0x3d2   : > { %v10976_v28 = vpop.xlane.xlu1 %2728 }
 0x3d3   : > { %14228 = vst [vmem:[#allocation176_spill] sm:$0xff] %v10976_v28  ;;  %v7592_v1 = vpop.f32.mrb[64].mxu1  ;;  %2845 = vmax.xlane.f32.xlu0 %v2844_v21  ;;  %v2386_v28 = vadd.f32 %v10941_v18, %v10786_v6  ;;  %v2988_v6 = vsub.f32 %v10020_v3, %v10672_v42 }
 0x3d4   : > { %v10994_v59 = vadd.f32 %v7592_v1, %v10791_v62  ;;  %v10996_v25 = vpop.f32.mrb[65].mxu1  ;;  %v10998_v41 = vpop.xlane.xlu0 %2731 }
 0x3d5   : > { %v11000_v12 = vpop.f32.mrb[66].mxu1  ;;  %v11011_v1 = vpop.eup %8133  ;;  %2860 = vmax.xlane.f32.xlu1 %v2859_v55  ;;  %v11040_v23 = vadd.f32 %v10531_v26, %v2386_v28  ;;  %v2390_v55 = vadd.f32 %v11028_v61, %v10852_v39  ;;  %v11052_v26 = vld [vmem:[%s13652_s5 + $0xf8] sm:$0xff] }
 0x3d6   : > { %v2222_v21 = vpop.f32.mrb[67].mxu1  ;;  %v3347_v62 = vpop.xlane.xlu1 %3346  ;;  %14232 = vst [vmem:[#allocation35_spill] sm:$0xff] %v11011_v1 }
 0x3d7   : > { %v11019_v15 = vadd.f32 %v11005_v32, %v2222_v21  ;;  %2839 = vmax.xlane.f32.xlu0 %v2838_v49  ;;  %v11023_v44 = vpop.eup %8135  ;;  %v3429_v21 = vsel %vm2570_vm2, %v11011_v1, 0.0  ;;  %v11037_v49 = vld [vmem:[%s13652_s5 + $0xf0] sm:$0xff]  ;;  %14235 = vst [vmem:[#allocation181_spill] sm:$0xff] %v11040_v23  ;;  %v11074_v37 = vadd.f32 %v10679_v40, %v2390_v55 }
 0x3d8   : > { %v3350_v29 = vpop.xlane.xlu0 %3349  ;;  %14234 = vst [vmem:[#allocation180_spill] sm:$0xff] %v11023_v44 }
 0x3d9   : > { %8137 = vrcp.f32 %v3350_v29  ;;  %2890 = vmax.xlane.f32.xlu1 %v2889_v27  ;;  %v8613_v27 = vld [vmem:[%s13653_s6 + $0xf0] sm:$0xff]  ;;  %14237 = vst [vmem:[#allocation183_spill] sm:$0xff] %v11074_v37  ;;  %v2895_v55 = vsel %vm2570_vm2, %v11074_v37, -inf }
 0x3da   : > { %v3341_v60 = vpop.xlane.xlu1 %3340 }
 0x3db   : > { %8139 = vrcp.f32 %v3341_v60  ;;  %v7596_v3 = vpop.f32.mrb[68].mxu1  ;;  %3430 = vadd.xlane.f32.xlu0 %v3429_v21  ;;  %v11063_v60 = vadd.f32 %v8613_v27, %v10635_v7  ;;  %v3149_v21 = vmul.f32 1.442695, %v2988_v6  ;;  %v2883_v7 = vsel %vm2570_vm2, %v11040_v23, -inf }
 0x3dc   : > { %8141 = vrcp.f32 %v3347_v62  ;;  %v11047_v42 = vadd.f32 %v7596_v3, %v11037_v49  ;;  %v2235_v29 = vpop.f32.mrb[69].mxu1  ;;  %v3344_v1 = vpop.xlane.xlu0 %3343  ;;  %v3423_v62 = vsel %vm2570_vm2, %v11023_v44, 0.0  ;;  %v11068_v3 = vld [vmem:[%s13652_s5 + $0xe8] sm:$0xff]  ;;  %v2992_v44 = vsub.f32 %v10062_v30, %v10734_v35 }
 0x3dd   : > { %v11055_v39 = vadd.f32 %v11028_v61, %v2235_v29  ;;  %8143 = vrcp.f32 %v3344_v1  ;;  %v7597_v28 = vpop.f32.mrb[70].mxu1  ;;  %14236 = vst [vmem:[#allocation182_spill] sm:$0xff] %v11063_v60  ;;  %2884 = vmax.xlane.f32.xlu1 %v2883_v7  ;;  %v2853_v27 = vsel %vm2570_vm2, %v11063_v60, -inf  ;;  %v2994_v7 = vsub.f32 %v10057_v0, %v10706_v22  ;;  %v11144_v30 = vld [vmem:[%s13653_s6 + $0xe8] sm:$0xff] }
 0x3de   : > { %8145 = vpow2.f32 %v3153_v47  ;;  %v11071_v1 = vadd.f32 %v7597_v28, %v11052_v26  ;;  %v2238_v29 = vpop.f32.mrb[71].mxu1  ;;  %v2393_v47 = vadd.f32 %v10860_v51, %v11052_v26  ;;  %v11086_v28 = vld [vmem:[%s13653_s6 + $0xe0] sm:$0xff] }
 0x3df   : > { %v11081_v6 = vadd.f32 %v11068_v3, %v2238_v29  ;;  %3424 = vadd.xlane.f32.xlu0 %v3423_v62  ;;  %8147 = vpow2.f32 %v3149_v21  ;;  %v11090_v40 = vadd.f32 %v11086_v28, %v10640_v34  ;;  %v11104_v34 = vld [vmem:[%s13653_s6 + $0xf8] sm:$0xff] }
 0x3e0   : > { %v11093_v51 = vadd.f32 %v10753_v4, %v2393_v47  ;;  %v11108_v4 = vadd.f32 %v11104_v34, %v10649_v48  ;;  %v11122_v48 = vld [vmem:[%s13652_s5 + $0xd8] sm:$0xff] }
 0x3e1   : > { %14238 = vst [vmem:[#allocation184_spill] sm:$0xff] %v11090_v40  ;;  %2896 = vmax.xlane.f32.xlu1 %v2895_v55  ;;  %v2847_v55 = vsel %vm2570_vm2, %v11090_v40, -inf  ;;  %v3161_v40 = vmul.f32 1.442695, %v2994_v7  ;;  %v2381_v7 = vadd.f32 %v10590_v57, %v11122_v48  ;;  %v3157_v57 = vmul.f32 1.442695, %v2992_v44 }
 0x3e2   : > { %14239 = vst [vmem:[#allocation185_spill] sm:$0xff] %v11093_v51  ;;  %14240 = vst [vmem:[#allocation186_spill] sm:$0xff] %v11108_v4  ;;  %v2904_v47 = vsel %vm2570_vm2, %v11093_v51, -inf  ;;  %v14245_v44 = vld [vmem:[#allocation16_spill] sm:$0xff] }
 0x3e3   : > { %v8138_v62 = vpop.eup %8137  ;;  %2854 = vmax.xlane.f32.xlu0 %v2853_v27  ;;  %8149 = vpow2.f32 %v3161_v40  ;;  %v2379_v40 = vadd.f32 %v11005_v32, %v10610_v53 }
 0x3e4   : > { %v3854_v0 = vmul.f32 %v8138_v62, %v10172_v8  ;;  %8151 = vpow2.f32 %v3157_v57 }
 0x3e5   : > { %v8140_v21 = vpop.eup %8139  ;;  %2905 = vmax.xlane.f32.xlu1 %v2904_v47  ;;  %v11124_v60 = vpop.xlane.xlu1 %2746 }
 0x3e6   : > { %v8142_v29 = vpop.eup %8141  ;;  %v3851_v22 = vmul.f32 %v8140_v21, %v10176_v16  ;;  %v2394_v16 = vadd.f32 %v10941_v18, %v10800_v43 }
 0x3e7   : > { %v8144_v23 = vpop.eup %8143  ;;  %2848 = vmax.xlane.f32.xlu0 %v2847_v55  ;;  %v11126_v51 = vpop.xlane.xlu0 %2749  ;;  %v3853_v8 = vmul.f32 %v8142_v29, %v10168_v2  ;;  %v11148_v2 = vadd.f32 %v11144_v30, %v10664_v52  ;;  %v2397_v52 = vadd.f32 %v10808_v50, %v11122_v48  ;;  %v14243_v55 = vld [vmem:[#allocation19_spill] sm:$0xff] }
 0x3e8   : > { %v11114_v27 = vpop.eup %8145  ;;  %v3852_v37 = vmul.f32 %v8144_v23, %v10180_v45  ;;  %v2856_v23 = vsel %vm2570_vm2, %v11108_v4, -inf  ;;  %v11157_v29 = vadd.f32 %v10723_v36, %v2394_v16  ;;  %v2384_v16 = vadd.f32 %v10642_v9, %v11037_v49 }
 0x3e9   : > { %v3444_v45 = vsel %vm2570_vm2, %v11114_v27, 0.0  ;;  %v11137_v21 = vpop.eup %8147  ;;  %14241 = vst [vmem:[#allocation187_spill] sm:$0xff] %v11148_v2  ;;  %v3980_v43 = vpack.c.bf16 %v3854_v0, %v3853_v8  ;;  %v11150_v35 = vpop.xlane.xlu1 %2740  ;;  %v11165_v0 = vadd.f32 %v10321_v38, %v2381_v7  ;;  %v2850_v36 = vsel %vm2570_vm2, %v11148_v2, -inf }
 0x3ea   : > { %v3979_v62 = vpack.c.bf16 %v3852_v37, %v3851_v22  ;;  %3445 = vadd.xlane.f32.xlu1 %v3444_v45  ;;  %14242 = vst [vmem:[#allocation188_spill] sm:$0xff] %v11157_v29  ;;  %v3438_v47 = vsel %vm2570_vm2, %v11137_v21, 0.0  ;;  %v11173_v8 = vadd.f32 %v10813_v11, %v2397_v52  ;;  %v2907_v38 = vsel %vm2570_vm2, %v11157_v29, -inf  ;;  %v14249_v45 = vld [vmem:[#allocation27_spill] sm:$0xff] }
 0x3eb   : > { %2857 = vmax.xlane.f32.xlu0 %v2856_v23  ;;  %v11152_v37 = vpop.xlane.xlu0 %2743  ;;  %14244 = vst [vmem:[#allocation19_spill] sm:$0xff] %v11165_v0  ;;  %v2868_v23 = vsel %vm2570_vm2, %v11165_v0, -inf  ;;  %v14269_v0 = vld [vmem:[#allocation116_spill] sm:$0xff] }
 0x3ec   : > { %7606 = vmatprep.mubr.msk.bf16.mxu0 %vm2570_vm2, %v3979_v62  ;;  %14246 = vst [vmem:[#allocation16_spill] sm:$0xff] %v11173_v8  ;;  %v14247_v62 = vld [vmem:[#allocation108_spill] sm:$0xff]  ;;  %v2916_v52 = vsel %vm2570_vm2, %v11173_v8, -inf }
 0x3ed   : > { %7607 = vmatmul.mubr.msk.bf16.vlgmr.msra.gmra.mrb[88].mxu0 %vm2570_vm2, %v3980_v43  ;;  %v3359_v22 = vpop.xlane.xlu1 %3358  ;;  %v11179_v53 = vadd.f32 %v14247_v62, %v2379_v40  ;;  %v14250_v43 = vld [vmem:[#allocation73_spill] sm:$0xff]  ;;  %v11191_v9 = vpop.eup %8149  ;;  %v14253_v40 = vld [vmem:[#allocation132_spill] sm:$0xff] }
 0x3ee   : > { %7615 = vmatpush3.bf16.msra.mxu0 %v14243_v55  ;;  %3439 = vadd.xlane.f32.xlu1 %v3438_v47  ;;  %8153 = vrcp.f32 %v3359_v22  ;;  %v2998_v57 = vsub.f32 %v14250_v43, %v10762_v19  ;;  %v14251_v47 = vld [vmem:[#allocation110_spill] sm:$0xff]  ;;  %v14255_v62 = vld [vmem:[#allocation44_spill] sm:$0xff] }
 0x3ef   : > { %7616 = vmatprep.subr.bf16.mxu0 %v14245_v44  ;;  %2851 = vmax.xlane.f32.xlu0 %v2850_v36  ;;  %v3362_v50 = vpop.xlane.xlu0 %3361  ;;  %14248 = vst [vmem:[#allocation108_spill] sm:$0xff] %v11179_v53  ;;  %v11194_v55 = vadd.f32 %v14251_v47, %v2384_v16  ;;  %v14254_v36 = vld [vmem:[#allocation28_spill] sm:$0xff]  ;;  %v2862_v19 = vsel %vm2570_vm2, %v11179_v53, -inf  ;;  %v2398_v16 = vadd.f32 %v11028_v61, %v10858_v58 }
 0x3f0   : > { %8155 = vrcp.f32 %v3362_v50 }
 0x3f1   : > { %v3353_v11 = vpop.xlane.xlu1 %3352  ;;  %14252 = vst [vmem:[#allocation27_spill] sm:$0xff] %v11194_v55 }
 0x3f2   : > { %7617 = vmatpush3.bf16.msra.mxu0 %v14245_v44  ;;  %2908 = vmax.xlane.f32.xlu1 %v2907_v38  ;;  %8157 = vrcp.f32 %v3353_v11  ;;  %v2382_v44 = vadd.f32 %v11028_v61, %v14253_v40  ;;  %v3169_v38 = vmul.f32 1.442695, %v2998_v57  ;;  %v11212_v11 = vpop.eup %8151  ;;  %v14259_v57 = vld [vmem:[#allocation58_spill] sm:$0xff] }
 0x3f3   : > { %7618 = vmatprep.subr.bf16.mxu0 %v14249_v45  ;;  %2869 = vmax.xlane.f32.xlu0 %v2868_v23  ;;  %v3356_v7 = vpop.xlane.xlu0 %3355  ;;  %v3456_v23 = vsel %vm2570_vm2, %v11191_v9, 0.0 }
 0x3f4   : > { %8159 = vrcp.f32 %v3356_v7  ;;  %v14256_v7 = vld [vmem:[#allocation114_spill] sm:$0xff] }
 0x3f5   : > { %v11201_v22 = vpop.xlane.xlu1 %2758  ;;  %v11215_v43 = vadd.f32 %v14256_v7, %v2382_v44  ;;  %8161 = vpow2.f32 %v3169_v38  ;;  %v11227_v44 = vadd.f32 %v10769_v13, %v2398_v16 }
 0x3f6   : > { %7619 = vmatpush3.bf16.msra.mxu0 %v14249_v45  ;;  %2917 = vmax.xlane.f32.xlu1 %v2916_v52  ;;  %v2996_v45 = vsub.f32 %v14255_v62, %v10819_v20  ;;  %v14258_v52 = vld [vmem:[#allocation133_spill] sm:$0xff]  ;;  %v2877_v20 = vsel %vm2570_vm2, %v11194_v55, -inf  ;;  %v2401_v62 = vadd.f32 %v10862_v14, %v11052_v26  ;;  %v14264_v14 = vld [vmem:[#allocation98_spill] sm:$0xff]  ;;  %v14265_v55 = vld [vmem:[#allocation99_spill] sm:$0xff] }
 0x3f7   : > { %7620 = vmatprep.subr.bf16.mxu0 %v14254_v36  ;;  %2863 = vmax.xlane.f32.xlu0 %v2862_v19  ;;  %v11203_v50 = vpop.xlane.xlu0 %2761  ;;  %14257 = vst [vmem:[#allocation73_spill] sm:$0xff] %v11215_v43  ;;  %v2385_v47 = vadd.f32 %v14258_v52, %v11052_v26  ;;  %14260 = vst [vmem:[#allocation110_spill] sm:$0xff] %v11227_v44  ;;  %v14261_v52 = vld [vmem:[#allocation112_spill] sm:$0xff]  ;;  %v2871_v38 = vsel %vm2570_vm2, %v11215_v43, -inf }
 0x3f8   : > { %v8154_v40 = vpop.eup %8153  ;;  %v11248_v4 = vadd.f32 %v10867_v46, %v2401_v62 }
 0x3f9   : > { %v11222_v58 = vpop.xlane.xlu1 %2752  ;;  %v11234_v8 = vadd.f32 %v14261_v52, %v2385_v47  ;;  %v14266_v47 = vld [vmem:[#allocation100_spill] sm:$0xff] }
 0x3fa   : > { %7621 = vmatpush3.bf16.msra.mxu0 %v14254_v36  ;;  %3457 = vadd.xlane.f32.xlu1 %v3456_v23  ;;  %v3165_v36 = vmul.f32 1.442695, %v2996_v45  ;;  %v8156_v19 = vpop.eup %8155  ;;  %v3450_v23 = vsel %vm2570_vm2, %v11212_v11, 0.0  ;;  %14267 = vst [vmem:[#allocation28_spill] sm:$0xff] %v11248_v4 }
 0x3fb   : > { %7646 = vmatprep.subr.bf16.mxu0 %v14259_v57  ;;  %2878 = vmax.xlane.f32.xlu0 %v2877_v20  ;;  %v11224_v61 = vpop.xlane.xlu0 %2755  ;;  %14262 = vst [vmem:[#allocation132_spill] sm:$0xff] %v11234_v8  ;;  %v14263_v20 = vld [vmem:[#allocation136_spill] sm:$0xff]  ;;  %v3858_v26 = vmul.f32 %v8156_v19, %v14264_v14  ;;  %v14271_v19 = vld [vmem:[#allocation81_spill] sm:$0xff]  ;;  %v14275_v14 = vld [vmem:[#allocation127_spill] sm:$0xff] }
 0x3fc   : > { %v8158_v7 = vpop.eup %8157  ;;  %v2383_v29 = vadd.f32 %v11068_v3, %v14263_v20  ;;  %8163 = vpow2.f32 %v3165_v36  ;;  %v14268_v20 = vld [vmem:[#allocation97_spill] sm:$0xff] }
 0x3fd   : > { %v11240_v13 = vpop.xlane.xlu1 %2770  ;;  %v3855_v2 = vmul.f32 %v8158_v7, %v14265_v55  ;;  %v3857_v43 = vmul.f32 %v8154_v40, %v14268_v20  ;;  %v2880_v55 = vsel %vm2570_vm2, %v11234_v8, -inf  ;;  %v14272_v7 = vld [vmem:[#allocation14_spill] sm:$0xff] }
 0x3fe   : > { %3451 = vadd.xlane.f32.xlu1 %v3450_v23  ;;  %v8160_v45 = vpop.eup %8159  ;;  %v2919_v23 = vsel %vm2570_vm2, %v11227_v44, -inf  ;;  %v11254_v53 = vadd.f32 %v14269_v0, %v2383_v29  ;;  %v2989_v46 = vsub.f32 %v14272_v7, %v14271_v19  ;;  %v14273_v29 = vld [vmem:[#allocation86_spill] sm:$0xff]  ;;  %v14279_v7 = vld [vmem:[#allocation131_spill] sm:$0xff] }
 0x3ff   : > { %2872 = vmax.xlane.f32.xlu0 %v2871_v38  ;;  %v11242_v16 = vpop.xlane.xlu0 %2773  ;;  %v3856_v52 = vmul.f32 %v8160_v45, %v14266_v47  ;;  %v2389_v38 = vadd.f32 %v10802_v56, %v11122_v48  ;;  %v3982_v40 = vpack.c.bf16 %v3858_v26, %v3857_v43  ;;  %v3002_v0 = vsub.f32 %v14273_v29, %v10856_v63 }
 0x400   : > { %14270 = vst [vmem:[#allocation44_spill] sm:$0xff] %v11254_v53  ;;  %v2928_v56 = vsel %vm2570_vm2, %v11248_v4, -inf  ;;  %v2874_v43 = vsel %vm2570_vm2, %v11254_v53, -inf  ;;  %v3151_v63 = vmul.f32 1.442695, %v2989_v46  ;;  %v2402_v29 = vadd.f32 %v10941_v18, %v10996_v25  ;;  %v14282_v46 = vld [vmem:[#allocation129_spill] sm:$0xff] }
 0x401   : > { %v3981_v36 = vpack.c.bf16 %v3856_v52, %v3855_v2  ;;  %v11262_v62 = vpop.xlane.xlu1 %2764  ;;  %v11272_v2 = vpop.eup %8161  ;;  %v11275_v47 = vadd.f32 %v14275_v14, %v2389_v38  ;;  %v14277_v52 = vld [vmem:[#allocation15_spill] sm:$0xff]  ;;  %v14280_v38 = vld [vmem:[#allocation42_spill] sm:$0xff] }
 0x402   : > { %2920 = vmax.xlane.f32.xlu1 %v2919_v23  ;;  %14274 = vst [vmem:[#allocation114_spill] sm:$0xff] %v11272_v2  ;;  %v2387_v23 = vadd.f32 %v11005_v32, %v14277_v52  ;;  %8165 = vpow2.f32 %v3151_v63 }
 0x403   : > { %2881 = vmax.xlane.f32.xlu0 %v2880_v55  ;;  %v11264_v45 = vpop.xlane.xlu0 %2767  ;;  %7610 = vmatprep.mubr.msk.bf16.mxu0 %vm2570_vm2, %v3981_v36  ;;  %14276 = vst [vmem:[#allocation133_spill] sm:$0xff] %v11275_v47  ;;  %v3177_v55 = vmul.f32 1.442695, %v3002_v0  ;;  %v14278_v36 = vld [vmem:[#allocation87_spill] sm:$0xff]  ;;  %v2392_v0 = vadd.f32 %v10848_v33, %v11037_v49  ;;  %v2405_v33 = vadd.f32 %v11000_v12, %v11122_v48  ;;  %v14289_v12 = vld [vmem:[#allocation76_spill] sm:$0xff] }
 0x404   : > { %7611 = vmatmul.mubr.msk.bf16.gmra.mrb[92].mxu0 %vm2570_vm2, %v3982_v40  ;;  %v3000_v19 = vsub.f32 %v14278_v36, %v10914_v5  ;;  %v2987_v40 = vsub.f32 %v14280_v38, %v14279_v7  ;;  %v11296_v52 = vadd.f32 %v14282_v46, %v2387_v23  ;;  %v2892_v5 = vsel %vm2570_vm2, %v11275_v47, -inf  ;;  %v14284_v36 = vld [vmem:[#allocation88_spill] sm:$0xff] }
 0x405   : > { %v11281_v26 = vpop.xlane.xlu1 %2782  ;;  %8167 = vpow2.f32 %v3177_v55  ;;  %v3006_v7 = vsub.f32 %v14284_v36, %v10930_v17  ;;  %v11309_v38 = vadd.f32 %v10904_v31, %v2402_v29  ;;  %v3004_v48 = vsub.f32 %v14289_v12, %v10949_v24  ;;  %v14291_v36 = vld [vmem:[#allocation140_spill] sm:$0xff]  ;;  %v14297_v12 = vld [vmem:[#allocation91_spill] sm:$0xff] }
 0x406   : > { %2929 = vmax.xlane.f32.xlu1 %v2928_v56  ;;  %v3468_v56 = vsel %vm2570_vm2, %v11272_v2, 0.0  ;;  %v11293_v14 = vpop.eup %8163  ;;  %14283 = vst [vmem:[#allocation112_spill] sm:$0xff] %v11296_v52  ;;  %v3173_v25 = vmul.f32 1.442695, %v3000_v19  ;;  %v3147_v23 = vmul.f32 1.442695, %v2987_v40  ;;  %v11327_v29 = vadd.f32 %v10961_v10, %v2405_v33 }
 0x407   : > { %2875 = vmax.xlane.f32.xlu0 %v2874_v43  ;;  %v11283_v20 = vpop.xlane.xlu0 %2785  ;;  %14281 = vst [vmem:[#allocation58_spill] sm:$0xff] %v11293_v14  ;;  %14285 = vst [vmem:[#allocation136_spill] sm:$0xff] %v11309_v38  ;;  %v3462_v63 = vsel %vm2570_vm2, %v11293_v14, 0.0  ;;  %v2886_v17 = vsel %vm2570_vm2, %v11296_v52, -inf  ;;  %v3185_v40 = vmul.f32 1.442695, %v3006_v7 }
 0x408   : > { %8169 = vpow2.f32 %v3173_v25  ;;  %14290 = vst [vmem:[#allocation99_spill] sm:$0xff] %v11327_v29  ;;  %v14295_v7 = vld [vmem:[#allocation68_spill] sm:$0xff]  ;;  %v3181_v33 = vmul.f32 1.442695, %v3004_v48  ;;  %v14317_v52 = vld [vmem:[#allocation75_spill] sm:$0xff]  ;;  %v14323_v14 = vld [vmem:[#allocation146_spill] sm:$0xff] }
 0x409   : > { %v11302_v43 = vpop.xlane.xlu1 %2776  ;;  %8171 = vpow2.f32 %v3147_v23 }
 0x40a   : > { %3469 = vadd.xlane.f32.xlu1 %v3468_v56  ;;  %v14286_v56 = vld [vmem:[#allocation134_spill] sm:$0xff]  ;;  %8173 = vpow2.f32 %v3185_v40 }
 0x40b   : > { %2893 = vmax.xlane.f32.xlu0 %v2892_v5  ;;  %v11304_v18 = vpop.xlane.xlu0 %2779  ;;  %v11316_v46 = vadd.f32 %v14286_v56, %v2392_v0  ;;  %v14288_v5 = vld [vmem:[#allocation162_spill] sm:$0xff]  ;;  %v2931_v0 = vsel %vm2570_vm2, %v11309_v38, -inf  ;;  %v3010_v38 = vsub.f32 %v14297_v12, %v10971_v54  ;;  %8175 = vpow2.f32 %v3181_v33 }
 0x40c   : > { %v2391_v55 = vadd.f32 %v11068_v3, %v14288_v5  ;;  %v14293_v5 = vld [vmem:[#allocation150_spill] sm:$0xff]  ;;  %v11342_v44 = vpop.eup %8165 }
 0x40d   : > { %14287 = vst [vmem:[#allocation98_spill] sm:$0xff] %v11316_v46  ;;  %v2901_v25 = vsel %vm2570_vm2, %v11316_v46, -inf }
 0x40e   : > { %3463 = vadd.xlane.f32.xlu1 %v3462_v63  ;;  %v11322_v19 = vpop.xlane.xlu1 %3394  ;;  %v14292_v63 = vld [vmem:[#allocation70_spill] sm:$0xff]  ;;  %v11334_v4 = vadd.f32 %v14293_v5, %v2391_v55  ;;  %v14298_v55 = vld [vmem:[#allocation92_spill] sm:$0xff] }
 0x40f   : > { %2887 = vmax.xlane.f32.xlu0 %v2886_v17  ;;  %v3371_v31 = vpop.xlane.xlu0 %3370  ;;  %v2993_v56 = vsub.f32 %v14292_v63, %v14291_v36  ;;  %v14296_v17 = vld [vmem:[#allocation48_spill] sm:$0xff]  ;;  %v3008_v36 = vsub.f32 %v14298_v55, %v10998_v41  ;;  %v11348_v63 = vpop.eup %8167 }
 0x410   : > { %14294 = vst [vmem:[#allocation100_spill] sm:$0xff] %v11334_v4  ;;  %v2991_v24 = vsub.f32 %v14296_v17, %v14295_v7  ;;  %14299 = vst [vmem:[#allocation97_spill] sm:$0xff] %v11348_v63  ;;  %v3193_v7 = vmul.f32 1.442695, %v3010_v38  ;;  %v3480_v41 = vsel %vm2570_vm2, %v11348_v63, 0.0 }
 0x411   : > { %v3159_v5 = vmul.f32 1.442695, %v2993_v56  ;;  %v3189_v17 = vmul.f32 1.442695, %v3008_v36  ;;  %v3441_v56 = vsel %vm2570_vm2, %v11342_v44, 0.0  ;;  %v14304_v36 = vld [vmem:[#allocation66_spill] sm:$0xff] }
 0x412   : > { %2932 = vmax.xlane.f32.xlu1 %v2931_v0  ;;  %v3365_v23 = vpop.xlane.xlu1 %3364  ;;  %v2940_v0 = vsel %vm2570_vm2, %v11327_v29, -inf  ;;  %v3155_v40 = vmul.f32 1.442695, %v2991_v24  ;;  %v11356_v12 = vpop.eup %8169 }
 0x413   : > { %2902 = vmax.xlane.f32.xlu0 %v2901_v25  ;;  %v3389_v10 = vpop.xlane.xlu0 %3388  ;;  %v2898_v25 = vsel %vm2570_vm2, %v11334_v4, -inf  ;;  %14301 = vst [vmem:[#allocation81_spill] sm:$0xff] %v11356_v12  ;;  %8177 = vpow2.f32 %v3159_v5  ;;  %v11360_v55 = vpop.eup %8171  ;;  %v3474_v38 = vsel %vm2570_vm2, %v11356_v12, 0.0  ;;  %v14305_v5 = vld [vmem:[#allocation141_spill] sm:$0xff]  ;;  %v14320_v12 = vld [vmem:[#allocation122_spill] sm:$0xff] }
 0x414   : > { %8179 = vpow2.f32 %v3155_v40  ;;  %v11366_v33 = vpop.eup %8173  ;;  %v3435_v40 = vsel %vm2570_vm2, %v11360_v55, 0.0 }
 0x415   : > { %8181 = vpow2.f32 %v3193_v7  ;;  %14303 = vst [vmem:[#allocation86_spill] sm:$0xff] %v11366_v33 }
 0x416   : > { %2941 = vmax.xlane.f32.xlu1 %v2940_v0  ;;  %v11352_v48 = vpop.xlane.xlu1 %2794  ;;  %8183 = vpow2.f32 %v3189_v17 }
 0x417   : > { %14300 = vst [vmem:[#allocation116_spill] sm:$0xff] %v11352_v48  ;;  %2899 = vmax.xlane.f32.xlu0 %v2898_v25  ;;  %v3374_v54 = vpop.xlane.xlu0 %3373  ;;  %v11370_v25 = vadd.f32 %v14305_v5, %v14304_v36  ;;  %8185 = vrcp.f32 %v3371_v31  ;;  %v11380_v36 = vpop.eup %8175  ;;  %v14309_v5 = vld [vmem:[#allocation12_spill] sm:$0xff] }
 0x418   : > { %8187 = vrcp.f32 %v3374_v54  ;;  %14308 = vst [vmem:[#allocation15_spill] sm:$0xff] %v11380_v36 }
 0x419   : > { %14306 = vst [vmem:[#allocation127_spill] sm:$0xff] %v11370_v25  ;;  %8189 = vrcp.f32 %v3365_v23 }
 0x41a   : > { %3481 = vadd.xlane.f32.xlu1 %v3480_v41  ;;  %v11362_v24 = vpop.xlane.xlu1 %2788  ;;  %v14307_v41 = vld [vmem:[#allocation154_spill] sm:$0xff] }
 0x41b   : > { %14302 = vst [vmem:[#allocation14_spill] sm:$0xff] %v11362_v24  ;;  %3442 = vadd.xlane.f32.xlu0 %v3441_v56  ;;  %v3398_v0 = vpop.xlane.xlu0 %3397  ;;  %v2395_v29 = vadd.f32 %v11005_v32, %v14307_v41  ;;  %v3492_v56 = vsel %vm2570_vm2, %v11366_v33, 0.0  ;;  %v2913_v32 = vsel %vm2570_vm2, %v11370_v25, -inf  ;;  %v14312_v41 = vld [vmem:[#allocation71_spill] sm:$0xff] }
 0x41c   : > { %8191 = vrcp.f32 %v3398_v0 }
 0x41d   : > { %v11383_v46 = vadd.f32 %v14309_v5, %v2395_v29  ;;  %v11389_v23 = vpop.eup %8177 }
 0x41e   : > { %3475 = vadd.xlane.f32.xlu1 %v3474_v38  ;;  %v11376_v7 = vpop.xlane.xlu1 %3382  ;;  %v11392_v0 = vpop.eup %8179  ;;  %v14311_v38 = vld [vmem:[#allocation145_spill] sm:$0xff] }
 0x41f   : > { %3436 = vadd.xlane.f32.xlu0 %v3435_v40  ;;  %v3368_v17 = vpop.xlane.xlu0 %3367  ;;  %14310 = vst [vmem:[#allocation87_spill] sm:$0xff] %v11383_v46  ;;  %v2997_v29 = vsub.f32 %v14312_v41, %v14311_v38  ;;  %v3486_v40 = vsel %vm2570_vm2, %v11380_v36, 0.0  ;;  %v14316_v41 = vld [vmem:[#allocation152_spill] sm:$0xff] }
 0x420   : > { %8193 = vrcp.f32 %v3368_v17  ;;  %v11398_v17 = vpop.eup %8181  ;;  %v2995_v47 = vsub.f32 %v14317_v52, %v14316_v41  ;;  %v14321_v41 = vld [vmem:[#allocation120_spill] sm:$0xff] }
 0x421   : > { %8195 = vrcp.f32 %v3389_v10  ;;  %14313 = vst [vmem:[#allocation131_spill] sm:$0xff] %v11398_v17  ;;  %v2910_v10 = vsel %vm2570_vm2, %v11383_v46, -inf  ;;  %v3167_v4 = vmul.f32 1.442695, %v2997_v29  ;;  %v3453_v46 = vsel %vm2570_vm2, %v11389_v23, 0.0 }
 0x422   : > { %3493 = vadd.xlane.f32.xlu1 %v3492_v56  ;;  %v11387_v31 = vpop.xlane.xlu1 %3406  ;;  %8197 = vrcp.f32 %v11322_v19  ;;  %v11402_v56 = vpop.eup %8183  ;;  %v3163_v48 = vmul.f32 1.442695, %v2995_v47 }
 0x423   : > { %2914 = vmax.xlane.f32.xlu0 %v2913_v32  ;;  %14314 = vst [vmem:[#allocation42_spill] sm:$0xff] %v11402_v56  ;;  %v8186_v32 = vpop.eup %8185  ;;  %v3498_v52 = vsel %vm2570_vm2, %v11402_v56, 0.0  ;;  %v14327_v56 = vld [vmem:[#allocation123_spill] sm:$0xff] }
 0x424   : > { %v3392_v54 = vpop.xlane.xlu0 %3391  ;;  %v8188_v25 = vpop.eup %8187 }
 0x425   : > { %8199 = vrcp.f32 %v3392_v54  ;;  %v3504_v54 = vsel %vm2570_vm2, %v11398_v17, 0.0  ;;  %v8190_v38 = vpop.eup %8189  ;;  %v3862_v2 = vmul.f32 %v8188_v25, %v14320_v12  ;;  %v3447_v12 = vsel %vm2570_vm2, %v11392_v0, 0.0 }
 0x426   : > { %3487 = vadd.xlane.f32.xlu1 %v3486_v40  ;;  %v3377_v5 = vpop.xlane.xlu1 %3376  ;;  %v14318_v40 = vld [vmem:[#allocation158_spill] sm:$0xff]  ;;  %8201 = vpow2.f32 %v3167_v4  ;;  %v3859_v33 = vmul.f32 %v8190_v38, %v14321_v41  ;;  %v14326_v4 = vld [vmem:[#allocation163_spill] sm:$0xff] }
 0x427   : > { %2911 = vmax.xlane.f32.xlu0 %v2910_v10  ;;  %v2400_v8 = vadd.f32 %v14318_v40, %v11037_v49  ;;  %v8192_v10 = vpop.eup %8191  ;;  %v14322_v49 = vld [vmem:[#allocation78_spill] sm:$0xff]  ;;  %8203 = vpow2.f32 %v3163_v48  ;;  %v14335_v48 = vld [vmem:[#allocation156_spill] sm:$0xff] }
 0x428   : > { %v11404_v19 = vpop.xlane.xlu0 %2797  ;;  %v3870_v24 = vmul.f32 %v8192_v10, %v14327_v56  ;;  %v14332_v10 = vld [vmem:[#allocation165_spill] sm:$0xff] }
 0x429   : > { %14315 = vst [vmem:[#allocation129_spill] sm:$0xff] %v11404_v19  ;;  %v11422_v36 = vadd.f32 %v14323_v14, %v2400_v8  ;;  %v14329_v8 = vld [vmem:[#allocation121_spill] sm:$0xff] }
 0x42a   : > { %3505 = vadd.xlane.f32.xlu1 %v3504_v54  ;;  %v3401_v53 = vpop.xlane.xlu1 %3400  ;;  %v8194_v29 = vpop.eup %8193 }
 0x42b   : > { %3454 = vadd.xlane.f32.xlu0 %v3453_v46  ;;  %v8196_v17 = vpop.eup %8195  ;;  %v3860_v54 = vmul.f32 %v8194_v29, %v14322_v49  ;;  %14324 = vst [vmem:[#allocation134_spill] sm:$0xff] %v11422_v36  ;;  %v14325_v46 = vld [vmem:[#allocation118_spill] sm:$0xff]  ;;  %v14330_v49 = vld [vmem:[#allocation79_spill] sm:$0xff] }
 0x42c   : > { %v11414_v63 = vpop.xlane.xlu0 %2791  ;;  %v8198_v40 = vpop.eup %8197  ;;  %v3861_v19 = vmul.f32 %v8186_v32, %v14325_v46  ;;  %v3867_v14 = vmul.f32 %v8196_v17, %v14329_v8  ;;  %v14341_v8 = vld [vmem:[#allocation164_spill] sm:$0xff] }
 0x42d   : > { %14319 = vst [vmem:[#allocation88_spill] sm:$0xff] %v11414_v63  ;;  %v2399_v63 = vadd.f32 %v11068_v3, %v14326_v4  ;;  %v3983_v29 = vpack.c.bf16 %v3860_v54, %v3859_v33  ;;  %v2925_v3 = vsel %vm2570_vm2, %v11422_v36, -inf  ;;  %v14336_v54 = vld [vmem:[#allocation77_spill] sm:$0xff] }
 0x42e   : > { %3499 = vadd.xlane.f32.xlu1 %v3498_v52  ;;  %v11430_v38 = vpop.xlane.xlu1 %2806  ;;  %v3984_v41 = vpack.c.bf16 %v3862_v2, %v3861_v19  ;;  %v14331_v52 = vld [vmem:[#allocation119_spill] sm:$0xff]  ;;  %v14334_v19 = vld [vmem:[#allocation50_spill] sm:$0xff]  ;;  %v14360_v36 = vld [vmem:[#allocation89_spill] sm:$0xff] }
 0x42f   : > { %v8200_v25 = vpop.eup %8199  ;;  %14328 = vst [vmem:[#allocation162_spill] sm:$0xff] %v11430_v38  ;;  %3448 = vadd.xlane.f32.xlu0 %v3447_v12  ;;  %v3869_v46 = vmul.f32 %v8198_v40, %v14331_v52  ;;  %7622 = vmatprep.mubr.msk.bf16.mxu0 %vm2570_vm2, %v3983_v29  ;;  %v11440_v12 = vadd.f32 %v14332_v10, %v2399_v63 }
 0x430   : > { %v3386_v47 = vpop.xlane.xlu0 %3385  ;;  %v3868_v32 = vmul.f32 %v8200_v25, %v14330_v49  ;;  %7623 = vmatmul.mubr.msk.bf16.vlgmr.msra.gmra.mrb[96].mxu0 %vm2570_vm2, %v3984_v41  ;;  %v3001_v40 = vsub.f32 %v14336_v54, %v14335_v48  ;;  %v14337_v25 = vld [vmem:[#allocation63_spill] sm:$0xff]  ;;  %v11451_v63 = vpop.eup %8201  ;;  %v14340_v41 = vld [vmem:[#allocation62_spill] sm:$0xff]  ;;  %v14343_v49 = vld [vmem:[#allocation65_spill] sm:$0xff] }
 0x431   : > { %14333 = vst [vmem:[#allocation76_spill] sm:$0xff] %v11440_v12  ;;  %v3988_v33 = vpack.c.bf16 %v3870_v24, %v3869_v46  ;;  %7647 = vmatpush3.bf16.msra.mxu0 %v14259_v57  ;;  %8205 = vrcp.f32 %v3386_v47  ;;  %14338 = vst [vmem:[#allocation140_spill] sm:$0xff] %v11451_v63  ;;  %v14339_v57 = vld [vmem:[#allocation64_spill] sm:$0xff]  ;;  %v2922_v4 = vsel %vm2570_vm2, %v11440_v12, -inf  ;;  %v11470_v46 = vpop.eup %8203  ;;  %v14349_v48 = vld [vmem:[#allocation6_spill] sm:$0xff] }
 0x432   : > { %v3987_v56 = vpack.c.bf16 %v3868_v32, %v3867_v14  ;;  %v11443_v2 = vpop.xlane.xlu1 %2800  ;;  %7648 = vmatprep.subr.bf16.mxu0 %v14334_v19  ;;  %8207 = vrcp.f32 %v3377_v5  ;;  %v3175_v47 = vmul.f32 1.442695, %v3001_v40  ;;  %v14342_v14 = vld [vmem:[#allocation85_spill] sm:$0xff] }
 0x433   : > { %2926 = vmax.xlane.f32.xlu0 %v2925_v3  ;;  %8209 = vrcp.f32 %v11376_v7  ;;  %v2999_v5 = vsub.f32 %v14342_v14, %v14341_v8  ;;  %v3465_v7 = vsel %vm2570_vm2, %v11451_v63, 0.0  ;;  %v14352_v8 = vld [vmem:[#allocation177_spill] sm:$0xff] }
 0x434   : > { %v3410_v17 = vpop.xlane.xlu0 %3409  ;;  %7638 = vmatprep.mubr.msk.bf16.mxu1 %vm2570_vm2, %v3987_v56  ;;  %v14344_v56 = vld [vmem:[#allocation5_spill] sm:$0xff]  ;;  %v11492_v14 = vadd.f32 %v14352_v8, %v11019_v15 }
 0x435   : > { %7639 = vmatmul.mubr.msk.bf16.vlgmr.msra.gmra.mrb[72].mxu1 %vm2570_vm2, %v3988_v33  ;;  %7649 = vmatpush3.bf16.msra.mxu0 %v14334_v19  ;;  %v3171_v3 = vmul.f32 1.442695, %v2999_v5  ;;  %v14346_v33 = vld [vmem:[#allocation160_spill] sm:$0xff] }
 0x436   : > { %7663 = vmatpush3.bf16.msra.mxu1 %v14337_v25  ;;  %v11455_v24 = vpop.xlane.xlu1 %2818  ;;  %7650 = vmatprep.subr.bf16.mxu0 %v14340_v41  ;;  %14353 = vst [vmem:[#allocation68_spill] sm:$0xff] %v11492_v14 }
 0x437   : > { %7664 = vmatprep.subr.bf16.mxu1 %v14339_v57  ;;  %2923 = vmax.xlane.f32.xlu0 %v2922_v4 }
 0x438   : > { %v3380_v29 = vpop.xlane.xlu0 %3379 }
 0x439   : > { %8211 = vrcp.f32 %v3380_v29  ;;  %7651 = vmatpush3.bf16.msra.mxu0 %v14340_v41  ;;  %v14350_v29 = vld [vmem:[#allocation83_spill] sm:$0xff]  ;;  %v14351_v41 = vld [vmem:[#allocation74_spill] sm:$0xff] }
 0x43a   : > { %8213 = vrcp.f32 %v3410_v17  ;;  %7665 = vmatpush3.bf16.msra.mxu1 %v14339_v57  ;;  %v11466_v32 = vpop.xlane.xlu1 %2812  ;;  %v11478_v17 = vadd.f32 %v14346_v33, %v10994_v59  ;;  %v3003_v59 = vsub.f32 %v14351_v41, %v14350_v29  ;;  %v14358_v29 = vld [vmem:[#allocation124_spill] sm:$0xff] }
 0x43b   : > { %8215 = vrcp.f32 %v3401_v53  ;;  %7666 = vmatprep.subr.bf16.mxu1 %v14343_v49  ;;  %3466 = vadd.xlane.f32.xlu0 %v3465_v7  ;;  %v14345_v53 = vld [vmem:[#allocation72_spill] sm:$0xff]  ;;  %v8206_v40 = vpop.eup %8205 }
 0x43c   : > { %v3404_v52 = vpop.xlane.xlu0 %3403  ;;  %8217 = vrcp.f32 %v11387_v31  ;;  %v3005_v10 = vsub.f32 %v14345_v53, %v14344_v56  ;;  %14347 = vst [vmem:[#allocation70_spill] sm:$0xff] %v11478_v17  ;;  %v3459_v31 = vsel %vm2570_vm2, %v11470_v46, 0.0  ;;  %v8208_v25 = vpop.eup %8207  ;;  %v2937_v7 = vsel %vm2570_vm2, %v11478_v17, -inf }
 0x43d   : > { %8219 = vrcp.f32 %v3404_v52  ;;  %v8210_v57 = vpop.eup %8209  ;;  %v3179_v12 = vmul.f32 1.442695, %v3003_v59 }
 0x43e   : > { %8221 = vpow2.f32 %v3175_v47  ;;  %7667 = vmatpush3.bf16.msra.mxu1 %v14343_v49  ;;  %v11480_v19 = vpop.xlane.xlu1 %2830  ;;  %v3183_v4 = vmul.f32 1.442695, %v3005_v10  ;;  %v14354_v49 = vld [vmem:[#allocation17_spill] sm:$0xff]  ;;  %v14356_v10 = vld [vmem:[#allocation126_spill] sm:$0xff]  ;;  %v3865_v41 = vmul.f32 %v8210_v57, %v14358_v29  ;;  %v14366_v29 = vld [vmem:[#allocation176_spill] sm:$0xff] }
 0x43f   : > { %14348 = vst [vmem:[#allocation150_spill] sm:$0xff] %v11480_v19  ;;  %4405 = vrot.lane.b32.xlu1 %v14349_v48, %s8630_s18  ;;  %3460 = vadd.xlane.f32.xlu0 %v3459_v31  ;;  %8223 = vpow2.f32 %v3171_v3  ;;  %v14355_v3 = vld [vmem:[#allocation137_spill] sm:$0xff]  ;;  %v3863_v33 = vmul.f32 %v8208_v25, %v14356_v10  ;;  %v14357_v48 = vld [vmem:[#allocation67_spill] sm:$0xff]  ;;  %v14363_v57 = vld [vmem:[#allocation82_spill] sm:$0xff] }
 0x440   : > { %v11486_v54 = vpop.xlane.xlu0 %2809  ;;  %v3866_v56 = vmul.f32 %v8206_v40, %v14355_v3  ;;  %8225 = vpow2.f32 %v3183_v4  ;;  %v2934_v40 = vsel %vm2570_vm2, %v11492_v14, -inf  ;;  %v14377_v14 = vld [vmem:[#allocation106_spill] sm:$0xff] }
 0x441   : > { %8227 = vpow2.f32 %v3179_v12 }
 0x442   : > { %v11494_v5 = vpop.xlane.xlu1 %2824  ;;  %v3986_v25 = vpack.c.bf16 %v3866_v56, %v3865_v41 }
 0x443   : > { %v8212_v47 = vpop.eup %8211  ;;  %4488 = vrot.lane.b32.xlu1 %v14354_v49, %s8630_s18  ;;  %2938 = vmax.xlane.f32.xlu0 %v2937_v7  ;;  %v14359_v49 = vld [vmem:[#allocation172_spill] sm:$0xff] }
 0x444   : > { %v11500_v52 = vpop.xlane.xlu0 %2803  ;;  %v8214_v53 = vpop.eup %8213  ;;  %v3864_v31 = vmul.f32 %v8212_v47, %v14357_v48  ;;  %v3009_v63 = vsub.f32 %v14360_v36, %v14359_v49  ;;  %v14361_v47 = vld [vmem:[#allocation139_spill] sm:$0xff]  ;;  %v14367_v49 = vld [vmem:[#allocation90_spill] sm:$0xff] }
 0x445   : > { %v8216_v15 = vpop.eup %8215  ;;  %v3874_v3 = vmul.f32 %v8214_v53, %v14361_v47  ;;  %v14364_v36 = vld [vmem:[#allocation143_spill] sm:$0xff]  ;;  %v3007_v56 = vsub.f32 %v14367_v49, %v14366_v29 }
 0x446   : > { %v8218_v8 = vpop.eup %8217  ;;  %v3985_v17 = vpack.c.bf16 %v3864_v31, %v3863_v33  ;;  %v11508_v38 = vpop.xlane.xlu1 %3421  ;;  %v3871_v4 = vmul.f32 %v8216_v15, %v14363_v57  ;;  %v14365_v33 = vld [vmem:[#allocation125_spill] sm:$0xff]  ;;  %v3191_v31 = vmul.f32 1.442695, %v3009_v63 }
 0x447   : > { %v8220_v19 = vpop.eup %8219  ;;  %2935 = vmax.xlane.f32.xlu0 %v2934_v40  ;;  %v3873_v48 = vmul.f32 %v8218_v8, %v14365_v33  ;;  %v3187_v12 = vmul.f32 1.442695, %v3007_v56 }
 0x448   : > { %v11512_v7 = vpop.xlane.xlu0 %2821  ;;  %v11515_v10 = vpop.eup %8221  ;;  %7626 = vmatprep.mubr.msk.bf16.mxu0 %vm2570_vm2, %v3985_v17  ;;  %v3872_v59 = vmul.f32 %v8220_v19, %v14364_v36  ;;  %8229 = vpow2.f32 %v3191_v31 }
 0x449   : > { %14362 = vst [vmem:[#allocation48_spill] sm:$0xff] %v11515_v10  ;;  %7627 = vmatmul.mubr.msk.bf16.gmra.mrb[100].mxu0 %vm2570_vm2, %v3986_v25  ;;  %v3477_v40 = vsel %vm2570_vm2, %v11515_v10, 0.0  ;;  %v3990_v17 = vpack.c.bf16 %v3874_v3, %v3873_v48  ;;  %v11528_v15 = vpop.eup %8223  ;;  %8231 = vpow2.f32 %v3187_v12 }
 0x44a   : > { %v3989_v41 = vpack.c.bf16 %v3872_v59, %v3871_v4  ;;  %v3416_v53 = vpop.xlane.xlu1 %3415  ;;  %14368 = vst [vmem:[#allocation91_spill] sm:$0xff] %v11528_v15  ;;  %v3471_v19 = vsel %vm2570_vm2, %v11528_v15, 0.0  ;;  %v11538_v25 = vpop.eup %8225  ;;  %v14370_v59 = vld [vmem:[#allocation96_spill] sm:$0xff] }
 0x44b   : > { %3478 = vadd.xlane.f32.xlu0 %v3477_v40  ;;  %v3489_v57 = vsel %vm2570_vm2, %v11538_v25, 0.0  ;;  %v11546_v36 = vpop.eup %8227  ;;  %v3012_v33 = vsub.f32 %v14370_v59, %v11152_v37  ;;  %8233 = vrcp.f32 %v3416_v53 }
 0x44c   : > { %v11526_v47 = vpop.xlane.xlu0 %2815  ;;  %7642 = vmatprep.mubr.msk.bf16.mxu1 %vm2570_vm2, %v3989_v41  ;;  %v3483_v31 = vsel %vm2570_vm2, %v11546_v36, 0.0  ;;  %v14371_v41 = vld [vmem:[#allocation109_spill] sm:$0xff] }
 0x44d   : > { %7643 = vmatmul.mubr.msk.bf16.gmra.mrb[76].mxu1 %vm2570_vm2, %v3990_v17  ;;  %v3197_v56 = vmul.f32 1.442695, %v3012_v33  ;;  %v3020_v40 = vsub.f32 %v14371_v41, %v11264_v45  ;;  %v14373_v45 = vld [vmem:[#allocation94_spill] sm:$0xff]  ;;  %v11576_v41 = vadd.f32 %v11086_v28, %v11055_v39 }
 0x44e   : > { %v11532_v63 = vpop.xlane.xlu1 %2842  ;;  %v3014_v53 = vsub.f32 %v14373_v45, %v11126_v51  ;;  %v14379_v28 = vld [vmem:[#allocation170_spill] sm:$0xff] }
 0x44f   : > { %14369 = vst [vmem:[#allocation92_spill] sm:$0xff] %v11532_v63  ;;  %3472 = vadd.xlane.f32.xlu0 %v3471_v19  ;;  %8235 = vpow2.f32 %v3197_v56  ;;  %14374 = vst [vmem:[#allocation141_spill] sm:$0xff] %v11576_v41 }
 0x450   : > { %v11536_v8 = vpop.xlane.xlu0 %2833 }
 0x452   : > { %v11540_v3 = vpop.xlane.xlu1 %2836  ;;  %v11556_v49 = vpop.eup %8229 }
 0x453   : > { %3490 = vadd.xlane.f32.xlu0 %v3489_v57  ;;  %v3501_v37 = vsel %vm2570_vm2, %v11556_v49, 0.0  ;;  %v11564_v19 = vpop.eup %8231  ;;  %v3213_v57 = vmul.f32 1.442695, %v3020_v40 }
 0x454   : > { %v11544_v4 = vpop.xlane.xlu0 %2827  ;;  %v3495_v33 = vsel %vm2570_vm2, %v11564_v19, 0.0 }
 0x456   : > { %v11550_v48 = vpop.xlane.xlu1 %3433 }
 0x457   : > { %3484 = vadd.xlane.f32.xlu0 %v3483_v31 }
 0x458   : > { %v11554_v29 = vpop.xlane.xlu0 %3418 }
 0x45a   : > { %v11560_v17 = vpop.xlane.xlu1 %3427 }
 0x45b   : > { %3502 = vadd.xlane.f32.xlu0 %v3501_v37  ;;  %v8234_v37 = vpop.eup %8233 }
 0x45c   : > { %v3413_v12 = vpop.xlane.xlu0 %3412  ;;  %v11584_v63 = vpop.eup %8235 }
 0x45d   : > { %8237 = vrcp.f32 %v3413_v12  ;;  %v3201_v12 = vmul.f32 1.442695, %v3014_v53 }
 0x45e   : > { %v11566_v59 = vpop.xlane.xlu1 %2866  ;;  %8239 = vpow2.f32 %v3213_v57 }
 0x45f   : > { %14372 = vst [vmem:[#allocation66_spill] sm:$0xff] %v11566_v59  ;;  %3496 = vadd.xlane.f32.xlu0 %v3495_v33  ;;  %v3022_v59 = vsub.f32 %v14377_v14, %v11242_v16  ;;  %v2943_v33 = vsel %vm2570_vm2, %v11576_v41, -inf  ;;  %8241 = vpow2.f32 %v3201_v12  ;;  %v3510_v16 = vsel %vm2570_vm2, %v11584_v63, 0.0 }
 0x460   : > { %v11570_v31 = vpop.xlane.xlu0 %2845 }
 0x461   : > { %v3217_v53 = vmul.f32 1.442695, %v3022_v59 }
 0x462   : > { %v11578_v56 = vpop.xlane.xlu1 %2860 }
 0x463   : > { %14375 = vst [vmem:[#allocation154_spill] sm:$0xff] %v11578_v56  ;;  %v14380_v56 = vld [vmem:[#allocation157_spill] sm:$0xff]  ;;  %8243 = vpow2.f32 %v3217_v53 }
 0x464   : > { %v11580_v40 = vpop.xlane.xlu0 %2839 }
 0x465   : > { %14376 = vst [vmem:[#allocation12_spill] sm:$0xff] %v11580_v40  ;;  %v3876_v40 = vmul.f32 %v8234_v37, %v14380_v56 }
 0x466   : > { %v11588_v57 = vpop.xlane.xlu1 %2890 }
 0x467   : > { %v8238_v51 = vpop.eup %8237  ;;  %14378 = vst [vmem:[#allocation145_spill] sm:$0xff] %v11588_v57  ;;  %2944 = vmax.xlane.f32.xlu1 %v2943_v33  ;;  %v11605_v33 = vadd.f32 %v11104_v34, %v11071_v1  ;;  %v14388_v1 = vld [vmem:[#allocation2_spill] sm:$0xff]  ;;  %v14395_v57 = vld [vmem:[#allocation95_spill] sm:$0xff] }
 0x468   : > { %v11590_v39 = vpop.xlane.xlu0 %3430  ;;  %v3875_v45 = vmul.f32 %v8238_v51, %v14379_v28  ;;  %v11596_v10 = vpop.eup %8239 }
 0x469   : > { %14382 = vst [vmem:[#allocation152_spill] sm:$0xff] %v11605_v33  ;;  %v3534_v59 = vsel %vm2570_vm2, %v11596_v10, 0.0  ;;  %v2952_v37 = vsel %vm2570_vm2, %v11605_v33, -inf  ;;  %v11615_v12 = vpop.eup %8241 }
 0x46a   : > { %v3991_v14 = vpack.c.bf16 %v3876_v40, %v3875_v45  ;;  %v11598_v15 = vpop.xlane.xlu1 %2884  ;;  %14385 = vst [vmem:[#allocation122_spill] sm:$0xff] %v11615_v12  ;;  %v3516_v34 = vsel %vm2570_vm2, %v11615_v12, 0.0  ;;  %v3011_v12 = vsub.f32 %v14395_v57, %v11150_v35  ;;  %v14401_v35 = vld [vmem:[#allocation30_spill] sm:$0xff] }
 0x46b   : > { %14381 = vst [vmem:[#allocation71_spill] sm:$0xff] %v11598_v15  ;;  %3511 = vadd.xlane.f32.xlu1 %v3510_v16 }
 0x46c   : > { %v11600_v41 = vpop.xlane.xlu0 %3424  ;;  %7654 = vmatprep.mubr.msk.bf16.mxu0 %vm2570_vm2, %v3991_v14  ;;  %v14391_v14 = vld [vmem:[#allocation37_spill] sm:$0xff] }
 0x46d   : > { %v11625_v45 = vpop.eup %8243 }
 0x46e   : > { %v11609_v56 = vpop.xlane.xlu1 %2896  ;;  %14389 = vst [vmem:[#allocation146_spill] sm:$0xff] %v11625_v45 }
 0x46f   : > { %14383 = vst [vmem:[#allocation75_spill] sm:$0xff] %v11609_v56  ;;  %3535 = vadd.xlane.f32.xlu1 %v3534_v59  ;;  %v3540_v59 = vsel %vm2570_vm2, %v11625_v45, 0.0 }
 0x470   : > { %v11611_v40 = vpop.xlane.xlu0 %2854 }
 0x471   : > { %14384 = vst [vmem:[#allocation158_spill] sm:$0xff] %v11611_v40  ;;  %v3195_v40 = vmul.f32 1.442695, %v3011_v12  ;;  %v14403_v12 = vld [vmem:[#allocation93_spill] sm:$0xff] }
 0x472   : > { %v11617_v51 = vpop.xlane.xlu1 %2905 }
 0x473   : > { %14386 = vst [vmem:[#allocation120_spill] sm:$0xff] %v11617_v51  ;;  %2953 = vmax.xlane.f32.xlu1 %v2952_v37  ;;  %8245 = vpow2.f32 %v3195_v40 }
 0x474   : > { %v11619_v28 = vpop.xlane.xlu0 %2848 }
 0x475   : > { %14387 = vst [vmem:[#allocation78_spill] sm:$0xff] %v11619_v28  ;;  %4316 = vrot.lane.b32.xlu0 %v14388_v1, %s8630_s18 }
 0x477   : > { %v11627_v53 = vpop.xlane.xlu1 %3445  ;;  %3517 = vadd.xlane.f32.xlu1 %v3516_v34 }
 0x478   : > { %v11629_v16 = vpop.xlane.xlu0 %2857 }
 0x479   : > { %14390 = vst [vmem:[#allocation118_spill] sm:$0xff] %v11629_v16  ;;  %4577 = vrot.lane.b32.xlu0 %v14391_v14, %s8630_s18 }
 0x47b   : > { %v11635_v37 = vpop.xlane.xlu1 %3439  ;;  %3541 = vadd.xlane.f32.xlu1 %v3540_v59  ;;  %v14397_v59 = vld [vmem:[#allocation107_spill] sm:$0xff] }
 0x47c   : > { %v11637_v1 = vpop.xlane.xlu0 %2851  ;;  %v3019_v45 = vsub.f32 %v14397_v59, %v11262_v62 }
 0x47d   : > { %14392 = vst [vmem:[#allocation163_spill] sm:$0xff] %v11637_v1 }
 0x47f   : > { %v11639_v33 = vpop.xlane.xlu1 %2908 }
 0x480   : > { %14393 = vst [vmem:[#allocation123_spill] sm:$0xff] %v11639_v33  ;;  %v11641_v51 = vpop.xlane.xlu0 %2869  ;;  %v14398_v33 = vld [vmem:[#allocation29_spill] sm:$0xff] }
 0x483   : > { %v11643_v56 = vpop.xlane.xlu1 %2917 }
 0x484   : > { %14394 = vst [vmem:[#allocation121_spill] sm:$0xff] %v11643_v56  ;;  %v11645_v34 = vpop.xlane.xlu0 %2863  ;;  %v3211_v56 = vmul.f32 1.442695, %v3019_v45  ;;  %v14406_v45 = vld [vmem:[#allocation105_spill] sm:$0xff] }
 0x486   : > { %8247 = vpow2.f32 %v3211_v56  ;;  %v11685_v56 = vpop.eup %8245 }
 0x487   : > { %v11649_v14 = vpop.xlane.xlu1 %3457 }
 0x488   : > { %v11651_v15 = vpop.xlane.xlu0 %2878 }
 0x489   : > { %14396 = vst [vmem:[#allocation79_spill] sm:$0xff] %v11651_v15  ;;  %v3013_v15 = vsub.f32 %v14403_v12, %v11124_v60 }
 0x48b   : > { %v11655_v1 = vpop.xlane.xlu1 %3451  ;;  %v3199_v40 = vmul.f32 1.442695, %v3013_v15  ;;  %v3507_v15 = vsel %vm2570_vm2, %v11685_v56, 0.0 }
 0x48c   : > { %4579 = vrot.lane.b32.xlu1 %v14398_v33, %s8630_s18  ;;  %v11659_v16 = vpop.xlane.xlu0 %2872  ;;  %v11673_v33 = vadd.f32 %v11144_v30, %v11081_v6 }
 0x48d   : > { %14399 = vst [vmem:[#allocation119_spill] sm:$0xff] %v11659_v16  ;;  %8249 = vpow2.f32 %v3199_v40 }
 0x48e   : > { %14405 = vst [vmem:[#allocation77_spill] sm:$0xff] %v11673_v33  ;;  %v2946_v60 = vsel %vm2570_vm2, %v11673_v33, -inf }
 0x48f   : > { %v11661_v28 = vpop.xlane.xlu1 %2920 }
 0x490   : > { %14400 = vst [vmem:[#allocation165_spill] sm:$0xff] %v11661_v28  ;;  %4492 = vrot.lane.b32.xlu1 %v14401_v35, %s8630_s18  ;;  %v11665_v57 = vpop.xlane.xlu0 %2881  ;;  %v3021_v28 = vsub.f32 %v14406_v45, %v11240_v13  ;;  %v11693_v13 = vpop.eup %8247  ;;  %v14409_v45 = vld [vmem:[#allocation103_spill] sm:$0xff] }
 0x491   : > { %14402 = vst [vmem:[#allocation50_spill] sm:$0xff] %v11665_v57 }
 0x492   : > { %v3215_v12 = vmul.f32 1.442695, %v3021_v28  ;;  %v8617_v28 = vld [vmem:[%s13653_s6 + $0xf0] sm:$0xff] }
 0x493   : > { %v11669_v62 = vpop.xlane.xlu1 %2929  ;;  %v11703_v40 = vadd.f32 %v8617_v28, %v11047_v42  ;;  %v14417_v42 = vld [vmem:[#allocation102_spill] sm:$0xff] }
 0x494   : > { %14404 = vst [vmem:[#allocation156_spill] sm:$0xff] %v11669_v62  ;;  %v11675_v59 = vpop.xlane.xlu0 %2875  ;;  %v3015_v62 = vsub.f32 %v14409_v45, %v11222_v58  ;;  %8251 = vpow2.f32 %v3215_v12  ;;  %v3018_v28 = vsub.f32 %v14417_v42, %v11203_v50 }
 0x495   : > { %14411 = vst [vmem:[#allocation164_spill] sm:$0xff] %v11703_v40 }
 0x497   : > { %v11679_v16 = vpop.xlane.xlu1 %3469  ;;  %v11717_v57 = vpop.eup %8249 }
 0x498   : > { %v11681_v35 = vpop.xlane.xlu0 %2893  ;;  %2947 = vmax.xlane.f32.xlu0 %v2946_v60  ;;  %14416 = vst [vmem:[#allocation72_spill] sm:$0xff] %v11717_v57 }
 0x499   : > { %14407 = vst [vmem:[#allocation63_spill] sm:$0xff] %v11681_v35  ;;  %v14413_v35 = vld [vmem:[#allocation117_spill] sm:$0xff] }
 0x49a   : > { %v3024_v58 = vsub.f32 %v14413_v35, %v11304_v18  ;;  %v3513_v18 = vsel %vm2570_vm2, %v11717_v57, 0.0 }
 0x49b   : > { %v11687_v6 = vpop.xlane.xlu1 %3463 }
 0x49c   : > { %v11689_v30 = vpop.xlane.xlu0 %2887  ;;  %3508 = vadd.xlane.f32.xlu0 %v3507_v15  ;;  %v3203_v15 = vmul.f32 1.442695, %v3015_v62 }
 0x49d   : > { %14408 = vst [vmem:[#allocation64_spill] sm:$0xff] %v11689_v30  ;;  %v3531_v30 = vsel %vm2570_vm2, %v11693_v13, 0.0 }
 0x49e   : > { %8253 = vpow2.f32 %v3203_v15  ;;  %v11725_v35 = vpop.eup %8251 }
 0x49f   : > { %v11697_v33 = vpop.xlane.xlu1 %2932  ;;  %14418 = vst [vmem:[#allocation160_spill] sm:$0xff] %v11725_v35  ;;  %v3537_v15 = vsel %vm2570_vm2, %v11725_v35, 0.0 }
 0x4a0   : > { %14410 = vst [vmem:[#allocation62_spill] sm:$0xff] %v11697_v33  ;;  %v11705_v60 = vpop.xlane.xlu0 %2902  ;;  %3532 = vadd.xlane.f32.xlu0 %v3531_v30  ;;  %v2949_v33 = vsel %vm2570_vm2, %v11703_v40, -inf  ;;  %v14419_v40 = vld [vmem:[#allocation113_spill] sm:$0xff] }
 0x4a1   : > { %14412 = vst [vmem:[#allocation85_spill] sm:$0xff] %v11705_v60  ;;  %v3221_v60 = vmul.f32 1.442695, %v3024_v58 }
 0x4a3   : > { %v11711_v12 = vpop.xlane.xlu1 %2941  ;;  %8255 = vpow2.f32 %v3221_v60 }
 0x4a4   : > { %14414 = vst [vmem:[#allocation65_spill] sm:$0xff] %v11711_v12  ;;  %v11713_v45 = vpop.xlane.xlu0 %2899  ;;  %2950 = vmax.xlane.f32.xlu0 %v2949_v33  ;;  %v3209_v12 = vmul.f32 1.442695, %v3018_v28  ;;  %8257 = vrcp.f32 %v11635_v37 }
 0x4a5   : > { %14415 = vst [vmem:[#allocation5_spill] sm:$0xff] %v11713_v45  ;;  %v3026_v45 = vsub.f32 %v14419_v40, %v11283_v20 }
 0x4a7   : > { %v11721_v30 = vpop.xlane.xlu1 %3481  ;;  %v3225_v58 = vmul.f32 1.442695, %v3026_v45 }
 0x4a8   : > { %v3443_v62 = vpop.xlane.xlu0 %3442  ;;  %3514 = vadd.xlane.f32.xlu0 %v3513_v18  ;;  %v11736_v18 = vpop.eup %8253 }
 0x4a9   : > { %14420 = vst [vmem:[#allocation6_spill] sm:$0xff] %v11736_v18  ;;  %v3519_v37 = vsel %vm2570_vm2, %v11736_v18, 0.0 }
 0x4ab   : > { %v11730_v33 = vpop.xlane.xlu1 %3475 }
 0x4ac   : > { %v3437_v50 = vpop.xlane.xlu0 %3436  ;;  %3538 = vadd.xlane.f32.xlu0 %v3537_v15 }
 0x4ad   : > { %8259 = vrcp.f32 %v3437_v50  ;;  %v11745_v40 = vpop.eup %8255 }
 0x4ae   : > { %8261 = vpow2.f32 %v3209_v12  ;;  %14422 = vst [vmem:[#allocation74_spill] sm:$0xff] %v11745_v40  ;;  %v8258_v12 = vpop.eup %8257 }
 0x4af   : > { %v11734_v42 = vpop.xlane.xlu1 %3493  ;;  %8263 = vrcp.f32 %v3443_v62  ;;  %v3546_v62 = vsel %vm2570_vm2, %v11745_v40, 0.0 }
 0x4b0   : > { %v11738_v28 = vpop.xlane.xlu0 %2914  ;;  %8265 = vpow2.f32 %v3225_v58 }
 0x4b1   : > { %14421 = vst [vmem:[#allocation83_spill] sm:$0xff] %v11738_v28  ;;  %8267 = vrcp.f32 %v11627_v53  ;;  %v3884_v28 = vmul.f32 %v8258_v12, %v11137_v21 }
 0x4b3   : > { %v11741_v20 = vpop.xlane.xlu1 %3487 }
 0x4b4   : > { %3520 = vadd.xlane.f32.xlu1 %v3519_v37  ;;  %v11747_v60 = vpop.xlane.xlu0 %2911 }
 0x4b5   : > { %14423 = vst [vmem:[#allocation177_spill] sm:$0xff] %v11747_v60 }
 0x4b7   : > { %v8260_v45 = vpop.eup %8259  ;;  %v11749_v50 = vpop.xlane.xlu1 %3505 }
 0x4b8   : > { %v11753_v15 = vpop.eup %8261  ;;  %3547 = vadd.xlane.f32.xlu1 %v3546_v62  ;;  %v3455_v53 = vpop.xlane.xlu0 %3454  ;;  %v3883_v58 = vmul.f32 %v8260_v45, %v11360_v55 }
 0x4b9   : > { %8269 = vrcp.f32 %v3455_v53  ;;  %v8264_v37 = vpop.eup %8263  ;;  %v3528_v57 = vsel %vm2570_vm2, %v11753_v15, 0.0 }
 0x4ba   : > { %v3995_v18 = vpack.c.bf16 %v3884_v28, %v3883_v58  ;;  %8271 = vrcp.f32 %v11655_v1  ;;  %v11762_v35 = vpop.eup %8265  ;;  %v3885_v21 = vmul.f32 %v8264_v37, %v11342_v44  ;;  %v14429_v37 = vld [vmem:[#allocation18_spill] sm:$0xff] }
 0x4bb   : > { %v11758_v60 = vpop.xlane.xlu1 %3499  ;;  %8273 = vrcp.f32 %v11649_v14  ;;  %v8268_v45 = vpop.eup %8267  ;;  %v3552_v1 = vsel %vm2570_vm2, %v11762_v35, 0.0 }
 0x4bc   : > { %3529 = vadd.xlane.f32.xlu1 %v3528_v57  ;;  %7670 = vmatprep.mubr.msk.bf16.mxu1 %vm2570_vm2, %v3995_v18  ;;  %v3449_v55 = vpop.xlane.xlu0 %3448  ;;  %v3886_v62 = vmul.f32 %v8268_v45, %v11114_v27 }
 0x4bd   : > { %8275 = vrcp.f32 %v3449_v55 }
 0x4be   : > { %v3996_v18 = vpack.c.bf16 %v3886_v62, %v3885_v21  ;;  %v14431_v21 = vld [vmem:[#allocation43_spill] sm:$0xff] }
 0x4bf   : > { %v4406_v28 = vpop.permute.xlu1 %4405 }
 0x4c0   : > { %v11769_v12 = vpop.f32.mrb[88].mxu0  ;;  %7668 = vmatprep.subr.bf16.mxu1 %v4406_v28  ;;  %3553 = vadd.xlane.f32.xlu1 %v3552_v1  ;;  %v11772_v53 = vpop.xlane.xlu0 %2926 }
 0x4c1   : > { %14424 = vst [vmem:[#allocation17_spill] sm:$0xff] %v11769_v12  ;;  %14425 = vst [vmem:[#allocation137_spill] sm:$0xff] %v11772_v53  ;;  %v11774_v14 = vpop.f32.mrb[89].mxu0  ;;  %7669 = vmatpush3.bf16.msra.mxu1 %v4406_v28 }
 0x4c2   : > { %14426 = vst [vmem:[#allocation126_spill] sm:$0xff] %v11774_v14  ;;  %v11776_v57 = vpop.f32.mrb[90].mxu0  ;;  %4490 = vrot.lane.b32.xlu0 %v14429_v37, %s8630_s18 }
 0x4c3   : > { %14427 = vst [vmem:[#allocation67_spill] sm:$0xff] %v11776_v57  ;;  %v11780_v58 = vpop.f32.mrb[91].mxu0  ;;  %v8270_v55 = vpop.eup %8269 }
 0x4c4   : > { %14428 = vst [vmem:[#allocation124_spill] sm:$0xff] %v11780_v58  ;;  %7671 = vmatmul.mubr.msk.bf16.vlgmr.msra.gmra.mrb[80].mxu1 %vm2570_vm2, %v3996_v18  ;;  %v8272_v45 = vpop.eup %8271  ;;  %v11787_v1 = vpop.xlane.xlu0 %2923  ;;  %v3889_v62 = vmul.f32 %v8270_v55, %v11389_v23  ;;  %v14432_v58 = vld [vmem:[#allocation104_spill] sm:$0xff] }
 0x4c5   : > { %14430 = vst [vmem:[#allocation172_spill] sm:$0xff] %v11787_v1  ;;  %v8274_v28 = vpop.eup %8273  ;;  %v3888_v37 = vmul.f32 %v8272_v45, %v11212_v11  ;;  %v14434_v23 = vld [vmem:[#allocation36_spill] sm:$0xff] }
 0x4c6   : > { %4581 = vrot.lane.b32.xlu0 %v14431_v21, %s8630_s18  ;;  %v3890_v27 = vmul.f32 %v8274_v28, %v11191_v9  ;;  %v3016_v21 = vsub.f32 %v14432_v58, %v11224_v61  ;;  %v14439_v61 = vld [vmem:[#allocation111_spill] sm:$0xff] }
 0x4c7   : > { %v8276_v53 = vpop.eup %8275  ;;  %v3025_v58 = vsub.f32 %v14439_v61, %v11281_v26 }
 0x4c8   : > { %v3887_v44 = vmul.f32 %v8276_v53, %v11392_v0  ;;  %v11794_v12 = vpop.xlane.xlu0 %3466  ;;  %v3998_v18 = vpack.c.bf16 %v3890_v27, %v3889_v62  ;;  %v3205_v11 = vmul.f32 1.442695, %v3016_v21  ;;  %v14435_v0 = vld [vmem:[#allocation115_spill] sm:$0xff] }
 0x4c9   : > { %v3023_v53 = vsub.f32 %v14435_v0, %v11302_v43 }
 0x4ca   : > { %v3997_v57 = vpack.c.bf16 %v3888_v37, %v3887_v44  ;;  %v14437_v44 = vld [vmem:[#allocation53_spill] sm:$0xff]  ;;  %8277 = vpow2.f32 %v3205_v11 }
 0x4cb   : > { %v3219_v55 = vmul.f32 1.442695, %v3023_v53  ;;  %v14445_v53 = vld [vmem:[#allocation14_spill] sm:$0xff] }
 0x4cc   : > { %7674 = vmatprep.mubr.msk.bf16.mxu1 %vm2570_vm2, %v3997_v57  ;;  %v3461_v14 = vpop.xlane.xlu0 %3460  ;;  %v14438_v57 = vld [vmem:[#allocation101_spill] sm:$0xff] }
 0x4cd   : > { %7675 = vmatmul.mubr.msk.bf16.gmra.mrb[84].mxu1 %vm2570_vm2, %v3998_v18  ;;  %v3017_v27 = vsub.f32 %v14438_v57, %v11201_v22  ;;  %v3223_v22 = vmul.f32 1.442695, %v3025_v58  ;;  %8279 = vpow2.f32 %v3219_v55  ;;  %v14447_v55 = vld [vmem:[#allocation84_spill] sm:$0xff] }
 0x4cf   : > { %v3207_v37 = vmul.f32 1.442695, %v3017_v27 }
 0x4d0   : > { %v11801_v1 = vpop.xlane.xlu0 %2938 }
 0x4d1   : > { %14433 = vst [vmem:[#allocation89_spill] sm:$0xff] %v11801_v1  ;;  %4583 = vrot.lane.b32.xlu1 %v14434_v23, %s8630_s18  ;;  %8281 = vpow2.f32 %v3207_v37  ;;  %v3036_v37 = vsub.f32 %v14447_v55, %v11526_v47  ;;  %v14454_v1 = vld [vmem:[#allocation155_spill] sm:$0xff] }
 0x4d2   : > { %8283 = vpow2.f32 %v3223_v22 }
 0x4d3   : > { %8285 = vrcp.f32 %v11508_v38 }
 0x4d4   : > { %v11807_v9 = vpop.xlane.xlu0 %2935  ;;  %v11834_v0 = vpop.eup %8277  ;;  %8287 = vrcp.f32 %v11554_v29 }
 0x4d5   : > { %14436 = vst [vmem:[#allocation139_spill] sm:$0xff] %v11807_v9  ;;  %4666 = vrot.lane.b32.xlu1 %v14437_v44, %s8630_s18  ;;  %14444 = vst [vmem:[#allocation90_spill] sm:$0xff] %v11834_v0  ;;  %v14446_v44 = vld [vmem:[#allocation69_spill] sm:$0xff]  ;;  %8289 = vrcp.f32 %v11600_v41  ;;  %v3522_v61 = vsel %vm2570_vm2, %v11834_v0, 0.0 }
 0x4d6   : > { %v3027_v57 = vsub.f32 %v14446_v44, %v14445_v53  ;;  %8291 = vrcp.f32 %v11741_v20  ;;  %v14448_v53 = vld [vmem:[#allocation129_spill] sm:$0xff]  ;;  %v14449_v44 = vld [vmem:[#allocation128_spill] sm:$0xff] }
 0x4d7   : > { %v11815_v45 = vpop.f32.mrb[92].mxu0  ;;  %8293 = vrcp.f32 %v11560_v17  ;;  %v11844_v38 = vpop.eup %8279 }
 0x4d8   : > { %14440 = vst [vmem:[#allocation82_spill] sm:$0xff] %v11815_v45  ;;  %v11817_v28 = vpop.xlane.xlu0 %3478  ;;  %v11819_v62 = vpop.f32.mrb[93].mxu0  ;;  %v3227_v58 = vmul.f32 1.442695, %v3027_v57  ;;  %v3543_v41 = vsel %vm2570_vm2, %v11844_v38, 0.0  ;;  %v3030_v57 = vsub.f32 %v14449_v44, %v14448_v53 }
 0x4d9   : > { %14441 = vst [vmem:[#allocation143_spill] sm:$0xff] %v11819_v62  ;;  %v11821_v43 = vpop.f32.mrb[94].mxu0  ;;  %v4489_v45 = vpop.permute.xlu1 %4488 }
 0x4da   : > { %14442 = vst [vmem:[#allocation125_spill] sm:$0xff] %v11821_v43  ;;  %v11825_v21 = vpop.f32.mrb[95].mxu0 }
 0x4db   : > { %14443 = vst [vmem:[#allocation176_spill] sm:$0xff] %v11825_v21  ;;  %v11848_v22 = vpop.eup %8281  ;;  %v14452_v21 = vld [vmem:[#allocation15_spill] sm:$0xff] }
 0x4dc   : > { %v11829_v23 = vpop.xlane.xlu0 %3472  ;;  %v11854_v17 = vpop.eup %8283  ;;  %v3525_v18 = vsel %vm2570_vm2, %v11848_v22, 0.0 }
 0x4dd   : > { %v8286_v20 = vpop.eup %8285  ;;  %v3549_v43 = vsel %vm2570_vm2, %v11854_v17, 0.0 }
 0x4e0   : > { %v11832_v11 = vpop.xlane.xlu0 %3490 }
 0x4e4   : > { %v3485_v27 = vpop.xlane.xlu0 %3484 }
 0x4e5   : > { %8295 = vrcp.f32 %v3485_v27  ;;  %3523 = vadd.xlane.f32.xlu0 %v3522_v61  ;;  %v3245_v27 = vmul.f32 1.442695, %v3036_v37  ;;  %v8288_v61 = vpop.eup %8287  ;;  %v14450_v37 = vld [vmem:[#allocation153_spill] sm:$0xff] }
 0x4e6   : > { %8297 = vpow2.f32 %v3227_v58  ;;  %v8290_v47 = vpop.eup %8289  ;;  %v3038_v53 = vsub.f32 %v14450_v37, %v11512_v7 }
 0x4e7   : > { %8299 = vrcp.f32 %v11590_v39  ;;  %v8292_v26 = vpop.eup %8291 }
 0x4e8   : > { %v11850_v29 = vpop.xlane.xlu0 %3502  ;;  %8301 = vrcp.f32 %v3461_v14  ;;  %v8294_v58 = vpop.eup %8293  ;;  %v14451_v14 = vld [vmem:[#allocation168_spill] sm:$0xff]  ;;  %v3900_v9 = vmul.f32 %v8292_v26, %v14452_v21  ;;  %v3249_v7 = vmul.f32 1.442695, %v3038_v53  ;;  %v14458_v53 = vld [vmem:[#allocation169_spill] sm:$0xff] }
 0x4e9   : > { %3544 = vadd.xlane.f32.xlu0 %v3543_v41  ;;  %8303 = vrcp.f32 %v11550_v48  ;;  %v3233_v41 = vmul.f32 1.442695, %v3030_v57  ;;  %v3877_v44 = vmul.f32 %v8288_v61, %v14451_v14  ;;  %v3878_v57 = vmul.f32 %v8286_v20, %v14454_v1  ;;  %v14455_v61 = vld [vmem:[#allocation171_spill] sm:$0xff] }
 0x4ea   : > { %8305 = vrcp.f32 %v11687_v6  ;;  %v14453_v6 = vld [vmem:[#allocation180_spill] sm:$0xff]  ;;  %v3880_v37 = vmul.f32 %v8294_v58, %v14455_v61 }
 0x4eb   : > { %8307 = vpow2.f32 %v3245_v27  ;;  %v3992_v0 = vpack.c.bf16 %v3878_v57, %v3877_v44  ;;  %v14459_v44 = vld [vmem:[#allocation58_spill] sm:$0xff] }
 0x4ec   : > { %v11860_v55 = vpop.xlane.xlu0 %3496  ;;  %8309 = vpow2.f32 %v3233_v41 }
 0x4ed   : > { %3526 = vadd.xlane.f32.xlu0 %v3525_v18  ;;  %v3879_v18 = vmul.f32 %v8290_v47, %v14453_v6  ;;  %8311 = vpow2.f32 %v3249_v7  ;;  %v14457_v47 = vld [vmem:[#allocation35_spill] sm:$0xff] }
 0x4ef   : > { %v8296_v39 = vpop.eup %8295  ;;  %v3993_v26 = vpack.c.bf16 %v3880_v37, %v3879_v18 }
 0x4f0   : > { %v4317_v48 = vpop.permute.xlu0 %4316  ;;  %v3899_v62 = vmul.f32 %v8296_v39, %v11546_v36  ;;  %v11875_v14 = vpop.eup %8297 }
 0x4f1   : > { %7652 = vmatprep.subr.bf16.mxu0 %v4317_v48  ;;  %3550 = vadd.xlane.f32.xlu0 %v3549_v43  ;;  %v8300_v36 = vpop.eup %8299  ;;  %v3555_v20 = vsel %vm2570_vm2, %v11875_v14, 0.0 }
 0x4f2   : > { %7653 = vmatpush3.bf16.msra.mxu0 %v4317_v48  ;;  %v4003_v27 = vpack.c.bf16 %v3900_v9, %v3899_v62  ;;  %v8302_v1 = vpop.eup %8301  ;;  %v3881_v58 = vmul.f32 %v8300_v36, %v14457_v47  ;;  %v14465_v47 = vld [vmem:[#allocation22_spill] sm:$0xff] }
 0x4f3   : > { %7678 = vmatprep.subr.bf16.mxu0 %v4489_v45  ;;  %v8304_v43 = vpop.eup %8303 }
 0x4f4   : > { %v11877_v40 = vpop.xlane.xlu1 %2944  ;;  %7702 = vmatprep.mubr.msk.bf16.mxu1 %vm2570_vm2, %v4003_v27  ;;  %v4578_v21 = vpop.permute.xlu0 %4577  ;;  %v3882_v39 = vmul.f32 %v8304_v43, %v14458_v53  ;;  %v14473_v43 = vld [vmem:[#allocation3_spill] sm:$0xff] }
 0x4f5   : > { %14456 = vst [vmem:[#allocation96_spill] sm:$0xff] %v11877_v40  ;;  %7655 = vmatmul.mubr.msk.bf16.vlgmr.msra.gmra.mrb[104].mxu0 %vm2570_vm2, %v3992_v0  ;;  %7694 = vmatprep.subr.bf16.mxu1 %v4578_v21  ;;  %v8306_v9 = vpop.eup %8305  ;;  %v3891_v0 = vmul.f32 %v8302_v1, %v11470_v46 }
 0x4f6   : > { %7658 = vmatprep.mubr.msk.bf16.mxu0 %vm2570_vm2, %v3993_v26  ;;  %7679 = vmatpush3.bf16.msra.mxu0 %v4489_v45  ;;  %v11887_v41 = vpop.eup %8307  ;;  %v3892_v48 = vmul.f32 %v8306_v9, %v14459_v44  ;;  %v3994_v18 = vpack.c.bf16 %v3882_v39, %v3881_v58  ;;  %v14474_v44 = vld [vmem:[#allocation144_spill] sm:$0xff] }
 0x4f7   : > { %7695 = vmatpush3.bf16.msra.mxu1 %v4578_v21  ;;  %v3582_v45 = vsel %vm2570_vm2, %v11887_v41, 0.0  ;;  %v11896_v57 = vpop.eup %8309 }
 0x4f8   : > { %v11882_v62 = vpop.xlane.xlu1 %3511  ;;  %v3999_v7 = vpack.c.bf16 %v3892_v48, %v3891_v0  ;;  %v3564_v46 = vsel %vm2570_vm2, %v11896_v57, 0.0  ;;  %v11904_v61 = vpop.eup %8311 }
 0x4f9   : > { %3556 = vadd.xlane.f32.xlu1 %v3555_v20  ;;  %v3588_v36 = vsel %vm2570_vm2, %v11904_v61, 0.0 }
 0x4fc   : > { %v11892_v6 = vpop.xlane.xlu1 %3535 }
 0x4fd   : > { %3583 = vadd.xlane.f32.xlu1 %v3582_v45  ;;  %7659 = vmatmul.mubr.msk.bf16.gmra.mrb[108].mxu0 %vm2570_vm2, %v3994_v18  ;;  %v14470_v18 = vld [vmem:[#allocation8_spill] sm:$0xff] }
 0x4fe   : > { %7686 = vmatprep.mubr.msk.bf16.mxu0 %vm2570_vm2, %v3999_v7 }
 0x500   : > { %v11900_v27 = vpop.xlane.xlu1 %2953 }
 0x501   : > { %14460 = vst [vmem:[#allocation109_spill] sm:$0xff] %v11900_v27  ;;  %3565 = vadd.xlane.f32.xlu1 %v3564_v46  ;;  %v14471_v46 = vld [vmem:[#allocation88_spill] sm:$0xff] }
 0x503   : > { %v11910_v21 = vpop.f32.mrb[96].mxu0 }
 0x504   : > { %v11906_v37 = vpop.xlane.xlu1 %3517  ;;  %14461 = vst [vmem:[#allocation94_spill] sm:$0xff] %v11910_v21  ;;  %v11912_v26 = vpop.f32.mrb[97].mxu0 }
 0x505   : > { %3589 = vadd.xlane.f32.xlu1 %v3588_v36  ;;  %14462 = vst [vmem:[#allocation106_spill] sm:$0xff] %v11912_v26  ;;  %v11914_v1 = vpop.f32.mrb[98].mxu0  ;;  %v14472_v36 = vld [vmem:[#allocation130_spill] sm:$0xff] }
 0x506   : > { %14463 = vst [vmem:[#allocation170_spill] sm:$0xff] %v11914_v1  ;;  %v11918_v9 = vpop.f32.mrb[99].mxu0  ;;  %v14478_v1 = vld [vmem:[#allocation80_spill] sm:$0xff] }
 0x507   : > { %14464 = vst [vmem:[#allocation157_spill] sm:$0xff] %v11918_v9  ;;  %4494 = vrot.lane.b32.xlu0 %v14465_v47, %s8630_s18  ;;  %v3028_v47 = vsub.f32 %v14472_v36, %v14471_v46  ;;  %v14496_v9 = vld [vmem:[#allocation42_spill] sm:$0xff] }
 0x508   : > { %v11920_v20 = vpop.xlane.xlu1 %3541  ;;  %v11926_v0 = vpop.f32.mrb[72].mxu1 }
 0x509   : > { %14466 = vst [vmem:[#allocation2_spill] sm:$0xff] %v11926_v0  ;;  %v11928_v53 = vpop.f32.mrb[73].mxu1  ;;  %v3229_v58 = vmul.f32 1.442695, %v3028_v47  ;;  %v3035_v0 = vsub.f32 %v14474_v44, %v11466_v32  ;;  %v14483_v47 = vld [vmem:[#allocation142_spill] sm:$0xff] }
 0x50a   : > { %14467 = vst [vmem:[#allocation37_spill] sm:$0xff] %v11928_v53  ;;  %v11930_v39 = vpop.f32.mrb[74].mxu1 }
 0x50b   : > { %14468 = vst [vmem:[#allocation95_spill] sm:$0xff] %v11930_v39  ;;  %v11934_v45 = vpop.f32.mrb[75].mxu1  ;;  %4755 = vrot.lane.b32.xlu0 %v14470_v18, %s8630_s18  ;;  %v14475_v39 = vld [vmem:[#allocation57_spill] sm:$0xff]  ;;  %v14477_v18 = vld [vmem:[#allocation116_spill] sm:$0xff]  ;;  %8313 = vpow2.f32 %v3229_v58 }
 0x50c   : > { %v4580_v48 = vpop.permute.xlu1 %4579  ;;  %14469 = vst [vmem:[#allocation107_spill] sm:$0xff] %v11934_v45  ;;  %v3029_v7 = vsub.f32 %v14478_v1, %v14477_v18  ;;  %v3037_v1 = vsub.f32 %v14483_v47, %v11455_v24  ;;  %v14488_v24 = vld [vmem:[#allocation138_spill] sm:$0xff] }
 0x50d   : > { %7696 = vmatprep.subr.bf16.mxu1 %v4580_v48 }
 0x50e   : > { %7697 = vmatpush3.bf16.msra.mxu1 %v4580_v48  ;;  %v3243_v48 = vmul.f32 1.442695, %v3035_v0  ;;  %v3231_v44 = vmul.f32 1.442695, %v3029_v7  ;;  %v3247_v32 = vmul.f32 1.442695, %v3037_v1 }
 0x510   : > { %8315 = vpow2.f32 %v3243_v48  ;;  %v3031_v48 = vsub.f32 %v14488_v24, %v11443_v2  ;;  %v14490_v2 = vld [vmem:[#allocation148_spill] sm:$0xff] }
 0x511   : > { %8317 = vpow2.f32 %v3231_v44  ;;  %v14489_v44 = vld [vmem:[#allocation166_spill] sm:$0xff] }
 0x512   : > { %8319 = vpow2.f32 %v3247_v32  ;;  %v3040_v1 = vsub.f32 %v14489_v44, %v11544_v4  ;;  %v3034_v32 = vsub.f32 %v14490_v2, %v11486_v54  ;;  %v14492_v44 = vld [vmem:[#allocation159_spill] sm:$0xff]  ;;  %v4493_v2 = vpop.permute.xlu1 %4492 }
 0x514   : > { %v3253_v24 = vmul.f32 1.442695, %v3040_v1  ;;  %v3241_v4 = vmul.f32 1.442695, %v3034_v32 }
 0x515   : > { %v11978_v7 = vpop.eup %8313 }
 0x516   : > { %4757 = vrot.lane.b32.xlu1 %v14473_v43, %s8630_s18  ;;  %v3558_v18 = vsel %vm2570_vm2, %v11978_v7, 0.0 }
 0x51a   : > { %4670 = vrot.lane.b32.xlu1 %v14475_v39, %s8630_s18 }
 0x51c   : > { %v11948_v21 = vpop.f32.mrb[100].mxu0 }
 0x51d   : > { %14476 = vst [vmem:[#allocation29_spill] sm:$0xff] %v11948_v21  ;;  %v11952_v53 = vpop.f32.mrb[101].mxu0 }
 0x51e   : > { %14479 = vst [vmem:[#allocation30_spill] sm:$0xff] %v11952_v53  ;;  %v11954_v46 = vpop.f32.mrb[102].mxu0  ;;  %v3042_v53 = vsub.f32 %v14492_v44, %v11536_v8 }
 0x51f   : > { %14480 = vst [vmem:[#allocation93_spill] sm:$0xff] %v11954_v46  ;;  %v11958_v36 = vpop.f32.mrb[103].mxu0 }
 0x520   : > { %14481 = vst [vmem:[#allocation105_spill] sm:$0xff] %v11958_v36  ;;  %v11962_v39 = vpop.f32.mrb[76].mxu1  ;;  %v3257_v54 = vmul.f32 1.442695, %v3042_v53 }
 0x521   : > { %14482 = vst [vmem:[#allocation103_spill] sm:$0xff] %v11962_v39  ;;  %v11966_v58 = vpop.f32.mrb[77].mxu1  ;;  %v11986_v39 = vpop.eup %8315 }
 0x522   : > { %14484 = vst [vmem:[#allocation117_spill] sm:$0xff] %v11966_v58  ;;  %v11968_v0 = vpop.f32.mrb[78].mxu1  ;;  %v3579_v58 = vsel %vm2570_vm2, %v11986_v39, 0.0 }
 0x523   : > { %14485 = vst [vmem:[#allocation102_spill] sm:$0xff] %v11968_v0  ;;  %v11972_v43 = vpop.f32.mrb[79].mxu1  ;;  %v3235_v0 = vmul.f32 1.442695, %v3031_v48 }
 0x524   : > { %14486 = vst [vmem:[#allocation113_spill] sm:$0xff] %v11972_v43  ;;  %v11992_v43 = vpop.eup %8317 }
 0x525   : > { %v11976_v21 = vpop.xlane.xlu0 %2947  ;;  %8321 = vpow2.f32 %v3235_v0  ;;  %v12000_v48 = vpop.eup %8319 }
 0x526   : > { %14487 = vst [vmem:[#allocation18_spill] sm:$0xff] %v11976_v21  ;;  %8323 = vpow2.f32 %v3253_v24 }
 0x527   : > { %8325 = vpow2.f32 %v3241_v4 }
 0x528   : > { %8327 = vpow2.f32 %v3257_v54 }
 0x529   : > { %v11982_v47 = vpop.xlane.xlu0 %3508  ;;  %8329 = vrcp.f32 %v11832_v11 }
 0x52a   : > { %3559 = vadd.xlane.f32.xlu0 %v3558_v18  ;;  %v3561_v18 = vsel %vm2570_vm2, %v11992_v43, 0.0  ;;  %8331 = vrcp.f32 %v11860_v55 }
 0x52b   : > { %8333 = vrcp.f32 %v11734_v42 }
 0x52c   : > { %8335 = vrcp.f32 %v11758_v60 }
 0x52d   : > { %v3533_v45 = vpop.xlane.xlu0 %3532  ;;  %8337 = vrcp.f32 %v11850_v29 }
 0x52e   : > { %3580 = vadd.xlane.f32.xlu0 %v3579_v58  ;;  %v3585_v58 = vsel %vm2570_vm2, %v12000_v48, 0.0  ;;  %8339 = vrcp.f32 %v3533_v45  ;;  %v14495_v45 = vld [vmem:[#allocation86_spill] sm:$0xff] }
 0x52f   : > { %v12008_v0 = vpop.eup %8321  ;;  %8341 = vrcp.f32 %v11749_v50 }
 0x530   : > { %v3567_v32 = vsel %vm2570_vm2, %v12008_v0, 0.0  ;;  %8343 = vrcp.f32 %v11892_v6 }
 0x531   : > { %v11996_v46 = vpop.xlane.xlu0 %2950 }
 0x532   : > { %14491 = vst [vmem:[#allocation43_spill] sm:$0xff] %v11996_v46  ;;  %3562 = vadd.xlane.f32.xlu0 %v3561_v18  ;;  %v12014_v18 = vpop.eup %8323 }
 0x533   : > { %v3594_v53 = vsel %vm2570_vm2, %v12014_v18, 0.0  ;;  %v12020_v4 = vpop.eup %8325 }
 0x534   : > { %v3576_v54 = vsel %vm2570_vm2, %v12020_v4, 0.0 }
 0x535   : > { %v12004_v36 = vpop.xlane.xlu0 %3514 }
 0x536   : > { %3586 = vadd.xlane.f32.xlu0 %v3585_v58 }
 0x539   : > { %v12010_v1 = vpop.xlane.xlu0 %3538 }
 0x53d   : > { %v4491_v8 = vpop.permute.xlu0 %4490 }
 0x53e   : > { %3568 = vadd.xlane.f32.xlu1 %v3567_v32  ;;  %7680 = vmatprep.subr.bf16.mxu0 %v4491_v8  ;;  %v12029_v32 = vpop.eup %8327 }
 0x53f   : > { %7681 = vmatpush3.bf16.msra.mxu0 %v4491_v8  ;;  %v3600_v11 = vsel %vm2570_vm2, %v12029_v32, 0.0  ;;  %v8330_v42 = vpop.eup %8329 }
 0x540   : > { %7682 = vmatprep.subr.bf16.mxu0 %v4493_v2 }
 0x541   : > { %v12016_v24 = vpop.xlane.xlu1 %3520  ;;  %v4582_v44 = vpop.permute.xlu0 %4581 }
 0x542   : > { %3595 = vadd.xlane.f32.xlu1 %v3594_v53  ;;  %7698 = vmatprep.subr.bf16.mxu1 %v4582_v44  ;;  %v8332_v53 = vpop.eup %8331 }
 0x543   : > { %7683 = vmatpush3.bf16.msra.mxu0 %v4493_v2  ;;  %7699 = vmatpush3.bf16.msra.mxu1 %v4582_v44  ;;  %v14493_v2 = vld [vmem:[#allocation47_spill] sm:$0xff]  ;;  %v8334_v60 = vpop.eup %8333  ;;  %v3903_v29 = vmul.f32 %v8332_v53, %v11564_v19 }
 0x544   : > { %v8336_v44 = vpop.eup %8335  ;;  %v3902_v50 = vmul.f32 %v8334_v60, %v14495_v45  ;;  %v14497_v53 = vld [vmem:[#allocation151_spill] sm:$0xff] }
 0x545   : > { %v12025_v58 = vpop.xlane.xlu1 %3547  ;;  %v3904_v27 = vmul.f32 %v8336_v44, %v14496_v9  ;;  %v8338_v21 = vpop.eup %8337  ;;  %v3032_v60 = vsub.f32 %v14497_v53, %v11500_v52  ;;  %v14499_v9 = vld [vmem:[#allocation7_spill] sm:$0xff]  ;;  %v14502_v52 = vld [vmem:[#allocation162_spill] sm:$0xff] }
 0x546   : > { %3577 = vadd.xlane.f32.xlu1 %v3576_v54  ;;  %v3901_v54 = vmul.f32 %v8330_v42, %v11538_v25  ;;  %v8340_v6 = vpop.eup %8339  ;;  %v3905_v42 = vmul.f32 %v8338_v21, %v11556_v49  ;;  %v14501_v49 = vld [vmem:[#allocation23_spill] sm:$0xff] }
 0x547   : > { %v4005_v46 = vpack.c.bf16 %v3904_v27, %v3903_v29  ;;  %v8342_v40 = vpop.eup %8341  ;;  %v3915_v19 = vmul.f32 %v8340_v6, %v11693_v13  ;;  %v14500_v29 = vld [vmem:[#allocation149_spill] sm:$0xff]  ;;  %v3237_v45 = vmul.f32 1.442695, %v3032_v60  ;;  %v14503_v13 = vld [vmem:[#allocation135_spill] sm:$0xff] }
 0x548   : > { %v8344_v25 = vpop.eup %8343 }
 0x549   : > { %v12032_v8 = vpop.xlane.xlu1 %3529  ;;  %v3916_v27 = vmul.f32 %v8344_v25, %v11596_v10  ;;  %8345 = vpow2.f32 %v3237_v45  ;;  %v14504_v10 = vld [vmem:[#allocation150_spill] sm:$0xff]  ;;  %v14506_v25 = vld [vmem:[#allocation167_spill] sm:$0xff] }
 0x54a   : > { %3601 = vadd.xlane.f32.xlu1 %v3600_v11  ;;  %v14494_v11 = vld [vmem:[#allocation11_spill] sm:$0xff] }
 0x54c   : > { %4668 = vrot.lane.b32.xlu0 %v14493_v2, %s8630_s18  ;;  %v4004_v2 = vpack.c.bf16 %v3902_v50, %v3901_v54  ;;  %v4011_v54 = vpack.c.bf16 %v3916_v27, %v3915_v19  ;;  %v14507_v19 = vld [vmem:[#allocation174_spill] sm:$0xff] }
 0x54d   : > { %v12038_v55 = vpop.xlane.xlu1 %3553  ;;  %v3046_v53 = vsub.f32 %v14507_v19, %v11570_v31 }
 0x54f   : > { %v3265_v27 = vmul.f32 1.442695, %v3046_v53  ;;  %v14512_v53 = vld [vmem:[#allocation114_spill] sm:$0xff] }
 0x550   : > { %4759 = vrot.lane.b32.xlu0 %v14494_v11, %s8630_s18 }
 0x551   : > { %v4584_v26 = vpop.permute.xlu1 %4583 }
 0x552   : > { %7700 = vmatprep.subr.bf16.mxu1 %v4584_v26 }
 0x553   : > { %7701 = vmatpush3.bf16.msra.mxu1 %v4584_v26  ;;  %v14498_v26 = vld [vmem:[#allocation131_spill] sm:$0xff]  ;;  %v12073_v60 = vpop.eup %8345 }
 0x554   : > { %v3906_v11 = vmul.f32 %v8342_v40, %v14498_v26  ;;  %v3033_v40 = vsub.f32 %v14503_v13, %v14502_v52  ;;  %v14508_v26 = vld [vmem:[#allocation108_spill] sm:$0xff]  ;;  %v14509_v52 = vld [vmem:[#allocation19_spill] sm:$0xff] }
 0x555   : > { %v3054_v13 = vsub.f32 %v14509_v52, %v11641_v51 }
 0x556   : > { %7703 = vmatmul.mubr.msk.bf16.vlgmr.msra.gmra.mrb[88].mxu1 %vm2570_vm2, %v4004_v2  ;;  %v4006_v44 = vpack.c.bf16 %v3906_v11, %v3905_v42  ;;  %v3239_v50 = vmul.f32 1.442695, %v3033_v40  ;;  %v14505_v2 = vld [vmem:[#allocation147_spill] sm:$0xff]  ;;  %v3043_v42 = vsub.f32 %v14506_v25, %v11540_v3  ;;  %v3052_v11 = vsub.f32 %v14508_v26, %v11645_v34 }
 0x557   : > { %7706 = vmatprep.mubr.msk.bf16.mxu1 %vm2570_vm2, %v4005_v46  ;;  %v3039_v46 = vsub.f32 %v14500_v29, %v11494_v5  ;;  %v3041_v6 = vsub.f32 %v14505_v2, %v14504_v10  ;;  %v14510_v10 = vld [vmem:[#allocation140_spill] sm:$0xff] }
 0x558   : > { %v3277_v29 = vmul.f32 1.442695, %v3052_v11  ;;  %v14513_v11 = vld [vmem:[#allocation81_spill] sm:$0xff] }
 0x559   : > { %v3251_v21 = vmul.f32 1.442695, %v3039_v46  ;;  %v3255_v5 = vmul.f32 1.442695, %v3041_v6  ;;  %v4667_v6 = vpop.permute.xlu1 %4666 }
 0x55b   : > { %4761 = vrot.lane.b32.xlu1 %v14499_v9, %s8630_s18  ;;  %8347 = vpow2.f32 %v3251_v21  ;;  %v3259_v9 = vmul.f32 1.442695, %v3043_v42  ;;  %v14511_v42 = vld [vmem:[#allocation91_spill] sm:$0xff] }
 0x55c   : > { %8349 = vpow2.f32 %v3239_v50 }
 0x55d   : > { %8351 = vpow2.f32 %v3255_v5 }
 0x55e   : > { %7707 = vmatmul.mubr.msk.bf16.gmra.mrb[92].mxu1 %vm2570_vm2, %v4006_v44  ;;  %v3570_v44 = vsel %vm2570_vm2, %v12073_v60, 0.0  ;;  %8353 = vpow2.f32 %v3259_v9 }
 0x55f   : > { %4844 = vrot.lane.b32.xlu1 %v14501_v49, %s8630_s18  ;;  %7734 = vmatprep.mubr.msk.bf16.mxu1 %vm2570_vm2, %v4011_v54  ;;  %8355 = vpow2.f32 %v3265_v27 }
 0x560   : > { %8357 = vpow2.f32 %v3277_v29 }
 0x561   : > { %8359 = vrcp.f32 %v11794_v12 }
 0x562   : > { %8361 = vrcp.f32 %v11829_v23 }
 0x563   : > { %8363 = vrcp.f32 %v11679_v16 }
 0x564   : > { %8365 = vrcp.f32 %v11730_v33  ;;  %v3281_v33 = vmul.f32 1.442695, %v3054_v13 }
 0x565   : > { %v12079_v54 = vpop.eup %8347  ;;  %8367 = vrcp.f32 %v11721_v30 }
 0x566   : > { %v3591_v31 = vsel %vm2570_vm2, %v12079_v54, 0.0  ;;  %v12085_v46 = vpop.eup %8349  ;;  %8369 = vrcp.f32 %v12032_v8 }
 0x567   : > { %v3573_v45 = vsel %vm2570_vm2, %v12085_v46, 0.0  ;;  %v12094_v49 = vpop.eup %8351  ;;  %8371 = vrcp.f32 %v11817_v28 }
 0x568   : > { %v3597_v12 = vsel %vm2570_vm2, %v12094_v49, 0.0  ;;  %v12104_v23 = vpop.eup %8353 }
 0x569   : > { %v12106_v40 = vpop.eup %8355  ;;  %v3603_v5 = vsel %vm2570_vm2, %v12104_v23, 0.0 }
 0x56a   : > { %v12109_v51 = vpop.eup %8357 }
 0x56b   : > { %v8360_v30 = vpop.eup %8359 }
 0x56c   : > { %v8362_v8 = vpop.eup %8361  ;;  %v3893_v2 = vmul.f32 %v8360_v30, %v14510_v10 }
 0x56d   : > { %v8364_v21 = vpop.eup %8363 }
 0x56e   : > { %v8366_v50 = vpop.eup %8365 }
 0x56f   : > { %3571 = vadd.xlane.f32.xlu0 %v3570_v44  ;;  %v3896_v9 = vmul.f32 %v8366_v50, %v14513_v11 }
 0x572   : > { %v12081_v3 = vpop.xlane.xlu0 %3523 }
 0x573   : > { %3592 = vadd.xlane.f32.xlu0 %v3591_v31  ;;  %v3630_v31 = vsel %vm2570_vm2, %v12109_v51, 0.0 }
 0x576   : > { %v12090_v34 = vpop.xlane.xlu0 %3544 }
 0x577   : > { %3574 = vadd.xlane.f32.xlu0 %v3573_v45 }
 0x57a   : > { %v3527_v16 = vpop.xlane.xlu0 %3526 }
 0x57b   : > { %8373 = vrcp.f32 %v3527_v16  ;;  %3598 = vadd.xlane.f32.xlu0 %v3597_v12 }
 0x57c   : > { %8375 = vrcp.f32 %v11982_v47  ;;  %v8368_v47 = vpop.eup %8367 }
 0x57d   : > { %8377 = vrcp.f32 %v12038_v55  ;;  %v3895_v55 = vmul.f32 %v8362_v8, %v14511_v42  ;;  %v8370_v19 = vpop.eup %8369 }
 0x57e   : > { %8379 = vrcp.f32 %v11882_v62  ;;  %v3551_v28 = vpop.xlane.xlu0 %3550  ;;  %v3894_v62 = vmul.f32 %v8364_v21, %v14512_v53  ;;  %v8372_v26 = vpop.eup %8371  ;;  %v12127_v12 = vmul.f32 %v8370_v19, %v11753_v15  ;;  %v14514_v15 = vld [vmem:[#allocation48_spill] sm:$0xff] }
 0x57f   : > { %8381 = vrcp.f32 %v3551_v28  ;;  %v4001_v13 = vpack.c.bf16 %v3896_v9, %v3895_v55  ;;  %v3897_v50 = vmul.f32 %v8372_v26, %v14514_v15 }
 0x580   : > { %8383 = vpow2.f32 %v3281_v33  ;;  %v4000_v44 = vpack.c.bf16 %v3894_v62, %v3893_v2 }
 0x582   : > { %v4495_v25 = vpop.permute.xlu0 %4494 }
 0x583   : > { %3604 = vadd.xlane.f32.xlu1 %v3603_v5  ;;  %7684 = vmatprep.subr.bf16.mxu0 %v4495_v25 }
 0x584   : > { %7685 = vmatpush3.bf16.msra.mxu0 %v4495_v25  ;;  %v14515_v25 = vld [vmem:[#allocation97_spill] sm:$0xff] }
 0x585   : > { %v8374_v27 = vpop.eup %8373  ;;  %7710 = vmatprep.subr.bf16.mxu0 %v4667_v6  ;;  %v3898_v42 = vmul.f32 %v8368_v47, %v14515_v25  ;;  %v14517_v47 = vld [vmem:[#allocation39_spill] sm:$0xff] }
 0x586   : > { %v12119_v29 = vpop.xlane.xlu1 %3556  ;;  %v8376_v45 = vpop.eup %8375  ;;  %v12124_v16 = vmul.f32 %v8374_v27, %v11848_v22  ;;  %v3612_v22 = vsel %vm2570_vm2, %v12106_v40, 0.0 }
 0x587   : > { %3631 = vadd.xlane.f32.xlu1 %v3630_v31  ;;  %v4756_v52 = vpop.permute.xlu0 %4755  ;;  %v8378_v33 = vpop.eup %8377  ;;  %7687 = vmatmul.mubr.msk.bf16.vlgmr.msra.gmra.mrb[112].mxu0 %vm2570_vm2, %v4000_v44  ;;  %v3907_v2 = vmul.f32 %v8376_v45, %v11685_v56  ;;  %v4002_v26 = vpack.c.bf16 %v3898_v42, %v3897_v50  ;;  %v14528_v50 = vld [vmem:[#allocation154_spill] sm:$0xff]  ;;  %v14537_v45 = vld [vmem:[#allocation184_spill] sm:$0xff] }
 0x588   : > { %7726 = vmatprep.subr.bf16.mxu1 %v4756_v52  ;;  %v8380_v30 = vpop.eup %8379  ;;  %7690 = vmatprep.mubr.msk.bf16.mxu0 %vm2570_vm2, %v4001_v13  ;;  %v14523_v13 = vld [vmem:[#allocation178_spill] sm:$0xff] }
 0x589   : > { %7711 = vmatpush3.bf16.msra.mxu0 %v4667_v6  ;;  %v8382_v8 = vpop.eup %8381  ;;  %7727 = vmatpush3.bf16.msra.mxu1 %v4756_v52  ;;  %v12145_v6 = vmul.f32 %v8378_v33, %v11762_v35  ;;  %v3908_v55 = vmul.f32 %v8380_v30, %v11584_v63  ;;  %v14522_v52 = vld [vmem:[#allocation12_spill] sm:$0xff]  ;;  %v14524_v30 = vld [vmem:[#allocation31_spill] sm:$0xff]  ;;  %v14536_v44 = vld [vmem:[#allocation78_spill] sm:$0xff] }
 0x58a   : > { %v12133_v21 = vpop.xlane.xlu1 %3583  ;;  %v12138_v10 = vpop.eup %8383  ;;  %v12142_v5 = vmul.f32 %v8382_v8, %v11854_v17  ;;  %v14516_v17 = vld [vmem:[#allocation52_spill] sm:$0xff]  ;;  %v3044_v33 = vsub.f32 %v14523_v13, %v14522_v52 }
 0x58b   : > { %3613 = vadd.xlane.f32.xlu1 %v3612_v22  ;;  %v3636_v62 = vsel %vm2570_vm2, %v12138_v10, 0.0  ;;  %v4007_v56 = vpack.c.bf16 %v3908_v55, %v3907_v2  ;;  %v14529_v2 = vld [vmem:[#allocation175_spill] sm:$0xff] }
 0x58c   : > { %v3051_v25 = vsub.f32 %v14529_v2, %v14528_v50  ;;  %v3261_v42 = vmul.f32 1.442695, %v3044_v33  ;;  %v14535_v50 = vld [vmem:[#allocation173_spill] sm:$0xff] }
 0x58e   : > { %v3566_v53 = vpop.xlane.xlu1 %3565  ;;  %v3275_v52 = vmul.f32 1.442695, %v3051_v25  ;;  %8385 = vpow2.f32 %v3261_v42  ;;  %v14538_v42 = vld [vmem:[#allocation44_spill] sm:$0xff] }
 0x58f   : > { %3637 = vadd.xlane.f32.xlu1 %v3636_v62  ;;  %7691 = vmatmul.mubr.msk.bf16.gmra.mrb[116].mxu0 %vm2570_vm2, %v4002_v26  ;;  %v14531_v26 = vld [vmem:[#allocation32_spill] sm:$0xff] }
 0x590   : > { %7718 = vmatprep.mubr.msk.bf16.mxu0 %vm2570_vm2, %v4007_v56  ;;  %8387 = vpow2.f32 %v3275_v52 }
 0x591   : > { %4672 = vrot.lane.b32.xlu0 %v14516_v17, %s8630_s18  ;;  %v14532_v17 = vld [vmem:[#allocation92_spill] sm:$0xff] }
 0x592   : > { %v12155_v35 = vpop.xlane.xlu1 %3589 }
 0x595   : > { %4933 = vrot.lane.b32.xlu0 %v14517_v47, %s8630_s18 }
 0x596   : > { %v4758_v63 = vpop.permute.xlu1 %4757 }
 0x597   : > { %v12161_v11 = vpop.f32.mrb[80].mxu1  ;;  %7728 = vmatprep.subr.bf16.mxu1 %v4758_v63 }
 0x598   : > { %14518 = vst [vmem:[#allocation104_spill] sm:$0xff] %v12161_v11  ;;  %v12163_v9 = vpop.f32.mrb[81].mxu1  ;;  %7729 = vmatpush3.bf16.msra.mxu1 %v4758_v63  ;;  %v14533_v63 = vld [vmem:[#allocation161_spill] sm:$0xff]  ;;  %v12197_v55 = vpop.eup %8385 }
 0x599   : > { %14519 = vst [vmem:[#allocation36_spill] sm:$0xff] %v12163_v9  ;;  %v12165_v27 = vpop.f32.mrb[82].mxu1  ;;  %v3045_v47 = vsub.f32 %v14533_v63, %v14532_v17  ;;  %v3606_v56 = vsel %vm2570_vm2, %v12197_v55, 0.0  ;;  %v3056_v17 = vsub.f32 %v14538_v42, %v11675_v59  ;;  %v14550_v9 = vld [vmem:[#allocation74_spill] sm:$0xff] }
 0x59a   : > { %14520 = vst [vmem:[#allocation115_spill] sm:$0xff] %v12165_v27  ;;  %v12169_v31 = vpop.f32.mrb[83].mxu1  ;;  %v12203_v28 = vpop.eup %8387 }
 0x59b   : > { %14521 = vst [vmem:[#allocation53_spill] sm:$0xff] %v12169_v31  ;;  %v3263_v13 = vmul.f32 1.442695, %v3045_v47  ;;  %v3627_v47 = vsel %vm2570_vm2, %v12203_v28, 0.0 }
 0x59d   : > { %8389 = vpow2.f32 %v3263_v13 }
 0x5a0   : > { %4935 = vrot.lane.b32.xlu1 %v14524_v30, %s8630_s18  ;;  %v12177_v8 = vpop.f32.mrb[84].mxu1  ;;  %v14534_v30 = vld [vmem:[#allocation66_spill] sm:$0xff] }
 0x5a1   : > { %14525 = vst [vmem:[#allocation101_spill] sm:$0xff] %v12177_v8  ;;  %v12179_v22 = vpop.f32.mrb[85].mxu1  ;;  %v3053_v33 = vsub.f32 %v14535_v50, %v14534_v30  ;;  %v3285_v30 = vmul.f32 1.442695, %v3056_v17 }
 0x5a2   : > { %14526 = vst [vmem:[#allocation111_spill] sm:$0xff] %v12179_v22  ;;  %v12181_v15 = vpop.f32.mrb[86].mxu1 }
 0x5a3   : > { %14527 = vst [vmem:[#allocation14_spill] sm:$0xff] %v12181_v15  ;;  %v12187_v62 = vpop.f32.mrb[87].mxu1  ;;  %v3279_v2 = vmul.f32 1.442695, %v3053_v33  ;;  %v14541_v33 = vld [vmem:[#allocation50_spill] sm:$0xff] }
 0x5a4   : > { %14530 = vst [vmem:[#allocation69_spill] sm:$0xff] %v12187_v62  ;;  %4848 = vrot.lane.b32.xlu1 %v14531_v26, %s8630_s18  ;;  %v3047_v26 = vsub.f32 %v14537_v45, %v14536_v44  ;;  %v14539_v44 = vld [vmem:[#allocation118_spill] sm:$0xff] }
 0x5a5   : > { %8391 = vpow2.f32 %v3279_v2  ;;  %v14540_v45 = vld [vmem:[#allocation186_spill] sm:$0xff]  ;;  %v14542_v2 = vld [vmem:[#allocation132_spill] sm:$0xff] }
 0x5a6   : > { %v3267_v25 = vmul.f32 1.442695, %v3047_v26  ;;  %8393 = vrcp.f32 %v12119_v29  ;;  %v3050_v13 = vsub.f32 %v14540_v45, %v14539_v44  ;;  %v3058_v26 = vsub.f32 %v14542_v2, %v14541_v33 }
 0x5a7   : > { %v12210_v52 = vpop.eup %8389 }
 0x5a8   : > { %v3609_v59 = vsel %vm2570_vm2, %v12210_v52, 0.0  ;;  %v3273_v29 = vmul.f32 1.442695, %v3050_v13  ;;  %v3289_v17 = vmul.f32 1.442695, %v3058_v26 }
 0x5af   : > { %v12218_v50 = vpop.eup %8391 }
 0x5b4   : > { %3607 = vadd.xlane.f32.xlu0 %v3606_v56 }
 0x5b7   : > { %v3560_v63 = vpop.xlane.xlu0 %3559 }
 0x5b8   : > { %8395 = vrcp.f32 %v3560_v63  ;;  %3628 = vadd.xlane.f32.xlu0 %v3627_v47  ;;  %v8394_v63 = vpop.eup %8393 }
 0x5b9   : > { %8397 = vpow2.f32 %v3267_v25  ;;  %v3633_v25 = vsel %vm2570_vm2, %v12218_v50, 0.0  ;;  %v12228_v13 = vmul.f32 %v8394_v63, %v11875_v14 }
 0x5ba   : > { %8399 = vpow2.f32 %v3285_v30 }
 0x5bb   : > { %v12214_v56 = vpop.xlane.xlu0 %3580  ;;  %8401 = vrcp.f32 %v3566_v53 }
 0x5bc   : > { %3610 = vadd.xlane.f32.xlu0 %v3609_v59  ;;  %v4671_v59 = vpop.permute.xlu1 %4670 }
 0x5bf   : > { %v3563_v42 = vpop.xlane.xlu0 %3562 }
 0x5c0   : > { %8403 = vrcp.f32 %v3563_v42  ;;  %3634 = vadd.xlane.f32.xlu0 %v3633_v25 }
 0x5c1   : > { %8405 = vpow2.f32 %v3273_v29 }
 0x5c2   : > { %v8396_v47 = vpop.eup %8395  ;;  %8407 = vrcp.f32 %v12155_v35 }
 0x5c3   : > { %v12225_v44 = vpop.eup %8397  ;;  %v3587_v45 = vpop.xlane.xlu0 %3586  ;;  %v12231_v53 = vmul.f32 %v8396_v47, %v11978_v7 }
 0x5c4   : > { %8409 = vrcp.f32 %v3587_v45  ;;  %v3615_v29 = vsel %vm2570_vm2, %v12225_v44, 0.0  ;;  %v12237_v33 = vpop.eup %8399 }
 0x5c5   : > { %8411 = vpow2.f32 %v3289_v17  ;;  %v8402_v2 = vpop.eup %8401  ;;  %v3642_v63 = vsel %vm2570_vm2, %v12237_v33, 0.0 }
 0x5c6   : > { %v12252_v47 = vmul.f32 %v8402_v2, %v11896_v57  ;;  %8413 = vrcp.f32 %v12010_v1  ;;  %v14546_v57 = vld [vmem:[#allocation20_spill] sm:$0xff] }
 0x5c7   : > { %v4669_v35 = vpop.permute.xlu0 %4668  ;;  %8415 = vrcp.f32 %v12090_v34 }
 0x5c8   : > { %3616 = vadd.xlane.f32.xlu1 %v3615_v29  ;;  %v12239_v26 = vpop.f32.mrb[104].mxu0  ;;  %7712 = vmatprep.subr.bf16.mxu0 %v4669_v35  ;;  %8417 = vrcp.f32 %v11920_v20 }
 0x5c9   : > { %v12241_v14 = vpop.f32.mrb[105].mxu0  ;;  %7713 = vmatpush3.bf16.msra.mxu0 %v4669_v35  ;;  %8419 = vrcp.f32 %v12025_v58 }
 0x5ca   : > { %v8404_v7 = vpop.eup %8403  ;;  %v12243_v42 = vpop.f32.mrb[106].mxu0  ;;  %7714 = vmatprep.subr.bf16.mxu0 %v4671_v59  ;;  %8421 = vrcp.f32 %v12214_v56  ;;  %v14549_v56 = vld [vmem:[#allocation146_spill] sm:$0xff] }
 0x5cb   : > { %v12245_v25 = vpop.xlane.xlu1 %3568  ;;  %v12249_v17 = vpop.eup %8405  ;;  %v12255_v45 = vmul.f32 %v8404_v7, %v11992_v43  ;;  %8423 = vrcp.f32 %v12133_v21 }
 0x5cc   : > { %v12259_v35 = vpop.f32.mrb[107].mxu0  ;;  %3643 = vadd.xlane.f32.xlu1 %v3642_v63  ;;  %v4760_v30 = vpop.permute.xlu0 %4759  ;;  %v3624_v7 = vsel %vm2570_vm2, %v12249_v17, 0.0 }
 0x5cd   : > { %v8408_v19 = vpop.eup %8407  ;;  %7730 = vmatprep.subr.bf16.mxu1 %v4760_v30  ;;  %7715 = vmatpush3.bf16.msra.mxu0 %v4671_v59 }
 0x5ce   : > { %7731 = vmatpush3.bf16.msra.mxu1 %v4760_v30  ;;  %v8410_v43 = vpop.eup %8409  ;;  %v12276_v63 = vmul.f32 %v8408_v19, %v11904_v61  ;;  %v14547_v61 = vld [vmem:[#allocation160_spill] sm:$0xff] }
 0x5cf   : > { %v12268_v2 = vpop.xlane.xlu1 %3595  ;;  %v12272_v1 = vpop.eup %8411  ;;  %v12279_v34 = vmul.f32 %v8410_v43, %v12000_v48 }
 0x5d0   : > { %3625 = vadd.xlane.f32.xlu1 %v3624_v7  ;;  %v12281_v30 = vpop.f32.mrb[108].mxu0  ;;  %v3648_v58 = vsel %vm2570_vm2, %v12272_v1, 0.0  ;;  %v8414_v43 = vpop.eup %8413 }
 0x5d1   : > { %14543 = vst [vmem:[#allocation84_spill] sm:$0xff] %v12281_v30  ;;  %v12285_v59 = vpop.f32.mrb[109].mxu0  ;;  %v8416_v20 = vpop.eup %8415  ;;  %v3917_v62 = vmul.f32 %v8414_v43, %v14547_v61  ;;  %v14551_v43 = vld [vmem:[#allocation163_spill] sm:$0xff] }
 0x5d2   : > { %14544 = vst [vmem:[#allocation129_spill] sm:$0xff] %v12285_v59  ;;  %v12287_v29 = vpop.f32.mrb[110].mxu0  ;;  %v8418_v15 = vpop.eup %8417  ;;  %v3919_v19 = vmul.f32 %v8416_v20, %v11844_v38  ;;  %v14553_v38 = vld [vmem:[#allocation38_spill] sm:$0xff] }
 0x5d3   : > { %14545 = vst [vmem:[#allocation128_spill] sm:$0xff] %v12287_v29  ;;  %v12289_v8 = vpop.xlane.xlu1 %3577  ;;  %v12295_v48 = vpop.f32.mrb[111].mxu0  ;;  %v3918_v27 = vmul.f32 %v8418_v15, %v14549_v56  ;;  %v14561_v56 = vld [vmem:[#allocation27_spill] sm:$0xff] }
 0x5d4   : > { %3649 = vadd.xlane.f32.xlu1 %v3648_v58  ;;  %v8420_v22 = vpop.eup %8419  ;;  %v14548_v58 = vld [vmem:[#allocation45_spill] sm:$0xff] }
 0x5d5   : > { %v3920_v31 = vmul.f32 %v8420_v22, %v14550_v9  ;;  %v8422_v29 = vpop.eup %8421 }
 0x5d6   : > { %4846 = vrot.lane.b32.xlu0 %v14546_v57, %s8630_s18  ;;  %v4012_v57 = vpack.c.bf16 %v3918_v27, %v3917_v62  ;;  %v8424_v21 = vpop.eup %8423  ;;  %v3931_v61 = vmul.f32 %v8422_v29, %v11986_v39  ;;  %v14554_v27 = vld [vmem:[#allocation119_spill] sm:$0xff]  ;;  %v14556_v62 = vpack.c.bf16 %v12145_v6, %v12142_v5  ;;  %v14558_v29 = vld [vmem:[#allocation158_spill] sm:$0xff] }
 0x5d7   : > { %v12300_v7 = vpop.xlane.xlu1 %3601  ;;  %v4013_v30 = vpack.c.bf16 %v3920_v31, %v3919_v19  ;;  %v14555_v31 = vld [vmem:[#allocation73_spill] sm:$0xff]  ;;  %v14557_v39 = vld [vmem:[#allocation55_spill] sm:$0xff] }
 0x5d8   : > { %v3055_v22 = vsub.f32 %v14555_v31, %v14554_v27 }
 0x5da   : > { %4937 = vrot.lane.b32.xlu0 %v14548_v58, %s8630_s18  ;;  %v14552_v58 = vld [vmem:[#allocation187_spill] sm:$0xff] }
 0x5db   : > { %v4762_v11 = vpop.permute.xlu1 %4761  ;;  %v3048_v59 = vsub.f32 %v14552_v58, %v14551_v43 }
 0x5dc   : > { %7732 = vmatprep.subr.bf16.mxu1 %v4762_v11 }
 0x5dd   : > { %7733 = vmatpush3.bf16.msra.mxu1 %v4762_v11  ;;  %v3932_v11 = vmul.f32 %v8424_v21, %v11887_v41  ;;  %v3269_v9 = vmul.f32 1.442695, %v3048_v59  ;;  %v3283_v41 = vmul.f32 1.442695, %v3055_v22  ;;  %v14560_v59 = vld [vmem:[#allocation79_spill] sm:$0xff] }
 0x5de   : > { %v14562_v21 = vld [vmem:[#allocation71_spill] sm:$0xff] }
 0x5df   : > { %v4019_v15 = vpack.c.bf16 %v3932_v11, %v3931_v61  ;;  %8425 = vpow2.f32 %v3269_v9  ;;  %v14563_v61 = vld [vmem:[#allocation181_spill] sm:$0xff] }
 0x5e0   : > { %7735 = vmatmul.mubr.msk.bf16.vlgmr.msra.gmra.mrb[96].mxu1 %vm2570_vm2, %v4012_v57  ;;  %v3057_v57 = vsub.f32 %v14561_v56, %v14560_v59  ;;  %8427 = vpow2.f32 %v3283_v41  ;;  %v3059_v5 = vsub.f32 %v14563_v61, %v14562_v21  ;;  %v14565_v9 = vld [vmem:[#allocation133_spill] sm:$0xff] }
 0x5e1   : > { %7738 = vmatprep.mubr.msk.bf16.mxu1 %vm2570_vm2, %v4013_v30  ;;  %v14559_v30 = vld [vmem:[#allocation182_spill] sm:$0xff] }
 0x5e2   : > { %v3049_v20 = vsub.f32 %v14559_v30, %v14558_v29  ;;  %v3287_v6 = vmul.f32 1.442695, %v3057_v57  ;;  %v3291_v58 = vmul.f32 1.442695, %v3059_v5 }
 0x5e4   : > { %v3271_v19 = vmul.f32 1.442695, %v3049_v20 }
 0x5e5   : > { %4939 = vrot.lane.b32.xlu1 %v14553_v38, %s8630_s18 }
 0x5e6   : > { %8429 = vpow2.f32 %v3271_v19 }
 0x5e7   : > { %8431 = vpow2.f32 %v3287_v6  ;;  %v14566_v6 = vld [vmem:[#allocation72_spill] sm:$0xff] }
 0x5e8   : > { %7739 = vmatmul.mubr.msk.bf16.gmra.mrb[100].mxu1 %vm2570_vm2, %v14556_v62  ;;  %8433 = vpow2.f32 %v3291_v58 }
 0x5e9   : > { %5022 = vrot.lane.b32.xlu1 %v14557_v39, %s8630_s18  ;;  %7766 = vmatprep.mubr.msk.bf16.mxu1 %vm2570_vm2, %v4019_v15  ;;  %v12334_v43 = vpop.eup %8425  ;;  %v14564_v15 = vld [vmem:[#allocation63_spill] sm:$0xff]  ;;  %8435 = vrcp.f32 %v11906_v37 }
 0x5ea   : > { %v3618_v38 = vsel %vm2570_vm2, %v12334_v43, 0.0  ;;  %v12338_v11 = vpop.eup %8427  ;;  %v3062_v27 = vsub.f32 %v14565_v9, %v14564_v15  ;;  %8437 = vrcp.f32 %v12245_v25  ;;  %v14567_v9 = vld [vmem:[#allocation90_spill] sm:$0xff] }
 0x5eb   : > { %8439 = vrcp.f32 %v12004_v36  ;;  %v3639_v22 = vsel %vm2570_vm2, %v12338_v11, 0.0 }
 0x5ec   : > { %v3297_v39 = vmul.f32 1.442695, %v3062_v27 }
 0x5f0   : > { %v12347_v62 = vpop.eup %8429 }
 0x5f1   : > { %v3621_v25 = vsel %vm2570_vm2, %v12347_v62, 0.0  ;;  %v12354_v36 = vpop.eup %8431 }
 0x5f2   : > { %v12356_v29 = vpop.eup %8433 }
 0x5f3   : > { %v8436_v30 = vpop.eup %8435 }
 0x5f9   : > { %3619 = vadd.xlane.f32.xlu0 %v3618_v38  ;;  %v4845_v38 = vpop.permute.xlu1 %4844 }
 0x5fc   : > { %v3572_v31 = vpop.xlane.xlu0 %3571 }
 0x5fd   : > { %8441 = vrcp.f32 %v3572_v31  ;;  %3640 = vadd.xlane.f32.xlu0 %v3639_v22 }
 0x5fe   : > { %8443 = vrcp.f32 %v12081_v3  ;;  %v3645_v3 = vsel %vm2570_vm2, %v12354_v36, 0.0 }
 0x5ff   : > { %8445 = vrcp.f32 %v12268_v2  ;;  %v8438_v2 = vpop.eup %8437 }
 0x600   : > { %8447 = vrcp.f32 %v12016_v24  ;;  %v3593_v37 = vpop.xlane.xlu0 %3592  ;;  %v8440_v24 = vpop.eup %8439  ;;  %v12363_v56 = vmul.f32 %v8438_v2, %v12008_v0 }
 0x601   : > { %8449 = vrcp.f32 %v3593_v37  ;;  %3622 = vadd.xlane.f32.xlu0 %v3621_v25  ;;  %v3909_v58 = vmul.f32 %v8440_v24, %v14566_v6  ;;  %v14569_v25 = vld [vmem:[#allocation6_spill] sm:$0xff] }
 0x602   : > { %8451 = vpow2.f32 %v3297_v39  ;;  %v14568_v39 = vld [vmem:[#allocation122_spill] sm:$0xff] }
 0x603   : > { %8453 = vrcp.f32 %v12289_v8  ;;  %v3910_v37 = vmul.f32 %v8436_v30, %v14568_v39 }
 0x604   : > { %v3575_v20 = vpop.xlane.xlu0 %3574 }
 0x605   : > { %8455 = vrcp.f32 %v3575_v20  ;;  %3646 = vadd.xlane.f32.xlu0 %v3645_v3  ;;  %v4008_v24 = vpack.c.bf16 %v3910_v37, %v3909_v58 }
 0x606   : > { %8457 = vrcp.f32 %v12300_v7  ;;  %v3651_v7 = vsel %vm2570_vm2, %v12356_v29, 0.0 }
 0x607   : > { %v8442_v41 = vpop.eup %8441 }
 0x608   : > { %v8444_v19 = vpop.eup %8443  ;;  %v3599_v59 = vpop.xlane.xlu0 %3598  ;;  %v12366_v57 = vmul.f32 %v8442_v41, %v12073_v60 }
 0x609   : > { %v8446_v8 = vpop.eup %8445  ;;  %8459 = vrcp.f32 %v3599_v59  ;;  %v3912_v60 = vmul.f32 %v8444_v19, %v14567_v9 }
 0x60a   : > { %v8448_v21 = vpop.eup %8447  ;;  %v12380_v31 = vmul.f32 %v8446_v8, %v12014_v18 }
 0x60b   : > { %v8450_v5 = vpop.eup %8449  ;;  %v3911_v20 = vmul.f32 %v8448_v21, %v14569_v25 }
 0x60c   : > { %v12373_v15 = vpop.eup %8451  ;;  %v4673_v0 = vpop.permute.xlu0 %4672  ;;  %v12377_v27 = vmul.f32 %v8450_v5, %v12079_v54 }
 0x60d   : > { %3652 = vadd.xlane.f32.xlu1 %v3651_v7  ;;  %v8454_v22 = vpop.eup %8453  ;;  %7716 = vmatprep.subr.bf16.mxu0 %v4673_v0  ;;  %v3660_v54 = vsel %vm2570_vm2, %v12373_v15, 0.0  ;;  %v4009_v19 = vpack.c.bf16 %v3912_v60, %v3911_v20  ;;  %v14573_v60 = vld [vmem:[#allocation10_spill] sm:$0xff] }
 0x60e   : > { %7717 = vmatpush3.bf16.msra.mxu0 %v4673_v0  ;;  %v12392_v30 = vmul.f32 %v8454_v22, %v12020_v4  ;;  %v14571_v0 = vpack.c.bf16 %v12231_v53, %v12228_v13  ;;  %v14574_v22 = vld [vmem:[#allocation4_spill] sm:$0xff] }
 0x60f   : > { %v8456_v2 = vpop.eup %8455  ;;  %7742 = vmatprep.subr.bf16.mxu0 %v4845_v38  ;;  %v14577_v13 = vld [vmem:[#allocation112_spill] sm:$0xff] }
 0x610   : > { %v3605_v41 = vpop.xlane.xlu1 %3604  ;;  %v4934_v18 = vpop.permute.xlu0 %4933  ;;  %v12389_v59 = vmul.f32 %v8456_v2, %v12085_v46 }
 0x611   : > { %3661 = vadd.xlane.f32.xlu1 %v3660_v54  ;;  %v8458_v8 = vpop.eup %8457  ;;  %7719 = vmatmul.mubr.msk.bf16.vlgmr.msra.gmra.mrb[120].mxu0 %vm2570_vm2, %v4008_v24  ;;  %v14582_v24 = vld [vmem:[#allocation145_spill] sm:$0xff]  ;;  %v14583_v54 = vld [vmem:[#allocation179_spill] sm:$0xff] }
 0x612   : > { %7758 = vmatprep.subr.bf16.mxu1 %v4934_v18  ;;  %7722 = vmatprep.mubr.msk.bf16.mxu0 %vm2570_vm2, %v4009_v19  ;;  %v12404_v4 = vmul.f32 %v8458_v8, %v12029_v32 }
 0x613   : > { %7743 = vmatpush3.bf16.msra.mxu0 %v4845_v38  ;;  %v8460_v5 = vpop.eup %8459  ;;  %7759 = vmatpush3.bf16.msra.mxu1 %v4934_v18  ;;  %v14570_v38 = vpack.c.bf16 %v12127_v12, %v12124_v16  ;;  %v14575_v16 = vld [vmem:[#allocation59_spill] sm:$0xff]  ;;  %v14576_v12 = vld [vmem:[#allocation64_spill] sm:$0xff]  ;;  %v3061_v18 = vsub.f32 %v14583_v54, %v14582_v24  ;;  %v14591_v54 = vld [vmem:[#allocation185_spill] sm:$0xff] }
 0x614   : > { %v12398_v6 = vpop.xlane.xlu1 %3631  ;;  %v12401_v46 = vmul.f32 %v8460_v5, %v12094_v49  ;;  %v14572_v49 = vld [vmem:[#allocation24_spill] sm:$0xff]  ;;  %v3060_v53 = vsub.f32 %v14577_v13, %v14576_v12 }
 0x615   : > { %v3295_v5 = vmul.f32 1.442695, %v3061_v18  ;;  %v14590_v24 = vld [vmem:[#allocation120_spill] sm:$0xff] }
 0x616   : > { %v3293_v19 = vmul.f32 1.442695, %v3060_v53  ;;  %v3066_v18 = vsub.f32 %v14591_v54, %v14590_v24 }
 0x618   : > { %v3614_v7 = vpop.xlane.xlu1 %3613  ;;  %8461 = vpow2.f32 %v3293_v19  ;;  %v3305_v20 = vmul.f32 1.442695, %v3066_v18 }
 0x619   : > { %7723 = vmatmul.mubr.msk.bf16.gmra.mrb[124].mxu0 %vm2570_vm2, %v14570_v38  ;;  %8463 = vpow2.f32 %v3295_v5 }
 0x61a   : > { %7750 = vmatprep.mubr.msk.bf16.mxu0 %vm2570_vm2, %v14571_v0 }
 0x61b   : > { %4850 = vrot.lane.b32.xlu0 %v14572_v49, %s8630_s18 }
 0x61c   : > { %v3638_v9 = vpop.xlane.xlu1 %3637 }
 0x61f   : > { %5111 = vrot.lane.b32.xlu0 %v14573_v60, %s8630_s18  ;;  %v14588_v60 = vld [vmem:[#allocation183_spill] sm:$0xff] }
 0x620   : > { %v4936_v32 = vpop.permute.xlu1 %4935 }
 0x621   : > { %7760 = vmatprep.subr.bf16.mxu1 %v4936_v32 }
 0x622   : > { %5113 = vrot.lane.b32.xlu1 %v14574_v22, %s8630_s18  ;;  %7761 = vmatpush3.bf16.msra.mxu1 %v4936_v32  ;;  %v14587_v32 = vld [vmem:[#allocation75_spill] sm:$0xff]  ;;  %v12456_v19 = vpop.eup %8461 }
 0x623   : > { %v3063_v22 = vsub.f32 %v14588_v60, %v14587_v32  ;;  %v3654_v32 = vsel %vm2570_vm2, %v12456_v19, 0.0  ;;  %v12460_v60 = vpop.eup %8463 }
 0x624   : > { %v4849_v13 = vpop.permute.xlu1 %4848 }
 0x625   : > { %v3299_v53 = vmul.f32 1.442695, %v3063_v22 }
 0x626   : > { %5026 = vrot.lane.b32.xlu1 %v14575_v16, %s8630_s18  ;;  %v3657_v16 = vsel %vm2570_vm2, %v12460_v60, 0.0 }
 0x627   : > { %8465 = vpow2.f32 %v3299_v53 }
 0x628   : > { %8467 = vpow2.f32 %v3305_v20 }
 0x629   : > { %v12426_v39 = vpop.f32.mrb[88].mxu1  ;;  %8469 = vrcp.f32 %v3605_v41 }
 0x62a   : > { %14578 = vst [vmem:[#allocation153_spill] sm:$0xff] %v12426_v39  ;;  %v12428_v37 = vpop.f32.mrb[89].mxu1 }
 0x62b   : > { %14579 = vst [vmem:[#allocation168_spill] sm:$0xff] %v12428_v37  ;;  %v12430_v25 = vpop.f32.mrb[90].mxu1  ;;  %v14602_v37 = vpack.c.bf16 %v12276_v63, %v12279_v34  ;;  %v14606_v63 = vpack.c.bf16 %v12404_v4, %v12401_v46 }
 0x62c   : > { %14580 = vst [vmem:[#allocation15_spill] sm:$0xff] %v12430_v25  ;;  %v12434_v2 = vpop.f32.mrb[91].mxu1 }
 0x62d   : > { %14581 = vst [vmem:[#allocation180_spill] sm:$0xff] %v12434_v2  ;;  %v14604_v2 = vld [vmem:[#allocation177_spill] sm:$0xff] }
 0x631   : > { %v12440_v38 = vpop.f32.mrb[92].mxu1  ;;  %v12464_v22 = vpop.eup %8465 }
 0x632   : > { %14584 = vst [vmem:[#allocation155_spill] sm:$0xff] %v12440_v38  ;;  %v12442_v0 = vpop.f32.mrb[93].mxu1  ;;  %v3663_v53 = vsel %vm2570_vm2, %v12464_v22, 0.0  ;;  %v12468_v54 = vpop.eup %8467  ;;  %v14598_v38 = vld [vmem:[#allocation5_spill] sm:$0xff] }
 0x633   : > { %14585 = vst [vmem:[#allocation171_spill] sm:$0xff] %v12442_v0  ;;  %v12444_v49 = vpop.f32.mrb[94].mxu1  ;;  %v3672_v20 = vsel %vm2570_vm2, %v12468_v54, 0.0  ;;  %v14600_v0 = vld [vmem:[#allocation85_spill] sm:$0xff] }
 0x634   : > { %14586 = vst [vmem:[#allocation35_spill] sm:$0xff] %v12444_v49  ;;  %v12450_v12 = vpop.f32.mrb[95].mxu1  ;;  %v14599_v49 = vld [vmem:[#allocation100_spill] sm:$0xff] }
 0x635   : > { %14589 = vst [vmem:[#allocation169_spill] sm:$0xff] %v12450_v12  ;;  %v14601_v12 = vld [vmem:[#allocation98_spill] sm:$0xff] }
 0x636   : > { %v3065_v39 = vsub.f32 %v14601_v12, %v14600_v0  ;;  %v14605_v0 = vld [vmem:[#allocation87_spill] sm:$0xff] }
 0x637   : > { %v3068_v12 = vsub.f32 %v14605_v0, %v14604_v2 }
 0x639   : > { %v3309_v34 = vmul.f32 1.442695, %v3068_v12 }
 0x63e   : > { %3655 = vadd.xlane.f32.xlu0 %v3654_v32  ;;  %v8470_v32 = vpop.eup %8469 }
 0x641   : > { %v3608_v5 = vpop.xlane.xlu0 %3607 }
 0x642   : > { %8471 = vrcp.f32 %v3608_v5  ;;  %3658 = vadd.xlane.f32.xlu0 %v3657_v16  ;;  %v12473_v5 = vmul.f32 %v8470_v32, %v12104_v23 }
 0x643   : > { %8473 = vrcp.f32 %v3614_v7 }
 0x645   : > { %v3629_v24 = vpop.xlane.xlu0 %3628 }
 0x649   : > { %v3611_v18 = vpop.xlane.xlu0 %3610 }
 0x64a   : > { %3664 = vadd.xlane.f32.xlu1 %v3663_v53  ;;  %8475 = vrcp.f32 %v3611_v18 }
 0x64b   : > { %8477 = vrcp.f32 %v3638_v9 }
 0x64c   : > { %v8472_v41 = vpop.eup %8471 }
 0x64d   : > { %v3635_v16 = vpop.xlane.xlu0 %3634  ;;  %v12476_v7 = vmul.f32 %v8472_v41, %v12197_v55  ;;  %v8474_v18 = vpop.eup %8473 }
 0x64e   : > { %3673 = vadd.xlane.f32.xlu1 %v3672_v20  ;;  %8479 = vrcp.f32 %v3635_v16  ;;  %v12481_v20 = vmul.f32 %v8474_v18, %v12106_v40  ;;  %v14595_v18 = vld [vmem:[#allocation25_spill] sm:$0xff] }
 0x64f   : > { %8481 = vrcp.f32 %v3629_v24 }
 0x650   : > { %8483 = vrcp.f32 %v12398_v6  ;;  %v3303_v6 = vmul.f32 1.442695, %v3065_v39 }
 0x651   : > { %v4847_v8 = vpop.permute.xlu0 %4846 }
 0x652   : > { %7744 = vmatprep.subr.bf16.mxu0 %v4847_v8 }
 0x653   : > { %7745 = vmatpush3.bf16.msra.mxu0 %v4847_v8  ;;  %v14592_v8 = vld [vmem:[#allocation49_spill] sm:$0xff] }
 0x654   : > { %v8476_v9 = vpop.eup %8475  ;;  %7746 = vmatprep.subr.bf16.mxu0 %v4849_v13 }
 0x655   : > { %v3617_v21 = vpop.xlane.xlu1 %3616  ;;  %v12484_v23 = vmul.f32 %v8476_v9, %v12210_v52  ;;  %v4938_v55 = vpop.permute.xlu0 %4937 }
 0x656   : > { %v8478_v32 = vpop.eup %8477  ;;  %7762 = vmatprep.subr.bf16.mxu1 %v4938_v55 }
 0x657   : > { %7747 = vmatpush3.bf16.msra.mxu0 %v4849_v13  ;;  %7763 = vmatpush3.bf16.msra.mxu1 %v4938_v55  ;;  %v12491_v61 = vmul.f32 %v8478_v32, %v12138_v10  ;;  %v14593_v55 = vld [vmem:[#allocation13_spill] sm:$0xff] }
 0x658   : > { %v8480_v16 = vpop.eup %8479  ;;  %5024 = vrot.lane.b32.xlu0 %v14592_v8, %s8630_s18 }
 0x659   : > { %v3644_v53 = vpop.xlane.xlu1 %3643  ;;  %v12494_v40 = vmul.f32 %v8480_v16, %v12218_v50  ;;  %v14594_v16 = vld [vmem:[#allocation9_spill] sm:$0xff]  ;;  %v3064_v50 = vsub.f32 %v14599_v49, %v14598_v38  ;;  %v14603_v38 = vpack.c.bf16 %v12380_v31, %v12377_v27 }
 0x65a   : > { %v12496_v52 = vpop.f32.mrb[112].mxu0 }
 0x65b   : > { %v12500_v9 = vpop.f32.mrb[113].mxu0  ;;  %v3301_v25 = vmul.f32 1.442695, %v3064_v50 }
 0x65c   : > { %5115 = vrot.lane.b32.xlu0 %v14593_v55, %s8630_s18  ;;  %v12504_v41 = vpop.f32.mrb[114].mxu0 }
 0x65d   : > { %v3626_v13 = vpop.xlane.xlu1 %3625  ;;  %v12508_v32 = vpop.f32.mrb[115].mxu0  ;;  %8485 = vpow2.f32 %v3301_v25 }
 0x65e   : > { %8487 = vpow2.f32 %v3303_v6 }
 0x65f   : > { %5117 = vrot.lane.b32.xlu1 %v14594_v16, %s8630_s18  ;;  %8489 = vpow2.f32 %v3309_v34 }
 0x660   : > { %8491 = vrcp.f32 %v3617_v21 }
 0x661   : > { %v3650_v8 = vpop.xlane.xlu1 %3649 }
 0x662   : > { %v12517_v55 = vpop.f32.mrb[116].mxu0 }
 0x663   : > { %5200 = vrot.lane.b32.xlu1 %v14595_v18, %s8630_s18  ;;  %14596 = vst [vmem:[#allocation58_spill] sm:$0xff] %v12517_v55  ;;  %v12519_v58 = vpop.f32.mrb[117].mxu0  ;;  %v8482_v18 = vpop.eup %8481 }
 0x664   : > { %v12521_v3 = vpop.f32.mrb[118].mxu0  ;;  %v8484_v49 = vpop.eup %8483  ;;  %v3947_v16 = vmul.f32 %v8482_v18, %v12203_v28 }
 0x665   : > { %v4940_v10 = vpop.permute.xlu1 %4939  ;;  %14597 = vst [vmem:[#allocation22_spill] sm:$0xff] %v12521_v3  ;;  %v12527_v24 = vpop.f32.mrb[119].mxu0 }
 0x666   : > { %7764 = vmatprep.subr.bf16.mxu1 %v4940_v10 }
 0x667   : > { %7765 = vmatpush3.bf16.msra.mxu1 %v4940_v10  ;;  %v3948_v10 = vmul.f32 %v8484_v49, %v12109_v51  ;;  %v12550_v27 = vpop.eup %8485 }
 0x668   : > { %v3666_v28 = vsel %vm2570_vm2, %v12550_v27, 0.0  ;;  %v12554_v51 = vpop.eup %8487 }
 0x669   : > { %v4027_v50 = vpack.c.bf16 %v3948_v10, %v3947_v16  ;;  %v3669_v31 = vsel %vm2570_vm2, %v12554_v51, 0.0  ;;  %v12558_v39 = vpop.eup %8489  ;;  %v5023_v10 = vpop.permute.xlu1 %5022 }
 0x66a   : > { %7767 = vmatmul.mubr.msk.bf16.vlgmr.msra.gmra.mrb[104].mxu1 %vm2570_vm2, %v14602_v37  ;;  %v3678_v46 = vsel %vm2570_vm2, %v12558_v39, 0.0  ;;  %v8492_v2 = vpop.eup %8491 }
 0x66b   : > { %7770 = vmatprep.mubr.msk.bf16.mxu1 %vm2570_vm2, %v14603_v38  ;;  %v12563_v18 = vmul.f32 %v8492_v2, %v12225_v44  ;;  %v14612_v2 = vld [vmem:[#allocation188_spill] sm:$0xff] }
 0x672   : > { %7771 = vmatmul.mubr.msk.bf16.gmra.mrb[108].mxu1 %vm2570_vm2, %v14606_v63 }
 0x673   : > { %7798 = vmatprep.mubr.msk.bf16.mxu1 %vm2570_vm2, %v4027_v50 }
 0x67b   : > { %3667 = vadd.xlane.f32.xlu0 %v3666_v28 }
 0x67f   : > { %3670 = vadd.xlane.f32.xlu0 %v3669_v31 }
 0x686   : > { %v3620_v4 = vpop.xlane.xlu0 %3619 }
 0x687   : > { %3679 = vadd.xlane.f32.xlu1 %v3678_v46  ;;  %8493 = vrcp.f32 %v3620_v4  ;;  %v14609_v46 = vpack.c.bf16 %v12252_v47, %v12255_v45  ;;  %v14610_v4 = vpack.c.bf16 %v12366_v57, %v12363_v56  ;;  %v14629_v56 = vld [vmem:[#allocation156_spill] sm:$0xff] }
 0x688   : > { %8495 = vrcp.f32 %v3644_v53 }
 0x68a   : > { %v3641_v37 = vpop.xlane.xlu0 %3640 }
 0x68b   : > { %8497 = vrcp.f32 %v3641_v37 }
 0x68c   : > { %8499 = vrcp.f32 %v3626_v13  ;;  %v14607_v13 = vld [vmem:[#allocation54_spill] sm:$0xff] }
 0x68e   : > { %v3623_v25 = vpop.xlane.xlu0 %3622 }
 0x68f   : > { %8501 = vrcp.f32 %v3623_v25  ;;  %v14611_v25 = vld [vmem:[#allocation123_spill] sm:$0xff] }
 0x690   : > { %8503 = vrcp.f32 %v3650_v8 }
 0x691   : > { %v8494_v16 = vpop.eup %8493 }
 0x692   : > { %v3647_v6 = vpop.xlane.xlu0 %3646  ;;  %v12566_v21 = vmul.f32 %v8494_v16, %v12334_v43  ;;  %v8496_v38 = vpop.eup %8495  ;;  %v14608_v43 = vld [vmem:[#allocation21_spill] sm:$0xff]  ;;  %v3067_v16 = vsub.f32 %v14612_v2, %v14611_v25 }
 0x693   : > { %8505 = vrcp.f32 %v3647_v6  ;;  %v12576_v44 = vmul.f32 %v8496_v38, %v12237_v33  ;;  %v14613_v38 = vld [vmem:[#allocation83_spill] sm:$0xff] }
 0x694   : > { %v3307_v6 = vmul.f32 1.442695, %v3067_v16 }
 0x695   : > { %v8498_v49 = vpop.eup %8497  ;;  %5028 = vrot.lane.b32.xlu0 %v14607_v13, %s8630_s18  ;;  %v14615_v13 = vpack.c.bf16 %v12392_v30, %v12389_v59 }
 0x696   : > { %v4851_v0 = vpop.permute.xlu0 %4850  ;;  %v12573_v8 = vmul.f32 %v8498_v49, %v12338_v11  ;;  %v8500_v12 = vpop.eup %8499  ;;  %v14614_v49 = vld [vmem:[#allocation127_spill] sm:$0xff]  ;;  %8507 = vpow2.f32 %v3307_v6 }
 0x697   : > { %7748 = vmatprep.subr.bf16.mxu0 %v4851_v0  ;;  %v12588_v33 = vmul.f32 %v8500_v12, %v12249_v17 }
 0x698   : > { %5202 = vrot.lane.b32.xlu1 %v14608_v43, %s8630_s18  ;;  %7749 = vmatpush3.bf16.msra.mxu0 %v4851_v0  ;;  %v14618_v0 = vld [vmem:[#allocation110_spill] sm:$0xff]  ;;  %v14619_v43 = vld [vmem:[#allocation121_spill] sm:$0xff] }
 0x699   : > { %v8502_v63 = vpop.eup %8501  ;;  %7774 = vmatprep.subr.bf16.mxu0 %v5023_v10 }
 0x69a   : > { %v12582_v34 = vpop.xlane.xlu1 %3652  ;;  %v5112_v28 = vpop.permute.xlu0 %5111  ;;  %v12585_v11 = vmul.f32 %v8502_v63, %v12347_v62  ;;  %v14620_v63 = vld [vmem:[#allocation16_spill] sm:$0xff] }
 0x69b   : > { %v8504_v31 = vpop.eup %8503  ;;  %7751 = vmatmul.mubr.msk.bf16.vlgmr.msra.gmra.mrb[128].mxu0 %vm2570_vm2, %v14609_v46  ;;  %7790 = vmatprep.subr.bf16.mxu1 %v5112_v28 }
 0x69c   : > { %7754 = vmatprep.mubr.msk.bf16.mxu0 %vm2570_vm2, %v14610_v4  ;;  %7775 = vmatpush3.bf16.msra.mxu0 %v5023_v10  ;;  %v12606_v45 = vmul.f32 %v8504_v31, %v12272_v1  ;;  %v3069_v10 = vsub.f32 %v14614_v49, %v14613_v38  ;;  %v14617_v1 = vld [vmem:[#allocation165_spill] sm:$0xff]  ;;  %v14625_v38 = vld [vmem:[#allocation172_spill] sm:$0xff] }
 0x69d   : > { %v8506_v37 = vpop.eup %8505  ;;  %7791 = vmatpush3.bf16.msra.mxu1 %v5112_v28  ;;  %v3071_v12 = vsub.f32 %v14618_v0, %v14617_v1  ;;  %v3070_v28 = vsub.f32 %v14620_v63, %v14619_v43  ;;  %v14621_v4 = vld [vmem:[#allocation137_spill] sm:$0xff] }
 0x69e   : > { %v3662_v17 = vpop.xlane.xlu1 %3661  ;;  %v12603_v47 = vmul.f32 %v8506_v37, %v12354_v36  ;;  %v14616_v36 = vpack.c.bf16 %v12476_v7, %v12473_v5  ;;  %v3311_v31 = vmul.f32 1.442695, %v3069_v10  ;;  %v14622_v37 = vld [vmem:[#allocation134_spill] sm:$0xff]  ;;  %v14626_v10 = vld [vmem:[#allocation76_spill] sm:$0xff] }
 0x69f   : > { %v3315_v46 = vmul.f32 1.442695, %v3071_v12  ;;  %v3073_v59 = vsub.f32 %v14622_v37, %v14621_v4  ;;  %v3313_v30 = vmul.f32 1.442695, %v3070_v28  ;;  %v3072_v62 = vsub.f32 %v14626_v10, %v14625_v38  ;;  %v14631_v10 = vld [vmem:[#allocation89_spill] sm:$0xff] }
 0x6a0   : > { %8509 = vpow2.f32 %v3311_v31  ;;  %v12626_v5 = vpop.eup %8507 }
 0x6a1   : > { %8511 = vpow2.f32 %v3315_v46  ;;  %v3319_v25 = vmul.f32 1.442695, %v3073_v59  ;;  %v3675_v16 = vsel %vm2570_vm2, %v12626_v5, 0.0  ;;  %v3317_v55 = vmul.f32 1.442695, %v3072_v62 }
 0x6a2   : > { %v5114_v57 = vpop.permute.xlu1 %5113  ;;  %8513 = vpow2.f32 %v3313_v30 }
 0x6a3   : > { %7792 = vmatprep.subr.bf16.mxu1 %v5114_v57  ;;  %7755 = vmatmul.mubr.msk.bf16.gmra.mrb[132].mxu0 %vm2570_vm2, %v14615_v13  ;;  %8515 = vpow2.f32 %v3319_v25 }
 0x6a4   : > { %7793 = vmatpush3.bf16.msra.mxu1 %v5114_v57  ;;  %7782 = vmatprep.mubr.msk.bf16.mxu0 %vm2570_vm2, %v14616_v36  ;;  %8517 = vrcp.f32 %v12582_v34 }
 0x6aa   : > { %v12634_v57 = vpop.eup %8509 }
 0x6ab   : > { %v12644_v13 = vpop.eup %8511  ;;  %v3681_v36 = vsel %vm2570_vm2, %v12634_v57, 0.0 }
 0x6ac   : > { %v12648_v1 = vpop.eup %8513  ;;  %v3687_v12 = vsel %vm2570_vm2, %v12644_v13, 0.0 }
 0x6ad   : > { %v12654_v43 = vpop.eup %8515  ;;  %v3684_v28 = vsel %vm2570_vm2, %v12648_v1, 0.0 }
 0x6ae   : > { %v3693_v59 = vsel %vm2570_vm2, %v12654_v43, 0.0  ;;  %v8518_v46 = vpop.eup %8517 }
 0x6b3   : > { %v12628_v7 = vpop.f32.mrb[96].mxu1 }
 0x6b4   : > { %v12630_v2 = vpop.f32.mrb[97].mxu1  ;;  %3676 = vadd.xlane.f32.xlu0 %v3675_v16  ;;  %v14623_v16 = vld [vmem:[#allocation26_spill] sm:$0xff] }
 0x6b5   : > { %v12636_v6 = vpop.f32.mrb[98].mxu1 }
 0x6b6   : > { %v12640_v49 = vpop.f32.mrb[99].mxu1 }
 0x6b8   : > { %3682 = vadd.xlane.f32.xlu0 %v3681_v36  ;;  %v5027_v36 = vpop.permute.xlu1 %5026 }
 0x6bb   : > { %v12650_v0 = vpop.f32.mrb[100].mxu1 }
 0x6bc   : > { %3688 = vadd.xlane.f32.xlu1 %v3687_v12  ;;  %v12656_v63 = vpop.f32.mrb[101].mxu1  ;;  %3685 = vadd.xlane.f32.xlu0 %v3684_v28  ;;  %v14624_v12 = vld [vmem:[#allocation34_spill] sm:$0xff] }
 0x6bd   : > { %v12660_v31 = vpop.f32.mrb[102].mxu1 }
 0x6be   : > { %v12664_v4 = vpop.f32.mrb[103].mxu1 }
 0x6c0   : > { %3694 = vadd.xlane.f32.xlu1 %v3693_v59 }
 0x6cb   : > { %v3656_v30 = vpop.xlane.xlu0 %3655 }
 0x6cc   : > { %8519 = vrcp.f32 %v3656_v30 }
 0x6cd   : > { %8521 = vrcp.f32 %v3662_v17  ;;  %v12678_v17 = vmul.f32 %v8518_v46, %v12356_v29  ;;  %v14627_v46 = vld [vmem:[#allocation62_spill] sm:$0xff] }
 0x6cf   : > { %v3659_v25 = vpop.xlane.xlu0 %3658 }
 0x6d0   : > { %8523 = vrcp.f32 %v3659_v25 }
 0x6d1   : > { %5206 = vrot.lane.b32.xlu1 %v14623_v16, %s8630_s18  ;;  %v14630_v16 = vld [vmem:[#allocation28_spill] sm:$0xff]  ;;  %8525 = vpow2.f32 %v3317_v55 }
 0x6d2   : > { %5204 = vrot.lane.b32.xlu0 %v14624_v12, %s8630_s18  ;;  %v3074_v50 = vsub.f32 %v14630_v16, %v14629_v56 }
 0x6d3   : > { %v5025_v28 = vpop.permute.xlu0 %5024 }
 0x6d4   : > { %7776 = vmatprep.subr.bf16.mxu0 %v5025_v28  ;;  %v3321_v3 = vmul.f32 1.442695, %v3074_v50 }
 0x6d5   : > { %7777 = vmatpush3.bf16.msra.mxu0 %v5025_v28 }
 0x6d6   : > { %v8520_v37 = vpop.eup %8519  ;;  %7778 = vmatprep.subr.bf16.mxu0 %v5027_v36 }
 0x6d7   : > { %v12675_v59 = vpop.xlane.xlu1 %3664  ;;  %v5116_v34 = vpop.permute.xlu0 %5115  ;;  %v12681_v30 = vmul.f32 %v8520_v37, %v12456_v19  ;;  %v14628_v37 = vld [vmem:[#allocation136_spill] sm:$0xff] }
 0x6d8   : > { %v8522_v25 = vpop.eup %8521  ;;  %7794 = vmatprep.subr.bf16.mxu1 %v5116_v34 }
 0x6d9   : > { %7779 = vmatpush3.bf16.msra.mxu0 %v5027_v36  ;;  %7795 = vmatpush3.bf16.msra.mxu1 %v5116_v34  ;;  %v12688_v53 = vmul.f32 %v8522_v25, %v12373_v15  ;;  %v3075_v36 = vsub.f32 %v14628_v37, %v14627_v46  ;;  %v14632_v15 = vld [vmem:[#allocation70_spill] sm:$0xff]  ;;  %v14635_v46 = vpack.c.bf16 %v12576_v44, %v12573_v8 }
 0x6da   : > { %v8524_v12 = vpop.eup %8523  ;;  %v3077_v25 = vsub.f32 %v14632_v15, %v14631_v10  ;;  %v14639_v8 = vpack.c.bf16 %v12606_v45, %v12603_v47 }
 0x6db   : > { %v3674_v28 = vpop.xlane.xlu1 %3673  ;;  %v12691_v29 = vmul.f32 %v8524_v12, %v12460_v60  ;;  %v3323_v38 = vmul.f32 1.442695, %v3075_v36  ;;  %v14633_v60 = vpack.c.bf16 %v12491_v61, %v12494_v40  ;;  %v12727_v50 = vpop.eup %8525  ;;  %v14647_v40 = vld [vmem:[#allocation68_spill] sm:$0xff] }
 0x6dc   : > { %v3327_v56 = vmul.f32 1.442695, %v3077_v25  ;;  %v3690_v45 = vsel %vm2570_vm2, %v12727_v50, 0.0 }
 0x6dd   : > { %8527 = vpow2.f32 %v3323_v38 }
 0x6de   : > { %8529 = vpow2.f32 %v3321_v3 }
 0x6df   : > { %v5118_v34 = vpop.permute.xlu1 %5117  ;;  %8531 = vpow2.f32 %v3327_v56 }
 0x6e0   : > { %7796 = vmatprep.subr.bf16.mxu1 %v5118_v34  ;;  %8533 = vrcp.f32 %v3674_v28  ;;  %v14649_v28 = vpack.c.bf16 %v12566_v21, %v12563_v18 }
 0x6e1   : > { %7797 = vmatpush3.bf16.msra.mxu1 %v5118_v34 }
 0x6e3   : > { %v5201_v47 = vpop.permute.xlu1 %5200 }
 0x6e4   : > { %7799 = vmatmul.mubr.msk.bf16.vlgmr.msra.gmra.mrb[112].mxu1 %vm2570_vm2, %v14633_v60  ;;  %v12705_v12 = vpop.f32.mrb[120].mxu0 }
 0x6e5   : > { %14634 = vst [vmem:[#allocation8_spill] sm:$0xff] %v12705_v12  ;;  %7802 = vmatprep.mubr.msk.bf16.mxu1 %vm2570_vm2, %v14635_v46  ;;  %v12711_v62 = vpop.f32.mrb[121].mxu0 }
 0x6e6   : > { %14636 = vst [vmem:[#allocation88_spill] sm:$0xff] %v12711_v62  ;;  %v12713_v16 = vpop.f32.mrb[122].mxu0  ;;  %v14670_v62 = vld [vmem:[#allocation152_spill] sm:$0xff] }
 0x6e7   : > { %14637 = vst [vmem:[#allocation130_spill] sm:$0xff] %v12713_v16  ;;  %v12717_v61 = vpop.f32.mrb[123].mxu0  ;;  %v12737_v38 = vpop.eup %8527 }
 0x6e8   : > { %14638 = vst [vmem:[#allocation3_spill] sm:$0xff] %v12717_v61  ;;  %v12743_v10 = vpop.eup %8529  ;;  %v3699_v15 = vsel %vm2570_vm2, %v12737_v38, 0.0 }
 0x6e9   : > { %v12747_v25 = vpop.eup %8531  ;;  %v3696_v60 = vsel %vm2570_vm2, %v12743_v10, 0.0 }
 0x6ea   : > { %v3705_v46 = vsel %vm2570_vm2, %v12747_v25, 0.0 }
 0x6ec   : > { %7803 = vmatmul.mubr.msk.bf16.gmra.mrb[116].mxu1 %vm2570_vm2, %v14639_v8  ;;  %v12725_v44 = vpop.f32.mrb[124].mxu0  ;;  %v14644_v8 = vld [vmem:[#allocation33_spill] sm:$0xff] }
 0x6ed   : > { %14640 = vst [vmem:[#allocation144_spill] sm:$0xff] %v12725_v44  ;;  %v12729_v37 = vpop.f32.mrb[125].mxu0  ;;  %v14648_v44 = vpack.c.bf16 %v12481_v20, %v12484_v23 }
 0x6ee   : > { %14641 = vst [vmem:[#allocation57_spill] sm:$0xff] %v12729_v37  ;;  %v12731_v3 = vpop.f32.mrb[126].mxu0  ;;  %v14652_v37 = vld [vmem:[#allocation65_spill] sm:$0xff] }
 0x6ef   : > { %14642 = vst [vmem:[#allocation116_spill] sm:$0xff] %v12731_v3  ;;  %v12735_v34 = vpop.f32.mrb[127].mxu0 }
 0x6f0   : > { %14643 = vst [vmem:[#allocation80_spill] sm:$0xff] %v12735_v34  ;;  %v14653_v34 = vld [vmem:[#allocation99_spill] sm:$0xff] }
 0x6f1   : > { %3691 = vadd.xlane.f32.xlu0 %v3690_v45  ;;  %v14645_v45 = vld [vmem:[#allocation41_spill] sm:$0xff] }
 0x6f5   : > { %3700 = vadd.xlane.f32.xlu1 %v3699_v15  ;;  %3697 = vadd.xlane.f32.xlu0 %v3696_v60  ;;  %v14646_v60 = vld [vmem:[#allocation139_spill] sm:$0xff] }
 0x6f6   : > { %v3076_v19 = vsub.f32 %v14647_v40, %v14646_v60  ;;  %v3078_v40 = vsub.f32 %v14653_v34, %v14652_v37 }
 0x6f8   : > { %v3325_v60 = vmul.f32 1.442695, %v3076_v19  ;;  %v14656_v19 = vpack.c.bf16 %v12588_v33, %v12585_v11 }
 0x6f9   : > { %3706 = vadd.xlane.f32.xlu1 %v3705_v46  ;;  %v8534_v46 = vpop.eup %8533 }
 0x6fa   : > { %v12775_v23 = vmul.f32 %v8534_v46, %v12468_v54 }
 0x708   : > { %v3668_v56 = vpop.xlane.xlu0 %3667 }
 0x70a   : > { %5291 = vrot.lane.b32.xlu1 %v14644_v8, %s8630_s18  ;;  %v14650_v8 = vld [vmem:[#allocation96_spill] sm:$0xff] }
 0x70b   : > { %5289 = vrot.lane.b32.xlu0 %v14645_v45, %s8630_s18  ;;  %v14651_v45 = vld [vmem:[#allocation141_spill] sm:$0xff] }
 0x70c   : > { %v3671_v36 = vpop.xlane.xlu0 %3670 }
 0x70d   : > { %8535 = vrcp.f32 %v3671_v36 }
 0x70e   : > { %8537 = vpow2.f32 %v3325_v60 }
 0x710   : > { %v5029_v15 = vpop.permute.xlu0 %5028 }
 0x711   : > { %7780 = vmatprep.subr.bf16.mxu0 %v5029_v15 }
 0x712   : > { %7781 = vmatpush3.bf16.msra.mxu0 %v5029_v15  ;;  %v3079_v15 = vsub.f32 %v14651_v45, %v14650_v8  ;;  %v3329_v8 = vmul.f32 1.442695, %v3078_v40  ;;  %v14668_v40 = vld [vmem:[#allocation77_spill] sm:$0xff] }
 0x713   : > { %7806 = vmatprep.subr.bf16.mxu0 %v5201_v47 }
 0x714   : > { %v3680_v55 = vpop.xlane.xlu1 %3679  ;;  %v3331_v21 = vmul.f32 1.442695, %v3079_v15 }
 0x715   : > { %7783 = vmatmul.mubr.msk.bf16.vlgmr.msra.gmra.mrb[136].mxu0 %vm2570_vm2, %v14648_v44  ;;  %v14654_v44 = vld [vmem:[#allocation43_spill] sm:$0xff] }
 0x716   : > { %7786 = vmatprep.mubr.msk.bf16.mxu0 %vm2570_vm2, %v14649_v28  ;;  %7807 = vmatpush3.bf16.msra.mxu0 %v5201_v47  ;;  %v14655_v47 = vld [vmem:[#allocation164_spill] sm:$0xff]  ;;  %8539 = vpow2.f32 %v3331_v21 }
 0x717   : > { %v8536_v36 = vpop.eup %8535  ;;  %v3081_v28 = vsub.f32 %v14655_v47, %v14654_v44  ;;  %8541 = vpow2.f32 %v3329_v8  ;;  %v14659_v47 = vld [vmem:[#allocation40_spill] sm:$0xff] }
 0x718   : > { %v5203_v3 = vpop.permute.xlu1 %5202  ;;  %v12772_v20 = vmul.f32 %v8536_v36, %v12554_v51  ;;  %v14657_v51 = vpack.c.bf16 %v12681_v30, %v12678_v17  ;;  %v12789_v37 = vpop.eup %8537 }
 0x719   : > { %7808 = vmatprep.subr.bf16.mxu0 %v5203_v3  ;;  %v3335_v54 = vmul.f32 1.442695, %v3081_v28  ;;  %v3702_v34 = vsel %vm2570_vm2, %v12789_v37, 0.0  ;;  %v14660_v28 = vld [vmem:[#allocation46_spill] sm:$0xff] }
 0x71a   : > { %7809 = vmatpush3.bf16.msra.mxu0 %v5203_v3 }
 0x71b   : > { %8543 = vpow2.f32 %v3335_v54 }
 0x71c   : > { %8545 = vrcp.f32 %v3680_v55  ;;  %v14663_v55 = vld [vmem:[#allocation51_spill] sm:$0xff] }
 0x71d   : > { %7787 = vmatmul.mubr.msk.bf16.gmra.mrb[140].mxu0 %vm2570_vm2, %v14656_v19 }
 0x71e   : > { %7814 = vmatprep.mubr.msk.bf16.mxu0 %vm2570_vm2, %v14657_v51 }
 0x720   : > { %v12791_v3 = vpop.eup %8539 }
 0x721   : > { %v12795_v46 = vpop.eup %8541  ;;  %v3711_v11 = vsel %vm2570_vm2, %v12791_v3, 0.0 }
 0x722   : > { %v3708_v17 = vsel %vm2570_vm2, %v12795_v46, 0.0 }
 0x725   : > { %v12799_v33 = vpop.eup %8543 }
 0x726   : > { %v3717_v30 = vsel %vm2570_vm2, %v12799_v33, 0.0 }
 0x72a   : > { %3703 = vadd.xlane.f32.xlu0 %v3702_v34 }
 0x72e   : > { %3712 = vadd.xlane.f32.xlu1 %v3711_v11  ;;  %3709 = vadd.xlane.f32.xlu0 %v3708_v17 }
 0x732   : > { %3718 = vadd.xlane.f32.xlu1 %v3717_v30 }
 0x73d   : > { %v12805_v36 = vpop.f32.mrb[104].mxu1 }
 0x73e   : > { %14658 = vst [vmem:[#allocation142_spill] sm:$0xff] %v12805_v36  ;;  %v12807_v45 = vpop.f32.mrb[105].mxu1  ;;  %v5531_v36 = vld [vmem:[%s13650_s3] sm:$0xf] }
 0x73f   : > { %v12809_v15 = vpop.f32.mrb[106].mxu1 }
 0x740   : > { %v12813_v60 = vpop.f32.mrb[107].mxu1 }
 0x741   : > { %v3677_v44 = vpop.xlane.xlu0 %3676 }
 0x742   : > { %8547 = vrcp.f32 %v3677_v44  ;;  %v8546_v44 = vpop.eup %8545 }
 0x743   : > { %5295 = vrot.lane.b32.xlu1 %v14659_v47, %s8630_s18  ;;  %8549 = vrcp.f32 %v3668_v56  ;;  %v3964_v18 = vmul.f32 %v8546_v44, %v12558_v39 }
 0x744   : > { %5293 = vrot.lane.b32.xlu0 %v14660_v28, %s8630_s18  ;;  %8551 = vrcp.f32 %v12675_v59  ;;  %v14666_v59 = vld [vmem:[#allocation61_spill] sm:$0xff] }
 0x745   : > { %v12821_v8 = vpop.f32.mrb[108].mxu1  ;;  %v3683_v51 = vpop.xlane.xlu0 %3682 }
 0x746   : > { %14661 = vst [vmem:[#allocation138_spill] sm:$0xff] %v12821_v8  ;;  %v12823_v19 = vpop.f32.mrb[109].mxu1  ;;  %8553 = vrcp.f32 %v3683_v51 }
 0x747   : > { %14662 = vst [vmem:[#allocation166_spill] sm:$0xff] %v12823_v19  ;;  %5380 = vrot.lane.b32.xlu1 %v14663_v55, %s8630_s18  ;;  %v12828_v54 = vpop.f32.mrb[110].mxu1  ;;  %v14667_v55 = vld [vmem:[#allocation18_spill] sm:$0xff] }
 0x748   : > { %14664 = vst [vmem:[#allocation148_spill] sm:$0xff] %v12828_v54  ;;  %v12832_v11 = vpop.f32.mrb[111].mxu1  ;;  %v3080_v34 = vsub.f32 %v14668_v40, %v14667_v55 }
 0x749   : > { %14665 = vst [vmem:[#allocation159_spill] sm:$0xff] %v12832_v11  ;;  %v12836_v17 = vpop.xlane.xlu1 %3688  ;;  %v3686_v30 = vpop.xlane.xlu0 %3685 }
 0x74a   : > { %8555 = vrcp.f32 %v3686_v30  ;;  %v14669_v30 = vld [vmem:[#allocation109_spill] sm:$0xff]  ;;  %v3333_v8 = vmul.f32 1.442695, %v3080_v34  ;;  %v14671_v34 = vpack.c.bf16 %v12688_v53, %v12691_v29 }
 0x74b   : > { %5382 = vrot.lane.b32.xlu1 %v14666_v59, %s8630_s18  ;;  %v3082_v61 = vsub.f32 %v14670_v62, %v14669_v30 }
 0x74c   : > { %v8548_v47 = vpop.eup %8547  ;;  %8557 = vpow2.f32 %v3333_v8 }
 0x74d   : > { %v12840_v28 = vpop.xlane.xlu1 %3694  ;;  %v5205_v21 = vpop.permute.xlu0 %5204  ;;  %v3963_v51 = vmul.f32 %v8548_v47, %v12626_v5  ;;  %v3337_v44 = vmul.f32 1.442695, %v3082_v61 }
 0x74e   : > { %v8550_v56 = vpop.eup %8549  ;;  %7810 = vmatprep.subr.bf16.mxu0 %v5205_v21 }
 0x74f   : > { %7811 = vmatpush3.bf16.msra.mxu0 %v5205_v21  ;;  %v4035_v12 = vpack.c.bf16 %v3964_v18, %v3963_v51  ;;  %v8552_v16 = vpop.eup %8551  ;;  %v3960_v40 = vmul.f32 %v8550_v56, %v12550_v27  ;;  %8559 = vpow2.f32 %v3337_v44  ;;  %v14674_v44 = vld [vmem:[#allocation60_spill] sm:$0xff] }
 0x750   : > { %v8554_v55 = vpop.eup %8553  ;;  %v3959_v5 = vmul.f32 %v8552_v16, %v12464_v22  ;;  %v14672_v22 = vpack.c.bf16 %v12775_v23, %v12772_v20 }
 0x751   : > { %v5207_v59 = vpop.permute.xlu1 %5206  ;;  %7830 = vmatprep.mubr.msk.bf16.mxu1 %vm2570_vm2, %v4035_v12  ;;  %v12852_v18 = vmul.f32 %v8554_v55, %v12634_v57  ;;  %v14673_v55 = vld [vmem:[#allocation56_spill] sm:$0xff] }
 0x752   : > { %7812 = vmatprep.subr.bf16.mxu0 %v5207_v59  ;;  %v4033_v62 = vpack.c.bf16 %v3960_v40, %v3959_v5 }
 0x753   : > { %7813 = vmatpush3.bf16.msra.mxu0 %v5207_v59 }
 0x754   : > { %v8556_v39 = vpop.eup %8555 }
 0x755   : > { %v12855_v21 = vmul.f32 %v8556_v39, %v12648_v1 }
 0x756   : > { %7815 = vmatmul.mubr.msk.bf16.vlgmr.msra.gmra.mrb[144].mxu0 %vm2570_vm2, %v14671_v34  ;;  %v12868_v57 = vpop.eup %8557 }
 0x757   : > { %7818 = vmatprep.mubr.msk.bf16.mxu0 %vm2570_vm2, %v4033_v62  ;;  %v3714_v1 = vsel %vm2570_vm2, %v12868_v57, 0.0 }
 0x759   : > { %v12872_v12 = vpop.eup %8559 }
 0x75a   : > { %v3720_v53 = vsel %vm2570_vm2, %v12872_v12, 0.0 }
 0x75e   : > { %7819 = vmatmul.mubr.msk.bf16.gmra.mrb[148].mxu0 %vm2570_vm2, %v14672_v22 }
 0x763   : > { %3715 = vadd.xlane.f32.xlu0 %v3714_v1 }
 0x767   : > { %3721 = vadd.xlane.f32.xlu0 %v3720_v53 }
 0x76e   : > { %v12876_v29 = vpop.f32.mrb[128].mxu0 }
 0x76f   : > { %v12878_v16 = vpop.f32.mrb[129].mxu0 }
 0x770   : > { %v12880_v61 = vpop.f32.mrb[130].mxu0 }
 0x771   : > { %v12884_v23 = vpop.f32.mrb[131].mxu0 }
 0x776   : > { %v12888_v56 = vpop.f32.mrb[132].mxu0 }
 0x777   : > { %v12890_v47 = vpop.f32.mrb[133].mxu0 }
 0x778   : > { %v12892_v51 = vpop.f32.mrb[134].mxu0 }
 0x779   : > { %v12896_v59 = vpop.f32.mrb[135].mxu0 }
 0x77d   : > { %5378 = vrot.lane.b32.xlu0 %v14673_v55, %s8630_s18 }
 0x77e   : > { %v3692_v5 = vpop.xlane.xlu0 %3691 }
 0x77f   : > { %8561 = vrcp.f32 %v3692_v5 }
 0x781   : > { %5384 = vrot.lane.b32.xlu0 %v14674_v44, %s8630_s18 }
 0x782   : > { %v3701_v39 = vpop.xlane.xlu1 %3700  ;;  %v3698_v62 = vpop.xlane.xlu0 %3697 }
 0x783   : > { %8563 = vrcp.f32 %v3701_v39 }
 0x784   : > { %8565 = vrcp.f32 %v12836_v17 }
 0x786   : > { %v12904_v34 = vpop.xlane.xlu1 %3706  ;;  %v5290_v22 = vpop.permute.xlu0 %5289 }
 0x787   : > { %7822 = vmatprep.subr.bf16.mxu1 %v5290_v22 }
 0x788   : > { %7823 = vmatpush3.bf16.msra.mxu1 %v5290_v22 }
 0x78a   : > { %v5292_v1 = vpop.permute.xlu1 %5291 }
 0x78b   : > { %7824 = vmatprep.subr.bf16.mxu1 %v5292_v1 }
 0x78c   : > { %7825 = vmatpush3.bf16.msra.mxu1 %v5292_v1 }
 0x7b7   : > { %v12906_v53 = vpop.f32.mrb[112].mxu1  ;;  %v3704_v30 = vpop.xlane.xlu0 %3703 }
 0x7b8   : > { %14675 = vst [vmem:[#allocation47_spill] sm:$0xff] %v12906_v53  ;;  %v12909_v55 = vpop.f32.mrb[113].mxu1  ;;  %8567 = vrcp.f32 %v3704_v30  ;;  %v8562_v30 = vpop.eup %8561 }
 0x7b9   : > { %14676 = vst [vmem:[#allocation11_spill] sm:$0xff] %v12909_v55  ;;  %v12911_v44 = vpop.f32.mrb[114].mxu1  ;;  %8569 = vrcp.f32 %v3698_v62  ;;  %v8564_v27 = vpop.eup %8563  ;;  %v3968_v11 = vmul.f32 %v8562_v30, %v12727_v50  ;;  %v5533_v50 = vld [vmem:[%s13650_s3 + $0x8] sm:$0xf] }
 0x7ba   : > { %14677 = vst [vmem:[#allocation86_spill] sm:$0xff] %v12911_v44  ;;  %v12915_v20 = vpop.f32.mrb[115].mxu1  ;;  %8571 = vrcp.f32 %v12840_v28  ;;  %v8566_v22 = vpop.eup %8565  ;;  %v3971_v28 = vmul.f32 %v8564_v27, %v12737_v38  ;;  %v14682_v27 = vld [vmem:[#allocation126_spill] sm:$0xff] }
 0x7bb   : > { %14678 = vst [vmem:[#allocation42_spill] sm:$0xff] %v12915_v20  ;;  %v12919_v5 = vpop.xlane.xlu1 %3712  ;;  %v12921_v39 = vpop.xlane.xlu0 %3709  ;;  %v5585_v20 = vsel %vm5583_vm3, %v5531_v36, 0 }
 0x7bc   : > { %8573 = vrcp.f32 %v12921_v39 }
 0x7bf   : > { %v12923_v17 = vpop.xlane.xlu1 %3718  ;;  %v12925_v1 = vpop.f32.mrb[116].mxu1 }
 0x7c0   : > { %14679 = vst [vmem:[#allocation151_spill] sm:$0xff] %v12925_v1  ;;  %v12928_v8 = vpop.f32.mrb[117].mxu1  ;;  %v5294_v40 = vpop.permute.xlu0 %5293 }
 0x7c1   : > { %v12930_v53 = vpop.f32.mrb[118].mxu1  ;;  %7826 = vmatprep.subr.bf16.mxu1 %v5294_v40 }
 0x7c2   : > { %v12934_v55 = vpop.f32.mrb[119].mxu1  ;;  %7827 = vmatpush3.bf16.msra.mxu1 %v5294_v40  ;;  %v8568_v62 = vpop.eup %8567  ;;  %v3967_v40 = vmul.f32 %v8566_v22, %v12644_v13  ;;  %v14685_v22 = vld [vmem:[#allocation17_spill] sm:$0xff] }
 0x7c3   : > { %v5296_v54 = vpop.permute.xlu1 %5295  ;;  %v3972_v19 = vmul.f32 %v8568_v62, %v12789_v37  ;;  %v8570_v1 = vpop.eup %8569  ;;  %v14680_v37 = vpack.c.bf16 %v12855_v21, %v12852_v18  ;;  %v6009_v18 = vsel %vm5583_vm3, %v5533_v50, 0  ;;  %v14684_v21 = vld [vmem:[#allocation67_spill] sm:$0xff]  ;;  %v14691_v62 = vld [vmem:[#allocation82_spill] sm:$0xff] }
 0x7c4   : > { %7828 = vmatprep.subr.bf16.mxu1 %v5296_v54  ;;  %v4037_v38 = vpack.c.bf16 %v3968_v11, %v3967_v40  ;;  %v3970_v13 = vmul.f32 %v8570_v1, %v12743_v10  ;;  %v14681_v11 = vld [vmem:[#allocation124_spill] sm:$0xff]  ;;  %v14686_v30 = vpack.c.bf16 %v14684_v21, %v14685_v22  ;;  %v14693_v40 = vld [vmem:[#allocation157_spill] sm:$0xff] }
 0x7c5   : > { %v4039_v44 = vpack.c.bf16 %v3972_v19, %v3971_v28  ;;  %v8572_v19 = vpop.eup %8571  ;;  %v14687_v10 = vld [vmem:[#allocation176_spill] sm:$0xff] }
 0x7c6   : > { %7829 = vmatpush3.bf16.msra.mxu1 %v5296_v54 }
 0x7c7   : > { %8054 = vmatprep.subr.msk.bf16.mxu1 %vm5583_vm3, %v5531_v36  ;;  %7846 = vmatprep.mubr.msk.bf16.mxu0 %vm2570_vm2, %v4039_v44  ;;  %v3969_v36 = vmul.f32 %v8572_v19, %v12654_v43  ;;  %v14683_v44 = vpack.c.bf16 %v14681_v11, %v14682_v27  ;;  %v14690_v43 = vld [vmem:[#allocation125_spill] sm:$0xff]  ;;  %v14696_v19 = vld [vmem:[#allocation170_spill] sm:$0xff] }
 0x7c8   : > { %v14692_v28 = vpack.c.bf16 %v14690_v43, %v14691_v62  ;;  %v14699_v11 = vld [vmem:[#allocation105_spill] sm:$0xff]  ;;  %v14700_v27 = vld [vmem:[#allocation30_spill] sm:$0xff] }
 0x7c9   : > { %7831 = vmatmul.mubr.msk.bf16.vlgmr.msra.gmra.mrb[120].mxu1 %vm2570_vm2, %v14680_v37  ;;  %v4038_v54 = vpack.c.bf16 %v3970_v13, %v3969_v36  ;;  %v14697_v13 = vld [vmem:[#allocation94_spill] sm:$0xff] }
 0x7ca   : > { %7834 = vmatprep.mubr.msk.bf16.mxu1 %vm2570_vm2, %v4037_v38  ;;  %7855 = vmatpush3.bf16.msra.mxu1 %v5585_v20  ;;  %v14688_v20 = vld [vmem:[#allocation143_spill] sm:$0xff]  ;;  %v14694_v38 = vld [vmem:[#allocation106_spill] sm:$0xff]  ;;  %v14698_v36 = vpack.c.bf16 %v14696_v19, %v14697_v13 }
 0x7cb   : > { %8056 = vmatprep.subr.msk.bf16.mxu1 %vm5583_vm3, %v5533_v50  ;;  %v14689_v1 = vpack.c.bf16 %v14687_v10, %v14688_v20  ;;  %v14695_v37 = vpack.c.bf16 %v14693_v40, %v14694_v38  ;;  %v14702_v20 = vld [vmem:[#allocation93_spill] sm:$0xff]  ;;  %v14705_v40 = vld [vmem:[#allocation107_spill] sm:$0xff] }
 0x7cc   : > { %v14706_v38 = vld [vmem:[#allocation37_spill] sm:$0xff] }
 0x7d1   : > { %7835 = vmatmul.mubr.msk.bf16.gmra.mrb[124].mxu1 %vm2570_vm2, %v4038_v54 }
 0x7d2   : > { %7856 = vmatprep.mubr.msk.bf16.mxu1 %vm705_vm1, %v14683_v44  ;;  %v14701_v44 = vpack.c.bf16 %v14699_v11, %v14700_v27 }
 0x7d9   : > { %7857 = vmatmul.mubr.msk.bf16.vlgmr.msra.gmra.mrb[128].mxu1 %vm705_vm1, %v14686_v30 }
 0x7da   : > { %7860 = vmatprep.mubr.msk.bf16.mxu1 %vm705_vm1, %v14689_v1  ;;  %7923 = vmatpush3.bf16.msra.mxu1 %v6009_v18  ;;  %v14703_v1 = vld [vmem:[#allocation29_spill] sm:$0xff] }
 0x7db   : > { %v14704_v43 = vpack.c.bf16 %v14702_v20, %v14703_v1  ;;  %v14708_v20 = vld [vmem:[#allocation95_spill] sm:$0xff]  ;;  %v14709_v1 = vld [vmem:[#allocation2_spill] sm:$0xff] }
 0x7e1   : > { %7861 = vmatmul.mubr.msk.bf16.gmra.mrb[132].mxu1 %vm705_vm1, %v14692_v28 }
 0x7e2   : > { %7864 = vmatprep.mubr.msk.bf16.mxu1 %vm705_vm1, %v14695_v37  ;;  %v14707_v37 = vpack.c.bf16 %v14705_v40, %v14706_v38  ;;  %v14711_v38 = vld [vmem:[#allocation113_spill] sm:$0xff] }
 0x7e8   : > { %v12981_v50 = vpop.f32.mrb[136].mxu0 }
 0x7e9   : > { %7865 = vmatmul.mubr.msk.bf16.gmra.mrb[136].mxu1 %vm705_vm1, %v14698_v36  ;;  %v12987_v54 = vpop.f32.mrb[137].mxu0 }
 0x7ea   : > { %7868 = vmatprep.mubr.msk.bf16.mxu1 %vm705_vm1, %v14701_v44  ;;  %v12993_v18 = vpop.f32.mrb[138].mxu0  ;;  %v5381_v44 = vpop.permute.xlu1 %5380 }
 0x7eb   : > { %v5512_v21 = vpack.c.bf16 %v12993_v18, %v12981_v50  ;;  %v12997_v22 = vpop.f32.mrb[139].mxu0  ;;  %v14781_v18 = vld [vmem:[#allocation116_spill] sm:$0xff] }
 0x7ec   : > { %v5511_v30 = vpack.c.bf16 %v12997_v22, %v12987_v54  ;;  %v14777_v54 = vld [vmem:[#allocation80_spill] sm:$0xff]  ;;  %v14778_v22 = vld [vmem:[#allocation57_spill] sm:$0xff] }
 0x7ee   : > { %v5383_v39 = vpop.permute.xlu1 %5382 }
 0x7f0   : > { %v13001_v10 = vpop.f32.mrb[140].mxu0  ;;  %v3716_v62 = vpop.xlane.xlu0 %3715 }
 0x7f1   : > { %7869 = vmatmul.mubr.msk.bf16.gmra.mrb[140].mxu1 %vm705_vm1, %v14704_v43  ;;  %v13007_v28 = vpop.f32.mrb[141].mxu0  ;;  %8575 = vrcp.f32 %v3716_v62  ;;  %v14710_v43 = vpack.c.bf16 %v14708_v20, %v14709_v1  ;;  %v14714_v62 = vld [vmem:[#allocation102_spill] sm:$0xff]  ;;  %v14715_v20 = vld [vmem:[#allocation103_spill] sm:$0xff] }
 0x7f2   : > { %7872 = vmatprep.mubr.msk.bf16.mxu1 %vm705_vm1, %v14707_v37  ;;  %v13013_v19 = vpop.f32.mrb[142].mxu0  ;;  %8577 = vrcp.f32 %v12904_v34  ;;  %v14712_v37 = vld [vmem:[#allocation117_spill] sm:$0xff]  ;;  %v8574_v34 = vpop.eup %8573  ;;  %v14716_v1 = vpack.c.bf16 %v14714_v62, %v14715_v20 }
 0x7f3   : > { %v13017_v36 = vpop.f32.mrb[143].mxu0  ;;  %8579 = vrcp.f32 %v12919_v5  ;;  %v14713_v13 = vpack.c.bf16 %v14711_v38, %v14712_v37  ;;  %v5532_v38 = vld [vmem:[%s13650_s3 + $0x4] sm:$0xf]  ;;  %v14780_v50 = vpack.c.bf16 %v13013_v19, %v13001_v10  ;;  %v14790_v10 = vpack.c.bf16 %v12934_v55, %v12928_v8  ;;  %v14791_v19 = vld [vmem:[#allocation151_spill] sm:$0xff] }
 0x7f4   : > { %v5513_v11 = vpack.c.bf16 %v13017_v36, %v13007_v28  ;;  %v3722_v27 = vpop.xlane.xlu0 %3721  ;;  %v14787_v36 = vld [vmem:[#allocation86_spill] sm:$0xff] }
 0x7f5   : > { %8581 = vrcp.f32 %v3722_v27 }
 0x7f6   : > { %8583 = vrcp.f32 %v12923_v17 }
 0x7f8   : > { %v5379_v40 = vpop.permute.xlu0 %5378 }
 0x7f9   : > { %7873 = vmatmul.mubr.msk.bf16.gmra.mrb[144].mxu1 %vm705_vm1, %v14710_v43  ;;  %7838 = vmatprep.subr.bf16.mxu0 %v5379_v40  ;;  %v14717_v43 = vpack.c.bf16 %v12259_v35, %v12241_v14 }
 0x7fa   : > { %7876 = vmatprep.mubr.msk.bf16.mxu1 %vm705_vm1, %v14713_v13  ;;  %7839 = vmatpush3.bf16.msra.mxu0 %v5379_v40 }
 0x7fb   : > { %7840 = vmatprep.subr.bf16.mxu0 %v5381_v44  ;;  %v8576_v5 = vpop.eup %8575 }
 0x7fc   : > { %v8578_v13 = vpop.eup %8577  ;;  %v5385_v40 = vpop.permute.xlu0 %5384  ;;  %v3976_v17 = vmul.f32 %v8576_v5, %v12868_v57  ;;  %v14721_v5 = vld [vmem:[#allocation128_spill] sm:$0xff] }
 0x7fd   : > { %v8580_v27 = vpop.eup %8579  ;;  %v3973_v37 = vmul.f32 %v8578_v13, %v12747_v25  ;;  %v14719_v25 = vld [vmem:[#allocation129_spill] sm:$0xff] }
 0x7fe   : > { %7841 = vmatpush3.bf16.msra.mxu0 %v5381_v44  ;;  %v3974_v44 = vmul.f32 %v8574_v34, %v12795_v46  ;;  %v3975_v14 = vmul.f32 %v8580_v27, %v12791_v3  ;;  %v14718_v46 = vpack.c.bf16 %v12243_v42, %v12239_v26  ;;  %v5534_v34 = vld [vmem:[%s13650_s3 + $0xc] sm:$0xf]  ;;  %v14720_v3 = vpack.c.bf16 %v12295_v48, %v14719_v25  ;;  %v14726_v27 = vld [vmem:[#allocation36_spill] sm:$0xff] }
 0x7ff   : > { %7842 = vmatprep.subr.bf16.mxu0 %v5383_v39  ;;  %v8582_v62 = vpop.eup %8581  ;;  %v14724_v48 = vpack.c.bf16 %v12640_v49, %v12630_v2  ;;  %v14732_v2 = vpack.c.bf16 %v12664_v4, %v12656_v63  ;;  %v14733_v49 = vld [vmem:[#allocation69_spill] sm:$0xff]  ;;  %v14740_v63 = vpack.c.bf16 %v12884_v23, %v12878_v16  ;;  %v14741_v4 = vpack.c.bf16 %v12508_v32, %v12500_v9  ;;  %v14751_v25 = vld [vmem:[#allocation180_spill] sm:$0xff] }
 0x800   : > { %v4040_v35 = vpack.c.bf16 %v3974_v44, %v3973_v37  ;;  %v4041_v57 = vpack.c.bf16 %v3976_v17, %v3975_v14  ;;  %v8584_v20 = vpop.eup %8583  ;;  %v3978_v26 = vmul.f32 %v8582_v62, %v12872_v12  ;;  %v14728_v44 = vpack.c.bf16 %v12636_v6, %v12628_v7  ;;  %v14729_v17 = vld [vmem:[#allocation115_spill] sm:$0xff]  ;;  %v14737_v6 = vld [vmem:[#allocation14_spill] sm:$0xff] }
 0x801   : > { %7877 = vmatmul.mubr.msk.bf16.gmra.mrb[148].mxu1 %vm705_vm1, %v14716_v1  ;;  %v3977_v42 = vmul.f32 %v8584_v20, %v12799_v33  ;;  %v6221_v33 = vsel %vm5583_vm3, %v5534_v34, 0  ;;  %v14734_v14 = vld [vmem:[#allocation111_spill] sm:$0xff]  ;;  %v14736_v7 = vpack.c.bf16 %v12660_v31, %v12650_v0  ;;  %v14742_v0 = vpack.c.bf16 %v12880_v61, %v12876_v29 }
 0x802   : > { %7880 = vmatprep.mubr.msk.bf16.mxu1 %vm705_vm1, %v14717_v43  ;;  %7843 = vmatpush3.bf16.msra.mxu0 %v5383_v39  ;;  %v5797_v39 = vsel %vm5583_vm3, %v5532_v38, 0  ;;  %v14722_v43 = vld [vmem:[#allocation84_spill] sm:$0xff]  ;;  %v14744_v16 = vpack.c.bf16 %v12896_v59, %v12890_v47  ;;  %v14745_v9 = vpack.c.bf16 %v12527_v24, %v12519_v58  ;;  %v14748_v47 = vld [vmem:[#allocation58_spill] sm:$0xff]  ;;  %v14750_v58 = vpack.c.bf16 %v12813_v60, %v12807_v45  ;;  %v14759_v60 = vld [vmem:[#allocation159_spill] sm:$0xff] }
 0x803   : > { %7844 = vmatprep.subr.bf16.mxu0 %v5385_v40  ;;  %v4042_v1 = vpack.c.bf16 %v3978_v26, %v3977_v42  ;;  %v14723_v13 = vpack.c.bf16 %v14721_v5, %v14722_v43  ;;  %v14756_v43 = vld [vmem:[#allocation15_spill] sm:$0xff] }
 0x806   : > { %7845 = vmatpush3.bf16.msra.mxu0 %v5385_v40  ;;  %v14725_v40 = vld [vmem:[#allocation53_spill] sm:$0xff] }
 0x807   : > { %8055 = vmatprep.subr.msk.bf16.mxu0 %vm5583_vm3, %v5532_v38  ;;  %v14727_v12 = vpack.c.bf16 %v14725_v40, %v14726_v27  ;;  %v14730_v38 = vld [vmem:[#allocation104_spill] sm:$0xff]  ;;  %v14762_v27 = vld [vmem:[#allocation169_spill] sm:$0xff] }
 0x808   : > { %v14731_v37 = vpack.c.bf16 %v14729_v17, %v14730_v38  ;;  %v14766_v17 = vld [vmem:[#allocation138_spill] sm:$0xff]  ;;  %v14768_v38 = vld [vmem:[#allocation35_spill] sm:$0xff] }
 0x809   : > { %7881 = vmatmul.mubr.msk.bf16.gmra.mrb[152].mxu1 %vm705_vm1, %v14718_v46  ;;  %7847 = vmatmul.mubr.msk.bf16.vlgmr.msra.gmra.mrb[152].mxu0 %vm2570_vm2, %v4040_v35  ;;  %v14735_v35 = vpack.c.bf16 %v14733_v49, %v14734_v14  ;;  %v14743_v46 = vpack.c.bf16 %v12504_v41, %v12496_v52  ;;  %v14746_v41 = vpack.c.bf16 %v12892_v51, %v12888_v56  ;;  %v14771_v49 = vld [vmem:[#allocation3_spill] sm:$0xff]  ;;  %v14772_v14 = vld [vmem:[#allocation88_spill] sm:$0xff] }
 0x80a   : > { %7884 = vmatprep.mubr.msk.bf16.mxu1 %vm705_vm1, %v14720_v3  ;;  %7850 = vmatprep.mubr.msk.bf16.mxu0 %vm2570_vm2, %v4041_v57  ;;  %v14752_v3 = vld [vmem:[#allocation168_spill] sm:$0xff] }
 0x80b   : > { %7889 = vmatpush3.bf16.msra.mxu0 %v5797_v39  ;;  %v14738_v39 = vld [vmem:[#allocation101_spill] sm:$0xff]  ;;  %v14753_v20 = vpack.c.bf16 %v14751_v25, %v14752_v3 }
 0x80c   : > { %8057 = vmatprep.subr.msk.bf16.mxu0 %vm5583_vm3, %v5534_v34  ;;  %v14739_v62 = vpack.c.bf16 %v14737_v6, %v14738_v39  ;;  %v14747_v34 = vld [vmem:[#allocation22_spill] sm:$0xff]  ;;  %v14775_v6 = vld [vmem:[#allocation8_spill] sm:$0xff] }
 0x80d   : > { %v14749_v59 = vpack.c.bf16 %v14747_v34, %v14748_v47 }
 0x811   : > { %7885 = vmatmul.mubr.msk.bf16.gmra.mrb[156].mxu1 %vm705_vm1, %v14723_v13  ;;  %7851 = vmatmul.mubr.msk.bf16.gmra.mrb[156].mxu0 %vm2570_vm2, %v4042_v1  ;;  %v14754_v1 = vld [vmem:[#allocation142_spill] sm:$0xff]  ;;  %v14757_v13 = vld [vmem:[#allocation153_spill] sm:$0xff] }
 0x812   : > { %7924 = vmatprep.mubr.msk.bf16.mxu1 %vm705_vm1, %v14724_v48  ;;  %7890 = vmatprep.mubr.msk.bf16.mxu0 %vm705_vm1, %v14727_v12  ;;  %v14755_v5 = vpack.c.bf16 %v12809_v15, %v14754_v1  ;;  %v14758_v45 = vpack.c.bf16 %v14756_v43, %v14757_v13  ;;  %v14760_v48 = vld [vmem:[#allocation166_spill] sm:$0xff]  ;;  %v14763_v12 = vld [vmem:[#allocation171_spill] sm:$0xff] }
 0x813   : > { %v14761_v40 = vpack.c.bf16 %v14759_v60, %v14760_v48 }
 0x819   : > { %7925 = vmatmul.mubr.msk.bf16.vlgmr.msra.gmra.mrb[160].mxu1 %vm705_vm1, %v14728_v44  ;;  %7891 = vmatmul.mubr.msk.bf16.vlgmr.msra.gmra.mrb[160].mxu0 %vm705_vm1, %v14731_v37  ;;  %v14765_v44 = vld [vmem:[#allocation148_spill] sm:$0xff]  ;;  %v14769_v37 = vld [vmem:[#allocation155_spill] sm:$0xff] }
 0x81a   : > { %7928 = vmatprep.mubr.msk.bf16.mxu1 %vm705_vm1, %v14732_v2  ;;  %7894 = vmatprep.mubr.msk.bf16.mxu0 %vm705_vm1, %v14735_v35  ;;  %v14767_v15 = vpack.c.bf16 %v14765_v44, %v14766_v17  ;;  %v14770_v2 = vpack.c.bf16 %v14768_v38, %v14769_v37  ;;  %v14773_v35 = vpack.c.bf16 %v14771_v49, %v14772_v14 }
 0x81b   : > { %7957 = vmatpush3.bf16.msra.mxu0 %v6221_v33  ;;  %v14764_v33 = vpack.c.bf16 %v14762_v27, %v14763_v12 }
 0x821   : > { %7929 = vmatmul.mubr.msk.bf16.gmra.mrb[164].mxu1 %vm705_vm1, %v14736_v7  ;;  %7895 = vmatmul.mubr.msk.bf16.gmra.mrb[164].mxu0 %vm705_vm1, %v14739_v62  ;;  %v14774_v7 = vld [vmem:[#allocation130_spill] sm:$0xff] }
 0x822   : > { %7932 = vmatprep.mubr.msk.bf16.mxu1 %vm705_vm1, %v14740_v63  ;;  %7898 = vmatprep.mubr.msk.bf16.mxu0 %vm705_vm1, %v14741_v4  ;;  %v14776_v39 = vpack.c.bf16 %v14774_v7, %v14775_v6  ;;  %v14784_v63 = vld [vmem:[#allocation42_spill] sm:$0xff]  ;;  %v14785_v4 = vld [vmem:[#allocation11_spill] sm:$0xff] }
 0x823   : > { %v14786_v28 = vpack.c.bf16 %v14784_v63, %v14785_v4 }
 0x829   : > { %7933 = vmatmul.mubr.msk.bf16.gmra.mrb[168].mxu1 %vm705_vm1, %v14742_v0  ;;  %v7816_v31 = vpop.f32.mrb[144].mxu0  ;;  %7899 = vmatmul.mubr.msk.bf16.gmra.mrb[168].mxu0 %vm705_vm1, %v14743_v46 }
 0x82a   : > { %7936 = vmatprep.mubr.msk.bf16.mxu1 %vm705_vm1, %v14744_v16  ;;  %v5258_v23 = vpop.f32.mrb[145].mxu0  ;;  %7902 = vmatprep.mubr.msk.bf16.mxu0 %vm705_vm1, %v14745_v9 }
 0x82b   : > { %v7817_v32 = vpop.f32.mrb[146].mxu0 }
 0x82c   : > { %v5520_v29 = vpack.c.bf16 %v7817_v32, %v7816_v31  ;;  %v5261_v61 = vpop.f32.mrb[147].mxu0  ;;  %v14792_v31 = vpack.c.bf16 %v12930_v53, %v14791_v19 }
 0x82d   : > { %v5519_v57 = vpack.c.bf16 %v5261_v61, %v5258_v23 }
 0x831   : > { %7937 = vmatmul.mubr.msk.bf16.gmra.mrb[172].mxu1 %vm705_vm1, %v14746_v41  ;;  %v7820_v52 = vpop.f32.mrb[148].mxu0  ;;  %7903 = vmatmul.mubr.msk.bf16.gmra.mrb[172].mxu0 %vm705_vm1, %v14749_v59 }
 0x832   : > { %7940 = vmatprep.mubr.msk.bf16.mxu1 %vm705_vm1, %v14750_v58  ;;  %v5274_v24 = vpop.f32.mrb[149].mxu0  ;;  %7906 = vmatprep.mubr.msk.bf16.mxu0 %vm705_vm1, %v14753_v20 }
 0x833   : > { %v7821_v56 = vpop.f32.mrb[150].mxu0 }
 0x834   : > { %v5522_v51 = vpack.c.bf16 %v7821_v56, %v7820_v52  ;;  %v5277_v26 = vpop.f32.mrb[151].mxu0 }
 0x835   : > { %v5521_v42 = vpack.c.bf16 %v5277_v26, %v5274_v24 }
 0x839   : > { %7941 = vmatmul.mubr.msk.bf16.gmra.mrb[176].mxu1 %vm705_vm1, %v14755_v5  ;;  %7907 = vmatmul.mubr.msk.bf16.gmra.mrb[176].mxu0 %vm705_vm1, %v14758_v45 }
 0x83a   : > { %7944 = vmatprep.mubr.msk.bf16.mxu1 %vm705_vm1, %v14761_v40  ;;  %7910 = vmatprep.mubr.msk.bf16.mxu0 %vm705_vm1, %v14764_v33 }
 0x841   : > { %7945 = vmatmul.mubr.msk.bf16.gmra.mrb[180].mxu1 %vm705_vm1, %v14767_v15  ;;  %7911 = vmatmul.mubr.msk.bf16.gmra.mrb[180].mxu0 %vm705_vm1, %v14770_v2 }
 0x842   : > { %7948 = vmatprep.mubr.msk.bf16.mxu1 %vm705_vm1, %v5511_v30  ;;  %7914 = vmatprep.mubr.msk.bf16.mxu0 %vm705_vm1, %v14773_v35  ;;  %v14779_v30 = vpack.c.bf16 %v14777_v54, %v14778_v22 }
 0x849   : > { %7949 = vmatmul.mubr.msk.bf16.gmra.mrb[184].mxu1 %vm705_vm1, %v5512_v21  ;;  %7915 = vmatmul.mubr.msk.bf16.gmra.mrb[184].mxu0 %vm705_vm1, %v14776_v39  ;;  %v14782_v21 = vld [vmem:[#allocation144_spill] sm:$0xff] }
 0x84a   : > { %7952 = vmatprep.mubr.msk.bf16.mxu1 %vm705_vm1, %v5513_v11  ;;  %7918 = vmatprep.mubr.msk.bf16.mxu0 %vm705_vm1, %v14779_v30  ;;  %v14783_v62 = vpack.c.bf16 %v14781_v18, %v14782_v21  ;;  %v14788_v11 = vld [vmem:[#allocation47_spill] sm:$0xff] }
 0x84b   : > { %v14789_v0 = vpack.c.bf16 %v14787_v36, %v14788_v11 }
 0x851   : > { %7953 = vmatmul.mubr.msk.bf16.gmra.mrb[188].mxu1 %vm705_vm1, %v14780_v50  ;;  %7919 = vmatmul.mubr.msk.bf16.gmra.mrb[188].mxu0 %vm705_vm1, %v14783_v62 }
 0x852   : > { %7958 = vmatprep.mubr.msk.bf16.mxu0 %vm705_vm1, %v14786_v28 }
 0x859   : > { %7959 = vmatmul.mubr.msk.bf16.vlgmr.msra.gmra.mrb[192].mxu0 %vm705_vm1, %v14789_v0 }
 0x85a   : > { %7962 = vmatprep.mubr.msk.bf16.mxu0 %vm705_vm1, %v14790_v10 }
 0x861   : > { %7963 = vmatmul.mubr.msk.bf16.gmra.mrb[196].mxu0 %vm705_vm1, %v14792_v31 }
 0x862   : > { %7966 = vmatprep.mubr.msk.bf16.mxu0 %vm705_vm1, %v5519_v57 }
 0x869   : > { %7967 = vmatmul.mubr.msk.bf16.gmra.mrb[200].mxu0 %vm705_vm1, %v5520_v29 }
 0x86a   : > { %7970 = vmatprep.mubr.msk.bf16.mxu0 %vm705_vm1, %v5521_v42 }
 0x871   : > { %7971 = vmatmul.mubr.msk.bf16.gmra.mrb[204].mxu0 %vm705_vm1, %v5522_v51 }
 0x89c   : > { %v7832_v46 = vpop.f32.mrb[120].mxu1 }
 0x89d   : > { %v5347_v16 = vpop.f32.mrb[121].mxu1 }
 0x89e   : > { %v7833_v23 = vpop.f32.mrb[122].mxu1 }
 0x89f   : > { %v5524_v9 = vpack.c.bf16 %v7833_v23, %v7832_v46  ;;  %v5350_v8 = vpop.f32.mrb[123].mxu1 }
 0x8a0   : > { %v5523_v55 = vpack.c.bf16 %v5350_v8, %v5347_v16 }
 0x8a2   : > { %7974 = vmatprep.mubr.msk.bf16.mxu0 %vm705_vm1, %v5523_v55 }
 0x8a3   : > { %7975 = vmatmul.mubr.msk.bf16.gmra.mrb[208].mxu0 %vm705_vm1, %v5524_v9 }
 0x8a4   : > { %v7836_v53 = vpop.f32.mrb[124].mxu1 }
 0x8a5   : > { %v5363_v32 = vpop.f32.mrb[125].mxu1 }
 0x8a6   : > { %v7837_v61 = vpop.f32.mrb[126].mxu1 }
 0x8a7   : > { %v5526_v57 = vpack.c.bf16 %v7837_v61, %v7836_v53  ;;  %v5366_v41 = vpop.f32.mrb[127].mxu1 }
 0x8a8   : > { %v5525_v29 = vpack.c.bf16 %v5366_v41, %v5363_v32 }
 0x8aa   : > { %7978 = vmatprep.mubr.msk.bf16.mxu0 %vm705_vm1, %v5525_v29 }
 0x8ab   : > { %7979 = vmatmul.mubr.msk.bf16.gmra.mrb[212].mxu0 %vm705_vm1, %v5526_v57 }
 0x8ac   : > { %v7858_v52 = vpop.f32.mrb[128].mxu1 }
 0x8ad   : > { %v5621_v34 = vpop.f32.mrb[129].mxu1  ;;  %v6398_v11 = vsel %vm359_vm0, %v7858_v52, 0.0 }
 0x8ae   : > { %v7859_v47 = vpop.f32.mrb[130].mxu1  ;;  %v6384_v31 = vsel %vm359_vm0, %v5621_v34, 0.0 }
 0x8af   : > { %v5624_v59 = vpop.f32.mrb[131].mxu1  ;;  %v6405_v46 = vsel %vm359_vm0, %v7859_v47, 0.0 }
 0x8b0   : > { %v6391_v55 = vsel %vm359_vm0, %v5624_v59, 0.0 }
 0x8b4   : > { %v13224_v58 = vpop.f32.mrb[132].mxu1 }
 0x8b5   : > { %v13226_v24 = vpop.f32.mrb[133].mxu1 }
 0x8b6   : > { %v13228_v25 = vpop.f32.mrb[134].mxu1 }
 0x8b7   : > { %v13230_v3 = vpop.f32.mrb[135].mxu1 }
 0x8bc   : > { %v13232_v20 = vpop.f32.mrb[136].mxu1 }
 0x8bd   : > { %v13234_v56 = vpop.f32.mrb[137].mxu1 }
 0x8be   : > { %v13236_v51 = vpop.f32.mrb[138].mxu1 }
 0x8bf   : > { %v13238_v26 = vpop.f32.mrb[139].mxu1 }
 0x8c4   : > { %v13240_v42 = vpop.f32.mrb[140].mxu1 }
 0x8c5   : > { %v13242_v1 = vpop.f32.mrb[141].mxu1 }
 0x8c6   : > { %v13244_v5 = vpop.f32.mrb[142].mxu1 }
 0x8c7   : > { %v13246_v43 = vpop.f32.mrb[143].mxu1 }
 0x8cc   : > { %v13248_v13 = vpop.f32.mrb[144].mxu1 }
 0x8cd   : > { %v13250_v45 = vpop.f32.mrb[145].mxu1 }
 0x8ce   : > { %v13252_v60 = vpop.f32.mrb[146].mxu1 }
 0x8cf   : > { %v13254_v48 = vpop.f32.mrb[147].mxu1 }
 0x8d4   : > { %v13256_v40 = vpop.f32.mrb[148].mxu1 }
 0x8d5   : > { %v13258_v27 = vpop.f32.mrb[149].mxu1 }
 0x8d6   : > { %v13260_v12 = vpop.f32.mrb[150].mxu1 }
 0x8d7   : > { %v13262_v33 = vpop.f32.mrb[151].mxu1 }
 0x8dc   : > { %v13264_v44 = vpop.f32.mrb[152].mxu1  ;;  %v7848_v17 = vpop.f32.mrb[152].mxu0 }
 0x8dd   : > { %v13266_v15 = vpop.f32.mrb[153].mxu1  ;;  %v5436_v38 = vpop.f32.mrb[153].mxu0 }
 0x8de   : > { %v13268_v37 = vpop.f32.mrb[154].mxu1  ;;  %v7849_v2 = vpop.f32.mrb[154].mxu0 }
 0x8df   : > { %v13270_v49 = vpop.f32.mrb[155].mxu1  ;;  %v5528_v14 = vpack.c.bf16 %v7849_v2, %v7848_v17  ;;  %v5439_v35 = vpop.f32.mrb[155].mxu0 }
 0x8e0   : > { %v5527_v7 = vpack.c.bf16 %v5439_v35, %v5436_v38 }
 0x8e2   : > { %7982 = vmatprep.mubr.msk.bf16.mxu0 %vm705_vm1, %v5527_v7 }
 0x8e3   : > { %7983 = vmatmul.mubr.msk.bf16.gmra.mrb[216].mxu0 %vm705_vm1, %v5528_v14 }
 0x8e4   : > { %v13273_v6 = vpop.f32.mrb[156].mxu1  ;;  %v7852_v39 = vpop.f32.mrb[156].mxu0 }
 0x8e5   : > { %v13276_v54 = vpop.f32.mrb[157].mxu1  ;;  %v5452_v22 = vpop.f32.mrb[157].mxu0 }
 0x8e6   : > { %v13278_v30 = vpop.f32.mrb[158].mxu1  ;;  %v7853_v50 = vpop.f32.mrb[158].mxu0 }
 0x8e7   : > { %v13280_v18 = vpop.f32.mrb[159].mxu1  ;;  %v5530_v21 = vpack.c.bf16 %v7853_v50, %v7852_v39  ;;  %v5455_v62 = vpop.f32.mrb[159].mxu0 }
 0x8e8   : > { %v5529_v63 = vpack.c.bf16 %v5455_v62, %v5452_v22  ;;  %v6426_v22 = vsel %vm359_vm0, %v13224_v58, 0.0 }
 0x8ea   : > { %7986 = vmatprep.mubr.msk.bf16.mxu0 %vm705_vm1, %v5529_v63  ;;  %v6412_v63 = vsel %vm359_vm0, %v13226_v24, 0.0 }
 0x8eb   : > { %7987 = vmatmul.mubr.msk.bf16.gmra.mrb[220].mxu0 %vm705_vm1, %v5530_v21 }
 0x8ec   : > { %v7926_v4 = vpop.f32.mrb[160].mxu1  ;;  %v7892_v28 = vpop.f32.mrb[160].mxu0 }
 0x8ed   : > { %v6045_v36 = vpop.f32.mrb[161].mxu1  ;;  %v6399_v0 = vsel %vm359_vm0, %v7892_v28, 0.0  ;;  %v5833_v10 = vpop.f32.mrb[161].mxu0  ;;  %v6401_v53 = vsel %vm359_vm0, %v7926_v4, 0.0  ;;  %v6433_v4 = vsel %vm359_vm0, %v13228_v25, 0.0 }
 0x8ee   : > { %v7927_v19 = vpop.f32.mrb[162].mxu1  ;;  %v6400_v16 = vadd.f32 %v6399_v0, %v6398_v11  ;;  %v6385_v23 = vsel %vm359_vm0, %v5833_v10, 0.0  ;;  %v7893_v9 = vpop.f32.mrb[162].mxu0  ;;  %v6387_v41 = vsel %vm359_vm0, %v6045_v36, 0.0  ;;  %v6419_v10 = vsel %vm359_vm0, %v13230_v3, 0.0 }
 0x8ef   : > { %v6048_v8 = vpop.f32.mrb[163].mxu1  ;;  %v6386_v32 = vadd.f32 %v6385_v23, %v6384_v31  ;;  %v6406_v61 = vsel %vm359_vm0, %v7893_v9, 0.0  ;;  %v5836_v57 = vpop.f32.mrb[163].mxu0  ;;  %v6408_v47 = vsel %vm359_vm0, %v7927_v19, 0.0 }
 0x8f0   : > { %v6407_v29 = vadd.f32 %v6406_v61, %v6405_v46  ;;  %v6392_v52 = vsel %vm359_vm0, %v5836_v57, 0.0  ;;  %v13294_v34 = vadd.f32 %v6401_v53, %v6400_v16  ;;  %v6394_v59 = vsel %vm359_vm0, %v6048_v8, 0.0 }
 0x8f1   : > { %v6393_v17 = vadd.f32 %v6392_v52, %v6391_v55  ;;  %v13297_v38 = vadd.f32 %v6387_v41, %v6386_v32 }
 0x8f2   : > { %v13300_v2 = vadd.f32 %v6408_v47, %v6407_v29  ;;  %v6454_v29 = vsel %vm359_vm0, %v13232_v20, 0.0 }
 0x8f3   : > { %v13302_v35 = vadd.f32 %v6394_v59, %v6393_v17  ;;  %v6440_v59 = vsel %vm359_vm0, %v13234_v56, 0.0 }
 0x8f4   : > { %v7930_v14 = vpop.f32.mrb[164].mxu1  ;;  %v7896_v7 = vpop.f32.mrb[164].mxu0 }
 0x8f5   : > { %v6061_v39 = vpop.f32.mrb[165].mxu1  ;;  %v6427_v50 = vsel %vm359_vm0, %v7896_v7, 0.0  ;;  %v5849_v21 = vpop.f32.mrb[165].mxu0  ;;  %v6429_v58 = vsel %vm359_vm0, %v7930_v14, 0.0  ;;  %v6461_v14 = vsel %vm359_vm0, %v13236_v51, 0.0 }
 0x8f6   : > { %v7931_v62 = vpop.f32.mrb[166].mxu1  ;;  %v6428_v28 = vadd.f32 %v6427_v50, %v6426_v22  ;;  %v6413_v36 = vsel %vm359_vm0, %v5849_v21, 0.0  ;;  %v7897_v11 = vpop.f32.mrb[166].mxu0  ;;  %v6415_v16 = vsel %vm359_vm0, %v6061_v39, 0.0  ;;  %v6447_v21 = vsel %vm359_vm0, %v13238_v26, 0.0 }
 0x8f7   : > { %v6064_v0 = vpop.f32.mrb[167].mxu1  ;;  %v6414_v19 = vadd.f32 %v6413_v36, %v6412_v63  ;;  %v6434_v31 = vsel %vm359_vm0, %v7897_v11, 0.0  ;;  %v5852_v46 = vpop.f32.mrb[167].mxu0  ;;  %v6436_v9 = vsel %vm359_vm0, %v7931_v62, 0.0 }
 0x8f8   : > { %v6435_v24 = vadd.f32 %v6434_v31, %v6433_v4  ;;  %v6420_v23 = vsel %vm359_vm0, %v5852_v46, 0.0  ;;  %v13318_v25 = vadd.f32 %v6429_v58, %v6428_v28  ;;  %v6422_v3 = vsel %vm359_vm0, %v6064_v0, 0.0 }
 0x8f9   : > { %v6421_v8 = vadd.f32 %v6420_v23, %v6419_v10  ;;  %v13321_v55 = vadd.f32 %v6415_v16, %v6414_v19 }
 0x8fa   : > { %v13324_v53 = vadd.f32 %v6436_v9, %v6435_v24  ;;  %v6482_v24 = vsel %vm359_vm0, %v13240_v42, 0.0 }
 0x8fb   : > { %v13326_v61 = vadd.f32 %v6422_v3, %v6421_v8  ;;  %v6468_v3 = vsel %vm359_vm0, %v13242_v1, 0.0 }
 0x8fc   : > { %v7934_v32 = vpop.f32.mrb[168].mxu1  ;;  %v7900_v57 = vpop.f32.mrb[168].mxu0 }
 0x8fd   : > { %v6077_v41 = vpop.f32.mrb[169].mxu1  ;;  %v6455_v52 = vsel %vm359_vm0, %v7900_v57, 0.0  ;;  %v5865_v47 = vpop.f32.mrb[169].mxu0  ;;  %v6457_v20 = vsel %vm359_vm0, %v7934_v32, 0.0  ;;  %v6489_v32 = vsel %vm359_vm0, %v13244_v5, 0.0 }
 0x8fe   : > { %v7935_v17 = vpop.f32.mrb[170].mxu1  ;;  %v6456_v7 = vadd.f32 %v6455_v52, %v6454_v29  ;;  %v6441_v39 = vsel %vm359_vm0, %v5865_v47, 0.0  ;;  %v7901_v22 = vpop.f32.mrb[170].mxu0  ;;  %v6443_v28 = vsel %vm359_vm0, %v6077_v41, 0.0  ;;  %v6475_v47 = vsel %vm359_vm0, %v13246_v43, 0.0 }
 0x8ff   : > { %v6080_v50 = vpop.f32.mrb[171].mxu1  ;;  %v6442_v62 = vadd.f32 %v6441_v39, %v6440_v59  ;;  %v6462_v63 = vsel %vm359_vm0, %v7901_v22, 0.0  ;;  %v5868_v4 = vpop.f32.mrb[171].mxu0  ;;  %v6464_v11 = vsel %vm359_vm0, %v7935_v17, 0.0 }
 0x900   : > { %v6463_v56 = vadd.f32 %v6462_v63, %v6461_v14  ;;  %v6448_v36 = vsel %vm359_vm0, %v5868_v4, 0.0  ;;  %v13342_v51 = vadd.f32 %v6457_v20, %v6456_v7  ;;  %v6450_v26 = vsel %vm359_vm0, %v6080_v50, 0.0 }
 0x901   : > { %v6449_v0 = vadd.f32 %v6448_v36, %v6447_v21  ;;  %v13345_v10 = vadd.f32 %v6443_v28, %v6442_v62 }
 0x902   : > { %v13348_v58 = vadd.f32 %v6464_v11, %v6463_v56  ;;  %v6510_v56 = vsel %vm359_vm0, %v13248_v13, 0.0 }
 0x903   : > { %v13350_v31 = vadd.f32 %v6450_v26, %v6449_v0  ;;  %v6496_v26 = vsel %vm359_vm0, %v13250_v45, 0.0 }
 0x904   : > { %v7938_v19 = vpop.f32.mrb[172].mxu1  ;;  %v7904_v46 = vpop.f32.mrb[172].mxu0 }
 0x905   : > { %v6093_v16 = vpop.f32.mrb[173].mxu1  ;;  %v6483_v23 = vsel %vm359_vm0, %v7904_v46, 0.0  ;;  %v5881_v9 = vpop.f32.mrb[173].mxu0  ;;  %v6485_v42 = vsel %vm359_vm0, %v7938_v19, 0.0  ;;  %v6517_v19 = vsel %vm359_vm0, %v13252_v60, 0.0 }
 0x906   : > { %v7939_v8 = vpop.f32.mrb[174].mxu1  ;;  %v6484_v57 = vadd.f32 %v6483_v23, %v6482_v24  ;;  %v6469_v41 = vsel %vm359_vm0, %v5881_v9, 0.0  ;;  %v7905_v29 = vpop.f32.mrb[174].mxu0  ;;  %v6471_v7 = vsel %vm359_vm0, %v6093_v16, 0.0  ;;  %v6503_v9 = vsel %vm359_vm0, %v13254_v48, 0.0 }
 0x907   : > { %v6096_v52 = vpop.f32.mrb[175].mxu1  ;;  %v6470_v17 = vadd.f32 %v6469_v41, %v6468_v3  ;;  %v6490_v59 = vsel %vm359_vm0, %v7905_v29, 0.0  ;;  %v5884_v14 = vpop.f32.mrb[175].mxu0  ;;  %v6492_v22 = vsel %vm359_vm0, %v7939_v8, 0.0 }
 0x908   : > { %v6491_v1 = vadd.f32 %v6490_v59, %v6489_v32  ;;  %v6476_v39 = vsel %vm359_vm0, %v5884_v14, 0.0  ;;  %v13366_v5 = vadd.f32 %v6485_v42, %v6484_v57  ;;  %v6478_v43 = vsel %vm359_vm0, %v6096_v52, 0.0 }
 0x909   : > { %v6477_v50 = vadd.f32 %v6476_v39, %v6475_v47  ;;  %v13369_v21 = vadd.f32 %v6471_v7, %v6470_v17 }
 0x90a   : > { %v13372_v20 = vadd.f32 %v6492_v22, %v6491_v1  ;;  %v6538_v1 = vsel %vm359_vm0, %v13256_v40, 0.0 }
 0x90b   : > { %v13374_v63 = vadd.f32 %v6478_v43, %v6477_v50  ;;  %v6524_v43 = vsel %vm359_vm0, %v13258_v27, 0.0 }
 0x90c   : > { %v7942_v62 = vpop.f32.mrb[176].mxu1  ;;  %v7908_v4 = vpop.f32.mrb[176].mxu0 }
 0x90d   : > { %v6109_v28 = vpop.f32.mrb[177].mxu1  ;;  %v6511_v36 = vsel %vm359_vm0, %v7908_v4, 0.0  ;;  %v5897_v11 = vpop.f32.mrb[177].mxu0  ;;  %v6513_v13 = vsel %vm359_vm0, %v7942_v62, 0.0  ;;  %v6545_v62 = vsel %vm359_vm0, %v13260_v12, 0.0 }
 0x90e   : > { %v7943_v0 = vpop.f32.mrb[178].mxu1  ;;  %v6512_v46 = vadd.f32 %v6511_v36, %v6510_v56  ;;  %v6497_v16 = vsel %vm359_vm0, %v5897_v11, 0.0  ;;  %v7909_v24 = vpop.f32.mrb[178].mxu0  ;;  %v6499_v57 = vsel %vm359_vm0, %v6109_v28, 0.0  ;;  %v6531_v11 = vsel %vm359_vm0, %v13262_v33, 0.0 }
 0x90f   : > { %v6112_v23 = vpop.f32.mrb[179].mxu1  ;;  %v6498_v8 = vadd.f32 %v6497_v16, %v6496_v26  ;;  %v6518_v3 = vsel %vm359_vm0, %v7909_v24, 0.0  ;;  %v5900_v32 = vpop.f32.mrb[179].mxu0  ;;  %v6520_v29 = vsel %vm359_vm0, %v7943_v0, 0.0 }
 0x910   : > { %v6519_v45 = vadd.f32 %v6518_v3, %v6517_v19  ;;  %v6504_v41 = vsel %vm359_vm0, %v5900_v32, 0.0  ;;  %v13390_v60 = vadd.f32 %v6513_v13, %v6512_v46  ;;  %v6506_v48 = vsel %vm359_vm0, %v6112_v23, 0.0 }
 0x911   : > { %v6505_v52 = vadd.f32 %v6504_v41, %v6503_v9  ;;  %v13393_v47 = vadd.f32 %v6499_v57, %v6498_v8 }
 0x912   : > { %v13396_v42 = vadd.f32 %v6520_v29, %v6519_v45  ;;  %v6566_v45 = vsel %vm359_vm0, %v13264_v44, 0.0 }
 0x913   : > { %v13398_v59 = vadd.f32 %v6506_v48, %v6505_v52  ;;  %v6552_v48 = vsel %vm359_vm0, %v13266_v15, 0.0 }
 0x914   : > { %v7946_v17 = vpop.f32.mrb[180].mxu1  ;;  %v7912_v14 = vpop.f32.mrb[180].mxu0 }
 0x915   : > { %v6125_v7 = vpop.f32.mrb[181].mxu1  ;;  %v6539_v39 = vsel %vm359_vm0, %v7912_v14, 0.0  ;;  %v5913_v22 = vpop.f32.mrb[181].mxu0  ;;  %v6541_v40 = vsel %vm359_vm0, %v7946_v17, 0.0  ;;  %v6573_v17 = vsel %vm359_vm0, %v13268_v37, 0.0 }
 0x916   : > { %v7947_v50 = vpop.f32.mrb[182].mxu1  ;;  %v6540_v4 = vadd.f32 %v6539_v39, %v6538_v1  ;;  %v6525_v28 = vsel %vm359_vm0, %v5913_v22, 0.0  ;;  %v7913_v56 = vpop.f32.mrb[182].mxu0  ;;  %v6527_v46 = vsel %vm359_vm0, %v6125_v7, 0.0  ;;  %v6559_v22 = vsel %vm359_vm0, %v13270_v49, 0.0 }
 0x917   : > { %v6128_v36 = vpop.f32.mrb[183].mxu1  ;;  %v6526_v0 = vadd.f32 %v6525_v28, %v6524_v43  ;;  %v6546_v26 = vsel %vm359_vm0, %v7913_v56, 0.0  ;;  %v5916_v19 = vpop.f32.mrb[183].mxu0  ;;  %v6548_v24 = vsel %vm359_vm0, %v7947_v50, 0.0 }
 0x918   : > { %v6547_v27 = vadd.f32 %v6546_v26, %v6545_v62  ;;  %v6532_v16 = vsel %vm359_vm0, %v5916_v19, 0.0  ;;  %v13414_v12 = vadd.f32 %v6541_v40, %v6540_v4  ;;  %v6534_v33 = vsel %vm359_vm0, %v6128_v36, 0.0 }
 0x919   : > { %v6533_v23 = vadd.f32 %v6532_v16, %v6531_v11  ;;  %v13417_v9 = vadd.f32 %v6527_v46, %v6526_v0 }
 0x91a   : > { %v13420_v13 = vadd.f32 %v6548_v24, %v6547_v27  ;;  %v6594_v27 = vsel %vm359_vm0, %v13273_v6, 0.0 }
 0x91b   : > { %v13422_v3 = vadd.f32 %v6534_v33, %v6533_v23  ;;  %v6580_v33 = vsel %vm359_vm0, %v13276_v54, 0.0 }
 0x91c   : > { %v7950_v8 = vpop.f32.mrb[184].mxu1  ;;  %v7916_v32 = vpop.f32.mrb[184].mxu0 }
 0x91d   : > { %v6141_v57 = vpop.f32.mrb[185].mxu1  ;;  %v6567_v41 = vsel %vm359_vm0, %v7916_v32, 0.0  ;;  %v5929_v29 = vpop.f32.mrb[185].mxu0  ;;  %v6569_v44 = vsel %vm359_vm0, %v7950_v8, 0.0  ;;  %v6601_v8 = vsel %vm359_vm0, %v13278_v30, 0.0 }
 0x91e   : > { %v7951_v52 = vpop.f32.mrb[186].mxu1  ;;  %v6568_v14 = vadd.f32 %v6567_v41, %v6566_v45  ;;  %v6553_v7 = vsel %vm359_vm0, %v5929_v29, 0.0  ;;  %v7917_v1 = vpop.f32.mrb[186].mxu0  ;;  %v6555_v4 = vsel %vm359_vm0, %v6141_v57, 0.0  ;;  %v6587_v29 = vsel %vm359_vm0, %v13280_v18, 0.0 }
 0x91f   : > { %v6144_v39 = vpop.f32.mrb[187].mxu1  ;;  %v6554_v50 = vadd.f32 %v6553_v7, %v6552_v48  ;;  %v6574_v43 = vsel %vm359_vm0, %v7917_v1, 0.0  ;;  %v5932_v62 = vpop.f32.mrb[187].mxu0  ;;  %v6576_v56 = vsel %vm359_vm0, %v7951_v52, 0.0 }
 0x920   : > { %v6575_v15 = vadd.f32 %v6574_v43, %v6573_v17  ;;  %v6560_v28 = vsel %vm359_vm0, %v5932_v62, 0.0  ;;  %v13438_v37 = vadd.f32 %v6569_v44, %v6568_v14  ;;  %v6562_v49 = vsel %vm359_vm0, %v6144_v39, 0.0 }
 0x921   : > { %v6561_v36 = vadd.f32 %v6560_v28, %v6559_v22  ;;  %v13441_v11 = vadd.f32 %v6555_v4, %v6554_v50  ;;  %v13476_v4 = vld [vmem:[%s13651_s4] ss:$0 sm:$0xff] }
 0x922   : > { %v13444_v40 = vadd.f32 %v6576_v56, %v6575_v15 }
 0x923   : > { %v13446_v26 = vadd.f32 %v6562_v49, %v6561_v36 }
 0x924   : > { %v7954_v0 = vpop.f32.mrb[188].mxu1  ;;  %v7920_v19 = vpop.f32.mrb[188].mxu0 }
 0x925   : > { %v6157_v46 = vpop.f32.mrb[189].mxu1  ;;  %v6595_v16 = vsel %vm359_vm0, %v7920_v19, 0.0  ;;  %v5945_v24 = vpop.f32.mrb[189].mxu0  ;;  %v6597_v6 = vsel %vm359_vm0, %v7954_v0, 0.0 }
 0x926   : > { %v7955_v23 = vpop.f32.mrb[190].mxu1  ;;  %v6596_v32 = vadd.f32 %v6595_v16, %v6594_v27  ;;  %v6581_v57 = vsel %vm359_vm0, %v5945_v24, 0.0  ;;  %v7921_v45 = vpop.f32.mrb[190].mxu0  ;;  %v6583_v14 = vsel %vm359_vm0, %v6157_v46, 0.0 }
 0x927   : > { %v6160_v41 = vpop.f32.mrb[191].mxu1  ;;  %v6582_v52 = vadd.f32 %v6581_v57, %v6580_v33  ;;  %v6602_v48 = vsel %vm359_vm0, %v7921_v45, 0.0  ;;  %v5948_v17 = vpop.f32.mrb[191].mxu0  ;;  %v6604_v1 = vsel %vm359_vm0, %v7955_v23, 0.0 }
 0x928   : > { %v6603_v54 = vadd.f32 %v6602_v48, %v6601_v8  ;;  %v6588_v30 = vsel %vm359_vm0, %v5948_v17, 0.0  ;;  %v13462_v7 = vadd.f32 %v6597_v6, %v6596_v32  ;;  %v6590_v18 = vsel %vm359_vm0, %v6160_v41, 0.0 }
 0x929   : > { %v6589_v39 = vadd.f32 %v6588_v30, %v6587_v29  ;;  %v13465_v22 = vadd.f32 %v6583_v14, %v6582_v52 }
 0x92a   : > { %v13468_v44 = vadd.f32 %v6604_v1, %v6603_v54 }
 0x92b   : > { %v13470_v50 = vadd.f32 %v6590_v18, %v6589_v39 }
 0x92c   : > { %v7960_v43 = vpop.f32.mrb[192].mxu0 }
 0x92d   : > { %v6403_v62 = vsel %vm359_vm0, %v7960_v43, 0.0  ;;  %v6257_v15 = vpop.f32.mrb[193].mxu0 }
 0x92e   : > { %v6404_v28 = vadd.f32 %v6403_v62, %v13294_v34  ;;  %v6389_v56 = vsel %vm359_vm0, %v6257_v15, 0.0  ;;  %v7961_v36 = vpop.f32.mrb[194].mxu0 }
 0x92f   : > { %v6390_v49 = vadd.f32 %v6389_v56, %v13297_v38  ;;  %v6410_v0 = vsel %vm359_vm0, %v7961_v36, 0.0  ;;  %v6260_v19 = vpop.f32.mrb[195].mxu0 }
 0x930   : > { %v6617_v34 = vadd.f32 %v13476_v4, %v6404_v28  ;;  %v6411_v46 = vadd.f32 %v6410_v0, %v13300_v2  ;;  %v6396_v27 = vsel %vm359_vm0, %v6260_v19, 0.0 }
 0x931   : > { %v6615_v16 = vadd.f32 %v13476_v4, %v6390_v49  ;;  %v6397_v24 = vadd.f32 %v6396_v27, %v13302_v35 }
 0x932   : > { %6649 = vst.msk [vmem:[%s13485_s14 + $0x10] sm:$0xff] %vm359_vm0, %v6617_v34  ;;  %v6618_v23 = vadd.f32 %v13476_v4, %v6411_v46 }
 0x933   : > { %6647 = vst.msk [vmem:[%s13485_s14] sm:$0xff] %vm359_vm0, %v6615_v16  ;;  %v6616_v38 = vadd.f32 %v13476_v4, %v6397_v24 }
 0x934   : > { %6650 = vst.msk [vmem:[%s13485_s14 + $0x18] sm:$0xff] %vm359_vm0, %v6618_v23  ;;  %v7964_v33 = vpop.f32.mrb[196].mxu0 }
 0x935   : > { %6648 = vst.msk [vmem:[%s13485_s14 + $0x8] sm:$0xff] %vm359_vm0, %v6616_v38  ;;  %v6431_v2 = vsel %vm359_vm0, %v7964_v33, 0.0  ;;  %v6273_v8 = vpop.f32.mrb[197].mxu0 }
 0x936   : > { %v6432_v35 = vadd.f32 %v6431_v2, %v13318_v25  ;;  %v6417_v32 = vsel %vm359_vm0, %v6273_v8, 0.0  ;;  %v7965_v57 = vpop.f32.mrb[198].mxu0 }
 0x937   : > { %v6418_v45 = vadd.f32 %v6417_v32, %v13321_v55  ;;  %v6438_v41 = vsel %vm359_vm0, %v7965_v57, 0.0  ;;  %v6276_v29 = vpop.f32.mrb[199].mxu0 }
 0x938   : > { %v6621_v6 = vadd.f32 %v13476_v4, %v6432_v35  ;;  %v6439_v52 = vadd.f32 %v6438_v41, %v13324_v53  ;;  %v6424_v48 = vsel %vm359_vm0, %v6276_v29, 0.0 }
 0x939   : > { %v6619_v17 = vadd.f32 %v13476_v4, %v6418_v45  ;;  %v6425_v14 = vadd.f32 %v6424_v48, %v13326_v61 }
 0x93a   : > { %6653 = vst.msk [vmem:[%s13485_s14 + $0x30] sm:$0xff] %vm359_vm0, %v6621_v6  ;;  %v6622_v25 = vadd.f32 %v13476_v4, %v6439_v52 }
 0x93b   : > { %6651 = vst.msk [vmem:[%s13485_s14 + $0x20] sm:$0xff] %vm359_vm0, %v6619_v17  ;;  %v6620_v55 = vadd.f32 %v13476_v4, %v6425_v14 }
 0x93c   : > { %6654 = vst.msk [vmem:[%s13485_s14 + $0x38] sm:$0xff] %vm359_vm0, %v6622_v25  ;;  %v7968_v54 = vpop.f32.mrb[200].mxu0 }
 0x93d   : > { %6652 = vst.msk [vmem:[%s13485_s14 + $0x28] sm:$0xff] %vm359_vm0, %v6620_v55  ;;  %v6459_v53 = vsel %vm359_vm0, %v7968_v54, 0.0  ;;  %v6289_v30 = vpop.f32.mrb[201].mxu0 }
 0x93e   : > { %v6460_v61 = vadd.f32 %v6459_v53, %v13342_v51  ;;  %v6445_v1 = vsel %vm359_vm0, %v6289_v30, 0.0  ;;  %v7969_v39 = vpop.f32.mrb[202].mxu0 }
 0x93f   : > { %v6446_v18 = vadd.f32 %v6445_v1, %v13345_v10  ;;  %v6466_v43 = vsel %vm359_vm0, %v7969_v39, 0.0  ;;  %v6292_v62 = vpop.f32.mrb[203].mxu0 }
 0x940   : > { %v6625_v15 = vadd.f32 %v13476_v4, %v6460_v61  ;;  %v6467_v28 = vadd.f32 %v6466_v43, %v13348_v58  ;;  %v6452_v56 = vsel %vm359_vm0, %v6292_v62, 0.0 }
 0x941   : > { %v6623_v36 = vadd.f32 %v13476_v4, %v6446_v18  ;;  %v6453_v49 = vadd.f32 %v6452_v56, %v13350_v31 }
 0x942   : > { %6657 = vst.msk [vmem:[%s13485_s14 + $0x50] sm:$0xff] %vm359_vm0, %v6625_v15  ;;  %v6626_v51 = vadd.f32 %v13476_v4, %v6467_v28 }
 0x943   : > { %6655 = vst.msk [vmem:[%s13485_s14 + $0x40] sm:$0xff] %vm359_vm0, %v6623_v36  ;;  %v6624_v10 = vadd.f32 %v13476_v4, %v6453_v49 }
 0x944   : > { %6658 = vst.msk [vmem:[%s13485_s14 + $0x58] sm:$0xff] %vm359_vm0, %v6626_v51  ;;  %v7972_v0 = vpop.f32.mrb[204].mxu0 }
 0x945   : > { %6656 = vst.msk [vmem:[%s13485_s14 + $0x48] sm:$0xff] %vm359_vm0, %v6624_v10  ;;  %v6487_v58 = vsel %vm359_vm0, %v7972_v0, 0.0  ;;  %v6305_v19 = vpop.f32.mrb[205].mxu0 }
 0x946   : > { %v6488_v31 = vadd.f32 %v6487_v58, %v13366_v5  ;;  %v6473_v34 = vsel %vm359_vm0, %v6305_v19, 0.0  ;;  %v7973_v46 = vpop.f32.mrb[206].mxu0 }
 0x947   : > { %v6474_v27 = vadd.f32 %v6473_v34, %v13369_v21  ;;  %v6494_v16 = vsel %vm359_vm0, %v7973_v46, 0.0  ;;  %v6308_v24 = vpop.f32.mrb[207].mxu0 }
 0x948   : > { %v6629_v23 = vadd.f32 %v13476_v4, %v6488_v31  ;;  %v6495_v38 = vadd.f32 %v6494_v16, %v13372_v20  ;;  %v6480_v33 = vsel %vm359_vm0, %v6308_v24, 0.0 }
 0x949   : > { %v6627_v2 = vadd.f32 %v13476_v4, %v6474_v27  ;;  %v6481_v8 = vadd.f32 %v6480_v33, %v13374_v63 }
 0x94a   : > { %6661 = vst.msk [vmem:[%s13485_s14 + $0x70] sm:$0xff] %vm359_vm0, %v6629_v23  ;;  %v6630_v5 = vadd.f32 %v13476_v4, %v6495_v38 }
 0x94b   : > { %6659 = vst.msk [vmem:[%s13485_s14 + $0x60] sm:$0xff] %vm359_vm0, %v6627_v2  ;;  %v6628_v21 = vadd.f32 %v13476_v4, %v6481_v8 }
 0x94c   : > { %6662 = vst.msk [vmem:[%s13485_s14 + $0x78] sm:$0xff] %vm359_vm0, %v6630_v5 }
 0x94d   : > { %6660 = vst.msk [vmem:[%s13485_s14 + $0x68] sm:$0xff] %vm359_vm0, %v6628_v21 }
 0x976   : > { %v7976_v20 = vpop.f32.mrb[208].mxu0 }
 0x977   : > { %v6515_v35 = vsel %vm359_vm0, %v7976_v20, 0.0  ;;  %v6321_v32 = vpop.f32.mrb[209].mxu0 }
 0x978   : > { %v6516_v63 = vadd.f32 %v6515_v35, %v13390_v60  ;;  %v6501_v57 = vsel %vm359_vm0, %v6321_v32, 0.0  ;;  %v7977_v45 = vpop.f32.mrb[210].mxu0 }
 0x979   : > { %v6502_v41 = vadd.f32 %v6501_v57, %v13393_v47  ;;  %v6522_v29 = vsel %vm359_vm0, %v7977_v45, 0.0  ;;  %v6324_v6 = vpop.f32.mrb[211].mxu0 }
 0x97a   : > { %v6633_v52 = vadd.f32 %v13476_v4, %v6516_v63  ;;  %v6523_v48 = vadd.f32 %v6522_v29, %v13396_v42  ;;  %v6508_v17 = vsel %vm359_vm0, %v6324_v6, 0.0 }
 0x97b   : > { %v6631_v14 = vadd.f32 %v13476_v4, %v6502_v41  ;;  %v6509_v25 = vadd.f32 %v6508_v17, %v13398_v59 }
 0x97c   : > { %6665 = vst.msk [vmem:[%s13485_s14 + $0x90] sm:$0xff] %vm359_vm0, %v6633_v52  ;;  %v6634_v60 = vadd.f32 %v13476_v4, %v6523_v48 }
 0x97d   : > { %6663 = vst.msk [vmem:[%s13485_s14 + $0x80] sm:$0xff] %vm359_vm0, %v6631_v14  ;;  %v6632_v47 = vadd.f32 %v13476_v4, %v6509_v25 }
 0x97e   : > { %6666 = vst.msk [vmem:[%s13485_s14 + $0x98] sm:$0xff] %vm359_vm0, %v6634_v60  ;;  %v7980_v55 = vpop.f32.mrb[212].mxu0 }
 0x97f   : > { %6664 = vst.msk [vmem:[%s13485_s14 + $0x88] sm:$0xff] %vm359_vm0, %v6632_v47  ;;  %v6543_v42 = vsel %vm359_vm0, %v7980_v55, 0.0  ;;  %v6337_v54 = vpop.f32.mrb[213].mxu0 }
 0x980   : > { %v6544_v59 = vadd.f32 %v6543_v42, %v13414_v12  ;;  %v6529_v53 = vsel %vm359_vm0, %v6337_v54, 0.0  ;;  %v7981_v30 = vpop.f32.mrb[214].mxu0 }
 0x981   : > { %v6530_v61 = vadd.f32 %v6529_v53, %v13417_v9  ;;  %v6550_v1 = vsel %vm359_vm0, %v7981_v30, 0.0  ;;  %v6340_v39 = vpop.f32.mrb[215].mxu0 }
 0x982   : > { %v6637_v18 = vadd.f32 %v13476_v4, %v6544_v59  ;;  %v6551_v43 = vadd.f32 %v6550_v1, %v13420_v13  ;;  %v6536_v62 = vsel %vm359_vm0, %v6340_v39, 0.0 }
 0x983   : > { %v6635_v15 = vadd.f32 %v13476_v4, %v6530_v61  ;;  %v6537_v28 = vadd.f32 %v6536_v62, %v13422_v3 }
 0x984   : > { %6669 = vst.msk [vmem:[%s13485_s14 + $0xb0] sm:$0xff] %vm359_vm0, %v6637_v18  ;;  %v6638_v12 = vadd.f32 %v13476_v4, %v6551_v43 }
 0x985   : > { %6667 = vst.msk [vmem:[%s13485_s14 + $0xa0] sm:$0xff] %vm359_vm0, %v6635_v15  ;;  %v6636_v9 = vadd.f32 %v13476_v4, %v6537_v28 }
 0x986   : > { %6670 = vst.msk [vmem:[%s13485_s14 + $0xb8] sm:$0xff] %vm359_vm0, %v6638_v12 }
 0x987   : > { %6668 = vst.msk [vmem:[%s13485_s14 + $0xa8] sm:$0xff] %vm359_vm0, %v6636_v9 }
 0x9b6   : > { %v7984_v13 = vpop.f32.mrb[216].mxu0 }
 0x9b7   : > { %v6571_v56 = vsel %vm359_vm0, %v7984_v13, 0.0  ;;  %v6353_v36 = vpop.f32.mrb[217].mxu0 }
 0x9b8   : > { %v6572_v3 = vadd.f32 %v6571_v56, %v13438_v37  ;;  %v6557_v49 = vsel %vm359_vm0, %v6353_v36, 0.0  ;;  %v7985_v51 = vpop.f32.mrb[218].mxu0 }
 0x9b9   : > { %v6558_v10 = vadd.f32 %v6557_v49, %v13441_v11  ;;  %v6578_v0 = vsel %vm359_vm0, %v7985_v51, 0.0  ;;  %v6356_v58 = vpop.f32.mrb[219].mxu0 }
 0x9ba   : > { %v6641_v19 = vadd.f32 %v13476_v4, %v6572_v3  ;;  %v6579_v31 = vadd.f32 %v6578_v0, %v13444_v40  ;;  %v6564_v34 = vsel %vm359_vm0, %v6356_v58, 0.0 }
 0x9bb   : > { %v6639_v46 = vadd.f32 %v13476_v4, %v6558_v10  ;;  %v6565_v27 = vadd.f32 %v6564_v34, %v13446_v26 }
 0x9bc   : > { %6673 = vst.msk [vmem:[%s13485_s14 + $0xd0] sm:$0xff] %vm359_vm0, %v6641_v19  ;;  %v6642_v37 = vadd.f32 %v13476_v4, %v6579_v31 }
 0x9bd   : > { %6671 = vst.msk [vmem:[%s13485_s14 + $0xc0] sm:$0xff] %vm359_vm0, %v6639_v46  ;;  %v6640_v11 = vadd.f32 %v13476_v4, %v6565_v27 }
 0x9be   : > { %6674 = vst.msk [vmem:[%s13485_s14 + $0xd8] sm:$0xff] %vm359_vm0, %v6642_v37  ;;  %v7988_v16 = vpop.f32.mrb[220].mxu0 }
 0x9bf   : > { %6672 = vst.msk [vmem:[%s13485_s14 + $0xc8] sm:$0xff] %vm359_vm0, %v6640_v11  ;;  %v6599_v40 = vsel %vm359_vm0, %v7988_v16, 0.0  ;;  %v6369_v24 = vpop.f32.mrb[221].mxu0 }
 0x9c0   : > { %v6600_v26 = vadd.f32 %v6599_v40, %v13462_v7  ;;  %v6585_v23 = vsel %vm359_vm0, %v6369_v24, 0.0  ;;  %v7989_v38 = vpop.f32.mrb[222].mxu0 }
 0x9c1   : > { %v6586_v33 = vadd.f32 %v6585_v23, %v13465_v22  ;;  %v6606_v2 = vsel %vm359_vm0, %v7989_v38, 0.0  ;;  %v6372_v8 = vpop.f32.mrb[223].mxu0 }
 0x9c2   : > { %v6645_v5 = vadd.f32 %v13476_v4, %v6600_v26  ;;  %v6607_v21 = vadd.f32 %v6606_v2, %v13468_v44  ;;  %v6592_v20 = vsel %vm359_vm0, %v6372_v8, 0.0 }
 0x9c3   : > { %v6643_v35 = vadd.f32 %v13476_v4, %v6586_v33  ;;  %v6593_v32 = vadd.f32 %v6592_v20, %v13470_v50 }
 0x9c4   : > { %6677 = vst.msk [vmem:[%s13485_s14 + $0xf0] sm:$0xff] %vm359_vm0, %v6645_v5  ;;  %v6646_v7 = vadd.f32 %v13476_v4, %v6607_v21 }
 0x9c5   : > { %6675 = vst.msk [vmem:[%s13485_s14 + $0xe0] sm:$0xff] %vm359_vm0, %v6643_v35  ;;  %v6644_v22 = vadd.f32 %v13476_v4, %v6593_v32 }
 0x9c6   : > { %6678 = vst.msk [vmem:[%s13485_s14 + $0xf8] sm:$0xff] %vm359_vm0, %v6646_v7 }
 0x9c7   : > { %6676 = vst.msk [vmem:[%s13485_s14 + $0xe8] sm:$0xff] %vm359_vm0, %v6644_v22 }
 0x9c8 PF: > { %s17_s24 = sadd.s32 1, %s8624_s24  }
 0x9c9   : > { %p14_p4 = scmp.ge.s32.totalorder %s17_s24, 4  }
 0x9cb   :  { %16 = sbr.rel (!%p14_p4) target bundleno = 1 (0x1), region = 78 }

</bundles_post_ra>
